<compile_context>
chip_gen: v7x
topology: tpu7x:2x2x1
jax: 0.10.0
libtpu: 0.0.40
codegen_flags: <defaults>
</compile_context>

<pallas_src>
import functools

import jax
import jax.numpy as jnp
import numpy as np
from jax import lax
from jax.experimental import pallas as pl
from jax.experimental.pallas import tpu as pltpu


# ----------------------------------------------------------------------------
# Fused kernel: G aspect-attention heads per grid step + rating prediction.
#
# Per grid step a (grid = A // G):
#   for g in range(G):
#     h      = tanh(x @ W_in[a*G+g])          (bf16 MXU, f32 accum)
#     score  = sum(h * w_i, lanes)            masked_fill(mask==0, -inf)
#     attn   = softmax(score, seq)            (approx reciprocal)
#     ctx    = sum_s x * attn                 -> [B, D]
#     out    = ctx @ W_out^T + b_out          -> [B, 4]   (dot_general, trans_b)
#   star     = tanh(x_cls @ star_w + b) @ star_beta^T + b_beta   (tiny, every
#              step -> race-free under "parallel"; wrapper keeps block 0)
# ----------------------------------------------------------------------------
def aspect_star_kernel(x_ref, mask_ref, w_in_ref, w_i_ref, w_out_ref, b_out_ref,
                       xs_ref, sw_ref, swb_ref, sb_ref, sbb_ref,
                       out_ref, attn_ref, star_ref):
    x = x_ref[...]                                  # [B, S, D] f32
    mask = mask_ref[...]                            # [B, S]    f32
    B, S, D = x.shape
    G = w_in_ref.shape[0]

    x2_bf = x.reshape(B * S, D).astype(jnp.bfloat16)     # bf16 operand for MXU
    masked = mask == 0.0                                  # [B, S] bool (0/1 mask)

    for g in range(G):                                    # static unroll, G small
        # h = tanh(x @ W_in^T)  (W_in pre-transposed to (in,out), bf16)
        h = jnp.tanh(jnp.dot(x2_bf, w_in_ref[g],
                             preferred_element_type=jnp.float32))   # [B*S, D] f32

        # score = h @ w_i^T  -> [B, S]
        score = jnp.sum(h.reshape(B, S, D) * w_i_ref[g][None], axis=-1)

        # masked softmax over the sequence axis (matches torch masked_fill(-inf))
        score = jnp.where(masked, -jnp.inf, score)
        m = jnp.max(score, axis=-1, keepdims=True)
        e = jnp.exp(score - m)
        a = e * pl.reciprocal(jnp.sum(e, axis=-1, keepdims=True), approx=True)

        # context = (x^T @ a)^T -> [B, D]   (f32 activations)
        ctx = jnp.sum(x * a[..., None], axis=1)

        # output head: ctx @ W_out^T + b   (W_out kept in original (4, D) layout)
        out = lax.dot_general(ctx, w_out_ref[g],
                              (((1,), (1,)), ((), ())),
                              preferred_element_type=jnp.float32) + b_out_ref[g]

        out_ref[g] = out.astype(out_ref.dtype)            # [B, 4]
        attn_ref[g] = a.astype(attn_ref.dtype)            # [B, S]

    # Rating prediction (cheap; recomputed each step to stay race-free when the
    # aspect grid axis is sharded across TensorCores).
    xs = xs_ref[...].astype(jnp.bfloat16)                 # [B, D]
    hs = jnp.tanh(jnp.dot(xs, sw_ref[...],
                          preferred_element_type=jnp.float32) + swb_ref[...])
    star = jnp.sum(hs * sb_ref[...], axis=-1, keepdims=True) + sbb_ref[...]
    star_ref[0] = star.astype(star_ref.dtype)             # [B, 1]


# ----------------------------------------------------------------------------
# One-time (load-time) parameter preparation: pre-transpose + bf16-cast the
# large weight streams so the forward path does zero layout work in HBM.
# ----------------------------------------------------------------------------
def prepare_params(params):
    return {
        "w_in_t": jnp.transpose(params["w_in_W"], (0, 2, 1)).astype(jnp.bfloat16),  # [A, D, D] (in,out)
        "w_i": params["w_i_W"].astype(jnp.float32),                                  # [A, 1, D]
        "out_W": params["out_W"].astype(jnp.float32),                                # [A, 4, D] (orig layout)
        "out_b": params["out_b"][:, None, :].astype(jnp.float32),                    # [A, 1, 4]
        "star_w_t": params["star_w_W"].T.astype(jnp.bfloat16),                       # [D, D] (in,out)
        "star_w_b": params["star_w_b"][None, :].astype(jnp.float32),                 # [1, D]
        "star_beta_W": params["star_beta_W"].astype(jnp.float32),                    # [1, D] (orig layout)
        "star_beta_b": params["star_beta_b"][None, :].astype(jnp.float32),           # [1, 1]
    }


# ----------------------------------------------------------------------------
# Full ASAP_SHIBA forward (post-bert part).
# ----------------------------------------------------------------------------
@functools.partial(jax.jit, static_argnames=("aspects_per_step",))
def asap_shiba_forward(hidden, attention_mask, prep, aspects_per_step=3):
    B, S, D = hidden.shape
    A = prep["w_in_t"].shape[0]
    G = aspects_per_step
    assert A % G == 0

    mask = attention_mask.astype(jnp.float32)       # [B, S]
    x_star = hidden[:, 0, :]                        # [B, D]  (dropout = identity, eval)

    out18, attn18, star_blocks = pl.pallas_call(
        aspect_star_kernel,
        out_shape=(jax.ShapeDtypeStruct((A, B, 4), jnp.float32),
                   jax.ShapeDtypeStruct((A, B, S), jnp.float32),
                   jax.ShapeDtypeStruct((A // G, B, 1), jnp.float32)),
        grid_spec=pltpu.PrefetchScalarGridSpec(
            num_scalar_prefetch=0,
            grid=(A // G,),
            in_specs=[
                pl.BlockSpec((B, S, D), lambda a: (0, 0, 0)),   # hidden (resident)
                pl.BlockSpec((B, S), lambda a: (0, 0)),         # mask (resident)
                pl.BlockSpec((G, D, D), lambda a: (a, 0, 0)),   # W_in^T  bf16, streamed
                pl.BlockSpec((G, 1, D), lambda a: (a, 0, 0)),   # w_i
                pl.BlockSpec((G, 4, D), lambda a: (a, 0, 0)),   # W_out (orig layout)
                pl.BlockSpec((G, 1, 4), lambda a: (a, 0, 0)),   # b_out
                pl.BlockSpec((B, D), lambda a: (0, 0)),         # x_star (resident)
                pl.BlockSpec((D, D), lambda a: (0, 0)),         # star_w^T bf16 (resident)
                pl.BlockSpec((1, D), lambda a: (0, 0)),         # star_w_b
                pl.BlockSpec((1, D), lambda a: (0, 0)),         # star_beta_W
                pl.BlockSpec((1, 1), lambda a: (0, 0)),         # star_beta_b
            ],
            out_specs=[
                pl.BlockSpec((G, B, 4), lambda a: (a, 0, 0)),
                pl.BlockSpec((G, B, S), lambda a: (a, 0, 0)),
                pl.BlockSpec((1, B, 1), lambda a: (a, 0, 0)),
            ]),
        compiler_params=pltpu.CompilerParams(
            dimension_semantics=("parallel",),          # aspects independent -> 2 TCs on v7x
            vmem_limit_bytes=32 * 1024 * 1024),         # explicit (v5e default is 16 MiB)
    )(hidden, mask, prep["w_in_t"], prep["w_i"], prep["out_W"], prep["out_b"],
      x_star, prep["star_w_t"], prep["star_w_b"], prep["star_beta_W"],
      prep["star_beta_b"])

    star = star_blocks[0]                             # [B, 1]
    output = jnp.transpose(out18, (1, 0, 2))          # [B, 18, 4]  (torch.cat dim=1)
    attentions = jnp.transpose(attn18, (1, 0, 2))     # [B, 18, S]
    return star, output, attentions


# ----------------------------------------------------------------------------
# Pure-JAX reference (mirrors the PyTorch module, eval mode, f32).
# ----------------------------------------------------------------------------
def reference_forward(hidden, attention_mask, params):
    x_star = hidden[:, 0, :]
    star = jnp.tanh(x_star @ params["star_w_W"].T + params["star_w_b"])
    star = star @ params["star_beta_W"].T + params["star_beta_b"]

    m3 = attention_mask[..., None].astype(jnp.float32)        # [B, S, 1]
    outs, attns = [], []
    A = params["w_in_W"].shape[0]
    for a in range(A):
        h = jnp.tanh(hidden @ params["w_in_W"][a].T)           # [B, S, D]
        s = h @ params["w_i_W"][a].T                           # [B, S, 1]
        s = jnp.where(m3 == 0, -jnp.inf, s)
        p = jax.nn.softmax(s, axis=1)                          # [B, S, 1]
        ctx = jnp.einsum("bsd,bso->bod", hidden, p)            # [B, 1, D]
        o = ctx @ params["out_W"][a].T + params["out_b"][a]    # [B, 1, 4]
        outs.append(o)
        attns.append(jnp.transpose(p, (0, 2, 1)))              # [B, 1, S]
    return star, jnp.concatenate(outs, axis=1), jnp.concatenate(attns, axis=1)


if __name__ == "__main__":
    B, S, D, A = 2, 8, 768, 18
    key = jax.random.PRNGKey(0)
    ks = jax.random.split(key, 10)

    hidden = jax.random.normal(ks[0], (B, S, D), jnp.float32)   # bert_out[0] stand-in
    attention_mask = jnp.ones((B, S), jnp.float32).at[1, 6:].set(0.0)

    params = {
        "w_in_W": 0.02 * jax.random.normal(ks[1], (A, D, D), jnp.float32),
        "w_i_W": 0.02 * jax.random.normal(ks[2], (A, 1, D), jnp.float32),
        "out_W": 0.02 * jax.random.normal(ks[3], (A, 4, D), jnp.float32),
        "out_b": 0.02 * jax.random.normal(ks[4], (A, 4), jnp.float32),
        "star_w_W": 0.02 * jax.random.normal(ks[5], (D, D), jnp.float32),
        "star_w_b": 0.02 * jax.random.normal(ks[6], (D,), jnp.float32),
        "star_beta_W": 0.02 * jax.random.normal(ks[7], (1, D), jnp.float32),
        "star_beta_b": 0.02 * jax.random.normal(ks[8], (1,), jnp.float32),
    }

    # One-time weight preparation (load-time): pre-transpose + bf16 cast.
    prep = jax.block_until_ready(prepare_params(params))

    star, output, attentions = asap_shiba_forward(hidden, attention_mask, prep)
    jax.block_until_ready((star, output, attentions))

    star_r, output_r, attn_r = reference_forward(hidden, attention_mask, params)

    np.testing.assert_allclose(np.asarray(star), np.asarray(star_r), rtol=2e-3, atol=2e-3)
    np.testing.assert_allclose(np.asarray(output), np.asarray(output_r), rtol=2e-3, atol=2e-3)
    np.testing.assert_allclose(np.asarray(attentions), np.asarray(attn_r), rtol=2e-3, atol=2e-3)

    assert star.shape == (B, 1)
    assert output.shape == (B, A, 4)
    assert attentions.shape == (B, A, S)

    print("KERNEL_OK")
</pallas_src>

<mosaic_0001>
module attributes {stable_mosaic.version = 11 : i64} {
  func.func @aspect_star_kernel(%arg0: i32, %arg1: memref<2x8x768xf32, #tpu.memory_space<vmem>>, %arg2: memref<2x8xf32, #tpu.memory_space<vmem>>, %arg3: memref<3x768x768xbf16, #tpu.memory_space<vmem>>, %arg4: memref<3x1x768xf32, #tpu.memory_space<vmem>>, %arg5: memref<3x4x768xf32, #tpu.memory_space<vmem>>, %arg6: memref<3x1x4xf32, #tpu.memory_space<vmem>>, %arg7: memref<2x768xf32, #tpu.memory_space<vmem>>, %arg8: memref<768x768xbf16, #tpu.memory_space<vmem>>, %arg9: memref<1x768xf32, #tpu.memory_space<vmem>>, %arg10: memref<1x768xf32, #tpu.memory_space<vmem>>, %arg11: memref<1x1xf32, #tpu.memory_space<vmem>>, %arg12: memref<3x2x4xf32, #tpu.memory_space<vmem>>, %arg13: memref<3x2x8xf32, #tpu.memory_space<vmem>>, %arg14: memref<1x2x1xf32, #tpu.memory_space<vmem>>) attributes {dimension_semantics = [#tpu.dimension_semantics<parallel>], iteration_bounds = array<i64: 6>, scalar_prefetch = 0 : i64, scratch_operands = 0 : i64, tpu.core_type = #tpu.core_type<tc>, window_params = [{pipeline_mode = #tpu.pipeline_mode<synchronous>, transform_indices = @transform_0, window_bounds = array<i64: 2, 8, 768>}, {pipeline_mode = #tpu.pipeline_mode<synchronous>, transform_indices = @transform_1, window_bounds = array<i64: 2, 8>}, {transform_indices = @transform_2, window_bounds = array<i64: 3, 768, 768>}, {transform_indices = @transform_3, window_bounds = array<i64: 3, 1, 768>}, {transform_indices = @transform_4, window_bounds = array<i64: 3, 4, 768>}, {transform_indices = @transform_5, window_bounds = array<i64: 3, 1, 4>}, {pipeline_mode = #tpu.pipeline_mode<synchronous>, transform_indices = @transform_6, window_bounds = array<i64: 2, 768>}, {pipeline_mode = #tpu.pipeline_mode<synchronous>, transform_indices = @transform_7, window_bounds = array<i64: 768, 768>}, {pipeline_mode = #tpu.pipeline_mode<synchronous>, transform_indices = @transform_8, window_bounds = array<i64: 1, 768>}, {pipeline_mode = #tpu.pipeline_mode<synchronous>, transform_indices = @transform_9, window_bounds = array<i64: 1, 768>}, {pipeline_mode = #tpu.pipeline_mode<synchronous>, transform_indices = @transform_10, window_bounds = array<i64: 1, 1>}, {transform_indices = @transform_11, window_bounds = array<i64: 3, 2, 4>}, {transform_indices = @transform_12, window_bounds = array<i64: 3, 2, 8>}, {transform_indices = @transform_13, window_bounds = array<i64: 1, 2, 1>}]} {
    %c0 = arith.constant 0 : index
    %c0_0 = arith.constant 0 : index
    %c0_1 = arith.constant 0 : index
    %0 = vector.load %arg1[%c0, %c0_0, %c0_1] : memref<2x8x768xf32, #tpu.memory_space<vmem>>, vector<2x8x768xf32>
    %c0_2 = arith.constant 0 : index
    %c0_3 = arith.constant 0 : index
    %1 = vector.load %arg2[%c0_2, %c0_3] : memref<2x8xf32, #tpu.memory_space<vmem>>, vector<2x8xf32>
    %2 = vector.shape_cast %0 : vector<2x8x768xf32> to vector<16x768xf32>
    %3 = arith.truncf %2 : vector<16x768xf32> to vector<16x768xbf16>
    %cst = arith.constant 0.000000e+00 : f32
    %4 = vector.broadcast %cst : f32 to vector<2x8xf32>
    %5 = arith.cmpf oeq, %1, %4 : vector<2x8xf32>
    %c0_4 = arith.constant 0 : index
    %c0_5 = arith.constant 0 : index
    %c0_6 = arith.constant 0 : index
    %6 = vector.load %arg3[%c0_4, %c0_5, %c0_6] : memref<3x768x768xbf16, #tpu.memory_space<vmem>>, vector<1x768x768xbf16>
    %7 = vector.shape_cast %6 : vector<1x768x768xbf16> to vector<768x768xbf16>
    %cst_7 = arith.constant dense<0.000000e+00> : vector<16x768xf32>
    %8 = tpu.matmul %3, %7, %cst_7 {dimension_numbers = #tpu.dot_dimension_numbers<[1], [0], [0], [1], [0, 0, 1, 1], [], []>} : vector<16x768xbf16>, vector<768x768xbf16>, vector<16x768xf32> -> vector<16x768xf32>
    %9 = math.tanh %8 : vector<16x768xf32>
    %10 = vector.shape_cast %9 : vector<16x768xf32> to vector<2x8x768xf32>
    %c0_8 = arith.constant 0 : index
    %c0_9 = arith.constant 0 : index
    %c0_10 = arith.constant 0 : index
    %11 = vector.load %arg4[%c0_8, %c0_9, %c0_10] : memref<3x1x768xf32, #tpu.memory_space<vmem>>, vector<1x1x768xf32>
    %12 = vector.shape_cast %11 : vector<1x1x768xf32> to vector<1x768xf32>
    %13 = vector.shape_cast %12 : vector<1x768xf32> to vector<1x1x768xf32>
    %14 = vector.broadcast %13 : vector<1x1x768xf32> to vector<2x8x768xf32>
    %15 = arith.mulf %10, %14 : vector<2x8x768xf32>
    %cst_11 = arith.constant dense<0.000000e+00> : vector<2x8xf32>
    %16 = vector.multi_reduction <add>, %15, %cst_11 [2] : vector<2x8x768xf32> to vector<2x8xf32>
    %cst_12 = arith.constant 0xFF800000 : f32
    %17 = vector.broadcast %cst_12 : f32 to vector<2x8xf32>
    %18 = arith.select %5, %17, %16 : vector<2x8xi1>, vector<2x8xf32>
    %cst_13 = arith.constant dense<0xFF800000> : vector<2xf32>
    %19 = vector.multi_reduction <maximumf>, %18, %cst_13 [1] : vector<2x8xf32> to vector<2xf32>
    %20 = vector.shape_cast %19 : vector<2xf32> to vector<2x1xf32>
    %21 = vector.broadcast %20 : vector<2x1xf32> to vector<2x8xf32>
    %22 = arith.subf %18, %21 : vector<2x8xf32>
    %23 = math.exp %22 : vector<2x8xf32>
    %cst_14 = arith.constant dense<0.000000e+00> : vector<2xf32>
    %24 = vector.multi_reduction <add>, %23, %cst_14 [1] : vector<2x8xf32> to vector<2xf32>
    %25 = vector.shape_cast %24 : vector<2xf32> to vector<2x1xf32>
    %26 = tpu.reciprocal %25 {approx = true} : vector<2x1xf32> -> vector<2x1xf32>
    %27 = vector.broadcast %26 : vector<2x1xf32> to vector<2x8xf32>
    %28 = arith.mulf %23, %27 : vector<2x8xf32>
    %29 = vector.shape_cast %28 : vector<2x8xf32> to vector<2x8x1xf32>
    %30 = vector.broadcast %29 : vector<2x8x1xf32> to vector<2x8x768xf32>
    %31 = arith.mulf %0, %30 : vector<2x8x768xf32>
    %cst_15 = arith.constant dense<0.000000e+00> : vector<2x768xf32>
    %32 = vector.multi_reduction <add>, %31, %cst_15 [1] : vector<2x8x768xf32> to vector<2x768xf32>
    %c0_16 = arith.constant 0 : index
    %c0_17 = arith.constant 0 : index
    %c0_18 = arith.constant 0 : index
    %33 = vector.load %arg5[%c0_16, %c0_17, %c0_18] : memref<3x4x768xf32, #tpu.memory_space<vmem>>, vector<1x4x768xf32>
    %34 = vector.shape_cast %33 : vector<1x4x768xf32> to vector<4x768xf32>
    %cst_19 = arith.constant dense<0.000000e+00> : vector<2x4xf32>
    %35 = tpu.matmul %32, %34, %cst_19 {dimension_numbers = #tpu.dot_dimension_numbers<[1], [1], [0], [0], [0, 0, 1, 0], [], []>} : vector<2x768xf32>, vector<4x768xf32>, vector<2x4xf32> -> vector<2x4xf32>
    %c0_20 = arith.constant 0 : index
    %c0_21 = arith.constant 0 : index
    %c0_22 = arith.constant 0 : index
    %36 = vector.load %arg6[%c0_20, %c0_21, %c0_22] : memref<3x1x4xf32, #tpu.memory_space<vmem>>, vector<1x1x4xf32>
    %37 = vector.shape_cast %36 : vector<1x1x4xf32> to vector<1x4xf32>
    %38 = vector.broadcast %37 : vector<1x4xf32> to vector<2x4xf32>
    %39 = arith.addf %35, %38 : vector<2x4xf32>
    %c0_23 = arith.constant 0 : index
    %c0_24 = arith.constant 0 : index
    %c0_25 = arith.constant 0 : index
    %40 = vector.load %arg12[%c0_23, %c0_24, %c0_25] : memref<3x2x4xf32, #tpu.memory_space<vmem>>, vector<1x2x4xf32>
    %41 = vector.shape_cast %40 : vector<1x2x4xf32> to vector<2x4xf32>
    %42 = vector.shape_cast %39 : vector<2x4xf32> to vector<1x2x4xf32>
    tpu.vector_store %arg12[%c0_23, %c0_24, %c0_25], %42 {strides = array<i32>} : memref<3x2x4xf32, #tpu.memory_space<vmem>>, vector<1x2x4xf32>,
    %c0_26 = arith.constant 0 : index
    %c0_27 = arith.constant 0 : index
    %c0_28 = arith.constant 0 : index
    %43 = vector.load %arg13[%c0_26, %c0_27, %c0_28] : memref<3x2x8xf32, #tpu.memory_space<vmem>>, vector<1x2x8xf32>
    %44 = vector.shape_cast %43 : vector<1x2x8xf32> to vector<2x8xf32>
    %45 = vector.shape_cast %28 : vector<2x8xf32> to vector<1x2x8xf32>
    tpu.vector_store %arg13[%c0_26, %c0_27, %c0_28], %45 {strides = array<i32>} : memref<3x2x8xf32, #tpu.memory_space<vmem>>, vector<1x2x8xf32>,
    %c1 = arith.constant 1 : index
    %c0_29 = arith.constant 0 : index
    %c0_30 = arith.constant 0 : index
    %46 = vector.load %arg3[%c1, %c0_29, %c0_30] : memref<3x768x768xbf16, #tpu.memory_space<vmem>>, vector<1x768x768xbf16>
    %47 = vector.shape_cast %46 : vector<1x768x768xbf16> to vector<768x768xbf16>
    %cst_31 = arith.constant dense<0.000000e+00> : vector<16x768xf32>
    %48 = tpu.matmul %3, %47, %cst_31 {dimension_numbers = #tpu.dot_dimension_numbers<[1], [0], [0], [1], [0, 0, 1, 1], [], []>} : vector<16x768xbf16>, vector<768x768xbf16>, vector<16x768xf32> -> vector<16x768xf32>
    %49 = math.tanh %48 : vector<16x768xf32>
    %50 = vector.shape_cast %49 : vector<16x768xf32> to vector<2x8x768xf32>
    %c1_32 = arith.constant 1 : index
    %c0_33 = arith.constant 0 : index
    %c0_34 = arith.constant 0 : index
    %51 = vector.load %arg4[%c1_32, %c0_33, %c0_34] : memref<3x1x768xf32, #tpu.memory_space<vmem>>, vector<1x1x768xf32>
    %52 = vector.shape_cast %51 : vector<1x1x768xf32> to vector<1x768xf32>
    %53 = vector.shape_cast %52 : vector<1x768xf32> to vector<1x1x768xf32>
    %54 = vector.broadcast %53 : vector<1x1x768xf32> to vector<2x8x768xf32>
    %55 = arith.mulf %50, %54 : vector<2x8x768xf32>
    %cst_35 = arith.constant dense<0.000000e+00> : vector<2x8xf32>
    %56 = vector.multi_reduction <add>, %55, %cst_35 [2] : vector<2x8x768xf32> to vector<2x8xf32>
    %cst_36 = arith.constant 0xFF800000 : f32
    %57 = vector.broadcast %cst_36 : f32 to vector<2x8xf32>
    %58 = arith.select %5, %57, %56 : vector<2x8xi1>, vector<2x8xf32>
    %cst_37 = arith.constant dense<0xFF800000> : vector<2xf32>
    %59 = vector.multi_reduction <maximumf>, %58, %cst_37 [1] : vector<2x8xf32> to vector<2xf32>
    %60 = vector.shape_cast %59 : vector<2xf32> to vector<2x1xf32>
    %61 = vector.broadcast %60 : vector<2x1xf32> to vector<2x8xf32>
    %62 = arith.subf %58, %61 : vector<2x8xf32>
    %63 = math.exp %62 : vector<2x8xf32>
    %cst_38 = arith.constant dense<0.000000e+00> : vector<2xf32>
    %64 = vector.multi_reduction <add>, %63, %cst_38 [1] : vector<2x8xf32> to vector<2xf32>
    %65 = vector.shape_cast %64 : vector<2xf32> to vector<2x1xf32>
    %66 = tpu.reciprocal %65 {approx = true} : vector<2x1xf32> -> vector<2x1xf32>
    %67 = vector.broadcast %66 : vector<2x1xf32> to vector<2x8xf32>
    %68 = arith.mulf %63, %67 : vector<2x8xf32>
    %69 = vector.shape_cast %68 : vector<2x8xf32> to vector<2x8x1xf32>
    %70 = vector.broadcast %69 : vector<2x8x1xf32> to vector<2x8x768xf32>
    %71 = arith.mulf %0, %70 : vector<2x8x768xf32>
    %cst_39 = arith.constant dense<0.000000e+00> : vector<2x768xf32>
    %72 = vector.multi_reduction <add>, %71, %cst_39 [1] : vector<2x8x768xf32> to vector<2x768xf32>
    %c1_40 = arith.constant 1 : index
    %c0_41 = arith.constant 0 : index
    %c0_42 = arith.constant 0 : index
    %73 = vector.load %arg5[%c1_40, %c0_41, %c0_42] : memref<3x4x768xf32, #tpu.memory_space<vmem>>, vector<1x4x768xf32>
    %74 = vector.shape_cast %73 : vector<1x4x768xf32> to vector<4x768xf32>
    %cst_43 = arith.constant dense<0.000000e+00> : vector<2x4xf32>
    %75 = tpu.matmul %72, %74, %cst_43 {dimension_numbers = #tpu.dot_dimension_numbers<[1], [1], [0], [0], [0, 0, 1, 0], [], []>} : vector<2x768xf32>, vector<4x768xf32>, vector<2x4xf32> -> vector<2x4xf32>
    %c1_44 = arith.constant 1 : index
    %c0_45 = arith.constant 0 : index
    %c0_46 = arith.constant 0 : index
    %76 = vector.load %arg6[%c1_44, %c0_45, %c0_46] : memref<3x1x4xf32, #tpu.memory_space<vmem>>, vector<1x1x4xf32>
    %77 = vector.shape_cast %76 : vector<1x1x4xf32> to vector<1x4xf32>
    %78 = vector.broadcast %77 : vector<1x4xf32> to vector<2x4xf32>
    %79 = arith.addf %75, %78 : vector<2x4xf32>
    %c1_47 = arith.constant 1 : index
    %c0_48 = arith.constant 0 : index
    %c0_49 = arith.constant 0 : index
    %80 = vector.load %arg12[%c1_47, %c0_48, %c0_49] : memref<3x2x4xf32, #tpu.memory_space<vmem>>, vector<1x2x4xf32>
    %81 = vector.shape_cast %80 : vector<1x2x4xf32> to vector<2x4xf32>
    %82 = vector.shape_cast %79 : vector<2x4xf32> to vector<1x2x4xf32>
    tpu.vector_store %arg12[%c1_47, %c0_48, %c0_49], %82 {strides = array<i32>} : memref<3x2x4xf32, #tpu.memory_space<vmem>>, vector<1x2x4xf32>,
    %c1_50 = arith.constant 1 : index
    %c0_51 = arith.constant 0 : index
    %c0_52 = arith.constant 0 : index
    %83 = vector.load %arg13[%c1_50, %c0_51, %c0_52] : memref<3x2x8xf32, #tpu.memory_space<vmem>>, vector<1x2x8xf32>
    %84 = vector.shape_cast %83 : vector<1x2x8xf32> to vector<2x8xf32>
    %85 = vector.shape_cast %68 : vector<2x8xf32> to vector<1x2x8xf32>
    tpu.vector_store %arg13[%c1_50, %c0_51, %c0_52], %85 {strides = array<i32>} : memref<3x2x8xf32, #tpu.memory_space<vmem>>, vector<1x2x8xf32>,
    %c2 = arith.constant 2 : index
    %c0_53 = arith.constant 0 : index
    %c0_54 = arith.constant 0 : index
    %86 = vector.load %arg3[%c2, %c0_53, %c0_54] : memref<3x768x768xbf16, #tpu.memory_space<vmem>>, vector<1x768x768xbf16>
    %87 = vector.shape_cast %86 : vector<1x768x768xbf16> to vector<768x768xbf16>
    %cst_55 = arith.constant dense<0.000000e+00> : vector<16x768xf32>
    %88 = tpu.matmul %3, %87, %cst_55 {dimension_numbers = #tpu.dot_dimension_numbers<[1], [0], [0], [1], [0, 0, 1, 1], [], []>} : vector<16x768xbf16>, vector<768x768xbf16>, vector<16x768xf32> -> vector<16x768xf32>
    %89 = math.tanh %88 : vector<16x768xf32>
    %90 = vector.shape_cast %89 : vector<16x768xf32> to vector<2x8x768xf32>
    %c2_56 = arith.constant 2 : index
    %c0_57 = arith.constant 0 : index
    %c0_58 = arith.constant 0 : index
    %91 = vector.load %arg4[%c2_56, %c0_57, %c0_58] : memref<3x1x768xf32, #tpu.memory_space<vmem>>, vector<1x1x768xf32>
    %92 = vector.shape_cast %91 : vector<1x1x768xf32> to vector<1x768xf32>
    %93 = vector.shape_cast %92 : vector<1x768xf32> to vector<1x1x768xf32>
    %94 = vector.broadcast %93 : vector<1x1x768xf32> to vector<2x8x768xf32>
    %95 = arith.mulf %90, %94 : vector<2x8x768xf32>
    %cst_59 = arith.constant dense<0.000000e+00> : vector<2x8xf32>
    %96 = vector.multi_reduction <add>, %95, %cst_59 [2] : vector<2x8x768xf32> to vector<2x8xf32>
    %cst_60 = arith.constant 0xFF800000 : f32
    %97 = vector.broadcast %cst_60 : f32 to vector<2x8xf32>
    %98 = arith.select %5, %97, %96 : vector<2x8xi1>, vector<2x8xf32>
    %cst_61 = arith.constant dense<0xFF800000> : vector<2xf32>
    %99 = vector.multi_reduction <maximumf>, %98, %cst_61 [1] : vector<2x8xf32> to vector<2xf32>
    %100 = vector.shape_cast %99 : vector<2xf32> to vector<2x1xf32>
    %101 = vector.broadcast %100 : vector<2x1xf32> to vector<2x8xf32>
    %102 = arith.subf %98, %101 : vector<2x8xf32>
    %103 = math.exp %102 : vector<2x8xf32>
    %cst_62 = arith.constant dense<0.000000e+00> : vector<2xf32>
    %104 = vector.multi_reduction <add>, %103, %cst_62 [1] : vector<2x8xf32> to vector<2xf32>
    %105 = vector.shape_cast %104 : vector<2xf32> to vector<2x1xf32>
    %106 = tpu.reciprocal %105 {approx = true} : vector<2x1xf32> -> vector<2x1xf32>
    %107 = vector.broadcast %106 : vector<2x1xf32> to vector<2x8xf32>
    %108 = arith.mulf %103, %107 : vector<2x8xf32>
    %109 = vector.shape_cast %108 : vector<2x8xf32> to vector<2x8x1xf32>
    %110 = vector.broadcast %109 : vector<2x8x1xf32> to vector<2x8x768xf32>
    %111 = arith.mulf %0, %110 : vector<2x8x768xf32>
    %cst_63 = arith.constant dense<0.000000e+00> : vector<2x768xf32>
    %112 = vector.multi_reduction <add>, %111, %cst_63 [1] : vector<2x8x768xf32> to vector<2x768xf32>
    %c2_64 = arith.constant 2 : index
    %c0_65 = arith.constant 0 : index
    %c0_66 = arith.constant 0 : index
    %113 = vector.load %arg5[%c2_64, %c0_65, %c0_66] : memref<3x4x768xf32, #tpu.memory_space<vmem>>, vector<1x4x768xf32>
    %114 = vector.shape_cast %113 : vector<1x4x768xf32> to vector<4x768xf32>
    %cst_67 = arith.constant dense<0.000000e+00> : vector<2x4xf32>
    %115 = tpu.matmul %112, %114, %cst_67 {dimension_numbers = #tpu.dot_dimension_numbers<[1], [1], [0], [0], [0, 0, 1, 0], [], []>} : vector<2x768xf32>, vector<4x768xf32>, vector<2x4xf32> -> vector<2x4xf32>
    %c2_68 = arith.constant 2 : index
    %c0_69 = arith.constant 0 : index
    %c0_70 = arith.constant 0 : index
    %116 = vector.load %arg6[%c2_68, %c0_69, %c0_70] : memref<3x1x4xf32, #tpu.memory_space<vmem>>, vector<1x1x4xf32>
    %117 = vector.shape_cast %116 : vector<1x1x4xf32> to vector<1x4xf32>
    %118 = vector.broadcast %117 : vector<1x4xf32> to vector<2x4xf32>
    %119 = arith.addf %115, %118 : vector<2x4xf32>
    %c2_71 = arith.constant 2 : index
    %c0_72 = arith.constant 0 : index
    %c0_73 = arith.constant 0 : index
    %120 = vector.load %arg12[%c2_71, %c0_72, %c0_73] : memref<3x2x4xf32, #tpu.memory_space<vmem>>, vector<1x2x4xf32>
    %121 = vector.shape_cast %120 : vector<1x2x4xf32> to vector<2x4xf32>
    %122 = vector.shape_cast %119 : vector<2x4xf32> to vector<1x2x4xf32>
    tpu.vector_store %arg12[%c2_71, %c0_72, %c0_73], %122 {strides = array<i32>} : memref<3x2x4xf32, #tpu.memory_space<vmem>>, vector<1x2x4xf32>,
    %c2_74 = arith.constant 2 : index
    %c0_75 = arith.constant 0 : index
    %c0_76 = arith.constant 0 : index
    %123 = vector.load %arg13[%c2_74, %c0_75, %c0_76] : memref<3x2x8xf32, #tpu.memory_space<vmem>>, vector<1x2x8xf32>
    %124 = vector.shape_cast %123 : vector<1x2x8xf32> to vector<2x8xf32>
    %125 = vector.shape_cast %108 : vector<2x8xf32> to vector<1x2x8xf32>
    tpu.vector_store %arg13[%c2_74, %c0_75, %c0_76], %125 {strides = array<i32>} : memref<3x2x8xf32, #tpu.memory_space<vmem>>, vector<1x2x8xf32>,
    %c0_77 = arith.constant 0 : index
    %c0_78 = arith.constant 0 : index
    %126 = vector.load %arg7[%c0_77, %c0_78] : memref<2x768xf32, #tpu.memory_space<vmem>>, vector<2x768xf32>
    %127 = arith.truncf %126 : vector<2x768xf32> to vector<2x768xbf16>
    %c0_79 = arith.constant 0 : index
    %c0_80 = arith.constant 0 : index
    %128 = vector.load %arg8[%c0_79, %c0_80] : memref<768x768xbf16, #tpu.memory_space<vmem>>, vector<768x768xbf16>
    %cst_81 = arith.constant dense<0.000000e+00> : vector<2x768xf32>
    %129 = tpu.matmul %127, %128, %cst_81 {dimension_numbers = #tpu.dot_dimension_numbers<[1], [0], [0], [1], [0, 0, 1, 1], [], []>} : vector<2x768xbf16>, vector<768x768xbf16>, vector<2x768xf32> -> vector<2x768xf32>
    %c0_82 = arith.constant 0 : index
    %c0_83 = arith.constant 0 : index
    %130 = vector.load %arg9[%c0_82, %c0_83] : memref<1x768xf32, #tpu.memory_space<vmem>>, vector<1x768xf32>
    %131 = vector.broadcast %130 : vector<1x768xf32> to vector<2x768xf32>
    %132 = arith.addf %129, %131 : vector<2x768xf32>
    %133 = math.tanh %132 : vector<2x768xf32>
    %c0_84 = arith.constant 0 : index
    %c0_85 = arith.constant 0 : index
    %134 = vector.load %arg10[%c0_84, %c0_85] : memref<1x768xf32, #tpu.memory_space<vmem>>, vector<1x768xf32>
    %135 = vector.broadcast %134 : vector<1x768xf32> to vector<2x768xf32>
    %136 = arith.mulf %133, %135 : vector<2x768xf32>
    %cst_86 = arith.constant dense<0.000000e+00> : vector<2xf32>
    %137 = vector.multi_reduction <add>, %136, %cst_86 [1] : vector<2x768xf32> to vector<2xf32>
    %138 = vector.shape_cast %137 : vector<2xf32> to vector<2x1xf32>
    %c0_87 = arith.constant 0 : index
    %c0_88 = arith.constant 0 : index
    %139 = vector.load %arg11[%c0_87, %c0_88] : memref<1x1xf32, #tpu.memory_space<vmem>>, vector<1x1xf32>
    %140 = vector.broadcast %139 : vector<1x1xf32> to vector<2x1xf32>
    %141 = arith.addf %138, %140 : vector<2x1xf32>
    %c0_89 = arith.constant 0 : index
    %c0_90 = arith.constant 0 : index
    %c0_91 = arith.constant 0 : index
    %142 = vector.load %arg14[%c0_89, %c0_90, %c0_91] : memref<1x2x1xf32, #tpu.memory_space<vmem>>, vector<1x2x1xf32>
    %143 = vector.shape_cast %142 : vector<1x2x1xf32> to vector<2x1xf32>
    %144 = vector.shape_cast %141 : vector<2x1xf32> to vector<1x2x1xf32>
    tpu.vector_store %arg14[%c0_89, %c0_90, %c0_91], %144 {strides = array<i32>} : memref<1x2x1xf32, #tpu.memory_space<vmem>>, vector<1x2x1xf32>,
    return
  }
  func.func @transform_0(%arg0: i32) -> (i32, i32, i32) {
    %c0_i32 = arith.constant 0 : i32
    %c0_i32_0 = arith.constant 0 : i32
    %c0_i32_1 = arith.constant 0 : i32
    %c0_i32_2 = arith.constant 0 : i32
    return %c0_i32, %c0_i32_0, %c0_i32_1 : i32, i32, i32
  }
  func.func @transform_1(%arg0: i32) -> (i32, i32) {
    %c0_i32 = arith.constant 0 : i32
    %c0_i32_0 = arith.constant 0 : i32
    %c0_i32_1 = arith.constant 0 : i32
    return %c0_i32, %c0_i32_0 : i32, i32
  }
  func.func @transform_2(%arg0: i32) -> (i32, i32, i32) {
    %c0_i32 = arith.constant 0 : i32
    %c0_i32_0 = arith.constant 0 : i32
    %c0_i32_1 = arith.constant 0 : i32
    return %arg0, %c0_i32, %c0_i32_0 : i32, i32, i32
  }
  func.func @transform_3(%arg0: i32) -> (i32, i32, i32) {
    %c0_i32 = arith.constant 0 : i32
    %c0_i32_0 = arith.constant 0 : i32
    %c0_i32_1 = arith.constant 0 : i32
    return %arg0, %c0_i32, %c0_i32_0 : i32, i32, i32
  }
  func.func @transform_4(%arg0: i32) -> (i32, i32, i32) {
    %c0_i32 = arith.constant 0 : i32
    %c0_i32_0 = arith.constant 0 : i32
    %c0_i32_1 = arith.constant 0 : i32
    return %arg0, %c0_i32, %c0_i32_0 : i32, i32, i32
  }
  func.func @transform_5(%arg0: i32) -> (i32, i32, i32) {
    %c0_i32 = arith.constant 0 : i32
    %c0_i32_0 = arith.constant 0 : i32
    %c0_i32_1 = arith.constant 0 : i32
    return %arg0, %c0_i32, %c0_i32_0 : i32, i32, i32
  }
  func.func @transform_6(%arg0: i32) -> (i32, i32) {
    %c0_i32 = arith.constant 0 : i32
    %c0_i32_0 = arith.constant 0 : i32
    %c0_i32_1 = arith.constant 0 : i32
    return %c0_i32, %c0_i32_0 : i32, i32
  }
  func.func @transform_7(%arg0: i32) -> (i32, i32) {
    %c0_i32 = arith.constant 0 : i32
    %c0_i32_0 = arith.constant 0 : i32
    %c0_i32_1 = arith.constant 0 : i32
    return %c0_i32, %c0_i32_0 : i32, i32
  }
  func.func @transform_8(%arg0: i32) -> (i32, i32) {
    %c0_i32 = arith.constant 0 : i32
    %c0_i32_0 = arith.constant 0 : i32
    %c0_i32_1 = arith.constant 0 : i32
    return %c0_i32, %c0_i32_0 : i32, i32
  }
  func.func @transform_9(%arg0: i32) -> (i32, i32) {
    %c0_i32 = arith.constant 0 : i32
    %c0_i32_0 = arith.constant 0 : i32
    %c0_i32_1 = arith.constant 0 : i32
    return %c0_i32, %c0_i32_0 : i32, i32
  }
  func.func @transform_10(%arg0: i32) -> (i32, i32) {
    %c0_i32 = arith.constant 0 : i32
    %c0_i32_0 = arith.constant 0 : i32
    %c0_i32_1 = arith.constant 0 : i32
    return %c0_i32, %c0_i32_0 : i32, i32
  }
  func.func @transform_11(%arg0: i32) -> (i32, i32, i32) {
    %c0_i32 = arith.constant 0 : i32
    %c0_i32_0 = arith.constant 0 : i32
    %c0_i32_1 = arith.constant 0 : i32
    return %arg0, %c0_i32, %c0_i32_0 : i32, i32, i32
  }
  func.func @transform_12(%arg0: i32) -> (i32, i32, i32) {
    %c0_i32 = arith.constant 0 : i32
    %c0_i32_0 = arith.constant 0 : i32
    %c0_i32_1 = arith.constant 0 : i32
    return %arg0, %c0_i32, %c0_i32_0 : i32, i32, i32
  }
  func.func @transform_13(%arg0: i32) -> (i32, i32, i32) {
    %c0_i32 = arith.constant 0 : i32
    %c0_i32_0 = arith.constant 0 : i32
    %c0_i32_1 = arith.constant 0 : i32
    return %arg0, %c0_i32, %c0_i32_0 : i32, i32, i32
  }
}

</mosaic_0001>

<bundles_post_ra>
// kernel: asap_shiba_forward.1
= control target key start
LH: loop header
LB: loop body
LE: loop exit
PB: predicated region body
PF: predicated region fallthrough
CT: control target
= control target key end

     0   :  { %s16603_s0 = inlined_call_operand.hbm [shape: f32[2,8,768], index: 0, kind: input, shape index: {}]   ;;  %s16604_s1 = inlined_call_operand.hbm [shape: f32[2,8], index: 1, kind: input, shape index: {}]   ;;  %s16605_s2 = inlined_call_operand.hbm [shape: bf16[18,768,768], index: 2, kind: input, shape index: {}]   ;;  %s16606_s3 = inlined_call_operand.hbm [shape: f32[18,1,768], index: 3, kind: input, shape index: {}]   ;;  %s16607_s4 = inlined_call_operand.hbm [shape: f32[18,4,768], index: 4, kind: input, shape index: {}]   ;;  %s16608_s5 = inlined_call_operand.vmem [shape: f32[18,1,4], index: 5, kind: input, shape index: {}]   ;;  %s16609_s6 = inlined_call_operand.vmem [shape: f32[2,768], index: 6, kind: input, shape index: {}]   ;;  %s16610_s7 = inlined_call_operand.hbm [shape: bf16[768,768], index: 7, kind: input, shape index: {}]   ;;  %s16611_s8 = inlined_call_operand.hbm [shape: f32[1,768], index: 8, kind: input, shape index: {}]   ;;  %s16612_s9 = inlined_call_operand.hbm [shape: f32[1,768], index: 9, kind: input, shape index: {}]   ;;  %s16613_s10 = inlined_call_operand.<no memory space> [shape: f32[1,1], index: 10, kind: input, shape index: {}]   ;;  %s16614_s11 = inlined_call_operand.vmem [shape: f32[18,2,4], index: 11, kind: output, shape index: {0}]   ;;  %s16615_s12 = inlined_call_operand.vmem [shape: f32[18,2,8], index: 12, kind: output, shape index: {1}]   ;;  %s16616_s13 = inlined_call_operand.vmem [shape: f32[6,2,1], index: 13, kind: output, shape index: {2}]  }
   0x1   :  { %16640 = sst [smem:[#allocation23_spill]] %s16603_s0  ;;  %v19_v0 = vstv %s16613_s10 }
   0x2   :  { %16641 = sst [smem:[#allocation24_spill]] %s16605_s2  ;;  %20 = vst [vmem:[#allocation2] sm:$0x1] %v19_v0 }
   0x3   :  { %16642 = sst [smem:[#allocation25_spill]] %s16608_s5 }
   0x4   :  { %16643 = sst [smem:[#allocation26_spill]] %s16609_s6 }
   0x5   :  { %16644 = sst [smem:[#allocation27_spill]] %s16614_s11 }
   0x6   :  { %16645 = sst [smem:[#allocation28_spill]] %s16615_s12 }
   0x7   :  { %16646 = sst [smem:[#allocation29_spill]] %s16616_s13 }
   0x8   :  { %21 = vsyncpa [#allocation4], 0 }
   0x9   :  { %22 = vsyncpa [#allocation6], 0 }
   0xa   :  { %23 = vsyncpa [#allocation12], 0  ;;  %s15085_s27 = smov 0   ;;  %s15087_s28 = smov 0  }
   0xb   :  { %s15089_s29 = smov 0   ;;  %s15091_s30 = smov 0  }
   0xc LB: > { %16647 = sst [smem:[#allocation19_spill]] %s14991_s29  ;;  %s15104_s10 = sadd.s32 4294967295, %s14995_s30   ;;  %s14995_s30 = sphi %s15091_s30, %s16684_s30   ;;  %s14991_s29 = sphi %s15089_s29, %s16686_s29   ;;  %s14987_s28 = sphi %s15087_s28, %s16688_s28   ;;  %s14983_s27 = sphi %s15085_s27, %s16687_s27  }
   0xd   : > { %p91_p0 = scmp.ne.s32.totalorder %s14987_s28, %s14983_s27  ;;  %p16617_p1 = scmp.eq.s32.totalorder %s15104_s10, 0 }
   0xe   : > { %p10842_p2 = scmp.ge.s32.totalorder %s14995_s30, 1  ;;  %p363_p3 = scmp.lt.s32.totalorder %s14995_s30, 7 }
   0xf   : > { %p15112_p4 = por %p16617_p1, %p91_p0  ;;  %s14997_s16 = smov [#allocation3]  }
  0x10   : > { %p15116_p5 = pnand %p10842_p2, %p363_p3  ;;  %s375_s17 = sshll.u32 %s14997_s16, 4  ;;  %s376_s17 = int_to_ptr.vmem [resolvable:$true] %s375_s17 }
  0x11   : > { %s16648_s14 = scalar_select %p15112_p4, 1, 0 }
  0x12   : > { %s16650_s15 = scalar_select %p15116_p5, 1, 0 }
  0x13   : > { %16649 = sst [smem:[#allocation20_spill]] %s16648_s14  ;;  %p12761_p6 = pneg %p15116_p5 }
  0x14   : > { %s15129_s19 = sadd.s32 1, %s14995_s30   ;;  %s16653_s0 = sld [smem:[#allocation23_spill]] }
  0x15   : > { %p15124_p7 = pnand %p12761_p6, %p16617_p1  ;;  %16652 = sst [smem:[#allocation21_spill]] %s15129_s19 }
  0x16   : > { %s75_s20 = ssub.s32 %s14995_s30, %s15129_s19 }
  0x17   : > { %s16651_s18 = scalar_select %p15124_p7, 1, 0 }
  0x18   : > { %p15141_p9 = pneg %p15124_p7 }
  0x1a   : > { %s14715_s23 = scalar_lea.hbm %s16653_s0, 1536 }
  0x1b   : > { %p14716_p8 = scmp.ne.s32.totalorder %s16653_s0, %s14715_s23  ;;  %p14722_p12 = scmp.lt.u32.totalorder %s14715_s23, %s16653_s0 }
  0x1c   : > { %s16654_s26 = scalar_select %p15141_p9, 1, 0 }
  0x1d   : > { %p14718_p10 = pnand %p15141_p9, %p14716_p8 }
  0x1f   : > { %p14719_p11 = pneg %p14718_p10 }
  0x21   : > { %p14724_p13 = pnand %p14722_p12, %p14719_p11 }
  0x23   : > { %14727 = shalt.err (!%p14724_p13)
}
  0x24   : > { %s14728_s21 = scalar_lea.vmem %s376_s17, 1536  ;;  %p14736_p6 = scmp.lt.s32.totalorder %s376_s17, %s376_s17 }
  0x25   : > { %p14729_p0 = scmp.ne.s32.totalorder %s376_s17, %s14728_s21  ;;  %p14737_p1 = scmp.lt.s32.totalorder %s14728_s21, %s14728_s21 }
  0x27   : > { %p14731_p2 = pnand %p14729_p0, %p15141_p9  ;;  %p14738_p4 = por %p14737_p1, %p14736_p6 }
  0x29   : > { %p14732_p3 = pneg %p14731_p2 }
  0x2b   : > { %p14739_p5 = pnand %p14738_p4, %p14732_p3 }
  0x2d   : > { %14742 = shalt.err (!%p14739_p5)
}
  0x2e   : > { %s14998_s22 = smov 768   ;;  %s14999_s23 = smov 48  }
  0x2f   : > { %12764 = dma.hbm_to_vmem [thread:$0]  (!%p15124_p7), %s16653_s0, 1536, %s376_s17, [#allocation4], %s14998_s22, %s14998_s22, %s14999_s23  }
  0x30   : > { %p76_p1 = scmp.eq.s32.totalorder %s75_s20, 0  ;;  %s78_s27 = sadd.s32 1, %s14991_s29 }
  0x31   : > { %p85_p4 = scmp.ne.s32.totalorder %s14991_s29, %s14987_s28  ;;  %p86_p5 = scmp.eq.s32.totalorder %s14995_s30, 0 }
  0x32   : > { %s15162_s16 = scalar_select %p76_p1, %s14991_s29, %s78_s27  }
  0x33   : > { %p87_p8 = por %p86_p5, %p85_p4  ;;  %p12792_p10 = scmp.lt.s32.totalorder %s14995_s30, 6 }
  0x34   : > { %16655 = sst [smem:[#allocation22_spill]] %s15162_s16  ;;  %s441_s21 = sand.u32 1, %s14995_s30  }
  0x35   : > { %s15167_s19 = sand.u32 1, %s14991_s29   ;;  %s12793_s6 = smul.u32 110592, %s14995_s30 }
  0x36   : > { %s12726_s13 = smul.u32 6912, %s15167_s19  ;;  %p15171_p11 = pnand %p12792_p10, %p87_p8 }
  0x37   : > { %s16657_s2 = sld [smem:[#allocation24_spill]]  ;;  %s15182_s25 = scalar_lea.sflag [#allocation4], %s441_s21 }
  0x38   : > { %s16656_s11 = scalar_select %p15171_p11, 1, 0 }
  0x39   : > { %s445_s22 = scalar_lea.vmem [#allocation7], %s12726_s13  ;;  %p15188_p13 = pneg %p15171_p11 }
  0x3a   : > { %s453_s23 = sshll.u32 %s445_s22, 4  ;;  %s15180_s23 = int_to_ptr.vmem [resolvable:$true] %s453_s23 }
  0x3b   : > { %s16658_s0 = scalar_select %p15188_p13, 1, 0 }
  0x3d   : > { %s15178_s20 = scalar_lea.hbm %s16657_s2, %s12793_s6  ;;  %s14748_s13 = scalar_lea.hbm %s16657_s2, 663552 }
  0x3e   : > { %s14743_s27 = scalar_lea.hbm %s15178_s20, 110592  ;;  %p14749_p3 = scmp.lt.u32.totalorder %s15178_s20, %s16657_s2 }
  0x3f   : > { %p14744_p12 = scmp.ne.s32.totalorder %s15178_s20, %s14743_s27  ;;  %p14750_p6 = scmp.lt.u32.totalorder %s14748_s13, %s14743_s27 }
  0x40   : > { %p14752_p4 = scmp.lt.u32.totalorder %s14743_s27, %s15178_s20 }
  0x41   : > { %p14746_p0 = pnand %p15188_p13, %p14744_p12  ;;  %p14751_p1 = por %p14750_p6, %p14749_p3 }
  0x43   : > { %p14747_p2 = pneg %p14746_p0  ;;  %p14753_p5 = por %p14752_p4, %p14751_p1 }
  0x45   : > { %p14754_p8 = pnand %p14753_p5, %p14747_p2 }
  0x47   : > { %14757 = shalt.err (!%p14754_p8)
}
  0x48   : > { %s14758_s21 = scalar_lea.vmem %s15180_s23, 110592  ;;  %s15000_s6 = smov [#allocation7]  }
  0x49   : > { %p14759_p10 = scmp.ne.s32.totalorder %s15180_s23, %s14758_s21  ;;  %s14763_s24 = sshll.u32 %s15000_s6, 4  ;;  %s14764_s24 = int_to_ptr.vmem [resolvable:$false] %s14763_s24 }
  0x4a   : > { %s14765_s17 = scalar_lea.vmem %s14764_s24, 221184  ;;  %p14766_p7 = scmp.lt.s32.totalorder %s15180_s23, %s14764_s24 }
  0x4b   : > { %p14761_p12 = pnand %p14759_p10, %p15188_p13  ;;  %p14767_p9 = scmp.lt.s32.totalorder %s14765_s17, %s14758_s21 }
  0x4d   : > { %p14762_p0 = pneg %p14761_p12  ;;  %p14768_p3 = por %p14767_p9, %p14766_p7 }
  0x4f   : > { %p14769_p6 = pnand %p14768_p3, %p14762_p0 }
  0x51   : > { %14772 = shalt.err (!%p14769_p6)
}
  0x52   : > { %s16635_s27 = smov 384   ;;  %s16637_s13 = smov 24  }
  0x53   : > { %12780 = dma.hbm_to_vmem [thread:$0]  (!%p15171_p11), %s15178_s20, 110592, %s15180_s23, %s15182_s25, %s16635_s27, %s16635_s27, %s16637_s13  }
  0x54   : > { %s15003_s22 = smov [#allocation5]   ;;  %s15004_s24 = smov [#allocation11]  }
  0x55   : > { %s389_s6 = sshll.u32 %s15003_s22, 4  ;;  %s416_s21 = sshll.u32 %s15004_s24, 4  ;;  %s390_s6 = int_to_ptr.vmem [resolvable:$true] %s389_s6  ;;  %s417_s21 = int_to_ptr.vmem [resolvable:$true] %s416_s21 }
  0x56   : > { %s14773_s16 = scalar_lea.hbm %s16604_s1, 32  ;;  %p16659_p9 = scmp.ne.s32.totalorder %s16654_s26, 0 }
  0x57   : > { %p14774_p7 = scmp.ne.s32.totalorder %s16604_s1, %s14773_s16  ;;  %p14780_p4 = scmp.lt.u32.totalorder %s14773_s16, %s16604_s1 }
  0x59   : > { %p14776_p2 = pnand %p14774_p7, %p16659_p9 }
  0x5b   : > { %p14777_p1 = pneg %p14776_p2 }
  0x5d   : > { %p14782_p5 = pnand %p14780_p4, %p14777_p1 }
  0x5f   : > { %14785 = shalt.err (!%p14782_p5)
}
  0x60   : > { %s14786_s20 = scalar_lea.vmem %s390_s6, 32  ;;  %p14794_p0 = scmp.lt.s32.totalorder %s390_s6, %s390_s6 }
  0x61   : > { %p14787_p8 = scmp.ne.s32.totalorder %s390_s6, %s14786_s20  ;;  %p14795_p3 = scmp.lt.s32.totalorder %s14786_s20, %s14786_s20 }
  0x63   : > { %p14789_p10 = pnand %p14787_p8, %p16659_p9  ;;  %p14796_p6 = por %p14795_p3, %p14794_p0 }
  0x65   : > { %p14790_p12 = pneg %p14789_p10 }
  0x67   : > { %p14797_p11 = pnand %p14796_p6, %p14790_p12 }
  0x69   : > { %14800 = shalt.err (!%p14797_p11)
}
  0x6a   : > { %p16660_p7 = scmp.ne.s32.totalorder %s16651_s18, 0  ;;  %s12728_s12 = smul.u32 18, %s15167_s19 }
  0x6b   : > { %s14801_s16 = scalar_lea.hbm %s16611_s8, 96 }
  0x6c   : > { %12767 = dma.hbm_to_vmem [thread:$0]  (!%p16660_p7), %s16604_s1, 32, %s390_s6, [#allocation6]  }
  0x6d   : > { %p14802_p2 = scmp.ne.s32.totalorder %s16611_s8, %s14801_s16  ;;  %p14808_p4 = scmp.lt.u32.totalorder %s14801_s16, %s16611_s8 }
  0x6f   : > { %p14804_p11 = pnand %p14802_p2, %p16659_p9 }
  0x71   : > { %p14805_p1 = pneg %p14804_p11 }
  0x73   : > { %p14810_p5 = pnand %p14808_p4, %p14805_p1 }
  0x75   : > { %14813 = shalt.err (!%p14810_p5)
}
  0x76   : > { %s14814_s6 = scalar_lea.vmem %s417_s21, 96  ;;  %p14822_p0 = scmp.lt.s32.totalorder %s417_s21, %s417_s21 }
  0x77   : > { %p14815_p8 = scmp.ne.s32.totalorder %s417_s21, %s14814_s6  ;;  %p14823_p3 = scmp.lt.s32.totalorder %s14814_s6, %s14814_s6 }
  0x79   : > { %p14817_p10 = pnand %p14815_p8, %p16659_p9  ;;  %p14824_p6 = por %p14823_p3, %p14822_p0 }
  0x7b   : > { %p14818_p12 = pneg %p14817_p10 }
  0x7d   : > { %p14825_p13 = pnand %p14824_p6, %p14818_p12 }
  0x7f   : > { %14828 = shalt.err (!%p14825_p13)
}
  0x80   : > { %12773 = dma.hbm_to_vmem [thread:$0]  (!%p16660_p7), %s16611_s8, 96, %s417_s21, [#allocation12]  }
  0x81   : > { %s12794_s5 = smul.u32 288, %s14995_s30  ;;  %s467_s29 = scalar_lea.vmem [#allocation8], %s12728_s12 }
  0x82   : > { %s475_s14 = sshll.u32 %s467_s29, 4  ;;  %p16661_p2 = scmp.ne.s32.totalorder %s16658_s0, 0  ;;  %s15258_s14 = int_to_ptr.vmem [resolvable:$true] %s475_s14 }
  0x83   : > { %s15256_s22 = scalar_lea.hbm %s16606_s3, %s12794_s5  ;;  %s14834_s12 = scalar_lea.hbm %s16606_s3, 1728 }
  0x84   : > { %s14829_s24 = scalar_lea.hbm %s15256_s22, 288  ;;  %p14835_p4 = scmp.lt.u32.totalorder %s15256_s22, %s16606_s3 }
  0x85   : > { %p14830_p13 = scmp.ne.s32.totalorder %s15256_s22, %s14829_s24  ;;  %p14836_p5 = scmp.lt.u32.totalorder %s14834_s12, %s14829_s24 }
  0x86   : > { %p14838_p10 = scmp.lt.u32.totalorder %s14829_s24, %s15256_s22 }
  0x87   : > { %p14832_p11 = pnand %p14830_p13, %p16661_p2  ;;  %p14837_p8 = por %p14836_p5, %p14835_p4 }
  0x89   : > { %p14833_p1 = pneg %p14832_p11  ;;  %p14839_p12 = por %p14838_p10, %p14837_p8 }
  0x8b   : > { %p14840_p0 = pnand %p14839_p12, %p14833_p1 }
  0x8d   : > { %14843 = shalt.err (!%p14840_p0)
}
  0x8e   : > { %s14844_s2 = scalar_lea.vmem %s15258_s14, 288  ;;  %s15005_s5 = smov [#allocation8]  }
  0x8f   : > { %p14845_p3 = scmp.ne.s32.totalorder %s15258_s14, %s14844_s2  ;;  %s14849_s29 = sshll.u32 %s15005_s5, 4  ;;  %s14850_s29 = int_to_ptr.vmem [resolvable:$false] %s14849_s29 }
  0x90   : > { %s14851_s16 = scalar_lea.vmem %s14850_s29, 576  ;;  %p14852_p11 = scmp.lt.s32.totalorder %s15258_s14, %s14850_s29 }
  0x91   : > { %p14847_p6 = pnand %p14845_p3, %p16661_p2  ;;  %p14853_p7 = scmp.lt.s32.totalorder %s14851_s16, %s14844_s2 }
  0x93   : > { %p14848_p13 = pneg %p14847_p6  ;;  %p14854_p4 = por %p14853_p7, %p14852_p11 }
  0x95   : > { %p14855_p5 = pnand %p14854_p4, %p14848_p13 }
  0x97   : > { %14858 = shalt.err (!%p14855_p5)
}
  0x98   : > { %s15006_s23 = smov 96   ;;  %s15007_s24 = smov 6  }
  0x99   : > { %p16662_p1 = scmp.ne.s32.totalorder %s16656_s11, 0  ;;  %s15008_s21 = smov [#allocation10]  }
  0x9a   : > { %s402_s17 = sshll.u32 %s15008_s21, 4  ;;  %s15009_s12 = smov [#allocation13]   ;;  %s403_s17 = int_to_ptr.vmem [resolvable:$true] %s402_s17 }
  0x9b   : > { %12783 = dma.hbm_to_vmem [thread:$0]  (!%p16662_p1), %s15256_s22, 288, %s15258_s14, %s15182_s25, %s15006_s23, %s15006_s23, %s15007_s24  }
  0x9c   : > { %s427_s6 = sshll.u32 %s15009_s12, 4  ;;  %s14859_s2 = scalar_lea.hbm %s16610_s7, 36864  ;;  %s428_s6 = int_to_ptr.vmem [resolvable:$true] %s427_s6 }
  0x9d   : > { %p14860_p7 = scmp.ne.s32.totalorder %s16610_s7, %s14859_s2  ;;  %p14866_p12 = scmp.lt.u32.totalorder %s14859_s2, %s16610_s7 }
  0x9f   : > { %p14862_p8 = pnand %p14860_p7, %p16659_p9 }
  0xa1   : > { %p14863_p10 = pneg %p14862_p8 }
  0xa3   : > { %p14868_p0 = pnand %p14866_p12, %p14863_p10 }
  0xa5   : > { %14871 = shalt.err (!%p14868_p0)
}
  0xa6   : > { %s14872_s14 = scalar_lea.vmem %s403_s17, 36864  ;;  %p14880_p11 = scmp.lt.s32.totalorder %s403_s17, %s403_s17 }
  0xa7   : > { %p14873_p3 = scmp.ne.s32.totalorder %s403_s17, %s14872_s14  ;;  %p14881_p4 = scmp.lt.s32.totalorder %s14872_s14, %s14872_s14 }
  0xa9   : > { %p14875_p6 = pnand %p14873_p3, %p16659_p9  ;;  %p14882_p5 = por %p14881_p4, %p14880_p11 }
  0xab   : > { %p14876_p13 = pneg %p14875_p6 }
  0xad   : > { %p14883_p1 = pnand %p14882_p5, %p14876_p13 }
  0xaf   : > { %14886 = shalt.err (!%p14883_p1)
}
  0xb0   : > { %p16663_p7 = scmp.ne.s32.totalorder %s16651_s18, 0  ;;  %s16664_s22 = smov 24  }
  0xb1   : > { %s16665_s23 = smov 384   ;;  %s12730_s24 = smul.u32 72, %s15167_s19 }
  0xb2   : > { %12770 = dma.hbm_to_vmem [thread:$0]  (!%p16663_p7), %s16610_s7, 36864, %s403_s17, [#allocation6], %s16665_s23, %s16665_s23, %s16664_s22  }
  0xb3   : > { %s14887_s20 = scalar_lea.hbm %s16612_s9, 96 }
  0xb4   : > { %p14888_p1 = scmp.ne.s32.totalorder %s16612_s9, %s14887_s20  ;;  %p14894_p12 = scmp.lt.u32.totalorder %s14887_s20, %s16612_s9 }
  0xb6   : > { %p14890_p8 = pnand %p14888_p1, %p16659_p9 }
  0xb8   : > { %p14891_p10 = pneg %p14890_p8 }
  0xba   : > { %p14896_p0 = pnand %p14894_p12, %p14891_p10 }
  0xbc   : > { %14899 = shalt.err (!%p14896_p0)
}
  0xbd   : > { %s14900_s17 = scalar_lea.vmem %s428_s6, 96  ;;  %p14908_p11 = scmp.lt.s32.totalorder %s428_s6, %s428_s6 }
  0xbe   : > { %p14901_p3 = scmp.ne.s32.totalorder %s428_s6, %s14900_s17  ;;  %p14909_p4 = scmp.lt.s32.totalorder %s14900_s17, %s14900_s17 }
  0xc0   : > { %p14903_p6 = pnand %p14901_p3, %p16659_p9  ;;  %p14910_p5 = por %p14909_p4, %p14908_p11 }
  0xc2   : > { %p14904_p13 = pneg %p14903_p6 }
  0xc4   : > { %p14911_p2 = pnand %p14910_p5, %p14904_p13 }
  0xc6   : > { %14914 = shalt.err (!%p14911_p2)
}
  0xc7   : > { %12776 = dma.hbm_to_vmem [thread:$0]  (!%p16663_p7), %s16612_s9, 96, %s428_s6, [#allocation12]  }
  0xc8   : > { %s12795_s27 = smul.u32 1152, %s14995_s30  ;;  %s489_s13 = scalar_lea.vmem [#allocation9], %s12730_s24 }
  0xc9   : > { %s497_s21 = sshll.u32 %s489_s13, 4  ;;  %p16666_p2 = scmp.ne.s32.totalorder %s16658_s0, 0  ;;  %s15328_s21 = int_to_ptr.vmem [resolvable:$true] %s497_s21 }
  0xca   : > { %s15326_s20 = scalar_lea.hbm %s16607_s4, %s12795_s27  ;;  %s14920_s24 = scalar_lea.hbm %s16607_s4, 6912 }
  0xcb   : > { %s14915_s18 = scalar_lea.hbm %s15326_s20, 1152  ;;  %p14921_p7 = scmp.lt.u32.totalorder %s15326_s20, %s16607_s4 }
  0xcc   : > { %p14916_p9 = scmp.ne.s32.totalorder %s15326_s20, %s14915_s18  ;;  %p14922_p10 = scmp.lt.u32.totalorder %s14920_s24, %s14915_s18 }
  0xcd   : > { %p14924_p0 = scmp.lt.u32.totalorder %s14915_s18, %s15326_s20 }
  0xce   : > { %p14918_p1 = pnand %p14916_p9, %p16666_p2  ;;  %p14923_p12 = por %p14922_p10, %p14921_p7 }
  0xd0   : > { %p14919_p8 = pneg %p14918_p1  ;;  %p14925_p3 = por %p14924_p0, %p14923_p12 }
  0xd2   : > { %p14926_p6 = pnand %p14925_p3, %p14919_p8 }
  0xd4   : > { %14929 = shalt.err (!%p14926_p6)
}
  0xd5   : > { %s14930_s29 = scalar_lea.vmem %s15328_s21, 1152  ;;  %s15010_s16 = smov [#allocation9]  }
  0xd6   : > { %p14931_p13 = scmp.ne.s32.totalorder %s15328_s21, %s14930_s29  ;;  %s14935_s17 = sshll.u32 %s15010_s16, 4  ;;  %s14936_s17 = int_to_ptr.vmem [resolvable:$false] %s14935_s17 }
  0xd7   : > { %s14937_s19 = scalar_lea.vmem %s14936_s17, 2304  ;;  %p14938_p5 = scmp.lt.s32.totalorder %s15328_s21, %s14936_s17 }
  0xd8   : > { %p14933_p11 = pnand %p14931_p13, %p16666_p2  ;;  %p14939_p9 = scmp.lt.s32.totalorder %s14937_s19, %s14930_s29 }
  0xda   : > { %p14934_p4 = pneg %p14933_p11  ;;  %p14940_p1 = por %p14939_p9, %p14938_p5 }
  0xdc   : > { %p14941_p7 = pnand %p14940_p1, %p14934_p4 }
  0xde   : > { %14944 = shalt.err (!%p14941_p7)
}
  0xdf   : > { %p16667_p8 = scmp.ne.s32.totalorder %s16656_s11, 0  ;;  %p16668_p2 = scmp.ne.s32.totalorder %s16650_s15, 0 }
  0xe0   : > { %p16669_p10 = scmp.eq.s32.totalorder (!%p16668_p2), %s15104_s10, 0 }
  0xe1   : > { %12786 = dma.hbm_to_vmem [thread:$0]  (!%p16667_p8), %s15326_s20, 1152, %s15328_s21, %s15182_s25, %s16665_s23, %s16665_s23, %s16664_s22  }
  0xe2   : > { %517 = sbr.rel (%p16668_p2) target bundleno = 4692 (0x1254), region = 64 }
  0xe9   : > { %14962 = dma.done.wait (%p16669_p10), [#allocation4], 1536   ;;  %p16670_p12 = pmov %p16669_p10 }
  0xea   : > { %p16671_p0 = pmov %p16669_p10 }
  0xeb   : > { %14964 = vsyncadd (%p16670_p12), [#allocation4], 4294965760 }
  0xec   : > { %14966 = dma.done.wait (%p16671_p0), [#allocation6], 32   ;;  %p16672_p3 = pmov %p16671_p0 }
  0xed   : > { %s16673_s0 = sld [smem:[#allocation20_spill]]  ;;  %s527_s11 = sand.u32 1, %s15104_s10  }
  0xee   : > { %14968 = vsyncadd (%p16672_p3), [#allocation6], 4294967264  ;;  %s529_s25 = sand.u32 1, %s14987_s28   ;;  %s528_s15 = scalar_lea.sflag [#allocation4], %s527_s11 }
  0xef   : > { %s12732_s22 = smul.u32 6912, %s529_s25 }
  0xf1   : > { %s15367_s23 = scalar_lea.vmem [#allocation7], %s12732_s22 }
  0xf3   : > { %p16674_p6 = scmp.ne.s32.totalorder %s16673_s0, 0 }
  0xf5   : > { %14970 = dma.done.wait (%p16674_p6), %s528_s15, 112032  }
  0xf6   : > { %14972 = vsyncadd (%p16674_p6), %s528_s15, 4294855264  ;;  %s12733_s14 = smul.u32 18, %s529_s25  ;;  %p16675_p13 = pmov %p16671_p0 }
  0xf7   : > { %s12734_s27 = smul.u32 72, %s529_s25 }
  0xf8   : > { %s15373_s13 = scalar_lea.vmem [#allocation8], %s12733_s14 }
  0xf9   : > { %s15375_s21 = scalar_lea.vmem [#allocation9], %s12734_s27 }
  0xfa   : > { %14974 = dma.done.wait (%p16675_p13), [#allocation6], 36864   ;;  %p16676_p11 = pmov %p16671_p0 }
  0xfb   : > { %p16677_p4 = pmov %p16671_p0 }
  0xfc   : > { %14976 = vsyncadd (%p16676_p11), [#allocation6], 4294930432 }
  0xfd   : > { %14978 = dma.done.wait (%p16677_p4), [#allocation12], 192   ;;  %p16678_p5 = pmov %p16671_p0 }
  0xfe   : > { %v12845_v1 = vld [vmem:[%s15367_s23 + $0x4] ss:$24 sps:$4 sm:$0xff]   ;;  %v12847_v2 = vld [vmem:[%s15367_s23] ss:$24 sps:$4 sm:$0xff]   ;;  %v12850_v4 = vld [vmem:[%s15367_s23 + $0x34] ss:$24 sps:$4 sm:$0xff]  }
  0xff   : > { %14980 = vsyncadd (%p16678_p5), [#allocation12], 4294967104  ;;  %2399 = vmatprep.subr.bf16.mxu0 %v12845_v1  ;;  %v12848_v3 = vld [vmem:[%s15367_s23 + $0xc] ss:$24 sps:$4 sm:$0xff]   ;;  %v12852_v5 = vld [vmem:[%s15367_s23 + $0x8] ss:$24 sps:$4 sm:$0xff]  }
 0x100   : > { %2400 = vmatpush1.bf16.msra.mxu0 %v12847_v2  ;;  %v12853_v6 = vld [vmem:[%s15367_s23 + $0x30] ss:$24 sps:$4 sm:$0xff]   ;;  %2528 = vmatprep.subr.bf16.mxu1 %v12848_v3  ;;  %v12854_v7 = vld [vmem:[%s15367_s23 + $0x3c] ss:$24 sps:$4 sm:$0xff]   ;;  %v12859_v10 = vld [vmem:[%s15367_s23 + $0x60] ss:$24 sps:$4 sm:$0xff]  }
 0x101   : > { %2401 = vmatprep.subr.bf16.mxu0 %v12850_v4  ;;  %2529 = vmatpush1.bf16.msra.mxu1 %v12852_v5  ;;  %v12856_v8 = vld [vmem:[%s15367_s23 + $0x64] ss:$24 sps:$4 sm:$0xff]   ;;  %v12858_v9 = vld [vmem:[%s15367_s23 + $0x38] ss:$24 sps:$4 sm:$0xff]   ;;  %v12862_v12 = vld [vmem:[%s15367_s23 + $0x94] ss:$24 sps:$4 sm:$0xff]  }
 0x102   : > { %2530 = vmatprep.subr.bf16.mxu1 %v12854_v7  ;;  %v12860_v11 = vld [vmem:[%s15367_s23 + $0x6c] ss:$24 sps:$4 sm:$0xff]   ;;  %v12864_v13 = vld [vmem:[%s15367_s23 + $0x68] ss:$24 sps:$4 sm:$0xff]   ;;  %v12866_v14 = vld [vmem:[%s15367_s23 + $0x9c] ss:$24 sps:$4 sm:$0xff]  }
 0x103   : > { %v12865_v15 = vld [vmem:[%s15367_s23 + $0x90] ss:$24 sps:$4 sm:$0xff]   ;;  %v12868_v16 = vld [vmem:[%s15367_s23 + $0xc4] ss:$24 sps:$4 sm:$0xff]   ;;  %v12871_v19 = vld [vmem:[%s15367_s23 + $0xc0] ss:$24 sps:$4 sm:$0xff]  }
 0x104   : > { %2402 = vmatpush1.bf16.msra.mxu0 %v12853_v6  ;;  %v12870_v17 = vld [vmem:[%s15367_s23 + $0x98] ss:$24 sps:$4 sm:$0xff]   ;;  %v12872_v18 = vld [vmem:[%s15367_s23 + $0xcc] ss:$24 sps:$4 sm:$0xff]   ;;  %v12876_v21 = vld [vmem:[%s15367_s23 + $0xc8] ss:$24 sps:$4 sm:$0xff]  }
 0x105   : > { %2403 = vmatprep.subr.bf16.mxu0 %v12856_v8  ;;  %2531 = vmatpush1.bf16.msra.mxu1 %v12858_v9  ;;  %v12874_v20 = vld [vmem:[%s15367_s23 + $0xf4] ss:$24 sps:$4 sm:$0xff]   ;;  %v12877_v23 = vld [vmem:[%s15367_s23 + $0xf0] ss:$24 sps:$4 sm:$0xff]   ;;  %v12880_v24 = vld [vmem:[%s15367_s23 + $0x124] ss:$24 sps:$4 sm:$0xff]  }
 0x106   : > { %2532 = vmatprep.subr.bf16.mxu1 %v12860_v11  ;;  %v12878_v22 = vld [vmem:[%s15367_s23 + $0xfc] ss:$24 sps:$4 sm:$0xff]   ;;  %v12882_v25 = vld [vmem:[%s15367_s23 + $0xf8] ss:$24 sps:$4 sm:$0xff]   ;;  %v12884_v26 = vld [vmem:[%s15367_s23 + $0x12c] ss:$24 sps:$4 sm:$0xff]  }
 0x107   : > { %v12883_v27 = vld [vmem:[%s15367_s23 + $0x120] ss:$24 sps:$4 sm:$0xff]   ;;  %v12886_v28 = vld [vmem:[%s15367_s23 + $0x154] ss:$24 sps:$4 sm:$0xff]   ;;  %v12889_v31 = vld [vmem:[%s15367_s23 + $0x150] ss:$24 sps:$4 sm:$0xff]  }
 0x108   : > { %2404 = vmatpush1.bf16.msra.mxu0 %v12859_v10  ;;  %v12888_v29 = vld [vmem:[%s15367_s23 + $0x128] ss:$24 sps:$4 sm:$0xff]   ;;  %v12890_v30 = vld [vmem:[%s15367_s23 + $0x15c] ss:$24 sps:$4 sm:$0xff]   ;;  %v12894_v33 = vld [vmem:[%s15367_s23 + $0x158] ss:$24 sps:$4 sm:$0xff]  }
 0x109   : > { %2405 = vmatprep.subr.bf16.mxu0 %v12862_v12  ;;  %2533 = vmatpush1.bf16.msra.mxu1 %v12864_v13  ;;  %v12892_v32 = vld [vmem:[%s15367_s23 + $0x184] ss:$24 sps:$4 sm:$0xff]   ;;  %v12895_v35 = vld [vmem:[%s15367_s23 + $0x180] ss:$24 sps:$4 sm:$0xff]   ;;  %v12898_v36 = vld [vmem:[%s15367_s23 + $0x1b4] ss:$24 sps:$4 sm:$0xff]  }
 0x10a   : > { %2534 = vmatprep.subr.bf16.mxu1 %v12866_v14  ;;  %v12896_v34 = vld [vmem:[%s15367_s23 + $0x18c] ss:$24 sps:$4 sm:$0xff]   ;;  %v12900_v37 = vld [vmem:[%s15367_s23 + $0x188] ss:$24 sps:$4 sm:$0xff]   ;;  %v12902_v38 = vld [vmem:[%s15367_s23 + $0x1bc] ss:$24 sps:$4 sm:$0xff]  }
 0x10b   : > { %v12901_v39 = vld [vmem:[%s15367_s23 + $0x1b0] ss:$24 sps:$4 sm:$0xff]   ;;  %v12904_v40 = vld [vmem:[%s15367_s23 + $0x1e4] ss:$24 sps:$4 sm:$0xff]   ;;  %v12907_v43 = vld [vmem:[%s15367_s23 + $0x1e0] ss:$24 sps:$4 sm:$0xff]  }
 0x10c   : > { %2406 = vmatpush1.bf16.msra.mxu0 %v12865_v15  ;;  %v12906_v41 = vld [vmem:[%s15367_s23 + $0x1b8] ss:$24 sps:$4 sm:$0xff]   ;;  %v12908_v42 = vld [vmem:[%s15367_s23 + $0x1ec] ss:$24 sps:$4 sm:$0xff]   ;;  %v12912_v45 = vld [vmem:[%s15367_s23 + $0x1e8] ss:$24 sps:$4 sm:$0xff]  }
 0x10d   : > { %2407 = vmatprep.subr.bf16.mxu0 %v12868_v16  ;;  %2535 = vmatpush1.bf16.msra.mxu1 %v12870_v17  ;;  %v12910_v44 = vld [vmem:[%s15367_s23 + $0x214] ss:$24 sps:$4 sm:$0xff]   ;;  %v12913_v49 = vld [vmem:[%s15367_s23 + $0x210] ss:$24 sps:$4 sm:$0xff]   ;;  %v12916_v51 = vld [vmem:[%s15367_s23 + $0x244] ss:$24 sps:$4 sm:$0xff]  }
 0x10e   : > { %2536 = vmatprep.subr.bf16.mxu1 %v12872_v18  ;;  %v12914_v46 = vld [vmem:[%s15367_s23 + $0x21c] ss:$24 sps:$4 sm:$0xff]   ;;  %v652_v47 = vld [vmem:[#allocation3 + $0x8] sm:$0xff]  ;;  %v12918_v52 = vld [vmem:[%s15367_s23 + $0x218] ss:$24 sps:$4 sm:$0xff]   ;;  %vm2868_vm0 = vcmask 1041409  }
 0x10f   : > { %v658_v48 = vld [vmem:[#allocation3 + $0x38] sm:$0xff]  ;;  %v12920_v53 = vld [vmem:[%s15367_s23 + $0x24c] ss:$24 sps:$4 sm:$0xff]   ;;  %v12924_v56 = vld [vmem:[%s15367_s23 + $0x248] ss:$24 sps:$4 sm:$0xff]   ;;  %vm2872_vm2 = vcmask 58368  }
 0x110   : > { %2408 = vmatpush1.bf16.msra.mxu0 %v12871_v19  ;;  %v15432_v50 = vpack.c.bf16 %v658_v48, %v652_v47  ;;  %v12919_v54 = vld [vmem:[%s15367_s23 + $0x240] ss:$24 sps:$4 sm:$0xff]   ;;  %v12922_v55 = vld [vmem:[%s15367_s23 + $0x274] ss:$24 sps:$4 sm:$0xff]   ;;  %v12925_v58 = vld [vmem:[%s15367_s23 + $0x270] ss:$24 sps:$4 sm:$0xff]  }
 0x111   : > { %2409 = vmatprep.subr.bf16.mxu0 %v12874_v20  ;;  %2537 = vmatpush1.bf16.msra.mxu1 %v12876_v21  ;;  %v12926_v57 = vld [vmem:[%s15367_s23 + $0x27c] ss:$24 sps:$4 sm:$0xff]   ;;  %v12930_v60 = vld [vmem:[%s15367_s23 + $0x278] ss:$24 sps:$4 sm:$0xff]   ;;  %v12932_v61 = vld [vmem:[%s15367_s23 + $0x2ac] ss:$24 sps:$4 sm:$0xff]  }
 0x112   : > { %2538 = vmatprep.subr.bf16.mxu1 %v12878_v22  ;;  %2431 = vmatprep.mubr.bf16.mxu0 %v15432_v50  ;;  %v12928_v59 = vld [vmem:[%s15367_s23 + $0x2a4] ss:$24 sps:$4 sm:$0xff]   ;;  %v12931_v62 = vld [vmem:[%s15367_s23 + $0x2a0] ss:$24 sps:$4 sm:$0xff]   ;;  %v12934_v63 = vld [vmem:[%s15367_s23 + $0x2d4] ss:$24 sps:$4 sm:$0xff]  }
 0x113   : > { %2560 = vmatprep.mubr.bf16.mxu1 %v15432_v50  ;;  %v12936_v0 = vld [vmem:[%s15367_s23 + $0x2a8] ss:$24 sps:$4 sm:$0xff]   ;;  %v12938_v2 = vld [vmem:[%s15367_s23 + $0x2dc] ss:$24 sps:$4 sm:$0xff]   ;;  %v12943_v6 = vld [vmem:[%s15367_s23 + $0x2d8] ss:$24 sps:$4 sm:$0xff]  }
 0x114   : > { %2410 = vmatpush1.bf16.msra.mxu0 %v12877_v23  ;;  %v12937_v1 = vld [vmem:[%s15367_s23 + $0x2d0] ss:$24 sps:$4 sm:$0xff]   ;;  %v651_v3 = vld [vmem:[#allocation3] sm:$0xff]  ;;  %v12949_v10 = vld [vmem:[%s15367_s23 + $0x334] ss:$24 sps:$4 sm:$0xff]   ;;  %s630_s12 = smul.u32 3, %s15104_s10 }
 0x115   : > { %2411 = vmatprep.subr.bf16.mxu0 %v12880_v24  ;;  %2539 = vmatpush1.bf16.msra.mxu1 %v12882_v25  ;;  %v657_v4 = vld [vmem:[#allocation3 + $0x30] sm:$0xff]  ;;  %v12942_v5 = vld [vmem:[%s15367_s23 + $0x304] ss:$24 sps:$4 sm:$0xff]   ;;  %v12940_v9 = vld [vmem:[%s15367_s23 + $0x300] ss:$24 sps:$4 sm:$0xff]   ;;  %s16679_s6 = sld [smem:[#allocation28_spill]] }
 0x116   : > { %2540 = vmatprep.subr.bf16.mxu1 %v12884_v26  ;;  %v15454_v7 = vpack.c.bf16 %v657_v4, %v651_v3  ;;  %v12946_v8 = vld [vmem:[%s15367_s23 + $0x30c] ss:$24 sps:$4 sm:$0xff]   ;;  %v12944_v11 = vld [vmem:[%s15367_s23 + $0x308] ss:$24 sps:$4 sm:$0xff]   ;;  %v12952_v12 = vld [vmem:[%s15367_s23 + $0x33c] ss:$24 sps:$4 sm:$0xff]  }
 0x117   : > { %v12947_v13 = vld [vmem:[%s15367_s23 + $0x330] ss:$24 sps:$4 sm:$0xff]   ;;  %v12955_v14 = vld [vmem:[%s15367_s23 + $0x364] ss:$24 sps:$4 sm:$0xff]   ;;  %v12953_v17 = vld [vmem:[%s15367_s23 + $0x360] ss:$24 sps:$4 sm:$0xff]  }
 0x118   : > { %2412 = vmatpush1.bf16.msra.mxu0 %v12883_v27  ;;  %v12950_v15 = vld [vmem:[%s15367_s23 + $0x338] ss:$24 sps:$4 sm:$0xff]   ;;  %v12958_v16 = vld [vmem:[%s15367_s23 + $0x36c] ss:$24 sps:$4 sm:$0xff]   ;;  %v12956_v19 = vld [vmem:[%s15367_s23 + $0x368] ss:$24 sps:$4 sm:$0xff]  }
 0x119   : > { %2413 = vmatprep.subr.bf16.mxu0 %v12886_v28  ;;  %2541 = vmatpush1.bf16.msra.mxu1 %v12888_v29  ;;  %v12961_v18 = vld [vmem:[%s15367_s23 + $0x394] ss:$24 sps:$4 sm:$0xff]   ;;  %v12959_v21 = vld [vmem:[%s15367_s23 + $0x390] ss:$24 sps:$4 sm:$0xff]   ;;  %v12967_v22 = vld [vmem:[%s15367_s23 + $0x3c4] ss:$24 sps:$4 sm:$0xff]  }
 0x11a   : > { %2542 = vmatprep.subr.bf16.mxu1 %v12890_v30  ;;  %v12964_v20 = vld [vmem:[%s15367_s23 + $0x39c] ss:$24 sps:$4 sm:$0xff]   ;;  %v12962_v23 = vld [vmem:[%s15367_s23 + $0x398] ss:$24 sps:$4 sm:$0xff]   ;;  %v12970_v24 = vld [vmem:[%s15367_s23 + $0x3cc] ss:$24 sps:$4 sm:$0xff]  }
 0x11b   : > { %v12965_v25 = vld [vmem:[%s15367_s23 + $0x3c0] ss:$24 sps:$4 sm:$0xff]   ;;  %v12973_v26 = vld [vmem:[%s15367_s23 + $0x3f4] ss:$24 sps:$4 sm:$0xff]   ;;  %v12971_v29 = vld [vmem:[%s15367_s23 + $0x3f0] ss:$24 sps:$4 sm:$0xff]  }
 0x11c   : > { %2414 = vmatpush1.bf16.msra.mxu0 %v12889_v31  ;;  %v12968_v27 = vld [vmem:[%s15367_s23 + $0x3c8] ss:$24 sps:$4 sm:$0xff]   ;;  %v12976_v28 = vld [vmem:[%s15367_s23 + $0x3fc] ss:$24 sps:$4 sm:$0xff]   ;;  %v12974_v31 = vld [vmem:[%s15367_s23 + $0x3f8] ss:$24 sps:$4 sm:$0xff]  }
 0x11d   : > { %2415 = vmatprep.subr.bf16.mxu0 %v12892_v32  ;;  %2543 = vmatpush1.bf16.msra.mxu1 %v12894_v33  ;;  %v12979_v30 = vld [vmem:[%s15367_s23 + $0x424] ss:$24 sps:$4 sm:$0xff]   ;;  %v12977_v32 = vld [vmem:[%s15367_s23 + $0x420] ss:$24 sps:$4 sm:$0xff]   ;;  %v12995_v48 = vld [vmem:[%s15367_s23 + $0x4b0] ss:$24 sps:$4 sm:$0xff]  }
 0x11e   : > { %2544 = vmatprep.subr.bf16.mxu1 %v12896_v34  ;;  %v12982_v33 = vld [vmem:[%s15367_s23 + $0x42c] ss:$24 sps:$4 sm:$0xff]   ;;  %v654_v34 = vld [vmem:[#allocation3 + $0x18] sm:$0xff]  ;;  %p631_p9 = scmp.lt.s32.totalorder %s630_s12, 17  ;;  %s16680_s2 = sld [smem:[#allocation25_spill]]  ;;  %vm3235_vm3 = vcmask 25600  }
 0x11f   : > { %v13000_v47 = vld [vmem:[%s15367_s23 + $0x4bc] ss:$24 sps:$4 sm:$0xff]   ;;  %v13022_v3 = vld [vmem:[%s15367_s23 + $0x578] ss:$24 sps:$4 sm:$0xff]   ;;  %v13030_v4 = vld [vmem:[%s15367_s23 + $0x5ac] ss:$24 sps:$4 sm:$0xff]  }
 0x120   : > { %2416 = vmatpush1.bf16.msra.mxu0 %v12895_v35  ;;  %v660_v35 = vld [vmem:[#allocation3 + $0x48] sm:$0xff]  ;;  %s16690_s12 = smov (!%p631_p9, %s630_s12), 17  ;;  %s16681_s19 = sld [smem:[#allocation27_spill]]  ;;  %vm10588_vm4 = vcmask 1041408   ;;  %vm10610_vm5 = vcmask 1024  }
 0x121   : > { %2417 = vmatprep.subr.bf16.mxu0 %v12898_v36  ;;  %2545 = vmatpush1.bf16.msra.mxu1 %v12900_v37  ;;  %v12985_v36 = vld [vmem:[%s15367_s23 + $0x454] ss:$24 sps:$4 sm:$0xff]   ;;  %v15485_v37 = vpack.c.bf16 %v660_v35, %v654_v34  ;;  %v13058_v34 = vld [vmem:[%s15367_s23 + $0x698] ss:$24 sps:$4 sm:$0xff]   ;;  %s10858_s26 = sshll.u32 %s16690_s12, 1  ;;  %s16682_s22 = sld [smem:[#allocation26_spill]] }
 0x122   : > { %2546 = vmatprep.subr.bf16.mxu1 %v12902_v38  ;;  %v12980_v38 = vld [vmem:[%s15367_s23 + $0x428] ss:$24 sps:$4 sm:$0xff]   ;;  %v13066_v35 = vld [vmem:[%s15367_s23 + $0x6cc] ss:$24 sps:$4 sm:$0xff]   ;;  %s15756_s30 = scalar_lea.vmem %s16679_s6, %s10858_s26  ;;  %p647_p1 = scmp.lt.s32.totalorder %s15104_s10, 5 }
 0x124   : > { %2418 = vmatpush1.bf16.msra.mxu0 %v12901_v39  ;;  %v12988_v39 = vld [vmem:[%s15367_s23 + $0x45c] ss:$24 sps:$4 sm:$0xff]   ;;  %s16000_s29 = scalar_lea.vmem %s16680_s2, %s16690_s12  ;;  %s16692_s10 = smov (!%p647_p1, %s15104_s10), 5 }
 0x125   : > { %2419 = vmatprep.subr.bf16.mxu0 %v12904_v40  ;;  %2547 = vmatpush1.bf16.msra.mxu1 %v12906_v41  ;;  %v12983_v40 = vld [vmem:[%s15367_s23 + $0x450] ss:$24 sps:$4 sm:$0xff]   ;;  %v12991_v41 = vld [vmem:[%s15367_s23 + $0x484] ss:$24 sps:$4 sm:$0xff]   ;;  %s10860_s14 = sshll.u32 %s16692_s10, 1 }
 0x126   : > { %2548 = vmatprep.subr.bf16.mxu1 %v12908_v42  ;;  %v12986_v42 = vld [vmem:[%s15367_s23 + $0x458] ss:$24 sps:$4 sm:$0xff]   ;;  %s16012_s0 = scalar_lea.vmem %s16681_s19, %s10858_s26 }
 0x128   : > { %2420 = vmatpush1.bf16.msra.mxu0 %v12907_v43  ;;  %v12994_v43 = vld [vmem:[%s15367_s23 + $0x48c] ss:$24 sps:$4 sm:$0xff]  }
 0x129   : > { %2421 = vmatprep.subr.bf16.mxu0 %v12910_v44  ;;  %2549 = vmatpush1.bf16.msra.mxu1 %v12912_v45  ;;  %v12989_v44 = vld [vmem:[%s15367_s23 + $0x480] ss:$24 sps:$4 sm:$0xff]   ;;  %v12997_v45 = vld [vmem:[%s15367_s23 + $0x4b4] ss:$24 sps:$4 sm:$0xff]  }
 0x12a   : > { %2550 = vmatprep.subr.bf16.mxu1 %v12914_v46  ;;  %v12992_v46 = vld [vmem:[%s15367_s23 + $0x488] ss:$24 sps:$4 sm:$0xff]  }
 0x12c   : > { %2422 = vmatpush1.bf16.msra.mxu0 %v12913_v49  ;;  %v13003_v49 = vld [vmem:[%s15367_s23 + $0x4e4] ss:$24 sps:$4 sm:$0xff]  }
 0x12d   : > { %2423 = vmatprep.subr.bf16.mxu0 %v12916_v51  ;;  %2551 = vmatpush1.bf16.msra.mxu1 %v12918_v52  ;;  %v12998_v51 = vld [vmem:[%s15367_s23 + $0x4b8] ss:$24 sps:$4 sm:$0xff]   ;;  %v13006_v52 = vld [vmem:[%s15367_s23 + $0x4ec] ss:$24 sps:$4 sm:$0xff]  }
 0x12e   : > { %2552 = vmatprep.subr.bf16.mxu1 %v12920_v53  ;;  %v13001_v53 = vld [vmem:[%s15367_s23 + $0x4e0] ss:$24 sps:$4 sm:$0xff]  }
 0x130   : > { %2424 = vmatpush1.bf16.msra.mxu0 %v12919_v54  ;;  %v13009_v54 = vld [vmem:[%s15367_s23 + $0x514] ss:$24 sps:$4 sm:$0xff]  }
 0x131   : > { %2425 = vmatprep.subr.bf16.mxu0 %v12922_v55  ;;  %2553 = vmatpush1.bf16.msra.mxu1 %v12924_v56  ;;  %v13004_v55 = vld [vmem:[%s15367_s23 + $0x4e8] ss:$24 sps:$4 sm:$0xff]   ;;  %v13012_v56 = vld [vmem:[%s15367_s23 + $0x51c] ss:$24 sps:$4 sm:$0xff]  }
 0x132   : > { %2554 = vmatprep.subr.bf16.mxu1 %v12926_v57  ;;  %v13007_v57 = vld [vmem:[%s15367_s23 + $0x510] ss:$24 sps:$4 sm:$0xff]  }
 0x134   : > { %2426 = vmatpush1.bf16.msra.mxu0 %v12925_v58  ;;  %v13015_v58 = vld [vmem:[%s15367_s23 + $0x544] ss:$24 sps:$4 sm:$0xff]  }
 0x135   : > { %2427 = vmatprep.subr.bf16.mxu0 %v12928_v59  ;;  %2555 = vmatpush1.bf16.msra.mxu1 %v12930_v60  ;;  %v13010_v59 = vld [vmem:[%s15367_s23 + $0x518] ss:$24 sps:$4 sm:$0xff]   ;;  %v13018_v60 = vld [vmem:[%s15367_s23 + $0x54c] ss:$24 sps:$4 sm:$0xff]  }
 0x136   : > { %2556 = vmatprep.subr.bf16.mxu1 %v12932_v61  ;;  %v13013_v61 = vld [vmem:[%s15367_s23 + $0x540] ss:$24 sps:$4 sm:$0xff]  }
 0x138   : > { %2428 = vmatpush1.bf16.msra.mxu0 %v12931_v62  ;;  %v13021_v62 = vld [vmem:[%s15367_s23 + $0x574] ss:$24 sps:$4 sm:$0xff]  }
 0x139   : > { %2429 = vmatprep.subr.bf16.mxu0 %v12934_v63  ;;  %2557 = vmatpush1.bf16.msra.mxu1 %v12936_v0  ;;  %v13016_v63 = vld [vmem:[%s15367_s23 + $0x548] ss:$24 sps:$4 sm:$0xff]   ;;  %v13024_v0 = vld [vmem:[%s15367_s23 + $0x57c] ss:$24 sps:$4 sm:$0xff]  }
 0x13a   : > { %2558 = vmatprep.subr.bf16.mxu1 %v12938_v2  ;;  %v13027_v2 = vld [vmem:[%s15367_s23 + $0x5a4] ss:$24 sps:$4 sm:$0xff]  }
 0x13c   : > { %2430 = vmatpush1.bf16.msra.mxu0 %v12937_v1  ;;  %v13019_v1 = vld [vmem:[%s15367_s23 + $0x570] ss:$24 sps:$4 sm:$0xff]  }
 0x13d   : > { %2442 = vmatprep.subr.bf16.mxu0 %v12942_v5  ;;  %2559 = vmatpush1.bf16.msra.mxu1 %v12943_v6  ;;  %v13025_v5 = vld [vmem:[%s15367_s23 + $0x5a0] ss:$24 sps:$4 sm:$0xff]   ;;  %v13033_v6 = vld [vmem:[%s15367_s23 + $0x5d4] ss:$24 sps:$4 sm:$0xff]  }
 0x13e   : > { %2571 = vmatprep.subr.bf16.mxu1 %v12946_v8  ;;  %v13028_v8 = vld [vmem:[%s15367_s23 + $0x5a8] ss:$24 sps:$4 sm:$0xff]  }
 0x13f   : > { %2432 = vmatmul.mubr.bf16.vlgmr.msra.gmra.mrb[0].mxu0 %v15454_v7 }
 0x140   : > { %2443 = vmatpush1.bf16.msra.mxu0 %v12940_v9  ;;  %2561 = vmatmul.mubr.bf16.vlgmr.msra.gmra.mrb[0].mxu1 %v15454_v7  ;;  %v13031_v9 = vld [vmem:[%s15367_s23 + $0x5d0] ss:$24 sps:$4 sm:$0xff]  }
 0x141   : > { %2444 = vmatprep.subr.bf16.mxu0 %v12949_v10  ;;  %2572 = vmatpush1.bf16.msra.mxu1 %v12944_v11  ;;  %v13036_v10 = vld [vmem:[%s15367_s23 + $0x5dc] ss:$24 sps:$4 sm:$0xff]  }
 0x142   : > { %2573 = vmatprep.subr.bf16.mxu1 %v12952_v12  ;;  %2474 = vmatprep.mubr.bf16.mxu0 %v15485_v37  ;;  %v653_v11 = vld [vmem:[#allocation3 + $0x10] sm:$0xff]  ;;  %v659_v12 = vld [vmem:[#allocation3 + $0x40] sm:$0xff] }
 0x143   : > { %2603 = vmatprep.mubr.bf16.mxu1 %v15485_v37 }
 0x144   : > { %2445 = vmatpush1.bf16.msra.mxu0 %v12947_v13  ;;  %v13039_v13 = vld [vmem:[%s15367_s23 + $0x604] ss:$24 sps:$4 sm:$0xff]  }
 0x145   : > { %2446 = vmatprep.subr.bf16.mxu0 %v12955_v14  ;;  %2574 = vmatpush1.bf16.msra.mxu1 %v12950_v15  ;;  %v13034_v14 = vld [vmem:[%s15367_s23 + $0x5d8] ss:$24 sps:$4 sm:$0xff]   ;;  %v15526_v15 = vpack.c.bf16 %v659_v12, %v653_v11 }
 0x146   : > { %2575 = vmatprep.subr.bf16.mxu1 %v12958_v16  ;;  %v13042_v16 = vld [vmem:[%s15367_s23 + $0x60c] ss:$24 sps:$4 sm:$0xff]   ;;  %v13115_v11 = vld [vmem:[%s15367_s23 + $0x870] ss:$24 sps:$4 sm:$0xff]  }
 0x147   : > { %v13118_v12 = vld [vmem:[%s15367_s23 + $0x878] ss:$24 sps:$4 sm:$0xff]  }
 0x148   : > { %2447 = vmatpush1.bf16.msra.mxu0 %v12953_v17  ;;  %v13037_v17 = vld [vmem:[%s15367_s23 + $0x600] ss:$24 sps:$4 sm:$0xff]  }
 0x149   : > { %2448 = vmatprep.subr.bf16.mxu0 %v12961_v18  ;;  %2576 = vmatpush1.bf16.msra.mxu1 %v12956_v19  ;;  %v13045_v18 = vld [vmem:[%s15367_s23 + $0x634] ss:$24 sps:$4 sm:$0xff]   ;;  %v13040_v19 = vld [vmem:[%s15367_s23 + $0x608] ss:$24 sps:$4 sm:$0xff]  }
 0x14a   : > { %2577 = vmatprep.subr.bf16.mxu1 %v12964_v20  ;;  %v656_v20 = vld [vmem:[#allocation3 + $0x28] sm:$0xff] }
 0x14c   : > { %2449 = vmatpush1.bf16.msra.mxu0 %v12959_v21  ;;  %v662_v21 = vld [vmem:[#allocation3 + $0x58] sm:$0xff] }
 0x14d   : > { %2450 = vmatprep.subr.bf16.mxu0 %v12967_v22  ;;  %2578 = vmatpush1.bf16.msra.mxu1 %v12962_v23  ;;  %v13048_v22 = vld [vmem:[%s15367_s23 + $0x63c] ss:$24 sps:$4 sm:$0xff]   ;;  %v15534_v23 = vpack.c.bf16 %v662_v21, %v656_v20  ;;  %v13127_v20 = vld [vmem:[%s15367_s23 + $0x8d0] ss:$24 sps:$4 sm:$0xff]  }
 0x14e   : > { %2579 = vmatprep.subr.bf16.mxu1 %v12970_v24  ;;  %v13043_v24 = vld [vmem:[%s15367_s23 + $0x630] ss:$24 sps:$4 sm:$0xff]   ;;  %v655_v21 = vld [vmem:[#allocation3 + $0x20] sm:$0xff] }
 0x150   : > { %2451 = vmatpush1.bf16.msra.mxu0 %v12965_v25  ;;  %v13051_v25 = vld [vmem:[%s15367_s23 + $0x664] ss:$24 sps:$4 sm:$0xff]  }
 0x151   : > { %2452 = vmatprep.subr.bf16.mxu0 %v12973_v26  ;;  %2580 = vmatpush1.bf16.msra.mxu1 %v12968_v27  ;;  %v13046_v26 = vld [vmem:[%s15367_s23 + $0x638] ss:$24 sps:$4 sm:$0xff]   ;;  %v13054_v27 = vld [vmem:[%s15367_s23 + $0x66c] ss:$24 sps:$4 sm:$0xff]  }
 0x152   : > { %2581 = vmatprep.subr.bf16.mxu1 %v12976_v28  ;;  %v13049_v28 = vld [vmem:[%s15367_s23 + $0x660] ss:$24 sps:$4 sm:$0xff]  }
 0x154   : > { %2453 = vmatpush1.bf16.msra.mxu0 %v12971_v29  ;;  %v13057_v29 = vld [vmem:[%s15367_s23 + $0x694] ss:$24 sps:$4 sm:$0xff]  }
 0x155   : > { %2454 = vmatprep.subr.bf16.mxu0 %v12979_v30  ;;  %2582 = vmatpush1.bf16.msra.mxu1 %v12974_v31  ;;  %v13052_v30 = vld [vmem:[%s15367_s23 + $0x668] ss:$24 sps:$4 sm:$0xff]   ;;  %v13060_v31 = vld [vmem:[%s15367_s23 + $0x69c] ss:$24 sps:$4 sm:$0xff]  }
 0x156   : > { %2583 = vmatprep.subr.bf16.mxu1 %v12982_v33  ;;  %v13063_v33 = vld [vmem:[%s15367_s23 + $0x6c4] ss:$24 sps:$4 sm:$0xff]  }
 0x158   : > { %2455 = vmatpush1.bf16.msra.mxu0 %v12977_v32  ;;  %v13055_v32 = vld [vmem:[%s15367_s23 + $0x690] ss:$24 sps:$4 sm:$0xff]  }
 0x159   : > { %2456 = vmatprep.subr.bf16.mxu0 %v12985_v36  ;;  %2584 = vmatpush1.bf16.msra.mxu1 %v12980_v38  ;;  %v13061_v36 = vld [vmem:[%s15367_s23 + $0x6c0] ss:$24 sps:$4 sm:$0xff]   ;;  %v13069_v38 = vld [vmem:[%s15367_s23 + $0x6f4] ss:$24 sps:$4 sm:$0xff]  }
 0x15a   : > { %2585 = vmatprep.subr.bf16.mxu1 %v12988_v39  ;;  %v13064_v39 = vld [vmem:[%s15367_s23 + $0x6c8] ss:$24 sps:$4 sm:$0xff]  }
 0x15c   : > { %2457 = vmatpush1.bf16.msra.mxu0 %v12983_v40  ;;  %v13072_v40 = vld [vmem:[%s15367_s23 + $0x6fc] ss:$24 sps:$4 sm:$0xff]  }
 0x15d   : > { %2458 = vmatprep.subr.bf16.mxu0 %v12991_v41  ;;  %2586 = vmatpush1.bf16.msra.mxu1 %v12986_v42  ;;  %v13067_v41 = vld [vmem:[%s15367_s23 + $0x6f0] ss:$24 sps:$4 sm:$0xff]   ;;  %v13075_v42 = vld [vmem:[%s15367_s23 + $0x724] ss:$24 sps:$4 sm:$0xff]  }
 0x15e   : > { %2587 = vmatprep.subr.bf16.mxu1 %v12994_v43  ;;  %v13070_v43 = vld [vmem:[%s15367_s23 + $0x6f8] ss:$24 sps:$4 sm:$0xff]  }
 0x160   : > { %2459 = vmatpush1.bf16.msra.mxu0 %v12989_v44  ;;  %v13078_v44 = vld [vmem:[%s15367_s23 + $0x72c] ss:$24 sps:$4 sm:$0xff]  }
 0x161   : > { %2460 = vmatprep.subr.bf16.mxu0 %v12997_v45  ;;  %2588 = vmatpush1.bf16.msra.mxu1 %v12992_v46  ;;  %v13073_v45 = vld [vmem:[%s15367_s23 + $0x720] ss:$24 sps:$4 sm:$0xff]   ;;  %v13081_v46 = vld [vmem:[%s15367_s23 + $0x754] ss:$24 sps:$4 sm:$0xff]  }
 0x162   : > { %2589 = vmatprep.subr.bf16.mxu1 %v13000_v47  ;;  %v13076_v47 = vld [vmem:[%s15367_s23 + $0x728] ss:$24 sps:$4 sm:$0xff]  }
 0x164   : > { %2461 = vmatpush1.bf16.msra.mxu0 %v12995_v48  ;;  %v13084_v48 = vld [vmem:[%s15367_s23 + $0x75c] ss:$24 sps:$4 sm:$0xff]  }
 0x165   : > { %2462 = vmatprep.subr.bf16.mxu0 %v13003_v49  ;;  %2590 = vmatpush1.bf16.msra.mxu1 %v12998_v51  ;;  %v13079_v49 = vld [vmem:[%s15367_s23 + $0x750] ss:$24 sps:$4 sm:$0xff]   ;;  %v13087_v51 = vld [vmem:[%s15367_s23 + $0x784] ss:$24 sps:$4 sm:$0xff]  }
 0x166   : > { %2591 = vmatprep.subr.bf16.mxu1 %v13006_v52  ;;  %v13082_v52 = vld [vmem:[%s15367_s23 + $0x758] ss:$24 sps:$4 sm:$0xff]  }
 0x168   : > { %2463 = vmatpush1.bf16.msra.mxu0 %v13001_v53  ;;  %v13090_v53 = vld [vmem:[%s15367_s23 + $0x78c] ss:$24 sps:$4 sm:$0xff]  }
 0x169   : > { %2464 = vmatprep.subr.bf16.mxu0 %v13009_v54  ;;  %2592 = vmatpush1.bf16.msra.mxu1 %v13004_v55  ;;  %v13085_v54 = vld [vmem:[%s15367_s23 + $0x780] ss:$24 sps:$4 sm:$0xff]   ;;  %v13093_v55 = vld [vmem:[%s15367_s23 + $0x7b4] ss:$24 sps:$4 sm:$0xff]  }
 0x16a   : > { %2593 = vmatprep.subr.bf16.mxu1 %v13012_v56  ;;  %v13088_v56 = vld [vmem:[%s15367_s23 + $0x788] ss:$24 sps:$4 sm:$0xff]  }
 0x16c   : > { %2465 = vmatpush1.bf16.msra.mxu0 %v13007_v57  ;;  %v13096_v57 = vld [vmem:[%s15367_s23 + $0x7bc] ss:$24 sps:$4 sm:$0xff]  }
 0x16d   : > { %2466 = vmatprep.subr.bf16.mxu0 %v13015_v58  ;;  %2594 = vmatpush1.bf16.msra.mxu1 %v13010_v59  ;;  %v13091_v58 = vld [vmem:[%s15367_s23 + $0x7b0] ss:$24 sps:$4 sm:$0xff]   ;;  %v13099_v59 = vld [vmem:[%s15367_s23 + $0x7e4] ss:$24 sps:$4 sm:$0xff]  }
 0x16e   : > { %2595 = vmatprep.subr.bf16.mxu1 %v13018_v60  ;;  %v13094_v60 = vld [vmem:[%s15367_s23 + $0x7b8] ss:$24 sps:$4 sm:$0xff]  }
 0x170   : > { %2467 = vmatpush1.bf16.msra.mxu0 %v13013_v61  ;;  %v13097_v61 = vld [vmem:[%s15367_s23 + $0x7e0] ss:$24 sps:$4 sm:$0xff]  }
 0x171   : > { %2468 = vmatprep.subr.bf16.mxu0 %v13021_v62  ;;  %2596 = vmatpush1.bf16.msra.mxu1 %v13016_v63  ;;  %v13102_v62 = vld [vmem:[%s15367_s23 + $0x7ec] ss:$24 sps:$4 sm:$0xff]   ;;  %v13100_v63 = vld [vmem:[%s15367_s23 + $0x7e8] ss:$24 sps:$4 sm:$0xff]  }
 0x172   : > { %2597 = vmatprep.subr.bf16.mxu1 %v13024_v0  ;;  %v13105_v0 = vld [vmem:[%s15367_s23 + $0x814] ss:$24 sps:$4 sm:$0xff]  }
 0x174   : > { %2469 = vmatpush1.bf16.msra.mxu0 %v13019_v1  ;;  %v13108_v1 = vld [vmem:[%s15367_s23 + $0x81c] ss:$24 sps:$4 sm:$0xff]  }
 0x175   : > { %2470 = vmatprep.subr.bf16.mxu0 %v13027_v2  ;;  %2598 = vmatpush1.bf16.msra.mxu1 %v13022_v3  ;;  %v13103_v2 = vld [vmem:[%s15367_s23 + $0x810] ss:$24 sps:$4 sm:$0xff]  }
 0x176   : > { %2599 = vmatprep.subr.bf16.mxu1 %v13030_v4  ;;  %v13106_v3 = vld [vmem:[%s15367_s23 + $0x818] ss:$24 sps:$4 sm:$0xff]   ;;  %v13111_v4 = vld [vmem:[%s15367_s23 + $0x844] ss:$24 sps:$4 sm:$0xff]  }
 0x178   : > { %2471 = vmatpush1.bf16.msra.mxu0 %v13025_v5  ;;  %v13114_v5 = vld [vmem:[%s15367_s23 + $0x84c] ss:$24 sps:$4 sm:$0xff]  }
 0x179   : > { %2472 = vmatprep.subr.bf16.mxu0 %v13033_v6  ;;  %2600 = vmatpush1.bf16.msra.mxu1 %v13028_v8  ;;  %v13109_v6 = vld [vmem:[%s15367_s23 + $0x840] ss:$24 sps:$4 sm:$0xff]  }
 0x17a   : > { %2601 = vmatprep.subr.bf16.mxu1 %v13036_v10  ;;  %v13112_v8 = vld [vmem:[%s15367_s23 + $0x848] ss:$24 sps:$4 sm:$0xff]   ;;  %v13120_v10 = vld [vmem:[%s15367_s23 + $0x87c] ss:$24 sps:$4 sm:$0xff]  }
 0x17c   : > { %2473 = vmatpush1.bf16.msra.mxu0 %v13031_v9  ;;  %v13117_v9 = vld [vmem:[%s15367_s23 + $0x874] ss:$24 sps:$4 sm:$0xff]  }
 0x17d   : > { %2485 = vmatprep.subr.bf16.mxu0 %v13039_v13  ;;  %2602 = vmatpush1.bf16.msra.mxu1 %v13034_v14  ;;  %v13123_v13 = vld [vmem:[%s15367_s23 + $0x8a4] ss:$24 sps:$4 sm:$0xff]  }
 0x17e   : > { %2614 = vmatprep.subr.bf16.mxu1 %v13042_v16  ;;  %v13126_v14 = vld [vmem:[%s15367_s23 + $0x8ac] ss:$24 sps:$4 sm:$0xff]   ;;  %v13121_v16 = vld [vmem:[%s15367_s23 + $0x8a0] ss:$24 sps:$4 sm:$0xff]  }
 0x17f   : > { %2475 = vmatmul.mubr.bf16.vlgmr.msra.gmra.mrb[0].mxu0 %v15526_v15 }
 0x180   : > { %2486 = vmatpush1.bf16.msra.mxu0 %v13037_v17  ;;  %2604 = vmatmul.mubr.bf16.vlgmr.msra.gmra.mrb[0].mxu1 %v15526_v15  ;;  %v13124_v17 = vld [vmem:[%s15367_s23 + $0x8a8] ss:$24 sps:$4 sm:$0xff]  }
 0x181   : > { %2487 = vmatprep.subr.bf16.mxu0 %v13045_v18  ;;  %2615 = vmatpush1.bf16.msra.mxu1 %v13040_v19  ;;  %v13129_v18 = vld [vmem:[%s15367_s23 + $0x8d4] ss:$24 sps:$4 sm:$0xff]  }
 0x182   : > { %2517 = vmatprep.mubr.bf16.mxu0 %v15534_v23  ;;  %2616 = vmatprep.subr.bf16.mxu1 %v13048_v22  ;;  %v13132_v19 = vld [vmem:[%s15367_s23 + $0x8dc] ss:$24 sps:$4 sm:$0xff]   ;;  %v13130_v22 = vld [vmem:[%s15367_s23 + $0x8d8] ss:$24 sps:$4 sm:$0xff]  }
 0x183   : > { %2646 = vmatprep.mubr.bf16.mxu1 %v15534_v23 }
 0x184   : > { %2488 = vmatpush1.bf16.msra.mxu0 %v13043_v24  ;;  %v661_v24 = vld [vmem:[#allocation3 + $0x50] sm:$0xff] }
 0x185   : > { %2489 = vmatprep.subr.bf16.mxu0 %v13051_v25  ;;  %2617 = vmatpush1.bf16.msra.mxu1 %v13046_v26  ;;  %v13135_v25 = vld [vmem:[%s15367_s23 + $0x14] ss:$24 sps:$4 sm:$0xff]   ;;  %v15598_v26 = vpack.c.bf16 %v661_v24, %v655_v21  ;;  %v13214_v21 = vld [vmem:[%s15367_s23 + $0x520] ss:$24 sps:$4 sm:$0xff]   ;;  %v13217_v24 = vld [vmem:[%s15367_s23 + $0x550] ss:$24 sps:$4 sm:$0xff]  }
 0x186   : > { %2618 = vmatprep.subr.bf16.mxu1 %v13054_v27  ;;  %v13133_v27 = vld [vmem:[%s15367_s23 + $0x10] ss:$24 sps:$4 sm:$0xff]  }
 0x188   : > { %2490 = vmatpush1.bf16.msra.mxu0 %v13049_v28  ;;  %v13138_v28 = vld [vmem:[%s15367_s23 + $0x44] ss:$24 sps:$4 sm:$0xff]  }
 0x189   : > { %2491 = vmatprep.subr.bf16.mxu0 %v13057_v29  ;;  %2619 = vmatpush1.bf16.msra.mxu1 %v13052_v30  ;;  %v13136_v29 = vld [vmem:[%s15367_s23 + $0x40] ss:$24 sps:$4 sm:$0xff]   ;;  %v13141_v30 = vld [vmem:[%s15367_s23 + $0x74] ss:$24 sps:$4 sm:$0xff]  }
 0x18a   : > { %2620 = vmatprep.subr.bf16.mxu1 %v13060_v31  ;;  %v13139_v31 = vld [vmem:[%s15367_s23 + $0x70] ss:$24 sps:$4 sm:$0xff]  }
 0x18c   : > { %2492 = vmatpush1.bf16.msra.mxu0 %v13055_v32  ;;  %v13144_v32 = vld [vmem:[%s15367_s23 + $0xa4] ss:$24 sps:$4 sm:$0xff]  }
 0x18d   : > { %2493 = vmatprep.subr.bf16.mxu0 %v13063_v33  ;;  %2621 = vmatpush1.bf16.msra.mxu1 %v13058_v34  ;;  %v13142_v33 = vld [vmem:[%s15367_s23 + $0xa0] ss:$24 sps:$4 sm:$0xff]   ;;  %v13147_v34 = vld [vmem:[%s15367_s23 + $0xd4] ss:$24 sps:$4 sm:$0xff]  }
 0x18e   : > { %2622 = vmatprep.subr.bf16.mxu1 %v13066_v35  ;;  %v13145_v35 = vld [vmem:[%s15367_s23 + $0xd0] ss:$24 sps:$4 sm:$0xff]  }
 0x190   : > { %2494 = vmatpush1.bf16.msra.mxu0 %v13061_v36  ;;  %v13150_v36 = vld [vmem:[%s15367_s23 + $0x104] ss:$24 sps:$4 sm:$0xff]  }
 0x191   : > { %2495 = vmatprep.subr.bf16.mxu0 %v13069_v38  ;;  %2623 = vmatpush1.bf16.msra.mxu1 %v13064_v39  ;;  %v13148_v38 = vld [vmem:[%s15367_s23 + $0x100] ss:$24 sps:$4 sm:$0xff]   ;;  %v13153_v39 = vld [vmem:[%s15367_s23 + $0x134] ss:$24 sps:$4 sm:$0xff]  }
 0x192   : > { %2624 = vmatprep.subr.bf16.mxu1 %v13072_v40  ;;  %v13151_v40 = vld [vmem:[%s15367_s23 + $0x130] ss:$24 sps:$4 sm:$0xff]  }
 0x194   : > { %2496 = vmatpush1.bf16.msra.mxu0 %v13067_v41  ;;  %v13156_v41 = vld [vmem:[%s15367_s23 + $0x164] ss:$24 sps:$4 sm:$0xff]  }
 0x195   : > { %2497 = vmatprep.subr.bf16.mxu0 %v13075_v42  ;;  %2625 = vmatpush1.bf16.msra.mxu1 %v13070_v43  ;;  %v13154_v42 = vld [vmem:[%s15367_s23 + $0x160] ss:$24 sps:$4 sm:$0xff]   ;;  %v13159_v43 = vld [vmem:[%s15367_s23 + $0x194] ss:$24 sps:$4 sm:$0xff]  }
 0x196   : > { %2626 = vmatprep.subr.bf16.mxu1 %v13078_v44  ;;  %v13157_v44 = vld [vmem:[%s15367_s23 + $0x190] ss:$24 sps:$4 sm:$0xff]  }
 0x198   : > { %2498 = vmatpush1.bf16.msra.mxu0 %v13073_v45  ;;  %v13162_v45 = vld [vmem:[%s15367_s23 + $0x1c4] ss:$24 sps:$4 sm:$0xff]  }
 0x199   : > { %2499 = vmatprep.subr.bf16.mxu0 %v13081_v46  ;;  %2627 = vmatpush1.bf16.msra.mxu1 %v13076_v47  ;;  %v13160_v46 = vld [vmem:[%s15367_s23 + $0x1c0] ss:$24 sps:$4 sm:$0xff]   ;;  %v13165_v47 = vld [vmem:[%s15367_s23 + $0x1f4] ss:$24 sps:$4 sm:$0xff]  }
 0x19a   : > { %2628 = vmatprep.subr.bf16.mxu1 %v13084_v48  ;;  %v13163_v48 = vld [vmem:[%s15367_s23 + $0x1f0] ss:$24 sps:$4 sm:$0xff]  }
 0x19c   : > { %2500 = vmatpush1.bf16.msra.mxu0 %v13079_v49  ;;  %v13168_v49 = vld [vmem:[%s15367_s23 + $0x224] ss:$24 sps:$4 sm:$0xff]  }
 0x19d   : > { %2501 = vmatprep.subr.bf16.mxu0 %v13087_v51  ;;  %2629 = vmatpush1.bf16.msra.mxu1 %v13082_v52  ;;  %v13166_v51 = vld [vmem:[%s15367_s23 + $0x220] ss:$24 sps:$4 sm:$0xff]   ;;  %v13171_v52 = vld [vmem:[%s15367_s23 + $0x254] ss:$24 sps:$4 sm:$0xff]  }
 0x19e   : > { %2630 = vmatprep.subr.bf16.mxu1 %v13090_v53  ;;  %v13169_v53 = vld [vmem:[%s15367_s23 + $0x250] ss:$24 sps:$4 sm:$0xff]  }
 0x1a0   : > { %2502 = vmatpush1.bf16.msra.mxu0 %v13085_v54  ;;  %v13174_v54 = vld [vmem:[%s15367_s23 + $0x284] ss:$24 sps:$4 sm:$0xff]  }
 0x1a1   : > { %2503 = vmatprep.subr.bf16.mxu0 %v13093_v55  ;;  %2631 = vmatpush1.bf16.msra.mxu1 %v13088_v56  ;;  %v13172_v55 = vld [vmem:[%s15367_s23 + $0x280] ss:$24 sps:$4 sm:$0xff]   ;;  %v13177_v56 = vld [vmem:[%s15367_s23 + $0x2b4] ss:$24 sps:$4 sm:$0xff]  }
 0x1a2   : > { %2632 = vmatprep.subr.bf16.mxu1 %v13096_v57  ;;  %v13175_v57 = vld [vmem:[%s15367_s23 + $0x2b0] ss:$24 sps:$4 sm:$0xff]  }
 0x1a4   : > { %2504 = vmatpush1.bf16.msra.mxu0 %v13091_v58  ;;  %v13180_v58 = vld [vmem:[%s15367_s23 + $0x2e4] ss:$24 sps:$4 sm:$0xff]  }
 0x1a5   : > { %2505 = vmatprep.subr.bf16.mxu0 %v13099_v59  ;;  %2633 = vmatpush1.bf16.msra.mxu1 %v13094_v60  ;;  %v13178_v59 = vld [vmem:[%s15367_s23 + $0x2e0] ss:$24 sps:$4 sm:$0xff]   ;;  %v13183_v60 = vld [vmem:[%s15367_s23 + $0x314] ss:$24 sps:$4 sm:$0xff]  }
 0x1a6   : > { %2634 = vmatprep.subr.bf16.mxu1 %v13102_v62  ;;  %v13186_v62 = vld [vmem:[%s15367_s23 + $0x344] ss:$24 sps:$4 sm:$0xff]  }
 0x1a8   : > { %2506 = vmatpush1.bf16.msra.mxu0 %v13097_v61  ;;  %v13181_v61 = vld [vmem:[%s15367_s23 + $0x310] ss:$24 sps:$4 sm:$0xff]  }
 0x1a9   : > { %2507 = vmatprep.subr.bf16.mxu0 %v13105_v0  ;;  %2635 = vmatpush1.bf16.msra.mxu1 %v13100_v63  ;;  %v13184_v63 = vld [vmem:[%s15367_s23 + $0x340] ss:$24 sps:$4 sm:$0xff]   ;;  %v13189_v0 = vld [vmem:[%s15367_s23 + $0x374] ss:$24 sps:$4 sm:$0xff]  }
 0x1aa   : > { %2636 = vmatprep.subr.bf16.mxu1 %v13108_v1  ;;  %v13187_v1 = vld [vmem:[%s15367_s23 + $0x370] ss:$24 sps:$4 sm:$0xff]  }
 0x1ac   : > { %2508 = vmatpush1.bf16.msra.mxu0 %v13103_v2  ;;  %v13192_v2 = vld [vmem:[%s15367_s23 + $0x3a4] ss:$24 sps:$4 sm:$0xff]  }
 0x1ad   : > { %2509 = vmatprep.subr.bf16.mxu0 %v13111_v4  ;;  %2637 = vmatpush1.bf16.msra.mxu1 %v13106_v3  ;;  %v13190_v3 = vld [vmem:[%s15367_s23 + $0x3a0] ss:$24 sps:$4 sm:$0xff]   ;;  %v13195_v4 = vld [vmem:[%s15367_s23 + $0x3d4] ss:$24 sps:$4 sm:$0xff]  }
 0x1ae   : > { %2638 = vmatprep.subr.bf16.mxu1 %v13114_v5  ;;  %v13193_v5 = vld [vmem:[%s15367_s23 + $0x3d0] ss:$24 sps:$4 sm:$0xff]  }
 0x1b0   : > { %2510 = vmatpush1.bf16.msra.mxu0 %v13109_v6  ;;  %v13198_v6 = vld [vmem:[%s15367_s23 + $0x404] ss:$24 sps:$4 sm:$0xff]  }
 0x1b1   : > { %2511 = vmatprep.subr.bf16.mxu0 %v13117_v9  ;;  %2639 = vmatpush1.bf16.msra.mxu1 %v13112_v8  ;;  %v13196_v8 = vld [vmem:[%s15367_s23 + $0x400] ss:$24 sps:$4 sm:$0xff]   ;;  %v13201_v9 = vld [vmem:[%s15367_s23 + $0x434] ss:$24 sps:$4 sm:$0xff]  }
 0x1b2   : > { %2640 = vmatprep.subr.bf16.mxu1 %v13120_v10  ;;  %v13199_v10 = vld [vmem:[%s15367_s23 + $0x430] ss:$24 sps:$4 sm:$0xff]  }
 0x1b4   : > { %2512 = vmatpush1.bf16.msra.mxu0 %v13115_v11  ;;  %v13204_v11 = vld [vmem:[%s15367_s23 + $0x464] ss:$24 sps:$4 sm:$0xff]  }
 0x1b5   : > { %2513 = vmatprep.subr.bf16.mxu0 %v13123_v13  ;;  %2641 = vmatpush1.bf16.msra.mxu1 %v13118_v12  ;;  %v13202_v12 = vld [vmem:[%s15367_s23 + $0x460] ss:$24 sps:$4 sm:$0xff]   ;;  %v13207_v13 = vld [vmem:[%s15367_s23 + $0x494] ss:$24 sps:$4 sm:$0xff]  }
 0x1b6   : > { %2642 = vmatprep.subr.bf16.mxu1 %v13126_v14  ;;  %v13205_v14 = vld [vmem:[%s15367_s23 + $0x490] ss:$24 sps:$4 sm:$0xff]  }
 0x1b8   : > { %2514 = vmatpush1.bf16.msra.mxu0 %v13121_v16  ;;  %v13210_v16 = vld [vmem:[%s15367_s23 + $0x4c4] ss:$24 sps:$4 sm:$0xff]  }
 0x1b9   : > { %2515 = vmatprep.subr.bf16.mxu0 %v13129_v18  ;;  %2643 = vmatpush1.bf16.msra.mxu1 %v13124_v17  ;;  %v13208_v17 = vld [vmem:[%s15367_s23 + $0x4c0] ss:$24 sps:$4 sm:$0xff]   ;;  %v13213_v18 = vld [vmem:[%s15367_s23 + $0x4f4] ss:$24 sps:$4 sm:$0xff]  }
 0x1ba   : > { %2644 = vmatprep.subr.bf16.mxu1 %v13132_v19  ;;  %v13211_v19 = vld [vmem:[%s15367_s23 + $0x4f0] ss:$24 sps:$4 sm:$0xff]  }
 0x1bc   : > { %2516 = vmatpush1.bf16.msra.mxu0 %v13127_v20  ;;  %v13216_v20 = vld [vmem:[%s15367_s23 + $0x524] ss:$24 sps:$4 sm:$0xff]  }
 0x1bd   : > { %2657 = vmatprep.subr.bf16.mxu0 %v13135_v25  ;;  %2645 = vmatpush1.bf16.msra.mxu1 %v13130_v22  ;;  %v13219_v22 = vld [vmem:[%s15367_s23 + $0x554] ss:$24 sps:$4 sm:$0xff]   ;;  %v13222_v25 = vld [vmem:[%s15367_s23 + $0x584] ss:$24 sps:$4 sm:$0xff]  }
 0x1bf   : > { %2518 = vmatmul.mubr.bf16.vlgmr.msra.gmra.mrb[0].mxu0 %v15598_v26 }
 0x1c0   : > { %2658 = vmatpush1.bf16.msra.mxu0 %v13133_v27  ;;  %2689 = vmatprep.mubr.bf16.mxu0 %v15432_v50  ;;  %v13220_v27 = vld [vmem:[%s15367_s23 + $0x580] ss:$24 sps:$4 sm:$0xff]  }
 0x1c1   : > { %2647 = vmatmul.mubr.bf16.vlgmr.msra.gmra.mrb[0].mxu1 %v15598_v26  ;;  %2659 = vmatprep.subr.bf16.mxu0 %v13138_v28  ;;  %v13225_v28 = vld [vmem:[%s15367_s23 + $0x5b4] ss:$24 sps:$4 sm:$0xff]  }
 0x1c4   : > { %2660 = vmatpush1.bf16.msra.mxu0 %v13136_v29  ;;  %v13223_v29 = vld [vmem:[%s15367_s23 + $0x5b0] ss:$24 sps:$4 sm:$0xff]  }
 0x1c5   : > { %2661 = vmatprep.subr.bf16.mxu0 %v13141_v30  ;;  %v13228_v30 = vld [vmem:[%s15367_s23 + $0x5e4] ss:$24 sps:$4 sm:$0xff]  }
 0x1c8   : > { %2662 = vmatpush1.bf16.msra.mxu0 %v13139_v31  ;;  %v13226_v31 = vld [vmem:[%s15367_s23 + $0x5e0] ss:$24 sps:$4 sm:$0xff]  }
 0x1c9   : > { %2663 = vmatprep.subr.bf16.mxu0 %v13144_v32  ;;  %v13231_v32 = vld [vmem:[%s15367_s23 + $0x614] ss:$24 sps:$4 sm:$0xff]  }
 0x1cc   : > { %2664 = vmatpush1.bf16.msra.mxu0 %v13142_v33  ;;  %v13229_v33 = vld [vmem:[%s15367_s23 + $0x610] ss:$24 sps:$4 sm:$0xff]  }
 0x1cd   : > { %2665 = vmatprep.subr.bf16.mxu0 %v13147_v34  ;;  %v13234_v34 = vld [vmem:[%s15367_s23 + $0x644] ss:$24 sps:$4 sm:$0xff]  }
 0x1d0   : > { %2666 = vmatpush1.bf16.msra.mxu0 %v13145_v35  ;;  %v13232_v35 = vld [vmem:[%s15367_s23 + $0x640] ss:$24 sps:$4 sm:$0xff]  }
 0x1d1   : > { %2667 = vmatprep.subr.bf16.mxu0 %v13150_v36  ;;  %v13237_v36 = vld [vmem:[%s15367_s23 + $0x674] ss:$24 sps:$4 sm:$0xff]  }
 0x1d4   : > { %2668 = vmatpush1.bf16.msra.mxu0 %v13148_v38  ;;  %v13235_v38 = vld [vmem:[%s15367_s23 + $0x670] ss:$24 sps:$4 sm:$0xff]  }
 0x1d5   : > { %2669 = vmatprep.subr.bf16.mxu0 %v13153_v39  ;;  %v13240_v39 = vld [vmem:[%s15367_s23 + $0x6a4] ss:$24 sps:$4 sm:$0xff]  }
 0x1d8   : > { %2670 = vmatpush1.bf16.msra.mxu0 %v13151_v40  ;;  %v13238_v40 = vld [vmem:[%s15367_s23 + $0x6a0] ss:$24 sps:$4 sm:$0xff]  }
 0x1d9   : > { %2671 = vmatprep.subr.bf16.mxu0 %v13156_v41  ;;  %v13243_v41 = vld [vmem:[%s15367_s23 + $0x6d4] ss:$24 sps:$4 sm:$0xff]  }
 0x1dc   : > { %2672 = vmatpush1.bf16.msra.mxu0 %v13154_v42  ;;  %v13241_v42 = vld [vmem:[%s15367_s23 + $0x6d0] ss:$24 sps:$4 sm:$0xff]  }
 0x1dd   : > { %2673 = vmatprep.subr.bf16.mxu0 %v13159_v43  ;;  %v13246_v43 = vld [vmem:[%s15367_s23 + $0x704] ss:$24 sps:$4 sm:$0xff]  }
 0x1e0   : > { %2674 = vmatpush1.bf16.msra.mxu0 %v13157_v44  ;;  %v13244_v44 = vld [vmem:[%s15367_s23 + $0x700] ss:$24 sps:$4 sm:$0xff]  }
 0x1e1   : > { %2675 = vmatprep.subr.bf16.mxu0 %v13162_v45  ;;  %v13249_v45 = vld [vmem:[%s15367_s23 + $0x734] ss:$24 sps:$4 sm:$0xff]  }
 0x1e4   : > { %2676 = vmatpush1.bf16.msra.mxu0 %v13160_v46  ;;  %v13247_v46 = vld [vmem:[%s15367_s23 + $0x730] ss:$24 sps:$4 sm:$0xff]  }
 0x1e5   : > { %2677 = vmatprep.subr.bf16.mxu0 %v13165_v47  ;;  %v13252_v47 = vld [vmem:[%s15367_s23 + $0x764] ss:$24 sps:$4 sm:$0xff]  }
 0x1e8   : > { %2678 = vmatpush1.bf16.msra.mxu0 %v13163_v48  ;;  %v13250_v48 = vld [vmem:[%s15367_s23 + $0x760] ss:$24 sps:$4 sm:$0xff]  }
 0x1e9   : > { %2679 = vmatprep.subr.bf16.mxu0 %v13168_v49  ;;  %v13255_v49 = vld [vmem:[%s15367_s23 + $0x794] ss:$24 sps:$4 sm:$0xff]  }
 0x1ec   : > { %2680 = vmatpush1.bf16.msra.mxu0 %v13166_v51  ;;  %v13253_v51 = vld [vmem:[%s15367_s23 + $0x790] ss:$24 sps:$4 sm:$0xff]  }
 0x1ed   : > { %2681 = vmatprep.subr.bf16.mxu0 %v13171_v52  ;;  %v13258_v52 = vld [vmem:[%s15367_s23 + $0x7c4] ss:$24 sps:$4 sm:$0xff]  }
 0x1f0   : > { %2682 = vmatpush1.bf16.msra.mxu0 %v13169_v53  ;;  %v13256_v53 = vld [vmem:[%s15367_s23 + $0x7c0] ss:$24 sps:$4 sm:$0xff]  }
 0x1f1   : > { %2683 = vmatprep.subr.bf16.mxu0 %v13174_v54  ;;  %v13261_v54 = vld [vmem:[%s15367_s23 + $0x7f4] ss:$24 sps:$4 sm:$0xff]  }
 0x1f4   : > { %2684 = vmatpush1.bf16.msra.mxu0 %v13172_v55  ;;  %v13259_v55 = vld [vmem:[%s15367_s23 + $0x7f0] ss:$24 sps:$4 sm:$0xff]  }
 0x1f5   : > { %2685 = vmatprep.subr.bf16.mxu0 %v13177_v56  ;;  %v13264_v56 = vld [vmem:[%s15367_s23 + $0x824] ss:$24 sps:$4 sm:$0xff]  }
 0x1f8   : > { %2686 = vmatpush1.bf16.msra.mxu0 %v13175_v57  ;;  %v13262_v57 = vld [vmem:[%s15367_s23 + $0x820] ss:$24 sps:$4 sm:$0xff]  }
 0x1f9   : > { %2687 = vmatprep.subr.bf16.mxu0 %v13180_v58  ;;  %v13267_v58 = vld [vmem:[%s15367_s23 + $0x854] ss:$24 sps:$4 sm:$0xff]  }
 0x1fc   : > { %2688 = vmatpush1.bf16.msra.mxu0 %v13178_v59  ;;  %v13265_v59 = vld [vmem:[%s15367_s23 + $0x850] ss:$24 sps:$4 sm:$0xff]  }
 0x1fd   : > { %2700 = vmatprep.subr.bf16.mxu0 %v13183_v60  ;;  %v13270_v60 = vld [vmem:[%s15367_s23 + $0x884] ss:$24 sps:$4 sm:$0xff]  }
 0x1ff   : > { %2690 = vmatmul.mubr.bf16.vlgmr.msra.gmra.mrb[4].mxu0 %v15454_v7 }
 0x200   : > { %2701 = vmatpush1.bf16.msra.mxu0 %v13181_v61  ;;  %2732 = vmatprep.mubr.bf16.mxu0 %v15485_v37  ;;  %v13268_v61 = vld [vmem:[%s15367_s23 + $0x880] ss:$24 sps:$4 sm:$0xff]  }
 0x201   : > { %2702 = vmatprep.subr.bf16.mxu0 %v13186_v62  ;;  %v13273_v62 = vld [vmem:[%s15367_s23 + $0x8b4] ss:$24 sps:$4 sm:$0xff]  }
 0x204   : > { %2703 = vmatpush1.bf16.msra.mxu0 %v13184_v63  ;;  %v13271_v63 = vld [vmem:[%s15367_s23 + $0x8b0] ss:$24 sps:$4 sm:$0xff]  }
 0x205   : > { %2704 = vmatprep.subr.bf16.mxu0 %v13189_v0  ;;  %v13276_v0 = vld [vmem:[%s15367_s23 + $0x8e4] ss:$24 sps:$4 sm:$0xff]  }
 0x208   : > { %2705 = vmatpush1.bf16.msra.mxu0 %v13187_v1  ;;  %v13274_v1 = vld [vmem:[%s15367_s23 + $0x8e0] ss:$24 sps:$4 sm:$0xff]  }
 0x209   : > { %2706 = vmatprep.subr.bf16.mxu0 %v13192_v2  ;;  %v2800_v2 = vlaneseq }
 0x20c   : > { %2707 = vmatpush1.bf16.msra.mxu0 %v13190_v3 }
 0x20d   : > { %2708 = vmatprep.subr.bf16.mxu0 %v13195_v4  ;;  %v15704_v4 = vshrl.u32 %v2800_v2, 7 }
 0x210   : > { %2709 = vmatpush1.bf16.msra.mxu0 %v13193_v5 }
 0x211   : > { %2710 = vmatprep.subr.bf16.mxu0 %v13198_v6 }
 0x214   : > { %2711 = vmatpush1.bf16.msra.mxu0 %v13196_v8 }
 0x215   : > { %2712 = vmatprep.subr.bf16.mxu0 %v13201_v9 }
 0x218   : > { %2713 = vmatpush1.bf16.msra.mxu0 %v13199_v10 }
 0x219   : > { %2714 = vmatprep.subr.bf16.mxu0 %v13204_v11  ;;  %v2798_v11 = vld [vmem:[%s15373_s13] sm:$0x3f] }
 0x21c   : > { %2715 = vmatpush1.bf16.msra.mxu0 %v13202_v12 }
 0x21d   : > { %2716 = vmatprep.subr.bf16.mxu0 %v13207_v13  ;;  %v15708_v13 = vsub.s32 0, %v15704_v4 }
 0x220   : > { %2717 = vmatpush1.bf16.msra.mxu0 %v13205_v14 }
 0x221   : > { %2718 = vmatprep.subr.bf16.mxu0 %v13210_v16  ;;  %v15711_v16 = vsub.s32 1, %v15704_v4 }
 0x224   : > { %2719 = vmatpush1.bf16.msra.mxu0 %v13208_v17  ;;  %v2803_v17 = vrot.slane %v2798_v11, %v15708_v13 }
 0x225   : > { %2720 = vmatprep.subr.bf16.mxu0 %v13213_v18  ;;  %v15715_v18 = vsub.s32 2, %v15704_v4 }
 0x228   : > { %2721 = vmatpush1.bf16.msra.mxu0 %v13211_v19  ;;  %v2807_v19 = vrot.slane %v2798_v11, %v15711_v16 }
 0x229   : > { %2722 = vmatprep.subr.bf16.mxu0 %v13216_v20  ;;  %v15719_v20 = vsub.s32 3, %v15704_v4 }
 0x22c   : > { %2723 = vmatpush1.bf16.msra.mxu0 %v13214_v21 }
 0x22d   : > { %2724 = vmatprep.subr.bf16.mxu0 %v13219_v22 }
 0x230   : > { %2725 = vmatpush1.bf16.msra.mxu0 %v13217_v24  ;;  %v2811_v24 = vrot.slane %v2798_v11, %v15715_v18 }
 0x231   : > { %2726 = vmatprep.subr.bf16.mxu0 %v13222_v25 }
 0x234   : > { %2727 = vmatpush1.bf16.msra.mxu0 %v13220_v27 }
 0x235   : > { %2728 = vmatprep.subr.bf16.mxu0 %v13225_v28  ;;  %v2815_v28 = vrot.slane %v2798_v11, %v15719_v20 }
 0x238   : > { %2729 = vmatpush1.bf16.msra.mxu0 %v13223_v29 }
 0x239   : > { %2730 = vmatprep.subr.bf16.mxu0 %v13228_v30 }
 0x23c   : > { %2731 = vmatpush1.bf16.msra.mxu0 %v13226_v31 }
 0x23d   : > { %2743 = vmatprep.subr.bf16.mxu0 %v13231_v32 }
 0x23f   : > { %2733 = vmatmul.mubr.bf16.vlgmr.msra.gmra.mrb[4].mxu0 %v15526_v15 }
 0x240   : > { %2744 = vmatpush1.bf16.msra.mxu0 %v13229_v33  ;;  %2775 = vmatprep.mubr.bf16.mxu0 %v15534_v23 }
 0x241   : > { %2745 = vmatprep.subr.bf16.mxu0 %v13234_v34 }
 0x244   : > { %2746 = vmatpush1.bf16.msra.mxu0 %v13232_v35 }
 0x245   : > { %2747 = vmatprep.subr.bf16.mxu0 %v13237_v36 }
 0x248   : > { %2748 = vmatpush1.bf16.msra.mxu0 %v13235_v38 }
 0x249   : > { %2749 = vmatprep.subr.bf16.mxu0 %v13240_v39 }
 0x24c   : > { %2750 = vmatpush1.bf16.msra.mxu0 %v13238_v40 }
 0x24d   : > { %2751 = vmatprep.subr.bf16.mxu0 %v13243_v41 }
 0x250   : > { %2752 = vmatpush1.bf16.msra.mxu0 %v13241_v42 }
 0x251   : > { %2753 = vmatprep.subr.bf16.mxu0 %v13246_v43 }
 0x254   : > { %2754 = vmatpush1.bf16.msra.mxu0 %v13244_v44 }
 0x255   : > { %2755 = vmatprep.subr.bf16.mxu0 %v13249_v45 }
 0x258   : > { %2756 = vmatpush1.bf16.msra.mxu0 %v13247_v46 }
 0x259   : > { %2757 = vmatprep.subr.bf16.mxu0 %v13252_v47 }
 0x25c   : > { %2758 = vmatpush1.bf16.msra.mxu0 %v13250_v48 }
 0x25d   : > { %2759 = vmatprep.subr.bf16.mxu0 %v13255_v49 }
 0x260   : > { %2760 = vmatpush1.bf16.msra.mxu0 %v13253_v51 }
 0x261   : > { %2761 = vmatprep.subr.bf16.mxu0 %v13258_v52 }
 0x264   : > { %2762 = vmatpush1.bf16.msra.mxu0 %v13256_v53  ;;  %v15724_v53 = vsub.s32 4, %v15704_v4 }
 0x265   : > { %2763 = vmatprep.subr.bf16.mxu0 %v13261_v54  ;;  %v15727_v54 = vsub.s32 5, %v15704_v4 }
 0x268   : > { %2764 = vmatpush1.bf16.msra.mxu0 %v13259_v55  ;;  %v2819_v55 = vrot.slane %v2798_v11, %v15724_v53 }
 0x269   : > { %2765 = vmatprep.subr.bf16.mxu0 %v13264_v56  ;;  %v2823_v56 = vrot.slane %v2798_v11, %v15727_v54  ;;  %v15735_v11 = vld [vmem:[#allocation5] sm:$0x3] }
 0x26a   : > { %vm670_vm1 = vcmp.eq.f32.partialorder %v15735_v11, 0.0 }
 0x26c   : > { %2766 = vmatpush1.bf16.msra.mxu0 %v13262_v57 }
 0x26d   : > { %2767 = vmatprep.subr.bf16.mxu0 %v13267_v58 }
 0x270   : > { %2768 = vmatpush1.bf16.msra.mxu0 %v13265_v59 }
 0x271   : > { %2769 = vmatprep.subr.bf16.mxu0 %v13270_v60 }
 0x274   : > { %2770 = vmatpush1.bf16.msra.mxu0 %v13268_v61 }
 0x275   : > { %2771 = vmatprep.subr.bf16.mxu0 %v13273_v62 }
 0x278   : > { %2772 = vmatpush1.bf16.msra.mxu0 %v13271_v63 }
 0x279   : > { %2773 = vmatprep.subr.bf16.mxu0 %v13276_v0 }
 0x27c   : > { %2774 = vmatpush1.bf16.msra.mxu0 %v13274_v1 }
 0x27f   : > { %2776 = vmatmul.mubr.bf16.vlgmr.msra.gmra.mrb[4].mxu0 %v15598_v26 }
 0x292   : > { %v2519_v3 = vpop.f32.mrb[0].mxu0 }
 0x293   : > { %14583 = vtanh.f32 %v2519_v3  ;;  %v2521_v5 = vpop.f32.mrb[1].mxu0 }
 0x294   : > { %14585 = vtanh.f32 %v2521_v5  ;;  %v2523_v6 = vpop.f32.mrb[2].mxu0  ;;  %v2648_v8 = vpop.f32.mrb[0].mxu1 }
 0x295   : > { %14587 = vtanh.f32 %v2523_v6  ;;  %v2525_v9 = vpop.f32.mrb[3].mxu0  ;;  %v2650_v10 = vpop.f32.mrb[1].mxu1 }
 0x296   : > { %14589 = vtanh.f32 %v2525_v9  ;;  %v2652_v12 = vpop.f32.mrb[2].mxu1 }
 0x297   : > { %14591 = vtanh.f32 %v2648_v8  ;;  %v2654_v14 = vpop.f32.mrb[3].mxu1  ;;  %v2859_v8 = vand.u32 127, %v2800_v2 }
 0x298   : > { %14593 = vtanh.f32 %v2650_v10 }
 0x299   : > { %14595 = vtanh.f32 %v2652_v12  ;;  %v15733_v10 = vsub.s32 %v2859_v8, %v15704_v4 }
 0x29a   : > { %14597 = vtanh.f32 %v2654_v14 }
 0x29d   : > { %v14584_v21 = vpop.eup %14583 }
 0x29e   : > { %v14586_v22 = vpop.eup %14585  ;;  %v2830_v25 = vmul.f32 %v14584_v21, %v2803_v17 }
 0x29f   : > { %v14588_v27 = vpop.eup %14587  ;;  %v2831_v29 = vmul.f32 %v14586_v22, %v2807_v19 }
 0x2a0   : > { %v14590_v30 = vpop.eup %14589  ;;  %v2836_v31 = vmul.f32 %v14588_v27, %v2803_v17 }
 0x2a1   : > { %v14592_v32 = vpop.eup %14591  ;;  %v2842_v33 = vadd.f32 %v2831_v29, %v2830_v25  ;;  %v2837_v34 = vmul.f32 %v14590_v30, %v2807_v19  ;;  %v2983_v30 = vld [vmem:[%s15375_s21 + $0x8] sm:$0xff] }
 0x2a2   : > { %v14594_v35 = vpop.eup %14593  ;;  %v2832_v36 = vmul.f32 %v14592_v32, %v2811_v24  ;;  %v3020_v32 = vcombine.high %v2983_v30, %v2983_v30 }
 0x2a3   : > { %v14596_v38 = vpop.eup %14595  ;;  %v2833_v39 = vmul.f32 %v14594_v35, %v2815_v28  ;;  %v2849_v40 = vadd.f32 %v2837_v34, %v2836_v31  ;;  %v2982_v31 = vld [vmem:[%s15375_s21] sm:$0xff] }
 0x2a4   : > { %v14598_v41 = vpop.eup %14597  ;;  %v2843_v42 = vadd.f32 %v2842_v33, %v2832_v36  ;;  %v2838_v43 = vmul.f32 %v14596_v38, %v2811_v24  ;;  %v3019_v33 = vcombine.high %v2982_v31, %v2982_v31  ;;  %3095 = vmatprep.subr.mxu1 %v3020_v32 }
 0x2a5   : > { %v2839_v44 = vmul.f32 %v14598_v41, %v2815_v28  ;;  %3096 = vmatpush1.xpose.msra.mxu1 %v2983_v30  ;;  %v13285_v41 = vld [vmem:[%s15367_s23 + $0x90c] ss:$24 sps:$4 sm:$0xff]  }
 0x2a6   : > { %v2844_v45 = vadd.f32 %v2843_v42, %v2833_v39  ;;  %v2850_v46 = vadd.f32 %v2849_v40, %v2838_v43  ;;  %3025 = vmatprep.subr.mxu0 %v3019_v33  ;;  %v15763_v39 = vld [vmem:[%s15375_s21 + $0x10] sm:$0xff] }
 0x2a7   : > { %3026 = vmatpush1.xpose.msra.mxu0 %v2982_v31  ;;  %v3021_v40 = vcombine.high %v15763_v39, %v15763_v39 }
 0x2a8   : > { %v2851_v47 = vadd.f32 %v2850_v46, %v2839_v44  ;;  %5096 = vmatprep.subr.bf16.mxu0 %v13285_v41  ;;  %v14679_v44 = vld [vmem:[#allocation3 + $0x30] sm:$0xff]  ;;  %v14680_v46 = vld [vmem:[#allocation3 + $0x38] sm:$0xff] }
 0x2a9   : > { %3165 = vmatprep.subr.mxu1 %v3021_v40 }
 0x352   : > { %v2777_v48 = vpop.f32.mrb[4].mxu0 }
 0x353   : > { %14599 = vtanh.f32 %v2777_v48  ;;  %v2779_v49 = vpop.f32.mrb[5].mxu0  ;;  %v14681_v48 = vld [vmem:[#allocation3 + $0x40] sm:$0xff] }
 0x354   : > { %14601 = vtanh.f32 %v2779_v49  ;;  %v2781_v51 = vpop.f32.mrb[6].mxu0 }
 0x355   : > { %14603 = vtanh.f32 %v2781_v51  ;;  %v2783_v52 = vpop.f32.mrb[7].mxu0  ;;  %v14682_v51 = vld [vmem:[#allocation3 + $0x48] sm:$0xff] }
 0x356   : > { %14605 = vtanh.f32 %v2783_v52 }
 0x35d   : > { %v14600_v57 = vpop.eup %14599 }
 0x35e   : > { %v14602_v58 = vpop.eup %14601  ;;  %v2834_v59 = vmul.f32 %v14600_v57, %v2819_v55  ;;  %v14684_v57 = vld [vmem:[#allocation3 + $0x58] sm:$0xff] }
 0x35f   : > { %v14604_v60 = vpop.eup %14603  ;;  %v2835_v61 = vmul.f32 %v14602_v58, %v2823_v56 }
 0x360   : > { %v14606_v62 = vpop.eup %14605  ;;  %v2845_v63 = vadd.f32 %v2844_v45, %v2834_v59  ;;  %v2840_v0 = vmul.f32 %v14604_v60, %v2819_v55  ;;  %v14683_v55 = vld [vmem:[#allocation3 + $0x50] sm:$0xff]  ;;  %v14685_v59 = vld [vmem:[#allocation3] sm:$0xff] }
 0x361   : > { %v2841_v1 = vmul.f32 %v14606_v62, %v2823_v56 }
 0x362   : > { %v2846_v3 = vadd.f32 %v2845_v63, %v2835_v61  ;;  %v2852_v5 = vadd.f32 %v2851_v47, %v2840_v0  ;;  %v14686_v61 = vld [vmem:[#allocation3 + $0x8] sm:$0xff] }
 0x364   : > { %2847 = vadd.xlane.f32.xlu0 %v2846_v3  ;;  %v2853_v6 = vadd.f32 %v2852_v5, %v2841_v1  ;;  %v14687_v1 = vld [vmem:[#allocation3 + $0x10] sm:$0xff]  ;;  %v14688_v5 = vld [vmem:[#allocation3 + $0x18] sm:$0xff] }
 0x368   : > { %2854 = vadd.xlane.f32.xlu0 %v2853_v6 }
 0x3f1   : > { %v2848_v9 = vpop.xlane.xlu0 %2847 }
 0x3f2   : > { %v2863_v14 = vrot.slane %v2848_v9, %v15733_v10  ;;  %v14689_v9 = vld [vmem:[#allocation3 + $0x20] sm:$0xff] }
 0x3f5   : > { %v2855_v12 = vpop.xlane.xlu0 %2854 }
 0x3f6   : > { %v2867_v17 = vrot.slane %v2855_v12, %v15733_v10 }
 0x3f8   : > { %v2869_v19 = vsel %vm2868_vm0, %v2867_v17, %v2863_v14  ;;  %v14690_v14 = vld [vmem:[#allocation3 + $0x28] sm:$0xff] }
 0x3f9   : > { %v2871_v2 = vsel %vm670_vm1, -inf, %v2869_v19 }
 0x3fa   : > { %v2873_v21 = vsel %vm2872_vm2, %v2871_v2, -inf }
 0x3fb   : > { %2874 = vmax.xlane.f32.xlu1 %v2873_v21 }
 0x488   : > { %v2875_v22 = vpop.xlane.xlu1 %2874 }
 0x489   : > { %v2876_v24 = vsub.f32 %v2871_v2, %v2875_v22 }
 0x48b   : > { %v2877_v25 = vmul.f32 1.442695, %v2876_v24 }
 0x48d   : > { %14607 = vpow2.f32 %v2877_v25 }
 0x497   : > { %v14608_v27 = vpop.eup %14607 }
 0x498   : > { %v2879_v28 = vsel %vm2872_vm2, %v14608_v27, 0.0 }
 0x499   : > { %2880 = vadd.xlane.f32.xlu1 %v2879_v28 }
 0x526   : > { %v2881_v29 = vpop.xlane.xlu1 %2880 }
 0x527   : > { %14609 = vrcp.f32 %v2881_v29 }
 0x531   : > { %v14610_v34 = vpop.eup %14609 }
 0x532   : > { %v2883_v35 = vmul.f32 %v14610_v34, %v14608_v27 }
 0x534   : > { %v2894_v36 = vrot.slane %v2883_v35, %v15711_v16  ;;  %v2887_v38 = vrot.slane %v2883_v35, %v15708_v13  ;;  %3237 = vst.msk [vmem:[%s15756_s30] sm:$0x3] %vm2872_vm2, %v2883_v35 }
 0x536   : > { %2896 = vbcast.lane.b32.xlu1 %v2894_v36, 256  ;;  %2889 = vbcast.lane.b32.xlu0 %v2887_v38, 256 }
 0x5a8   : > { %v2897_v42 = vpop.permute.xlu1 %2896  ;;  %v2890_v43 = vpop.permute.xlu0 %2889 }
 0x5a9   : > { %v2904_v45 = vmul.f32 %v14679_v44, %v2897_v42  ;;  %v2905_v47 = vmul.f32 %v14680_v46, %v2897_v42  ;;  %v2906_v49 = vmul.f32 %v14681_v48, %v2897_v42  ;;  %v2907_v52 = vmul.f32 %v14682_v51, %v2897_v42 }
 0x5aa   : > { %v15768_v56 = vmul.f32 %v14683_v55, %v2897_v42  ;;  %v15770_v58 = vmul.f32 %v14684_v57, %v2897_v42  ;;  %v2898_v60 = vmul.f32 %v14685_v59, %v2890_v43  ;;  %v2899_v62 = vmul.f32 %v14686_v61, %v2890_v43 }
 0x5ab   : > { %v2946_v63 = vrot.slane %v2904_v45, 4  ;;  %v2958_v0 = vrot.slane %v2906_v49, 4  ;;  %v2900_v3 = vmul.f32 %v14687_v1, %v2890_v43  ;;  %v2901_v6 = vmul.f32 %v14688_v5, %v2890_v43 }
 0x5ac   : > { %v2970_v8 = vrot.slane %v15768_v56, 4  ;;  %v2902_v12 = vmul.f32 %v14689_v9, %v2890_v43  ;;  %v2903_v17 = vmul.f32 %v14690_v14, %v2890_v43  ;;  %v2910_v19 = vrot.slane %v2898_v60, 4 }
 0x5ad   : > { %v2922_v2 = vrot.slane %v2900_v3, 4  ;;  %v2916_v21 = vrot.slane %v2899_v62, 4  ;;  %v2952_v22 = vrot.slane %v2905_v47, 4  ;;  %v2928_v24 = vrot.slane %v2901_v6, 4 }
 0x5ae   : > { %v2934_v25 = vrot.slane %v2902_v12, 4  ;;  %v2964_v27 = vrot.slane %v2907_v52, 4  ;;  %v2911_v28 = vadd.f32 %v2910_v19, %v2898_v60  ;;  %v2947_v29 = vadd.f32 %v2946_v63, %v2904_v45 }
 0x5af   : > { %v2917_v30 = vadd.f32 %v2916_v21, %v2899_v62  ;;  %v2953_v31 = vadd.f32 %v2952_v22, %v2905_v47  ;;  %v2929_v32 = vadd.f32 %v2928_v24, %v2901_v6  ;;  %v2923_v33 = vadd.f32 %v2922_v2, %v2900_v3 }
 0x5b0   : > { %v2965_v34 = vadd.f32 %v2964_v27, %v2907_v52  ;;  %v2912_v35 = vrot.slane %v2911_v28, 2  ;;  %v2948_v36 = vrot.slane %v2947_v29, 2  ;;  %v2959_v38 = vadd.f32 %v2958_v0, %v2906_v49 }
 0x5b1   : > { %v2918_v40 = vrot.slane %v2917_v30, 2  ;;  %v2954_v41 = vrot.slane %v2953_v31, 2  ;;  %v2930_v42 = vrot.slane %v2929_v32, 2  ;;  %v2924_v43 = vrot.slane %v2923_v33, 2 }
 0x5b2   : > { %v2966_v44 = vrot.slane %v2965_v34, 2  ;;  %v2913_v46 = vadd.f32 %v2912_v35, %v2911_v28  ;;  %v2949_v48 = vadd.f32 %v2948_v36, %v2947_v29  ;;  %v2960_v51 = vrot.slane %v2959_v38, 2  ;;  %v13283_v28 = vld [vmem:[%s15367_s23 + $0x908] ss:$24 sps:$4 sm:$0xff]  }
 0x5b3   : > { %v2919_v55 = vadd.f32 %v2918_v40, %v2917_v30  ;;  %v2955_v57 = vadd.f32 %v2954_v41, %v2953_v31  ;;  %v2931_v59 = vadd.f32 %v2930_v42, %v2929_v32  ;;  %v2925_v45 = vadd.f32 %v2924_v43, %v2923_v33  ;;  %v13291_v33 = vld [vmem:[%s15367_s23 + $0x93c] ss:$24 sps:$4 sm:$0xff]  }
 0x5b4   : > { %v2967_v60 = vadd.f32 %v2966_v44, %v2965_v34  ;;  %v2914_v47 = vrot.slane %v2913_v46, 1  ;;  %v2950_v61 = vrot.slane %v2949_v48, 1  ;;  %v2961_v62 = vadd.f32 %v2960_v51, %v2959_v38  ;;  %v13282_v38 = vld [vmem:[%s15367_s23 + $0x904] ss:$24 sps:$4 sm:$0xff]  }
 0x5b5   : > { %v2920_v52 = vrot.slane %v2919_v55, 1  ;;  %v2956_v63 = vrot.slane %v2955_v57, 1  ;;  %v2932_v49 = vrot.slane %v2931_v59, 1  ;;  %v2926_v0 = vrot.slane %v2925_v45, 1 }
 0x5b6   : > { %v2968_v1 = vrot.slane %v2967_v60, 1  ;;  %v2915_v3 = vadd.f32 %v2914_v47, %v2913_v46  ;;  %v2951_v5 = vadd.f32 %v2950_v61, %v2949_v48  ;;  %v2962_v6 = vrot.slane %v2961_v62, 1  ;;  %v13280_v61 = vld [vmem:[%s15367_s23 + $0x900] ss:$24 sps:$4 sm:$0xff]  }
 0x5b7   : > { %v2921_v9 = vadd.f32 %v2920_v52, %v2919_v55  ;;  %v2957_v14 = vadd.f32 %v2956_v63, %v2955_v57  ;;  %v2933_v19 = vadd.f32 %v2932_v49, %v2931_v59  ;;  %v2927_v2 = vadd.f32 %v2926_v0, %v2925_v45  ;;  %v13303_v57 = vld [vmem:[%s15367_s23 + $0x99c] ss:$24 sps:$4 sm:$0xff]   ;;  %v13309_v49 = vld [vmem:[%s15367_s23 + $0x9cc] ss:$24 sps:$4 sm:$0xff]  }
 0x5b8   : > { %v2969_v21 = vadd.f32 %v2968_v1, %v2967_v60  ;;  %v3004_v22 = vsel %vm2868_vm0, %v2951_v5, %v2915_v3  ;;  %v2963_v24 = vadd.f32 %v2962_v6, %v2961_v62  ;;  %v2940_v27 = vrot.slane %v2903_v17, 4  ;;  %v13301_v62 = vld [vmem:[%s15367_s23 + $0x998] ss:$24 sps:$4 sm:$0xff]   ;;  %v13288_v63 = vld [vmem:[%s15367_s23 + $0x934] ss:$24 sps:$4 sm:$0xff]  }
 0x5b9   : > { %v3005_v29 = vsel %vm2868_vm0, %v2957_v14, %v2921_v9  ;;  %v2976_v30 = vrot.slane %v15770_v58, 4  ;;  %v2935_v31 = vadd.f32 %v2934_v25, %v2902_v12  ;;  %v2971_v32 = vadd.f32 %v2970_v8, %v15768_v56  ;;  %v13289_v56 = vld [vmem:[%s15367_s23 + $0x938] ss:$24 sps:$4 sm:$0xff]   ;;  %v13307_v3 = vld [vmem:[%s15367_s23 + $0x9c8] ss:$24 sps:$4 sm:$0xff]  }
 0x5ba   : > { %3089 = vmatprep.mubr.f32.mxu0 %v3005_v29  ;;  %v3007_v34 = vsel %vm2868_vm0, %v2969_v21, %v2933_v19  ;;  %v3006_v35 = vsel %vm2868_vm0, %v2963_v24, %v2927_v2  ;;  %v2941_v36 = vadd.f32 %v2940_v27, %v2903_v17  ;;  %v13297_v17 = vld [vmem:[%s15367_s23 + $0x96c] ss:$24 sps:$4 sm:$0xff]   ;;  %v13286_v1 = vld [vmem:[%s15367_s23 + $0x930] ss:$24 sps:$4 sm:$0xff]   ;;  %v13315_v6 = vld [vmem:[%s15367_s23 + $0x9fc] ss:$24 sps:$4 sm:$0xff]  }
 0x5bb   : > { %3159 = vmatprep.mubr.f32.mxu1 %v3007_v34  ;;  %3090 = vmatmul.mubr.f32.vlgmr.msra.gmra.mrb[8].mxu0 %v3004_v22  ;;  %v2977_v40 = vadd.f32 %v2976_v30, %v15770_v58  ;;  %v2936_v41 = vrot.slane %v2935_v31, 2  ;;  %v2972_v42 = vrot.slane %v2971_v32, 2  ;;  %v13294_v5 = vld [vmem:[%s15367_s23 + $0x964] ss:$24 sps:$4 sm:$0xff]   ;;  %v13292_v9 = vld [vmem:[%s15367_s23 + $0x960] ss:$24 sps:$4 sm:$0xff]  }
 0x5bc   : > { %3160 = vmatmul.mubr.f32.vlgmr.msra.gmra.mrb[4].mxu1 %v3006_v35  ;;  %v2942_v12 = vrot.slane %v2941_v36, 2  ;;  %5097 = vmatpush1.bf16.msra.mxu0 %v13283_v28  ;;  %v13313_v14 = vld [vmem:[%s15367_s23 + $0x9f8] ss:$24 sps:$4 sm:$0xff]   ;;  %v13300_v19 = vld [vmem:[%s15367_s23 + $0x994] ss:$24 sps:$4 sm:$0xff]  }
 0x5bd   : > { %3166 = vmatpush1.xpose.msra.mxu1 %v15763_v39  ;;  %v2978_v8 = vrot.slane %v2977_v40, 2  ;;  %v2937_v25 = vadd.f32 %v2936_v41, %v2935_v31  ;;  %v2973_v43 = vadd.f32 %v2972_v42, %v2971_v32  ;;  %5098 = vmatprep.subr.bf16.mxu0 %v13291_v33  ;;  %v13295_v39 = vld [vmem:[%s15367_s23 + $0x968] ss:$24 sps:$4 sm:$0xff]   ;;  %v13321_v2 = vld [vmem:[%s15367_s23 + $0xa2c] ss:$24 sps:$4 sm:$0xff]  }
 0x5be   : > { %v2943_v44 = vadd.f32 %v2942_v12, %v2941_v36  ;;  %4967 = vmatprep.subr.bf16.mxu1 %v13282_v38  ;;  %5128 = vmatprep.mubr.bf16.mxu0 %v15432_v50  ;;  %v13298_v21 = vld [vmem:[%s15367_s23 + $0x990] ss:$24 sps:$4 sm:$0xff]   ;;  %v13306_v24 = vld [vmem:[%s15367_s23 + $0x9c4] ss:$24 sps:$4 sm:$0xff]   ;;  %v13304_v28 = vld [vmem:[%s15367_s23 + $0x9c0] ss:$24 sps:$4 sm:$0xff]  }
 0x5bf   : > { %v2979_v58 = vadd.f32 %v2978_v8, %v2977_v40  ;;  %v2938_v46 = vrot.slane %v2937_v25, 1  ;;  %v2974_v48 = vrot.slane %v2973_v43, 1  ;;  %v13319_v22 = vld [vmem:[%s15367_s23 + $0xa28] ss:$24 sps:$4 sm:$0xff]   ;;  %v13327_v27 = vld [vmem:[%s15367_s23 + $0xa5c] ss:$24 sps:$4 sm:$0xff]  }
 0x5c0   : > { %v2944_v51 = vrot.slane %v2943_v44, 1  ;;  %5099 = vmatpush1.bf16.msra.mxu0 %v13289_v56  ;;  %v13325_v29 = vld [vmem:[%s15367_s23 + $0xa58] ss:$24 sps:$4 sm:$0xff]   ;;  %v13312_v30 = vld [vmem:[%s15367_s23 + $0x9f4] ss:$24 sps:$4 sm:$0xff]  }
 0x5c1   : > { %v2980_v55 = vrot.slane %v2979_v58, 1  ;;  %5100 = vmatprep.subr.bf16.mxu0 %v13297_v17  ;;  %v2939_v45 = vadd.f32 %v2938_v46, %v2937_v25  ;;  %v2975_v60 = vadd.f32 %v2974_v48, %v2973_v43  ;;  %v13333_v31 = vld [vmem:[%s15367_s23 + $0xa8c] ss:$24 sps:$4 sm:$0xff]   ;;  %v13310_v32 = vld [vmem:[%s15367_s23 + $0x9f0] ss:$24 sps:$4 sm:$0xff]  }
 0x5c2   : > { %v2945_v59 = vadd.f32 %v2944_v51, %v2943_v44  ;;  %v13331_v33 = vld [vmem:[%s15367_s23 + $0xa88] ss:$24 sps:$4 sm:$0xff]   ;;  %v13318_v34 = vld [vmem:[%s15367_s23 + $0xa24] ss:$24 sps:$4 sm:$0xff]   ;;  %v13337_v38 = vld [vmem:[%s15367_s23 + $0xab8] ss:$24 sps:$4 sm:$0xff]  }
 0x5c3   : > { %v2981_v47 = vadd.f32 %v2980_v55, %v2979_v58  ;;  %v3008_v0 = vsel %vm2868_vm0, %v2975_v60, %v2939_v45  ;;  %v13339_v35 = vld [vmem:[%s15367_s23 + $0xabc] ss:$24 sps:$4 sm:$0xff]   ;;  %v13316_v36 = vld [vmem:[%s15367_s23 + $0xa20] ss:$24 sps:$4 sm:$0xff]   ;;  %v13345_v41 = vld [vmem:[%s15367_s23 + $0xaec] ss:$24 sps:$4 sm:$0xff]  }
 0x5c4   : > { %5101 = vmatpush1.bf16.msra.mxu0 %v13295_v39  ;;  %v13324_v40 = vld [vmem:[%s15367_s23 + $0xa54] ss:$24 sps:$4 sm:$0xff]   ;;  %v13322_v42 = vld [vmem:[%s15367_s23 + $0xa50] ss:$24 sps:$4 sm:$0xff]   ;;  %v13330_v56 = vld [vmem:[%s15367_s23 + $0xa84] ss:$24 sps:$4 sm:$0xff]  }
 0x5c5   : > { %v3009_v52 = vsel %vm2868_vm0, %v2981_v47, %v2945_v59  ;;  %5102 = vmatprep.subr.bf16.mxu0 %v13303_v57  ;;  %v13343_v12 = vld [vmem:[%s15367_s23 + $0xae8] ss:$24 sps:$4 sm:$0xff]   ;;  %v13351_v8 = vld [vmem:[%s15367_s23 + $0xb1c] ss:$24 sps:$4 sm:$0xff]   ;;  %v13349_v43 = vld [vmem:[%s15367_s23 + $0xb18] ss:$24 sps:$4 sm:$0xff]  }
 0x5c6   : > { %3229 = vmatprep.mubr.f32.mxu1 %v3009_v52  ;;  %v13328_v25 = vld [vmem:[%s15367_s23 + $0xa80] ss:$24 sps:$4 sm:$0xff]   ;;  %v13336_v17 = vld [vmem:[%s15367_s23 + $0xab4] ss:$24 sps:$4 sm:$0xff]   ;;  %v13334_v58 = vld [vmem:[%s15367_s23 + $0xab0] ss:$24 sps:$4 sm:$0xff]  }
 0x5c7   : > { %3230 = vmatmul.mubr.f32.vlgmr.msra.gmra.mrb[4].mxu1 %v3008_v0  ;;  %v13357_v44 = vld [vmem:[%s15367_s23 + $0xb4c] ss:$24 sps:$4 sm:$0xff]   ;;  %v13355_v46 = vld [vmem:[%s15367_s23 + $0xb48] ss:$24 sps:$4 sm:$0xff]   ;;  %v13363_v51 = vld [vmem:[%s15367_s23 + $0xb7c] ss:$24 sps:$4 sm:$0xff]  }
 0x5c8   : > { %4968 = vmatpush1.bf16.msra.mxu1 %v13280_v61  ;;  %5103 = vmatpush1.bf16.msra.mxu0 %v13301_v62  ;;  %v13342_v48 = vld [vmem:[%s15367_s23 + $0xae4] ss:$24 sps:$4 sm:$0xff]   ;;  %v13340_v39 = vld [vmem:[%s15367_s23 + $0xae0] ss:$24 sps:$4 sm:$0xff]   ;;  %v13348_v57 = vld [vmem:[%s15367_s23 + $0xb14] ss:$24 sps:$4 sm:$0xff]  }
 0x5c9   : > { %4969 = vmatprep.subr.bf16.mxu1 %v13288_v63  ;;  %5104 = vmatprep.subr.bf16.mxu0 %v13309_v49  ;;  %v13361_v55 = vld [vmem:[%s15367_s23 + $0xb78] ss:$24 sps:$4 sm:$0xff]   ;;  %v13369_v59 = vld [vmem:[%s15367_s23 + $0xbac] ss:$24 sps:$4 sm:$0xff]   ;;  %v13367_v60 = vld [vmem:[%s15367_s23 + $0xba8] ss:$24 sps:$4 sm:$0xff]  }
 0x5ca   : > { %4999 = vmatprep.mubr.bf16.mxu1 %v15432_v50  ;;  %v13346_v45 = vld [vmem:[%s15367_s23 + $0xb10] ss:$24 sps:$4 sm:$0xff]   ;;  %v13354_v47 = vld [vmem:[%s15367_s23 + $0xb44] ss:$24 sps:$4 sm:$0xff]   ;;  %v13352_v62 = vld [vmem:[%s15367_s23 + $0xb40] ss:$24 sps:$4 sm:$0xff]  }
 0x5cb   : > { %v13375_v61 = vld [vmem:[%s15367_s23 + $0xbdc] ss:$24 sps:$4 sm:$0xff]   ;;  %v13373_v52 = vld [vmem:[%s15367_s23 + $0xbd8] ss:$24 sps:$4 sm:$0xff]   ;;  %v13381_v49 = vld [vmem:[%s15367_s23 + $0xc0c] ss:$24 sps:$4 sm:$0xff]  }
 0x5cc   : > { %4970 = vmatpush1.bf16.msra.mxu1 %v13286_v1  ;;  %5105 = vmatpush1.bf16.msra.mxu0 %v13307_v3  ;;  %v13360_v63 = vld [vmem:[%s15367_s23 + $0xb74] ss:$24 sps:$4 sm:$0xff]   ;;  %v13358_v0 = vld [vmem:[%s15367_s23 + $0xb70] ss:$24 sps:$4 sm:$0xff]   ;;  %v13366_v3 = vld [vmem:[%s15367_s23 + $0xba4] ss:$24 sps:$4 sm:$0xff]  }
 0x5cd   : > { %4971 = vmatprep.subr.bf16.mxu1 %v13294_v5  ;;  %5106 = vmatprep.subr.bf16.mxu0 %v13315_v6  ;;  %v13379_v1 = vld [vmem:[%s15367_s23 + $0xc08] ss:$24 sps:$4 sm:$0xff]   ;;  %v13387_v5 = vld [vmem:[%s15367_s23 + $0xc3c] ss:$24 sps:$4 sm:$0xff]  }
 0x5ce   : > { %v13364_v6 = vld [vmem:[%s15367_s23 + $0xba0] ss:$24 sps:$4 sm:$0xff]  }
 0x5d0   : > { %4972 = vmatpush1.bf16.msra.mxu1 %v13292_v9  ;;  %5107 = vmatpush1.bf16.msra.mxu0 %v13313_v14  ;;  %v13385_v9 = vld [vmem:[%s15367_s23 + $0xc38] ss:$24 sps:$4 sm:$0xff]   ;;  %v13372_v14 = vld [vmem:[%s15367_s23 + $0xbd4] ss:$24 sps:$4 sm:$0xff]  }
 0x5d1   : > { %4973 = vmatprep.subr.bf16.mxu1 %v13300_v19  ;;  %5108 = vmatprep.subr.bf16.mxu0 %v13321_v2  ;;  %v13393_v19 = vld [vmem:[%s15367_s23 + $0xc6c] ss:$24 sps:$4 sm:$0xff]   ;;  %v13370_v2 = vld [vmem:[%s15367_s23 + $0xbd0] ss:$24 sps:$4 sm:$0xff]  }
 0x5d4   : > { %4974 = vmatpush1.bf16.msra.mxu1 %v13298_v21  ;;  %5109 = vmatpush1.bf16.msra.mxu0 %v13319_v22  ;;  %v13391_v21 = vld [vmem:[%s15367_s23 + $0xc68] ss:$24 sps:$4 sm:$0xff]   ;;  %v13378_v22 = vld [vmem:[%s15367_s23 + $0xc04] ss:$24 sps:$4 sm:$0xff]  }
 0x5d5   : > { %4975 = vmatprep.subr.bf16.mxu1 %v13306_v24  ;;  %5110 = vmatprep.subr.bf16.mxu0 %v13327_v27  ;;  %v13399_v24 = vld [vmem:[%s15367_s23 + $0xc9c] ss:$24 sps:$4 sm:$0xff]   ;;  %v13376_v27 = vld [vmem:[%s15367_s23 + $0xc00] ss:$24 sps:$4 sm:$0xff]  }
 0x5d8   : > { %4976 = vmatpush1.bf16.msra.mxu1 %v13304_v28  ;;  %5111 = vmatpush1.bf16.msra.mxu0 %v13325_v29  ;;  %v13397_v28 = vld [vmem:[%s15367_s23 + $0xc98] ss:$24 sps:$4 sm:$0xff]   ;;  %v13384_v29 = vld [vmem:[%s15367_s23 + $0xc34] ss:$24 sps:$4 sm:$0xff]  }
 0x5d9   : > { %4977 = vmatprep.subr.bf16.mxu1 %v13312_v30  ;;  %5112 = vmatprep.subr.bf16.mxu0 %v13333_v31  ;;  %v13405_v30 = vld [vmem:[%s15367_s23 + $0xccc] ss:$24 sps:$4 sm:$0xff]   ;;  %v13382_v31 = vld [vmem:[%s15367_s23 + $0xc30] ss:$24 sps:$4 sm:$0xff]  }
 0x5dc   : > { %4978 = vmatpush1.bf16.msra.mxu1 %v13310_v32  ;;  %5113 = vmatpush1.bf16.msra.mxu0 %v13331_v33  ;;  %v13403_v32 = vld [vmem:[%s15367_s23 + $0xcc8] ss:$24 sps:$4 sm:$0xff]   ;;  %v13390_v33 = vld [vmem:[%s15367_s23 + $0xc64] ss:$24 sps:$4 sm:$0xff]  }
 0x5dd   : > { %4979 = vmatprep.subr.bf16.mxu1 %v13318_v34  ;;  %5114 = vmatprep.subr.bf16.mxu0 %v13339_v35  ;;  %v13411_v34 = vld [vmem:[%s15367_s23 + $0xcfc] ss:$24 sps:$4 sm:$0xff]   ;;  %v13388_v35 = vld [vmem:[%s15367_s23 + $0xc60] ss:$24 sps:$4 sm:$0xff]  }
 0x5e0   : > { %4980 = vmatpush1.bf16.msra.mxu1 %v13316_v36  ;;  %5115 = vmatpush1.bf16.msra.mxu0 %v13337_v38  ;;  %v13409_v36 = vld [vmem:[%s15367_s23 + $0xcf8] ss:$24 sps:$4 sm:$0xff]   ;;  %v13396_v38 = vld [vmem:[%s15367_s23 + $0xc94] ss:$24 sps:$4 sm:$0xff]  }
 0x5e1   : > { %4981 = vmatprep.subr.bf16.mxu1 %v13324_v40  ;;  %5116 = vmatprep.subr.bf16.mxu0 %v13345_v41  ;;  %v13417_v40 = vld [vmem:[%s15367_s23 + $0xd2c] ss:$24 sps:$4 sm:$0xff]   ;;  %v13394_v41 = vld [vmem:[%s15367_s23 + $0xc90] ss:$24 sps:$4 sm:$0xff]  }
 0x5e4   : > { %4982 = vmatpush1.bf16.msra.mxu1 %v13322_v42  ;;  %5117 = vmatpush1.bf16.msra.mxu0 %v13343_v12  ;;  %v13415_v42 = vld [vmem:[%s15367_s23 + $0xd28] ss:$24 sps:$4 sm:$0xff]   ;;  %v13402_v12 = vld [vmem:[%s15367_s23 + $0xcc4] ss:$24 sps:$4 sm:$0xff]  }
 0x5e5   : > { %4983 = vmatprep.subr.bf16.mxu1 %v13330_v56  ;;  %5118 = vmatprep.subr.bf16.mxu0 %v13351_v8  ;;  %v13423_v56 = vld [vmem:[%s15367_s23 + $0xd5c] ss:$24 sps:$4 sm:$0xff]   ;;  %v13400_v8 = vld [vmem:[%s15367_s23 + $0xcc0] ss:$24 sps:$4 sm:$0xff]  }
 0x5e8   : > { %4984 = vmatpush1.bf16.msra.mxu1 %v13328_v25  ;;  %5119 = vmatpush1.bf16.msra.mxu0 %v13349_v43  ;;  %v13421_v25 = vld [vmem:[%s15367_s23 + $0xd58] ss:$24 sps:$4 sm:$0xff]   ;;  %v13408_v43 = vld [vmem:[%s15367_s23 + $0xcf4] ss:$24 sps:$4 sm:$0xff]  }
 0x5e9   : > { %4985 = vmatprep.subr.bf16.mxu1 %v13336_v17  ;;  %5120 = vmatprep.subr.bf16.mxu0 %v13357_v44  ;;  %v13429_v17 = vld [vmem:[%s15367_s23 + $0xd8c] ss:$24 sps:$4 sm:$0xff]   ;;  %v13406_v44 = vld [vmem:[%s15367_s23 + $0xcf0] ss:$24 sps:$4 sm:$0xff]  }
 0x5ec   : > { %4986 = vmatpush1.bf16.msra.mxu1 %v13334_v58  ;;  %5121 = vmatpush1.bf16.msra.mxu0 %v13355_v46  ;;  %v13427_v58 = vld [vmem:[%s15367_s23 + $0xd88] ss:$24 sps:$4 sm:$0xff]   ;;  %v13414_v46 = vld [vmem:[%s15367_s23 + $0xd24] ss:$24 sps:$4 sm:$0xff]  }
 0x5ed   : > { %4987 = vmatprep.subr.bf16.mxu1 %v13342_v48  ;;  %5122 = vmatprep.subr.bf16.mxu0 %v13363_v51  ;;  %v13435_v48 = vld [vmem:[%s15367_s23 + $0xdbc] ss:$24 sps:$4 sm:$0xff]   ;;  %v13412_v51 = vld [vmem:[%s15367_s23 + $0xd20] ss:$24 sps:$4 sm:$0xff]  }
 0x5f0   : > { %4988 = vmatpush1.bf16.msra.mxu1 %v13340_v39  ;;  %5123 = vmatpush1.bf16.msra.mxu0 %v13361_v55  ;;  %v13433_v39 = vld [vmem:[%s15367_s23 + $0xdb8] ss:$24 sps:$4 sm:$0xff]   ;;  %v13420_v55 = vld [vmem:[%s15367_s23 + $0xd54] ss:$24 sps:$4 sm:$0xff]  }
 0x5f1   : > { %4989 = vmatprep.subr.bf16.mxu1 %v13348_v57  ;;  %5124 = vmatprep.subr.bf16.mxu0 %v13369_v59  ;;  %v13441_v57 = vld [vmem:[%s15367_s23 + $0xdec] ss:$24 sps:$4 sm:$0xff]   ;;  %v13418_v59 = vld [vmem:[%s15367_s23 + $0xd50] ss:$24 sps:$4 sm:$0xff]  }
 0x5f4   : > { %4990 = vmatpush1.bf16.msra.mxu1 %v13346_v45  ;;  %5125 = vmatpush1.bf16.msra.mxu0 %v13367_v60  ;;  %v13439_v45 = vld [vmem:[%s15367_s23 + $0xde8] ss:$24 sps:$4 sm:$0xff]   ;;  %v13426_v60 = vld [vmem:[%s15367_s23 + $0xd84] ss:$24 sps:$4 sm:$0xff]  }
 0x5f5   : > { %4991 = vmatprep.subr.bf16.mxu1 %v13354_v47  ;;  %5126 = vmatprep.subr.bf16.mxu0 %v13375_v61  ;;  %v13447_v47 = vld [vmem:[%s15367_s23 + $0xe1c] ss:$24 sps:$4 sm:$0xff]   ;;  %v13424_v61 = vld [vmem:[%s15367_s23 + $0xd80] ss:$24 sps:$4 sm:$0xff]  }
 0x5f8   : > { %4992 = vmatpush1.bf16.msra.mxu1 %v13352_v62  ;;  %5127 = vmatpush1.bf16.msra.mxu0 %v13373_v52  ;;  %v13445_v62 = vld [vmem:[%s15367_s23 + $0xe18] ss:$24 sps:$4 sm:$0xff]   ;;  %v13432_v52 = vld [vmem:[%s15367_s23 + $0xdb4] ss:$24 sps:$4 sm:$0xff]  }
 0x5f9   : > { %4993 = vmatprep.subr.bf16.mxu1 %v13360_v63  ;;  %5139 = vmatprep.subr.bf16.mxu0 %v13381_v49  ;;  %v13453_v63 = vld [vmem:[%s15367_s23 + $0xe4c] ss:$24 sps:$4 sm:$0xff]   ;;  %v13430_v49 = vld [vmem:[%s15367_s23 + $0xdb0] ss:$24 sps:$4 sm:$0xff]  }
 0x5fb   : > { %5129 = vmatmul.mubr.bf16.vlgmr.msra.gmra.mrb[12].mxu0 %v15454_v7 }
 0x5fc   : > { %4994 = vmatpush1.bf16.msra.mxu1 %v13358_v0  ;;  %5140 = vmatpush1.bf16.msra.mxu0 %v13379_v1  ;;  %v13451_v0 = vld [vmem:[%s15367_s23 + $0xe48] ss:$24 sps:$4 sm:$0xff]   ;;  %v13438_v1 = vld [vmem:[%s15367_s23 + $0xde4] ss:$24 sps:$4 sm:$0xff]  }
 0x5fd   : > { %4995 = vmatprep.subr.bf16.mxu1 %v13366_v3  ;;  %5141 = vmatprep.subr.bf16.mxu0 %v13387_v5  ;;  %v13459_v3 = vld [vmem:[%s15367_s23 + $0xe7c] ss:$24 sps:$4 sm:$0xff]   ;;  %v13436_v5 = vld [vmem:[%s15367_s23 + $0xde0] ss:$24 sps:$4 sm:$0xff]  }
 0x5fe   : > { %5171 = vmatprep.mubr.bf16.mxu0 %v15485_v37 }
 0x600   : > { %4996 = vmatpush1.bf16.msra.mxu1 %v13364_v6  ;;  %5142 = vmatpush1.bf16.msra.mxu0 %v13385_v9  ;;  %v13457_v6 = vld [vmem:[%s15367_s23 + $0xe78] ss:$24 sps:$4 sm:$0xff]   ;;  %v13444_v9 = vld [vmem:[%s15367_s23 + $0xe14] ss:$24 sps:$4 sm:$0xff]  }
 0x601   : > { %4997 = vmatprep.subr.bf16.mxu1 %v13372_v14  ;;  %5143 = vmatprep.subr.bf16.mxu0 %v13393_v19  ;;  %v13465_v14 = vld [vmem:[%s15367_s23 + $0xeac] ss:$24 sps:$4 sm:$0xff]   ;;  %v13442_v19 = vld [vmem:[%s15367_s23 + $0xe10] ss:$24 sps:$4 sm:$0xff]  }
 0x604   : > { %4998 = vmatpush1.bf16.msra.mxu1 %v13370_v2  ;;  %5144 = vmatpush1.bf16.msra.mxu0 %v13391_v21  ;;  %v13463_v2 = vld [vmem:[%s15367_s23 + $0xea8] ss:$24 sps:$4 sm:$0xff]   ;;  %v13450_v21 = vld [vmem:[%s15367_s23 + $0xe44] ss:$24 sps:$4 sm:$0xff]  }
 0x605   : > { %5010 = vmatprep.subr.bf16.mxu1 %v13378_v22  ;;  %5145 = vmatprep.subr.bf16.mxu0 %v13399_v24  ;;  %v13471_v22 = vld [vmem:[%s15367_s23 + $0xedc] ss:$24 sps:$4 sm:$0xff]   ;;  %v13448_v24 = vld [vmem:[%s15367_s23 + $0xe40] ss:$24 sps:$4 sm:$0xff]  }
 0x607   : > { %5000 = vmatmul.mubr.bf16.vlgmr.msra.gmra.mrb[8].mxu1 %v15454_v7 }
 0x608   : > { %5011 = vmatpush1.bf16.msra.mxu1 %v13376_v27  ;;  %5146 = vmatpush1.bf16.msra.mxu0 %v13397_v28  ;;  %v13469_v27 = vld [vmem:[%s15367_s23 + $0xed8] ss:$24 sps:$4 sm:$0xff]   ;;  %v13456_v28 = vld [vmem:[%s15367_s23 + $0xe74] ss:$24 sps:$4 sm:$0xff]  }
 0x609   : > { %5012 = vmatprep.subr.bf16.mxu1 %v13384_v29  ;;  %5147 = vmatprep.subr.bf16.mxu0 %v13405_v30  ;;  %v13477_v29 = vld [vmem:[%s15367_s23 + $0xf0c] ss:$24 sps:$4 sm:$0xff]   ;;  %v13454_v30 = vld [vmem:[%s15367_s23 + $0xe70] ss:$24 sps:$4 sm:$0xff]  }
 0x60a   : > { %5042 = vmatprep.mubr.bf16.mxu1 %v15485_v37 }
 0x60c   : > { %5013 = vmatpush1.bf16.msra.mxu1 %v13382_v31  ;;  %5148 = vmatpush1.bf16.msra.mxu0 %v13403_v32  ;;  %v13475_v31 = vld [vmem:[%s15367_s23 + $0xf08] ss:$24 sps:$4 sm:$0xff]   ;;  %v13462_v32 = vld [vmem:[%s15367_s23 + $0xea4] ss:$24 sps:$4 sm:$0xff]  }
 0x60d   : > { %5014 = vmatprep.subr.bf16.mxu1 %v13390_v33  ;;  %5149 = vmatprep.subr.bf16.mxu0 %v13411_v34  ;;  %v13483_v33 = vld [vmem:[%s15367_s23 + $0xf3c] ss:$24 sps:$4 sm:$0xff]   ;;  %v13460_v34 = vld [vmem:[%s15367_s23 + $0xea0] ss:$24 sps:$4 sm:$0xff]  }
 0x610   : > { %5015 = vmatpush1.bf16.msra.mxu1 %v13388_v35  ;;  %5150 = vmatpush1.bf16.msra.mxu0 %v13409_v36  ;;  %v13481_v35 = vld [vmem:[%s15367_s23 + $0xf38] ss:$24 sps:$4 sm:$0xff]   ;;  %v13468_v36 = vld [vmem:[%s15367_s23 + $0xed4] ss:$24 sps:$4 sm:$0xff]  }
 0x611   : > { %5016 = vmatprep.subr.bf16.mxu1 %v13396_v38  ;;  %5151 = vmatprep.subr.bf16.mxu0 %v13417_v40  ;;  %v13489_v38 = vld [vmem:[%s15367_s23 + $0xf6c] ss:$24 sps:$4 sm:$0xff]   ;;  %v13466_v40 = vld [vmem:[%s15367_s23 + $0xed0] ss:$24 sps:$4 sm:$0xff]  }
 0x614   : > { %5017 = vmatpush1.bf16.msra.mxu1 %v13394_v41  ;;  %5152 = vmatpush1.bf16.msra.mxu0 %v13415_v42  ;;  %v13487_v41 = vld [vmem:[%s15367_s23 + $0xf68] ss:$24 sps:$4 sm:$0xff]   ;;  %v13474_v42 = vld [vmem:[%s15367_s23 + $0xf04] ss:$24 sps:$4 sm:$0xff]  }
 0x615   : > { %5018 = vmatprep.subr.bf16.mxu1 %v13402_v12  ;;  %5153 = vmatprep.subr.bf16.mxu0 %v13423_v56  ;;  %v13495_v12 = vld [vmem:[%s15367_s23 + $0xf9c] ss:$24 sps:$4 sm:$0xff]   ;;  %v13472_v56 = vld [vmem:[%s15367_s23 + $0xf00] ss:$24 sps:$4 sm:$0xff]  }
 0x618   : > { %5019 = vmatpush1.bf16.msra.mxu1 %v13400_v8  ;;  %5154 = vmatpush1.bf16.msra.mxu0 %v13421_v25  ;;  %v13493_v8 = vld [vmem:[%s15367_s23 + $0xf98] ss:$24 sps:$4 sm:$0xff]   ;;  %v13480_v25 = vld [vmem:[%s15367_s23 + $0xf34] ss:$24 sps:$4 sm:$0xff]  }
 0x619   : > { %5020 = vmatprep.subr.bf16.mxu1 %v13408_v43  ;;  %5155 = vmatprep.subr.bf16.mxu0 %v13429_v17  ;;  %v13501_v43 = vld [vmem:[%s15367_s23 + $0xfcc] ss:$24 sps:$4 sm:$0xff]   ;;  %v13478_v17 = vld [vmem:[%s15367_s23 + $0xf30] ss:$24 sps:$4 sm:$0xff]  }
 0x61c   : > { %5021 = vmatpush1.bf16.msra.mxu1 %v13406_v44  ;;  %5156 = vmatpush1.bf16.msra.mxu0 %v13427_v58  ;;  %v13499_v44 = vld [vmem:[%s15367_s23 + $0xfc8] ss:$24 sps:$4 sm:$0xff]   ;;  %v13486_v58 = vld [vmem:[%s15367_s23 + $0xf64] ss:$24 sps:$4 sm:$0xff]  }
 0x61d   : > { %5022 = vmatprep.subr.bf16.mxu1 %v13414_v46  ;;  %5157 = vmatprep.subr.bf16.mxu0 %v13435_v48  ;;  %v13507_v46 = vld [vmem:[%s15367_s23 + $0xffc] ss:$24 sps:$4 sm:$0xff]   ;;  %v13484_v48 = vld [vmem:[%s15367_s23 + $0xf60] ss:$24 sps:$4 sm:$0xff]  }
 0x620   : > { %5023 = vmatpush1.bf16.msra.mxu1 %v13412_v51  ;;  %5158 = vmatpush1.bf16.msra.mxu0 %v13433_v39  ;;  %v13505_v51 = vld [vmem:[%s15367_s23 + $0xff8] ss:$24 sps:$4 sm:$0xff]   ;;  %v13492_v39 = vld [vmem:[%s15367_s23 + $0xf94] ss:$24 sps:$4 sm:$0xff]  }
 0x621   : > { %5024 = vmatprep.subr.bf16.mxu1 %v13420_v55  ;;  %5159 = vmatprep.subr.bf16.mxu0 %v13441_v57  ;;  %v13513_v55 = vld [vmem:[%s15367_s23 + $0x102c] ss:$24 sps:$4 sm:$0xff]   ;;  %v13490_v57 = vld [vmem:[%s15367_s23 + $0xf90] ss:$24 sps:$4 sm:$0xff]  }
 0x624   : > { %5025 = vmatpush1.bf16.msra.mxu1 %v13418_v59  ;;  %5160 = vmatpush1.bf16.msra.mxu0 %v13439_v45  ;;  %v13511_v59 = vld [vmem:[%s15367_s23 + $0x1028] ss:$24 sps:$4 sm:$0xff]   ;;  %v13498_v45 = vld [vmem:[%s15367_s23 + $0xfc4] ss:$24 sps:$4 sm:$0xff]  }
 0x625   : > { %5026 = vmatprep.subr.bf16.mxu1 %v13426_v60  ;;  %5161 = vmatprep.subr.bf16.mxu0 %v13447_v47  ;;  %v13519_v60 = vld [vmem:[%s15367_s23 + $0x105c] ss:$24 sps:$4 sm:$0xff]   ;;  %v13496_v47 = vld [vmem:[%s15367_s23 + $0xfc0] ss:$24 sps:$4 sm:$0xff]  }
 0x628   : > { %5027 = vmatpush1.bf16.msra.mxu1 %v13424_v61  ;;  %5162 = vmatpush1.bf16.msra.mxu0 %v13445_v62  ;;  %v13517_v61 = vld [vmem:[%s15367_s23 + $0x1058] ss:$24 sps:$4 sm:$0xff]   ;;  %v13504_v62 = vld [vmem:[%s15367_s23 + $0xff4] ss:$24 sps:$4 sm:$0xff]  }
 0x629   : > { %5028 = vmatprep.subr.bf16.mxu1 %v13432_v52  ;;  %5163 = vmatprep.subr.bf16.mxu0 %v13453_v63  ;;  %v13525_v52 = vld [vmem:[%s15367_s23 + $0x108c] ss:$24 sps:$4 sm:$0xff]   ;;  %v13502_v63 = vld [vmem:[%s15367_s23 + $0xff0] ss:$24 sps:$4 sm:$0xff]  }
 0x62c   : > { %5029 = vmatpush1.bf16.msra.mxu1 %v13430_v49  ;;  %5164 = vmatpush1.bf16.msra.mxu0 %v13451_v0  ;;  %v13523_v49 = vld [vmem:[%s15367_s23 + $0x1088] ss:$24 sps:$4 sm:$0xff]   ;;  %v13510_v0 = vld [vmem:[%s15367_s23 + $0x1024] ss:$24 sps:$4 sm:$0xff]  }
 0x62d   : > { %5030 = vmatprep.subr.bf16.mxu1 %v13438_v1  ;;  %5165 = vmatprep.subr.bf16.mxu0 %v13459_v3  ;;  %v13531_v1 = vld [vmem:[%s15367_s23 + $0x10bc] ss:$24 sps:$4 sm:$0xff]   ;;  %v13508_v3 = vld [vmem:[%s15367_s23 + $0x1020] ss:$24 sps:$4 sm:$0xff]  }
 0x630   : > { %5031 = vmatpush1.bf16.msra.mxu1 %v13436_v5  ;;  %5166 = vmatpush1.bf16.msra.mxu0 %v13457_v6  ;;  %v13529_v5 = vld [vmem:[%s15367_s23 + $0x10b8] ss:$24 sps:$4 sm:$0xff]   ;;  %v13516_v6 = vld [vmem:[%s15367_s23 + $0x1054] ss:$24 sps:$4 sm:$0xff]  }
 0x631   : > { %5032 = vmatprep.subr.bf16.mxu1 %v13444_v9  ;;  %5167 = vmatprep.subr.bf16.mxu0 %v13465_v14  ;;  %v13537_v9 = vld [vmem:[%s15367_s23 + $0x10ec] ss:$24 sps:$4 sm:$0xff]   ;;  %v13514_v14 = vld [vmem:[%s15367_s23 + $0x1050] ss:$24 sps:$4 sm:$0xff]  }
 0x634   : > { %5033 = vmatpush1.bf16.msra.mxu1 %v13442_v19  ;;  %5168 = vmatpush1.bf16.msra.mxu0 %v13463_v2  ;;  %v13535_v19 = vld [vmem:[%s15367_s23 + $0x10e8] ss:$24 sps:$4 sm:$0xff]   ;;  %v13522_v2 = vld [vmem:[%s15367_s23 + $0x1084] ss:$24 sps:$4 sm:$0xff]  }
 0x635   : > { %5034 = vmatprep.subr.bf16.mxu1 %v13450_v21  ;;  %5169 = vmatprep.subr.bf16.mxu0 %v13471_v22  ;;  %v13543_v21 = vld [vmem:[%s15367_s23 + $0x111c] ss:$24 sps:$4 sm:$0xff]   ;;  %v13520_v22 = vld [vmem:[%s15367_s23 + $0x1080] ss:$24 sps:$4 sm:$0xff]  }
 0x638   : > { %5035 = vmatpush1.bf16.msra.mxu1 %v13448_v24  ;;  %5170 = vmatpush1.bf16.msra.mxu0 %v13469_v27  ;;  %v13541_v24 = vld [vmem:[%s15367_s23 + $0x1118] ss:$24 sps:$4 sm:$0xff]   ;;  %v13528_v27 = vld [vmem:[%s15367_s23 + $0x10b4] ss:$24 sps:$4 sm:$0xff]  }
 0x639   : > { %5036 = vmatprep.subr.bf16.mxu1 %v13456_v28  ;;  %5182 = vmatprep.subr.bf16.mxu0 %v13477_v29  ;;  %v13549_v28 = vld [vmem:[%s15367_s23 + $0x114c] ss:$24 sps:$4 sm:$0xff]   ;;  %v13526_v29 = vld [vmem:[%s15367_s23 + $0x10b0] ss:$24 sps:$4 sm:$0xff]  }
 0x63b   : > { %5172 = vmatmul.mubr.bf16.vlgmr.msra.gmra.mrb[12].mxu0 %v15526_v15 }
 0x63c   : > { %5037 = vmatpush1.bf16.msra.mxu1 %v13454_v30  ;;  %5183 = vmatpush1.bf16.msra.mxu0 %v13475_v31  ;;  %v13547_v30 = vld [vmem:[%s15367_s23 + $0x1148] ss:$24 sps:$4 sm:$0xff]   ;;  %v13534_v31 = vld [vmem:[%s15367_s23 + $0x10e4] ss:$24 sps:$4 sm:$0xff]  }
 0x63d   : > { %5038 = vmatprep.subr.bf16.mxu1 %v13462_v32  ;;  %5184 = vmatprep.subr.bf16.mxu0 %v13483_v33  ;;  %v13555_v32 = vld [vmem:[%s15367_s23 + $0x117c] ss:$24 sps:$4 sm:$0xff]   ;;  %v13532_v33 = vld [vmem:[%s15367_s23 + $0x10e0] ss:$24 sps:$4 sm:$0xff]  }
 0x63e   : > { %5214 = vmatprep.mubr.bf16.mxu0 %v15534_v23 }
 0x640   : > { %5039 = vmatpush1.bf16.msra.mxu1 %v13460_v34  ;;  %5185 = vmatpush1.bf16.msra.mxu0 %v13481_v35  ;;  %v13553_v34 = vld [vmem:[%s15367_s23 + $0x1178] ss:$24 sps:$4 sm:$0xff]   ;;  %v13540_v35 = vld [vmem:[%s15367_s23 + $0x1114] ss:$24 sps:$4 sm:$0xff]  }
 0x641   : > { %5040 = vmatprep.subr.bf16.mxu1 %v13468_v36  ;;  %5186 = vmatprep.subr.bf16.mxu0 %v13489_v38  ;;  %v13561_v36 = vld [vmem:[%s15367_s23 + $0x11ac] ss:$24 sps:$4 sm:$0xff]   ;;  %v13538_v38 = vld [vmem:[%s15367_s23 + $0x1110] ss:$24 sps:$4 sm:$0xff]  }
 0x644   : > { %5041 = vmatpush1.bf16.msra.mxu1 %v13466_v40  ;;  %5187 = vmatpush1.bf16.msra.mxu0 %v13487_v41  ;;  %v13559_v40 = vld [vmem:[%s15367_s23 + $0x11a8] ss:$24 sps:$4 sm:$0xff]   ;;  %v13546_v41 = vld [vmem:[%s15367_s23 + $0x1144] ss:$24 sps:$4 sm:$0xff]  }
 0x645   : > { %5053 = vmatprep.subr.bf16.mxu1 %v13474_v42  ;;  %5188 = vmatprep.subr.bf16.mxu0 %v13495_v12  ;;  %v13567_v42 = vld [vmem:[%s15367_s23 + $0x11dc] ss:$24 sps:$4 sm:$0xff]   ;;  %v13544_v12 = vld [vmem:[%s15367_s23 + $0x1140] ss:$24 sps:$4 sm:$0xff]  }
 0x647   : > { %5043 = vmatmul.mubr.bf16.vlgmr.msra.gmra.mrb[8].mxu1 %v15526_v15 }
 0x648   : > { %5054 = vmatpush1.bf16.msra.mxu1 %v13472_v56  ;;  %5189 = vmatpush1.bf16.msra.mxu0 %v13493_v8  ;;  %v13565_v56 = vld [vmem:[%s15367_s23 + $0x11d8] ss:$24 sps:$4 sm:$0xff]   ;;  %v13552_v8 = vld [vmem:[%s15367_s23 + $0x1174] ss:$24 sps:$4 sm:$0xff]  }
 0x649   : > { %5055 = vmatprep.subr.bf16.mxu1 %v13480_v25  ;;  %5190 = vmatprep.subr.bf16.mxu0 %v13501_v43  ;;  %v13550_v25 = vld [vmem:[%s15367_s23 + $0x1170] ss:$24 sps:$4 sm:$0xff]   ;;  %v13558_v43 = vld [vmem:[%s15367_s23 + $0x11a4] ss:$24 sps:$4 sm:$0xff]  }
 0x64a   : > { %5085 = vmatprep.mubr.bf16.mxu1 %v15534_v23 }
 0x64c   : > { %5056 = vmatpush1.bf16.msra.mxu1 %v13478_v17  ;;  %5191 = vmatpush1.bf16.msra.mxu0 %v13499_v44  ;;  %v13556_v17 = vld [vmem:[%s15367_s23 + $0x11a0] ss:$24 sps:$4 sm:$0xff]   ;;  %v13564_v44 = vld [vmem:[%s15367_s23 + $0x11d4] ss:$24 sps:$4 sm:$0xff]  }
 0x64d   : > { %5057 = vmatprep.subr.bf16.mxu1 %v13486_v58  ;;  %5192 = vmatprep.subr.bf16.mxu0 %v13507_v46  ;;  %v13562_v58 = vld [vmem:[%s15367_s23 + $0x11d0] ss:$24 sps:$4 sm:$0xff]   ;;  %v13570_v46 = vld [vmem:[%s15367_s23 + $0x914] ss:$24 sps:$4 sm:$0xff]  }
 0x650   : > { %5058 = vmatpush1.bf16.msra.mxu1 %v13484_v48  ;;  %5193 = vmatpush1.bf16.msra.mxu0 %v13505_v51  ;;  %v13568_v48 = vld [vmem:[%s15367_s23 + $0x910] ss:$24 sps:$4 sm:$0xff]   ;;  %v13573_v51 = vld [vmem:[%s15367_s23 + $0x944] ss:$24 sps:$4 sm:$0xff]  }
 0x651   : > { %5059 = vmatprep.subr.bf16.mxu1 %v13492_v39  ;;  %5194 = vmatprep.subr.bf16.mxu0 %v13513_v55  ;;  %v13571_v39 = vld [vmem:[%s15367_s23 + $0x940] ss:$24 sps:$4 sm:$0xff]   ;;  %v13576_v55 = vld [vmem:[%s15367_s23 + $0x974] ss:$24 sps:$4 sm:$0xff]  }
 0x654   : > { %5060 = vmatpush1.bf16.msra.mxu1 %v13490_v57  ;;  %5195 = vmatpush1.bf16.msra.mxu0 %v13511_v59  ;;  %v13574_v57 = vld [vmem:[%s15367_s23 + $0x970] ss:$24 sps:$4 sm:$0xff]   ;;  %v13579_v59 = vld [vmem:[%s15367_s23 + $0x9a4] ss:$24 sps:$4 sm:$0xff]  }
 0x655   : > { %5061 = vmatprep.subr.bf16.mxu1 %v13498_v45  ;;  %5196 = vmatprep.subr.bf16.mxu0 %v13519_v60 }
 0x658   : > { %5062 = vmatpush1.bf16.msra.mxu1 %v13496_v47  ;;  %5197 = vmatpush1.bf16.msra.mxu0 %v13517_v61  ;;  %v13577_v47 = vld [vmem:[%s15367_s23 + $0x9a0] ss:$24 sps:$4 sm:$0xff]   ;;  %v13582_v61 = vld [vmem:[%s15367_s23 + $0x9d4] ss:$24 sps:$4 sm:$0xff]  }
 0x659   : > { %5063 = vmatprep.subr.bf16.mxu1 %v13504_v62  ;;  %5198 = vmatprep.subr.bf16.mxu0 %v13525_v52  ;;  %v13580_v62 = vld [vmem:[%s15367_s23 + $0x9d0] ss:$24 sps:$4 sm:$0xff]   ;;  %v13585_v52 = vld [vmem:[%s15367_s23 + $0xa04] ss:$24 sps:$4 sm:$0xff]  }
 0x65c   : > { %5064 = vmatpush1.bf16.msra.mxu1 %v13502_v63  ;;  %5199 = vmatpush1.bf16.msra.mxu0 %v13523_v49  ;;  %v11149_v63 = vld [vmem:[%s16000_s29] ss:$0 sm:$0xff]  ;;  %v13583_v49 = vld [vmem:[%s15367_s23 + $0xa00] ss:$24 sps:$4 sm:$0xff]  }
 0x65d   : > { %5065 = vmatprep.subr.bf16.mxu1 %v13510_v0  ;;  %5200 = vmatprep.subr.bf16.mxu0 %v13531_v1  ;;  %v13588_v1 = vld [vmem:[%s15367_s23 + $0xa34] ss:$24 sps:$4 sm:$0xff]  }
 0x660   : > { %5066 = vmatpush1.bf16.msra.mxu1 %v13508_v3  ;;  %5201 = vmatpush1.bf16.msra.mxu0 %v13529_v5 }
 0x661   : > { %5067 = vmatprep.subr.bf16.mxu1 %v13516_v6  ;;  %5202 = vmatprep.subr.bf16.mxu0 %v13537_v9  ;;  %v13586_v9 = vld [vmem:[%s15367_s23 + $0xa30] ss:$24 sps:$4 sm:$0xff]  }
 0x664   : > { %5068 = vmatpush1.bf16.msra.mxu1 %v13514_v14  ;;  %5203 = vmatpush1.bf16.msra.mxu0 %v13535_v19  ;;  %v13591_v14 = vld [vmem:[%s15367_s23 + $0xa64] ss:$24 sps:$4 sm:$0xff]   ;;  %v13589_v19 = vld [vmem:[%s15367_s23 + $0xa60] ss:$24 sps:$4 sm:$0xff]  }
 0x665   : > { %5069 = vmatprep.subr.bf16.mxu1 %v13522_v2  ;;  %5204 = vmatprep.subr.bf16.mxu0 %v13543_v21  ;;  %v13594_v2 = vld [vmem:[%s15367_s23 + $0xa94] ss:$24 sps:$4 sm:$0xff]   ;;  %v13592_v21 = vld [vmem:[%s15367_s23 + $0xa90] ss:$24 sps:$4 sm:$0xff]  }
 0x668   : > { %5070 = vmatpush1.bf16.msra.mxu1 %v13520_v22  ;;  %5205 = vmatpush1.bf16.msra.mxu0 %v13541_v24  ;;  %v13597_v22 = vld [vmem:[%s15367_s23 + $0xac4] ss:$24 sps:$4 sm:$0xff]   ;;  %v13595_v24 = vld [vmem:[%s15367_s23 + $0xac0] ss:$24 sps:$4 sm:$0xff]  }
 0x669   : > { %5071 = vmatprep.subr.bf16.mxu1 %v13528_v27  ;;  %5206 = vmatprep.subr.bf16.mxu0 %v13549_v28  ;;  %v13600_v27 = vld [vmem:[%s15367_s23 + $0xaf4] ss:$24 sps:$4 sm:$0xff]   ;;  %v13598_v28 = vld [vmem:[%s15367_s23 + $0xaf0] ss:$24 sps:$4 sm:$0xff]  }
 0x66c   : > { %5072 = vmatpush1.bf16.msra.mxu1 %v13526_v29  ;;  %5207 = vmatpush1.bf16.msra.mxu0 %v13547_v30  ;;  %v13603_v29 = vld [vmem:[%s15367_s23 + $0xb24] ss:$24 sps:$4 sm:$0xff]   ;;  %v13601_v30 = vld [vmem:[%s15367_s23 + $0xb20] ss:$24 sps:$4 sm:$0xff]  }
 0x66d   : > { %5073 = vmatprep.subr.bf16.mxu1 %v13534_v31  ;;  %5208 = vmatprep.subr.bf16.mxu0 %v13555_v32  ;;  %v13606_v31 = vld [vmem:[%s15367_s23 + $0xb54] ss:$24 sps:$4 sm:$0xff]   ;;  %v13604_v32 = vld [vmem:[%s15367_s23 + $0xb50] ss:$24 sps:$4 sm:$0xff]  }
 0x670   : > { %5074 = vmatpush1.bf16.msra.mxu1 %v13532_v33  ;;  %5209 = vmatpush1.bf16.msra.mxu0 %v13553_v34  ;;  %v13609_v33 = vld [vmem:[%s15367_s23 + $0xb84] ss:$24 sps:$4 sm:$0xff]   ;;  %v13607_v34 = vld [vmem:[%s15367_s23 + $0xb80] ss:$24 sps:$4 sm:$0xff]  }
 0x671   : > { %5075 = vmatprep.subr.bf16.mxu1 %v13540_v35  ;;  %5210 = vmatprep.subr.bf16.mxu0 %v13561_v36  ;;  %v13612_v35 = vld [vmem:[%s15367_s23 + $0xbb4] ss:$24 sps:$4 sm:$0xff]   ;;  %v13610_v36 = vld [vmem:[%s15367_s23 + $0xbb0] ss:$24 sps:$4 sm:$0xff]  }
 0x674   : > { %5076 = vmatpush1.bf16.msra.mxu1 %v13538_v38  ;;  %5211 = vmatpush1.bf16.msra.mxu0 %v13559_v40  ;;  %v13615_v38 = vld [vmem:[%s15367_s23 + $0xbe4] ss:$24 sps:$4 sm:$0xff]   ;;  %v13613_v40 = vld [vmem:[%s15367_s23 + $0xbe0] ss:$24 sps:$4 sm:$0xff]  }
 0x675   : > { %5077 = vmatprep.subr.bf16.mxu1 %v13546_v41  ;;  %5212 = vmatprep.subr.bf16.mxu0 %v13567_v42  ;;  %v13618_v41 = vld [vmem:[%s15367_s23 + $0xc14] ss:$24 sps:$4 sm:$0xff]   ;;  %v13616_v42 = vld [vmem:[%s15367_s23 + $0xc10] ss:$24 sps:$4 sm:$0xff]  }
 0x678   : > { %5078 = vmatpush1.bf16.msra.mxu1 %v13544_v12  ;;  %5213 = vmatpush1.bf16.msra.mxu0 %v13565_v56  ;;  %v13621_v12 = vld [vmem:[%s15367_s23 + $0xc44] ss:$24 sps:$4 sm:$0xff]   ;;  %v13619_v56 = vld [vmem:[%s15367_s23 + $0xc40] ss:$24 sps:$4 sm:$0xff]  }
 0x679   : > { %5079 = vmatprep.subr.bf16.mxu1 %v13552_v8  ;;  %v13624_v8 = vld [vmem:[%s15367_s23 + $0xc74] ss:$24 sps:$4 sm:$0xff]  }
 0x67b   : > { %5215 = vmatmul.mubr.bf16.vlgmr.msra.gmra.mrb[12].mxu0 %v15598_v26 }
 0x67c   : > { %5080 = vmatpush1.bf16.msra.mxu1 %v13550_v25  ;;  %v13622_v25 = vld [vmem:[%s15367_s23 + $0xc70] ss:$24 sps:$4 sm:$0xff]  }
 0x67d   : > { %5081 = vmatprep.subr.bf16.mxu1 %v13558_v43  ;;  %v13627_v43 = vld [vmem:[%s15367_s23 + $0xca4] ss:$24 sps:$4 sm:$0xff]  }
 0x680   : > { %5082 = vmatpush1.bf16.msra.mxu1 %v13556_v17  ;;  %v13625_v17 = vld [vmem:[%s15367_s23 + $0xca0] ss:$24 sps:$4 sm:$0xff]  }
 0x681   : > { %5083 = vmatprep.subr.bf16.mxu1 %v13564_v44  ;;  %v13630_v44 = vld [vmem:[%s15367_s23 + $0xcd4] ss:$24 sps:$4 sm:$0xff]  }
 0x684   : > { %5084 = vmatpush1.bf16.msra.mxu1 %v13562_v58  ;;  %v13628_v58 = vld [vmem:[%s15367_s23 + $0xcd0] ss:$24 sps:$4 sm:$0xff]  }
 0x685   : > { %5225 = vmatprep.subr.bf16.mxu1 %v13570_v46  ;;  %v13633_v46 = vld [vmem:[%s15367_s23 + $0xd04] ss:$24 sps:$4 sm:$0xff]  }
 0x687   : > { %5086 = vmatmul.mubr.bf16.vlgmr.msra.gmra.mrb[8].mxu1 %v15598_v26 }
 0x688   : > { %5226 = vmatpush1.bf16.msra.mxu1 %v13568_v48  ;;  %5257 = vmatprep.mubr.bf16.mxu1 %v15432_v50  ;;  %v13631_v48 = vld [vmem:[%s15367_s23 + $0xd00] ss:$24 sps:$4 sm:$0xff]  }
 0x689   : > { %5227 = vmatprep.subr.bf16.mxu1 %v13573_v51  ;;  %v13636_v51 = vld [vmem:[%s15367_s23 + $0xd34] ss:$24 sps:$4 sm:$0xff]  }
 0x68c   : > { %5228 = vmatpush1.bf16.msra.mxu1 %v13571_v39  ;;  %v13634_v39 = vld [vmem:[%s15367_s23 + $0xd30] ss:$24 sps:$4 sm:$0xff]  }
 0x68d   : > { %5229 = vmatprep.subr.bf16.mxu1 %v13576_v55  ;;  %v13639_v55 = vld [vmem:[%s15367_s23 + $0xd64] ss:$24 sps:$4 sm:$0xff]  }
 0x68e   : > { %v3091_v45 = vpop.f32.mrb[8].mxu0 }
 0x68f   : > { %v3093_v60 = vpop.f32.mrb[9].mxu0  ;;  %v3092_v0 = vadd.f32 %v11149_v63, %v3091_v45  ;;  %v13640_v45 = vld [vmem:[%s15367_s23 + $0xd90] ss:$24 sps:$4 sm:$0xff]   ;;  %v13649_v63 = vld [vmem:[%s15367_s23 + $0xe20] ss:$24 sps:$4 sm:$0xff]  }
 0x690   : > { %5230 = vmatpush1.bf16.msra.mxu1 %v13574_v57  ;;  %v13637_v57 = vld [vmem:[%s15367_s23 + $0xd60] ss:$24 sps:$4 sm:$0xff]   ;;  %v13645_v60 = vld [vmem:[%s15367_s23 + $0xdc4] ss:$24 sps:$4 sm:$0xff]  }
 0x691   : > { %5231 = vmatprep.subr.bf16.mxu1 %v13579_v59  ;;  %v13642_v59 = vld [vmem:[%s15367_s23 + $0xd94] ss:$24 sps:$4 sm:$0xff]  }
 0x694   : > { %5232 = vmatpush1.bf16.msra.mxu1 %v13577_v47  ;;  %v13643_v47 = vld [vmem:[%s15367_s23 + $0xdc0] ss:$24 sps:$4 sm:$0xff]  }
 0x695   : > { %5233 = vmatprep.subr.bf16.mxu1 %v13582_v61  ;;  %v13648_v61 = vld [vmem:[%s15367_s23 + $0xdf4] ss:$24 sps:$4 sm:$0xff]  }
 0x698   : > { %5234 = vmatpush1.bf16.msra.mxu1 %v13580_v62  ;;  %v13646_v62 = vld [vmem:[%s15367_s23 + $0xdf0] ss:$24 sps:$4 sm:$0xff]  }
 0x699   : > { %5235 = vmatprep.subr.bf16.mxu1 %v13585_v52  ;;  %v13651_v52 = vld [vmem:[%s15367_s23 + $0xe24] ss:$24 sps:$4 sm:$0xff]  }
 0x69a   : > { %v3231_v3 = vpop.f32.mrb[4].mxu1 }
 0x69b   : > { %v12611_v5 = vadd.f32 %v3231_v3, %v3092_v0  ;;  %v3233_v6 = vpop.f32.mrb[5].mxu1  ;;  %v13652_v0 = vld [vmem:[%s15367_s23 + $0xe50] ss:$24 sps:$4 sm:$0xff]   ;;  %v13655_v3 = vld [vmem:[%s15367_s23 + $0xe80] ss:$24 sps:$4 sm:$0xff]  }
 0x69c   : > { %5236 = vmatpush1.bf16.msra.mxu1 %v13583_v49  ;;  %v13654_v49 = vld [vmem:[%s15367_s23 + $0xe54] ss:$24 sps:$4 sm:$0xff]   ;;  %v13658_v6 = vld [vmem:[%s15367_s23 + $0xeb0] ss:$24 sps:$4 sm:$0xff]  }
 0x69d   : > { %3236 = vst.msk [vmem:[%s16012_s0] sm:$0x3] %vm3235_vm3, %v12611_v5  ;;  %5237 = vmatprep.subr.bf16.mxu1 %v13588_v1  ;;  %v13657_v1 = vld [vmem:[%s15367_s23 + $0xe84] ss:$24 sps:$4 sm:$0xff]   ;;  %v13660_v5 = vld [vmem:[%s15367_s23 + $0xeb4] ss:$24 sps:$4 sm:$0xff]  }
 0x6a0   : > { %5238 = vmatpush1.bf16.msra.mxu1 %v13586_v9  ;;  %v13663_v9 = vld [vmem:[%s15367_s23 + $0xee4] ss:$24 sps:$4 sm:$0xff]  }
 0x6a1   : > { %5239 = vmatprep.subr.bf16.mxu1 %v13591_v14  ;;  %v13661_v14 = vld [vmem:[%s15367_s23 + $0xee0] ss:$24 sps:$4 sm:$0xff]  }
 0x6a4   : > { %5240 = vmatpush1.bf16.msra.mxu1 %v13589_v19  ;;  %v13666_v19 = vld [vmem:[%s15367_s23 + $0xf14] ss:$24 sps:$4 sm:$0xff]  }
 0x6a5   : > { %5241 = vmatprep.subr.bf16.mxu1 %v13594_v2  ;;  %v13664_v2 = vld [vmem:[%s15367_s23 + $0xf10] ss:$24 sps:$4 sm:$0xff]  }
 0x6a8   : > { %5242 = vmatpush1.bf16.msra.mxu1 %v13592_v21  ;;  %v13669_v21 = vld [vmem:[%s15367_s23 + $0xf44] ss:$24 sps:$4 sm:$0xff]  }
 0x6a9   : > { %5243 = vmatprep.subr.bf16.mxu1 %v13597_v22  ;;  %v13667_v22 = vld [vmem:[%s15367_s23 + $0xf40] ss:$24 sps:$4 sm:$0xff]  }
 0x6ac   : > { %5244 = vmatpush1.bf16.msra.mxu1 %v13595_v24  ;;  %v13672_v24 = vld [vmem:[%s15367_s23 + $0xf74] ss:$24 sps:$4 sm:$0xff]  }
 0x6ad   : > { %5245 = vmatprep.subr.bf16.mxu1 %v13600_v27  ;;  %v13670_v27 = vld [vmem:[%s15367_s23 + $0xf70] ss:$24 sps:$4 sm:$0xff]  }
 0x6b0   : > { %5246 = vmatpush1.bf16.msra.mxu1 %v13598_v28  ;;  %v13675_v28 = vld [vmem:[%s15367_s23 + $0xfa4] ss:$24 sps:$4 sm:$0xff]  }
 0x6b1   : > { %5247 = vmatprep.subr.bf16.mxu1 %v13603_v29  ;;  %v13673_v29 = vld [vmem:[%s15367_s23 + $0xfa0] ss:$24 sps:$4 sm:$0xff]  }
 0x6b4   : > { %5248 = vmatpush1.bf16.msra.mxu1 %v13601_v30  ;;  %v13678_v30 = vld [vmem:[%s15367_s23 + $0xfd4] ss:$24 sps:$4 sm:$0xff]  }
 0x6b5   : > { %5249 = vmatprep.subr.bf16.mxu1 %v13606_v31  ;;  %v13676_v31 = vld [vmem:[%s15367_s23 + $0xfd0] ss:$24 sps:$4 sm:$0xff]  }
 0x6b8   : > { %5250 = vmatpush1.bf16.msra.mxu1 %v13604_v32  ;;  %v13681_v32 = vld [vmem:[%s15367_s23 + $0x1004] ss:$24 sps:$4 sm:$0xff]  }
 0x6b9   : > { %5251 = vmatprep.subr.bf16.mxu1 %v13609_v33  ;;  %v13679_v33 = vld [vmem:[%s15367_s23 + $0x1000] ss:$24 sps:$4 sm:$0xff]  }
 0x6bc   : > { %5252 = vmatpush1.bf16.msra.mxu1 %v13607_v34  ;;  %v13684_v34 = vld [vmem:[%s15367_s23 + $0x1034] ss:$24 sps:$4 sm:$0xff]  }
 0x6bd   : > { %5253 = vmatprep.subr.bf16.mxu1 %v13612_v35  ;;  %v13682_v35 = vld [vmem:[%s15367_s23 + $0x1030] ss:$24 sps:$4 sm:$0xff]  }
 0x6c0   : > { %5254 = vmatpush1.bf16.msra.mxu1 %v13610_v36  ;;  %v13687_v36 = vld [vmem:[%s15367_s23 + $0x1064] ss:$24 sps:$4 sm:$0xff]  }
 0x6c1   : > { %5255 = vmatprep.subr.bf16.mxu1 %v13615_v38  ;;  %v13685_v38 = vld [vmem:[%s15367_s23 + $0x1060] ss:$24 sps:$4 sm:$0xff]  }
 0x6c4   : > { %5256 = vmatpush1.bf16.msra.mxu1 %v13613_v40  ;;  %v13690_v40 = vld [vmem:[%s15367_s23 + $0x1094] ss:$24 sps:$4 sm:$0xff]  }
 0x6c5   : > { %5268 = vmatprep.subr.bf16.mxu1 %v13618_v41  ;;  %v13688_v41 = vld [vmem:[%s15367_s23 + $0x1090] ss:$24 sps:$4 sm:$0xff]  }
 0x6c7   : > { %5258 = vmatmul.mubr.bf16.vlgmr.msra.gmra.mrb[12].mxu1 %v15454_v7 }
 0x6c8   : > { %5269 = vmatpush1.bf16.msra.mxu1 %v13616_v42  ;;  %5300 = vmatprep.mubr.bf16.mxu1 %v15485_v37  ;;  %v13693_v42 = vld [vmem:[%s15367_s23 + $0x10c4] ss:$24 sps:$4 sm:$0xff]  }
 0x6c9   : > { %5270 = vmatprep.subr.bf16.mxu1 %v13621_v12  ;;  %v13691_v12 = vld [vmem:[%s15367_s23 + $0x10c0] ss:$24 sps:$4 sm:$0xff]  }
 0x6cc   : > { %5271 = vmatpush1.bf16.msra.mxu1 %v13619_v56  ;;  %v13696_v56 = vld [vmem:[%s15367_s23 + $0x10f4] ss:$24 sps:$4 sm:$0xff]  }
 0x6cd   : > { %5272 = vmatprep.subr.bf16.mxu1 %v13624_v8  ;;  %v13694_v8 = vld [vmem:[%s15367_s23 + $0x10f0] ss:$24 sps:$4 sm:$0xff]  }
 0x6d0   : > { %5273 = vmatpush1.bf16.msra.mxu1 %v13622_v25  ;;  %v13699_v25 = vld [vmem:[%s15367_s23 + $0x1124] ss:$24 sps:$4 sm:$0xff]  }
 0x6d1   : > { %5274 = vmatprep.subr.bf16.mxu1 %v13627_v43  ;;  %v13697_v43 = vld [vmem:[%s15367_s23 + $0x1120] ss:$24 sps:$4 sm:$0xff]  }
 0x6d4   : > { %5275 = vmatpush1.bf16.msra.mxu1 %v13625_v17  ;;  %v13702_v17 = vld [vmem:[%s15367_s23 + $0x1154] ss:$24 sps:$4 sm:$0xff]  }
 0x6d5   : > { %5276 = vmatprep.subr.bf16.mxu1 %v13630_v44  ;;  %v13700_v44 = vld [vmem:[%s15367_s23 + $0x1150] ss:$24 sps:$4 sm:$0xff]  }
 0x6d8   : > { %5277 = vmatpush1.bf16.msra.mxu1 %v13628_v58  ;;  %v13705_v58 = vld [vmem:[%s15367_s23 + $0x1184] ss:$24 sps:$4 sm:$0xff]  }
 0x6d9   : > { %5278 = vmatprep.subr.bf16.mxu1 %v13633_v46  ;;  %v13703_v46 = vld [vmem:[%s15367_s23 + $0x1180] ss:$24 sps:$4 sm:$0xff]  }
 0x6dc   : > { %5279 = vmatpush1.bf16.msra.mxu1 %v13631_v48  ;;  %v13708_v48 = vld [vmem:[%s15367_s23 + $0x11b4] ss:$24 sps:$4 sm:$0xff]  }
 0x6dd   : > { %5280 = vmatprep.subr.bf16.mxu1 %v13636_v51  ;;  %v13706_v51 = vld [vmem:[%s15367_s23 + $0x11b0] ss:$24 sps:$4 sm:$0xff]  }
 0x6e0   : > { %5281 = vmatpush1.bf16.msra.mxu1 %v13634_v39  ;;  %v13711_v39 = vld [vmem:[%s15367_s23 + $0x11e4] ss:$24 sps:$4 sm:$0xff]  }
 0x6e1   : > { %5282 = vmatprep.subr.bf16.mxu1 %v13639_v55  ;;  %v13709_v55 = vld [vmem:[%s15367_s23 + $0x11e0] ss:$24 sps:$4 sm:$0xff]  }
 0x6e4   : > { %5283 = vmatpush1.bf16.msra.mxu1 %v13637_v57 }
 0x6e5   : > { %5284 = vmatprep.subr.bf16.mxu1 %v13642_v59 }
 0x6e8   : > { %5285 = vmatpush1.bf16.msra.mxu1 %v13640_v45 }
 0x6e9   : > { %5286 = vmatprep.subr.bf16.mxu1 %v13645_v60 }
 0x6ec   : > { %5287 = vmatpush1.bf16.msra.mxu1 %v13643_v47 }
 0x6ed   : > { %5288 = vmatprep.subr.bf16.mxu1 %v13648_v61 }
 0x6f0   : > { %5289 = vmatpush1.bf16.msra.mxu1 %v13646_v62 }
 0x6f1   : > { %5290 = vmatprep.subr.bf16.mxu1 %v13651_v52 }
 0x6f4   : > { %5291 = vmatpush1.bf16.msra.mxu1 %v13649_v63  ;;  %v11726_v63 = vld [vmem:[%s15373_s13 + $0x6] sm:$0x3f] }
 0x6f5   : > { %5292 = vmatprep.subr.bf16.mxu1 %v13654_v49 }
 0x6f8   : > { %5293 = vmatpush1.bf16.msra.mxu1 %v13652_v0 }
 0x6f9   : > { %5294 = vmatprep.subr.bf16.mxu1 %v13657_v1  ;;  %v5372_v1 = vrot.slane %v11726_v63, %v15708_v13 }
 0x6fc   : > { %5295 = vmatpush1.bf16.msra.mxu1 %v13655_v3 }
 0x6fd   : > { %5296 = vmatprep.subr.bf16.mxu1 %v13660_v5  ;;  %v5376_v5 = vrot.slane %v11726_v63, %v15711_v16 }
 0x700   : > { %5297 = vmatpush1.bf16.msra.mxu1 %v13658_v6  ;;  %v5380_v6 = vrot.slane %v11726_v63, %v15715_v18 }
 0x701   : > { %5298 = vmatprep.subr.bf16.mxu1 %v13663_v9 }
 0x704   : > { %5299 = vmatpush1.bf16.msra.mxu1 %v13661_v14 }
 0x705   : > { %5311 = vmatprep.subr.bf16.mxu1 %v13666_v19  ;;  %v5384_v19 = vrot.slane %v11726_v63, %v15719_v20 }
 0x707   : > { %5301 = vmatmul.mubr.bf16.vlgmr.msra.gmra.mrb[12].mxu1 %v15526_v15 }
 0x708   : > { %5312 = vmatpush1.bf16.msra.mxu1 %v13664_v2  ;;  %5343 = vmatprep.mubr.bf16.mxu1 %v15534_v23 }
 0x709   : > { %5313 = vmatprep.subr.bf16.mxu1 %v13669_v21 }
 0x70c   : > { %5314 = vmatpush1.bf16.msra.mxu1 %v13667_v22 }
 0x70d   : > { %5315 = vmatprep.subr.bf16.mxu1 %v13672_v24 }
 0x710   : > { %5316 = vmatpush1.bf16.msra.mxu1 %v13670_v27 }
 0x711   : > { %5317 = vmatprep.subr.bf16.mxu1 %v13675_v28 }
 0x714   : > { %5318 = vmatpush1.bf16.msra.mxu1 %v13673_v29 }
 0x715   : > { %5319 = vmatprep.subr.bf16.mxu1 %v13678_v30 }
 0x718   : > { %5320 = vmatpush1.bf16.msra.mxu1 %v13676_v31 }
 0x719   : > { %5321 = vmatprep.subr.bf16.mxu1 %v13681_v32 }
 0x71c   : > { %5322 = vmatpush1.bf16.msra.mxu1 %v13679_v33 }
 0x71d   : > { %5323 = vmatprep.subr.bf16.mxu1 %v13684_v34 }
 0x720   : > { %5324 = vmatpush1.bf16.msra.mxu1 %v13682_v35 }
 0x721   : > { %5325 = vmatprep.subr.bf16.mxu1 %v13687_v36 }
 0x724   : > { %5326 = vmatpush1.bf16.msra.mxu1 %v13685_v38 }
 0x725   : > { %5327 = vmatprep.subr.bf16.mxu1 %v13690_v40 }
 0x728   : > { %5328 = vmatpush1.bf16.msra.mxu1 %v13688_v41 }
 0x729   : > { %5329 = vmatprep.subr.bf16.mxu1 %v13693_v42 }
 0x72c   : > { %5330 = vmatpush1.bf16.msra.mxu1 %v13691_v12 }
 0x72d   : > { %5331 = vmatprep.subr.bf16.mxu1 %v13696_v56 }
 0x730   : > { %5332 = vmatpush1.bf16.msra.mxu1 %v13694_v8 }
 0x731   : > { %5333 = vmatprep.subr.bf16.mxu1 %v13699_v25  ;;  %v5388_v25 = vrot.slane %v11726_v63, %v15724_v53 }
 0x734   : > { %5334 = vmatpush1.bf16.msra.mxu1 %v13697_v43  ;;  %v5392_v43 = vrot.slane %v11726_v63, %v15727_v54 }
 0x735   : > { %5335 = vmatprep.subr.bf16.mxu1 %v13702_v17 }
 0x738   : > { %5336 = vmatpush1.bf16.msra.mxu1 %v13700_v44 }
 0x739   : > { %5337 = vmatprep.subr.bf16.mxu1 %v13705_v58 }
 0x73c   : > { %5338 = vmatpush1.bf16.msra.mxu1 %v13703_v46 }
 0x73d   : > { %5339 = vmatprep.subr.bf16.mxu1 %v13708_v48 }
 0x740   : > { %5340 = vmatpush1.bf16.msra.mxu1 %v13706_v51 }
 0x741   : > { %5341 = vmatprep.subr.bf16.mxu1 %v13711_v39 }
 0x744   : > { %5342 = vmatpush1.bf16.msra.mxu1 %v13709_v55 }
 0x747   : > { %5344 = vmatmul.mubr.bf16.vlgmr.msra.gmra.mrb[12].mxu1 %v15598_v26 }
 0x748   : > { %7696 = vmatprep.mubr.bf16.mxu1 %v15432_v50 }
 0x74e   : > { %v5216_v57 = vpop.f32.mrb[12].mxu0 }
 0x74f   : > { %v5218_v59 = vpop.f32.mrb[13].mxu0  ;;  %14611 = vtanh.f32 %v5216_v57 }
 0x750   : > { %v5220_v45 = vpop.f32.mrb[14].mxu0  ;;  %14613 = vtanh.f32 %v5218_v59 }
 0x751   : > { %v5222_v60 = vpop.f32.mrb[15].mxu0  ;;  %14615 = vtanh.f32 %v5220_v45 }
 0x752   : > { %14617 = vtanh.f32 %v5222_v60 }
 0x759   : > { %v14612_v49 = vpop.eup %14611 }
 0x75a   : > { %v5087_v47 = vpop.f32.mrb[8].mxu1  ;;  %v14614_v0 = vpop.eup %14613  ;;  %v5401_v27 = vmul.f32 %v14612_v49, %v5380_v6 }
 0x75b   : > { %14619 = vtanh.f32 %v5087_v47  ;;  %v5089_v61 = vpop.f32.mrb[9].mxu1  ;;  %v14616_v3 = vpop.eup %14615  ;;  %v5402_v30 = vmul.f32 %v14614_v0, %v5384_v19 }
 0x75c   : > { %14621 = vtanh.f32 %v5089_v61  ;;  %v5091_v62 = vpop.f32.mrb[10].mxu1  ;;  %v14618_v9 = vpop.eup %14617  ;;  %v5407_v33 = vmul.f32 %v14616_v3, %v5380_v6 }
 0x75d   : > { %14623 = vtanh.f32 %v5091_v62  ;;  %v5093_v52 = vpop.f32.mrb[11].mxu1  ;;  %v5408_v35 = vmul.f32 %v14618_v9, %v5384_v19  ;;  %v11727_v19 = vld [vmem:[%s15375_s21 + $0x18] sm:$0xff] }
 0x75e   : > { %14625 = vtanh.f32 %v5093_v52 }
 0x765   : > { %v14620_v14 = vpop.eup %14619 }
 0x766   : > { %v14622_v2 = vpop.eup %14621  ;;  %v5399_v21 = vmul.f32 %v14620_v14, %v5372_v1 }
 0x767   : > { %v14624_v22 = vpop.eup %14623  ;;  %v5400_v24 = vmul.f32 %v14622_v2, %v5376_v5  ;;  %v5586_v2 = vcombine.high %v11727_v19, %v11727_v19 }
 0x768   : > { %v14626_v28 = vpop.eup %14625  ;;  %v5405_v29 = vmul.f32 %v14624_v22, %v5372_v1 }
 0x769   : > { %v5411_v31 = vadd.f32 %v5400_v24, %v5399_v21  ;;  %v5406_v32 = vmul.f32 %v14626_v28, %v5376_v5  ;;  %5592 = vmatprep.subr.mxu0 %v5586_v2  ;;  %v16125_v28 = vld [vmem:[%s15375_s21 + $0x20] sm:$0xff] }
 0x76a   : > { %5593 = vmatpush1.xpose.msra.mxu0 %v11727_v19  ;;  %v13840_v19 = vld [vmem:[%s15367_s23 + $0x15cc] ss:$24 sps:$4 sm:$0xff]   ;;  %v13844_v2 = vld [vmem:[%s15367_s23 + $0x15f8] ss:$24 sps:$4 sm:$0xff]  }
 0x76b   : > { %v5412_v34 = vadd.f32 %v5411_v31, %v5401_v27  ;;  %v5418_v36 = vadd.f32 %v5406_v32, %v5405_v29  ;;  %v5587_v29 = vcombine.high %v16125_v28, %v16125_v28  ;;  %v13720_v31 = vld [vmem:[%s15367_s23 + $0x120c] ss:$24 sps:$4 sm:$0xff]   ;;  %v13724_v32 = vld [vmem:[%s15367_s23 + $0x1238] ss:$24 sps:$4 sm:$0xff]  }
 0x76c   : > { %7664 = vmatprep.subr.bf16.mxu1 %v13720_v31  ;;  %v13858_v31 = vld [vmem:[%s15367_s23 + $0x165c] ss:$24 sps:$4 sm:$0xff]  }
 0x76d   : > { %v5413_v38 = vadd.f32 %v5412_v34, %v5402_v30  ;;  %v5419_v40 = vadd.f32 %v5418_v36, %v5407_v33  ;;  %5662 = vmatprep.subr.mxu0 %v5587_v29  ;;  %v13718_v30 = vld [vmem:[%s15367_s23 + $0x1208] ss:$24 sps:$4 sm:$0xff]   ;;  %v13726_v33 = vld [vmem:[%s15367_s23 + $0x123c] ss:$24 sps:$4 sm:$0xff]   ;;  %v13736_v36 = vld [vmem:[%s15367_s23 + $0x1298] ss:$24 sps:$4 sm:$0xff]  }
 0x76e   : > { %7665 = vmatpush1.bf16.msra.mxu1 %v13718_v30  ;;  %v13730_v34 = vld [vmem:[%s15367_s23 + $0x1268] ss:$24 sps:$4 sm:$0xff]   ;;  %v13856_v30 = vld [vmem:[%s15367_s23 + $0x1658] ss:$24 sps:$4 sm:$0xff]  }
 0x76f   : > { %v5420_v41 = vadd.f32 %v5419_v40, %v5408_v35  ;;  %7666 = vmatprep.subr.bf16.mxu1 %v13726_v33  ;;  %v13732_v35 = vld [vmem:[%s15367_s23 + $0x126c] ss:$24 sps:$4 sm:$0xff]   ;;  %v13742_v40 = vld [vmem:[%s15367_s23 + $0x12c8] ss:$24 sps:$4 sm:$0xff]  }
 0x772   : > { %7667 = vmatpush1.bf16.msra.mxu1 %v13724_v32  ;;  %v14691_v32 = vld [vmem:[#allocation3 + $0x30] sm:$0xff] }
 0x773   : > { %7668 = vmatprep.subr.bf16.mxu1 %v13732_v35 }
 0x776   : > { %7669 = vmatpush1.bf16.msra.mxu1 %v13730_v34  ;;  %v14692_v34 = vld [vmem:[#allocation3 + $0x38] sm:$0xff] }
 0x81a   : > { %v5345_v42 = vpop.f32.mrb[12].mxu1 }
 0x81b   : > { %14627 = vtanh.f32 %v5345_v42  ;;  %v5347_v12 = vpop.f32.mrb[13].mxu1  ;;  %v13748_v42 = vld [vmem:[%s15367_s23 + $0x12f8] ss:$24 sps:$4 sm:$0xff]  }
 0x81c   : > { %14629 = vtanh.f32 %v5347_v12  ;;  %v5349_v56 = vpop.f32.mrb[14].mxu1  ;;  %v13750_v12 = vld [vmem:[%s15367_s23 + $0x12fc] ss:$24 sps:$4 sm:$0xff]  }
 0x81d   : > { %14631 = vtanh.f32 %v5349_v56  ;;  %v5351_v8 = vpop.f32.mrb[15].mxu1  ;;  %v13754_v56 = vld [vmem:[%s15367_s23 + $0x1328] ss:$24 sps:$4 sm:$0xff]  }
 0x81e   : > { %14633 = vtanh.f32 %v5351_v8  ;;  %v13756_v8 = vld [vmem:[%s15367_s23 + $0x132c] ss:$24 sps:$4 sm:$0xff]  }
 0x825   : > { %v14628_v17 = vpop.eup %14627 }
 0x826   : > { %v14630_v44 = vpop.eup %14629  ;;  %v5403_v58 = vmul.f32 %v14628_v17, %v5388_v25  ;;  %v13766_v17 = vld [vmem:[%s15367_s23 + $0x1388] ss:$24 sps:$4 sm:$0xff]  }
 0x827   : > { %v14632_v46 = vpop.eup %14631  ;;  %v5404_v48 = vmul.f32 %v14630_v44, %v5392_v43  ;;  %v13768_v44 = vld [vmem:[%s15367_s23 + $0x138c] ss:$24 sps:$4 sm:$0xff]  }
 0x828   : > { %v14634_v51 = vpop.eup %14633  ;;  %v5414_v39 = vadd.f32 %v5413_v38, %v5403_v58  ;;  %v5409_v55 = vmul.f32 %v14632_v46, %v5388_v25  ;;  %v13738_v38 = vld [vmem:[%s15367_s23 + $0x129c] ss:$24 sps:$4 sm:$0xff]   ;;  %v13760_v25 = vld [vmem:[%s15367_s23 + $0x1358] ss:$24 sps:$4 sm:$0xff]  }
 0x829   : > { %v5410_v57 = vmul.f32 %v14634_v51, %v5392_v43  ;;  %7670 = vmatprep.subr.bf16.mxu1 %v13738_v38  ;;  %v13762_v43 = vld [vmem:[%s15367_s23 + $0x135c] ss:$24 sps:$4 sm:$0xff]   ;;  %v13772_v58 = vld [vmem:[%s15367_s23 + $0x13b8] ss:$24 sps:$4 sm:$0xff]   ;;  %v13780_v51 = vld [vmem:[%s15367_s23 + $0x13ec] ss:$24 sps:$4 sm:$0xff]  }
 0x82a   : > { %v5415_v59 = vadd.f32 %v5414_v39, %v5404_v48  ;;  %v5421_v45 = vadd.f32 %v5420_v41, %v5409_v55  ;;  %7671 = vmatpush1.bf16.msra.mxu1 %v13736_v36  ;;  %v13744_v41 = vld [vmem:[%s15367_s23 + $0x12cc] ss:$24 sps:$4 sm:$0xff]   ;;  %v13774_v46 = vld [vmem:[%s15367_s23 + $0x13bc] ss:$24 sps:$4 sm:$0xff]   ;;  %v13778_v48 = vld [vmem:[%s15367_s23 + $0x13e8] ss:$24 sps:$4 sm:$0xff]  }
 0x82b   : > { %7672 = vmatprep.subr.bf16.mxu1 %v13744_v41  ;;  %v13784_v39 = vld [vmem:[%s15367_s23 + $0x1418] ss:$24 sps:$4 sm:$0xff]   ;;  %v13786_v55 = vld [vmem:[%s15367_s23 + $0x141c] ss:$24 sps:$4 sm:$0xff]  }
 0x82c   : > { %5416 = vadd.xlane.f32.xlu1 %v5415_v59  ;;  %v5422_v60 = vadd.f32 %v5421_v45, %v5410_v57  ;;  %v13790_v57 = vld [vmem:[%s15367_s23 + $0x1448] ss:$24 sps:$4 sm:$0xff]   ;;  %v13792_v59 = vld [vmem:[%s15367_s23 + $0x144c] ss:$24 sps:$4 sm:$0xff]   ;;  %v13796_v45 = vld [vmem:[%s15367_s23 + $0x1478] ss:$24 sps:$4 sm:$0xff]  }
 0x82d   : > { %v14693_v36 = vld [vmem:[#allocation3 + $0x40] sm:$0xff] }
 0x82e   : > { %5423 = vadd.xlane.f32.xlu0 %v5422_v60  ;;  %7673 = vmatpush1.bf16.msra.mxu1 %v13742_v40  ;;  %v13798_v60 = vld [vmem:[%s15367_s23 + $0x147c] ss:$24 sps:$4 sm:$0xff]   ;;  %v14694_v40 = vld [vmem:[#allocation3 + $0x48] sm:$0xff] }
 0x82f   : > { %7674 = vmatprep.subr.bf16.mxu1 %v13750_v12 }
 0x832   : > { %7675 = vmatpush1.bf16.msra.mxu1 %v13748_v42  ;;  %v14695_v42 = vld [vmem:[#allocation3 + $0x50] sm:$0xff] }
 0x833   : > { %7676 = vmatprep.subr.bf16.mxu1 %v13756_v8 }
 0x836   : > { %7677 = vmatpush1.bf16.msra.mxu1 %v13754_v56  ;;  %v14696_v56 = vld [vmem:[#allocation3] sm:$0xff] }
 0x837   : > { %7678 = vmatprep.subr.bf16.mxu1 %v13762_v43 }
 0x83a   : > { %7679 = vmatpush1.bf16.msra.mxu1 %v13760_v25  ;;  %v14697_v25 = vld [vmem:[#allocation3 + $0x8] sm:$0xff] }
 0x83b   : > { %7680 = vmatprep.subr.bf16.mxu1 %v13768_v44 }
 0x83e   : > { %7681 = vmatpush1.bf16.msra.mxu1 %v13766_v17 }
 0x83f   : > { %7682 = vmatprep.subr.bf16.mxu1 %v13774_v46 }
 0x842   : > { %7683 = vmatpush1.bf16.msra.mxu1 %v13772_v58  ;;  %v14698_v58 = vld [vmem:[#allocation3 + $0x10] sm:$0xff] }
 0x843   : > { %7684 = vmatprep.subr.bf16.mxu1 %v13780_v51 }
 0x846   : > { %7685 = vmatpush1.bf16.msra.mxu1 %v13778_v48  ;;  %v14699_v48 = vld [vmem:[#allocation3 + $0x18] sm:$0xff] }
 0x847   : > { %7686 = vmatprep.subr.bf16.mxu1 %v13786_v55 }
 0x84a   : > { %7687 = vmatpush1.bf16.msra.mxu1 %v13784_v39  ;;  %v14700_v39 = vld [vmem:[#allocation3 + $0x58] sm:$0xff] }
 0x84b   : > { %7688 = vmatprep.subr.bf16.mxu1 %v13792_v59 }
 0x84e   : > { %7689 = vmatpush1.bf16.msra.mxu1 %v13790_v57 }
 0x84f   : > { %7690 = vmatprep.subr.bf16.mxu1 %v13798_v60  ;;  %v13864_v60 = vld [vmem:[%s15367_s23 + $0x168c] ss:$24 sps:$4 sm:$0xff]  }
 0x852   : > { %7691 = vmatpush1.bf16.msra.mxu1 %v13796_v45  ;;  %v13862_v45 = vld [vmem:[%s15367_s23 + $0x1688] ss:$24 sps:$4 sm:$0xff]  }
 0x8b9   : > { %v5417_v47 = vpop.xlane.xlu1 %5416 }
 0x8ba   : > { %v5430_v62 = vrot.slane %v5417_v47, %v15733_v10  ;;  %v13802_v47 = vld [vmem:[%s15367_s23 + $0x14a8] ss:$24 sps:$4 sm:$0xff]  }
 0x8bb   : > { %v5424_v61 = vpop.xlane.xlu0 %5423 }
 0x8bc   : > { %v5434_v52 = vrot.slane %v5424_v61, %v15733_v10  ;;  %v13804_v61 = vld [vmem:[%s15367_s23 + $0x14ac] ss:$24 sps:$4 sm:$0xff]  }
 0x8bd   : > { %7692 = vmatprep.subr.bf16.mxu1 %v13804_v61 }
 0x8be   : > { %v5435_v63 = vsel %vm2868_vm0, %v5434_v52, %v5430_v62  ;;  %7693 = vmatpush1.bf16.msra.mxu1 %v13802_v47  ;;  %v13808_v62 = vld [vmem:[%s15367_s23 + $0x14d8] ss:$24 sps:$4 sm:$0xff]   ;;  %v13810_v52 = vld [vmem:[%s15367_s23 + $0x14dc] ss:$24 sps:$4 sm:$0xff]  }
 0x8bf   : > { %v5437_v49 = vsel %vm670_vm1, -inf, %v5435_v63  ;;  %7694 = vmatprep.subr.bf16.mxu1 %v13810_v52  ;;  %v13814_v63 = vld [vmem:[%s15367_s23 + $0x1508] ss:$24 sps:$4 sm:$0xff]  }
 0x8c0   : > { %v5438_v0 = vsel %vm2872_vm2, %v5437_v49, -inf }
 0x8c1   : > { %5439 = vmax.xlane.f32.xlu0 %v5438_v0  ;;  %v13820_v0 = vld [vmem:[%s15367_s23 + $0x1538] ss:$24 sps:$4 sm:$0xff]  }
 0x8c2   : > { %7695 = vmatpush1.bf16.msra.mxu1 %v13808_v62 }
 0x8c5   : > { %7697 = vmatmul.mubr.bf16.vlgmr.msra.gmra.mrb[16].mxu1 %v15454_v7 }
 0x8c6   : > { %7739 = vmatprep.mubr.bf16.mxu1 %v15485_v37 }
 0x94e   : > { %v5440_v1 = vpop.xlane.xlu0 %5439 }
 0x94f   : > { %v5441_v3 = vsub.f32 %v5437_v49, %v5440_v1  ;;  %v13816_v49 = vld [vmem:[%s15367_s23 + $0x150c] ss:$24 sps:$4 sm:$0xff]   ;;  %v13822_v1 = vld [vmem:[%s15367_s23 + $0x153c] ss:$24 sps:$4 sm:$0xff]  }
 0x950   : > { %7707 = vmatprep.subr.bf16.mxu1 %v13816_v49 }
 0x951   : > { %v5442_v5 = vmul.f32 1.442695, %v5441_v3  ;;  %7708 = vmatpush1.bf16.msra.mxu1 %v13814_v63  ;;  %v13826_v3 = vld [vmem:[%s15367_s23 + $0x1568] ss:$24 sps:$4 sm:$0xff]  }
 0x952   : > { %7709 = vmatprep.subr.bf16.mxu1 %v13822_v1  ;;  %v14701_v63 = vld [vmem:[#allocation3 + $0x20] sm:$0xff] }
 0x953   : > { %14635 = vpow2.f32 %v5442_v5  ;;  %v13828_v5 = vld [vmem:[%s15367_s23 + $0x156c] ss:$24 sps:$4 sm:$0xff]  }
 0x955   : > { %7710 = vmatpush1.bf16.msra.mxu1 %v13820_v0 }
 0x956   : > { %7711 = vmatprep.subr.bf16.mxu1 %v13828_v5 }
 0x959   : > { %7712 = vmatpush1.bf16.msra.mxu1 %v13826_v3 }
 0x95d   : > { %v14636_v6 = vpop.eup %14635 }
 0x95e   : > { %v5444_v9 = vsel %vm2872_vm2, %v14636_v6, 0.0 }
 0x95f   : > { %5445 = vadd.xlane.f32.xlu1 %v5444_v9  ;;  %v13834_v9 = vld [vmem:[%s15367_s23 + $0x159c] ss:$24 sps:$4 sm:$0xff]  }
 0x960   : > { %7713 = vmatprep.subr.bf16.mxu1 %v13834_v9 }
 0x9ec   : > { %v5446_v14 = vpop.xlane.xlu1 %5445 }
 0x9ed   : > { %14637 = vrcp.f32 %v5446_v14  ;;  %v13838_v14 = vld [vmem:[%s15367_s23 + $0x15c8] ss:$24 sps:$4 sm:$0xff]  }
 0x9f7   : > { %v14638_v21 = vpop.eup %14637 }
 0x9f8   : > { %v5448_v22 = vmul.f32 %v14638_v21, %v14636_v6  ;;  %v13832_v6 = vld [vmem:[%s15367_s23 + $0x1598] ss:$24 sps:$4 sm:$0xff]   ;;  %v13846_v21 = vld [vmem:[%s15367_s23 + $0x15fc] ss:$24 sps:$4 sm:$0xff]  }
 0x9f9   : > { %7714 = vmatpush1.bf16.msra.mxu1 %v13832_v6 }
 0x9fa   : > { %v5459_v24 = vrot.slane %v5448_v22, %v15711_v16  ;;  %11733 = vst.msk [vmem:[%s15756_s30 + $0x2] sm:$0x3] %vm2872_vm2, %v5448_v22  ;;  %v5452_v27 = vrot.slane %v5448_v22, %v15708_v13  ;;  %7715 = vmatprep.subr.bf16.mxu1 %v13840_v19  ;;  %v13850_v22 = vld [vmem:[%s15367_s23 + $0x1628] ss:$24 sps:$4 sm:$0xff]  }
 0x9fc   : > { %5461 = vbcast.lane.b32.xlu1 %v5459_v24, 256  ;;  %5454 = vbcast.lane.b32.xlu0 %v5452_v27, 256  ;;  %v13852_v24 = vld [vmem:[%s15367_s23 + $0x162c] ss:$24 sps:$4 sm:$0xff]  }
 0x9fd   : > { %7716 = vmatpush1.bf16.msra.mxu1 %v13838_v14 }
 0x9fe   : > { %7717 = vmatprep.subr.bf16.mxu1 %v13846_v21 }
 0xa01   : > { %7718 = vmatpush1.bf16.msra.mxu1 %v13844_v2 }
 0xa02   : > { %7719 = vmatprep.subr.bf16.mxu1 %v13852_v24  ;;  %v13868_v24 = vld [vmem:[%s15367_s23 + $0x16b8] ss:$24 sps:$4 sm:$0xff]  }
 0xa05   : > { %7720 = vmatpush1.bf16.msra.mxu1 %v13850_v22 }
 0xa06   : > { %7721 = vmatprep.subr.bf16.mxu1 %v13858_v31 }
 0xa09   : > { %7722 = vmatpush1.bf16.msra.mxu1 %v13856_v30 }
 0xa0a   : > { %7723 = vmatprep.subr.bf16.mxu1 %v13864_v60 }
 0xa0d   : > { %7724 = vmatpush1.bf16.msra.mxu1 %v13862_v45 }
 0xa6e   : > { %v5462_v27 = vpop.permute.xlu1 %5461  ;;  %v5455_v29 = vpop.permute.xlu0 %5454 }
 0xa6f   : > { %v5469_v33 = vmul.f32 %v14691_v32, %v5462_v27  ;;  %v5470_v35 = vmul.f32 %v14692_v34, %v5462_v27  ;;  %v5471_v38 = vmul.f32 %v14693_v36, %v5462_v27  ;;  %v5472_v41 = vmul.f32 %v14694_v40, %v5462_v27 }
 0xa70   : > { %v16179_v12 = vmul.f32 %v14695_v42, %v5462_v27  ;;  %v5463_v8 = vmul.f32 %v14696_v56, %v5455_v29  ;;  %v5464_v43 = vmul.f32 %v14697_v25, %v5455_v29  ;;  %v5465_v46 = vmul.f32 %v14698_v58, %v5455_v29  ;;  %v13874_v58 = vld [vmem:[%s15367_s23 + $0x16e8] ss:$24 sps:$4 sm:$0xff]  }
 0xa71   : > { %v5511_v17 = vrot.slane %v5469_v33, 4  ;;  %v5523_v44 = vrot.slane %v5471_v38, 4  ;;  %v5466_v51 = vmul.f32 %v14699_v48, %v5455_v29  ;;  %v16181_v55 = vmul.f32 %v14700_v39, %v5462_v27  ;;  %v13870_v27 = vld [vmem:[%s15367_s23 + $0x16bc] ss:$24 sps:$4 sm:$0xff]  }
 0xa72   : > { %v5535_v57 = vrot.slane %v16179_v12, 4  ;;  %v5475_v59 = vrot.slane %v5463_v8, 4  ;;  %v5487_v47 = vrot.slane %v5465_v46, 4  ;;  %v5481_v61 = vrot.slane %v5464_v43, 4  ;;  %7725 = vmatprep.subr.bf16.mxu1 %v13870_v27 }
 0xa73   : > { %v5517_v62 = vrot.slane %v5470_v35, 4  ;;  %v5512_v52 = vadd.f32 %v5511_v17, %v5469_v33  ;;  %v5467_v49 = vmul.f32 %v14701_v63, %v5455_v29  ;;  %v5493_v1 = vrot.slane %v5466_v51, 4  ;;  %7726 = vmatpush1.bf16.msra.mxu1 %v13868_v24 }
 0xa74   : > { %v5476_v0 = vadd.f32 %v5475_v59, %v5463_v8  ;;  %v5529_v3 = vrot.slane %v5472_v41, 4  ;;  %v5482_v5 = vadd.f32 %v5481_v61, %v5464_v43  ;;  %v5488_v14 = vadd.f32 %v5487_v47, %v5465_v46  ;;  %v13876_v46 = vld [vmem:[%s15367_s23 + $0x16ec] ss:$24 sps:$4 sm:$0xff]  }
 0xa75   : > { %v5518_v6 = vadd.f32 %v5517_v62, %v5470_v35  ;;  %v5513_v9 = vrot.slane %v5512_v52, 2  ;;  %v5494_v2 = vadd.f32 %v5493_v1, %v5466_v51  ;;  %v5524_v22 = vadd.f32 %v5523_v44, %v5471_v38  ;;  %v14702_v35 = vld [vmem:[#allocation3 + $0x28] sm:$0xff]  ;;  %7727 = vmatprep.subr.bf16.mxu1 %v13876_v46 }
 0xa76   : > { %v5477_v19 = vrot.slane %v5476_v0, 2  ;;  %v5530_v21 = vadd.f32 %v5529_v3, %v5472_v41  ;;  %v5483_v30 = vrot.slane %v5482_v5, 2  ;;  %v5489_v33 = vrot.slane %v5488_v14, 2  ;;  %v11729_v59 = vld [vmem:[%s15375_s21 + $0x28] sm:$0xff] }
 0xa77   : > { %v5519_v31 = vrot.slane %v5518_v6, 2  ;;  %v5514_v32 = vadd.f32 %v5513_v9, %v5512_v52  ;;  %v5495_v36 = vrot.slane %v5494_v2, 2  ;;  %v5525_v42 = vrot.slane %v5524_v22, 2  ;;  %7728 = vmatpush1.bf16.msra.mxu1 %v13874_v58  ;;  %v13882_v9 = vld [vmem:[%s15367_s23 + $0x171c] ss:$24 sps:$4 sm:$0xff]  }
 0xa78   : > { %v5478_v34 = vadd.f32 %v5477_v19, %v5476_v0  ;;  %v5531_v40 = vrot.slane %v5530_v21, 2  ;;  %v5468_v56 = vmul.f32 %v14702_v35, %v5455_v29  ;;  %v5484_v8 = vadd.f32 %v5483_v30, %v5482_v5  ;;  %7729 = vmatprep.subr.bf16.mxu1 %v13882_v9  ;;  %v13735_v9 = vld [vmem:[%s15367_s23 + $0x1294] ss:$24 sps:$4 sm:$0xff]  }
 0xa79   : > { %v5520_v25 = vadd.f32 %v5519_v31, %v5518_v6  ;;  %v5515_v41 = vrot.slane %v5514_v32, 1  ;;  %v5499_v38 = vrot.slane %v5467_v49, 4  ;;  %v5496_v17 = vadd.f32 %v5495_v36, %v5494_v2  ;;  %v13880_v6 = vld [vmem:[%s15367_s23 + $0x1718] ss:$24 sps:$4 sm:$0xff]   ;;  %v13888_v36 = vld [vmem:[%s15367_s23 + $0x174c] ss:$24 sps:$4 sm:$0xff]  }
 0xa7a   : > { %v5479_v43 = vrot.slane %v5478_v34, 1  ;;  %v5532_v44 = vadd.f32 %v5531_v40, %v5530_v21  ;;  %v5485_v48 = vrot.slane %v5484_v8, 1  ;;  %v5490_v45 = vadd.f32 %v5489_v33, %v5488_v14 }
 0xa7b   : > { %v5521_v51 = vrot.slane %v5520_v25, 1  ;;  %v5516_v39 = vadd.f32 %v5515_v41, %v5514_v32  ;;  %v5497_v47 = vrot.slane %v5496_v17, 1  ;;  %v5526_v61 = vadd.f32 %v5525_v42, %v5524_v22  ;;  %7730 = vmatpush1.bf16.msra.mxu1 %v13880_v6  ;;  %v13918_v6 = vld [vmem:[%s15367_s23 + $0x183c] ss:$24 sps:$4 sm:$0xff]  }
 0xa7c   : > { %v5480_v60 = vadd.f32 %v5479_v43, %v5478_v34  ;;  %v5533_v29 = vrot.slane %v5532_v44, 1  ;;  %v5486_v62 = vadd.f32 %v5485_v48, %v5484_v8  ;;  %v5505_v63 = vrot.slane %v5468_v56, 4  ;;  %v13886_v34 = vld [vmem:[%s15367_s23 + $0x1748] ss:$24 sps:$4 sm:$0xff]   ;;  %7731 = vmatprep.subr.bf16.mxu1 %v13888_v36  ;;  %v13717_v43 = vld [vmem:[%s15367_s23 + $0x1204] ss:$24 sps:$4 sm:$0xff]  }
 0xa7d   : > { %v5522_v52 = vadd.f32 %v5521_v51, %v5520_v25  ;;  %v5498_v1 = vadd.f32 %v5497_v47, %v5496_v17  ;;  %v5588_v5 = vcombine.high %v11729_v59, %v11729_v59  ;;  %v5541_v14 = vrot.slane %v16181_v55, 4  ;;  %v13894_v25 = vld [vmem:[%s15367_s23 + $0x177c] ss:$24 sps:$4 sm:$0xff]   ;;  %v13898_v48 = vld [vmem:[%s15367_s23 + $0x17a8] ss:$24 sps:$4 sm:$0xff]  }
 0xa7e   : > { %v5571_v0 = vsel %vm2868_vm0, %v5516_v39, %v5480_v60  ;;  %v5534_v3 = vadd.f32 %v5533_v29, %v5532_v44  ;;  %v5506_v2 = vadd.f32 %v5505_v63, %v5468_v56  ;;  %v5500_v21 = vadd.f32 %v5499_v38, %v5467_v49  ;;  %v13900_v51 = vld [vmem:[%s15367_s23 + $0x17ac] ss:$24 sps:$4 sm:$0xff]   ;;  %v13715_v47 = vld [vmem:[%s15367_s23 + $0x1200] ss:$24 sps:$4 sm:$0xff]  }
 0xa7f   : > { %v5572_v19 = vsel %vm2868_vm0, %v5522_v52, %v5486_v62  ;;  %v5491_v22 = vrot.slane %v5490_v45, 1  ;;  %v5527_v24 = vrot.slane %v5526_v61, 1  ;;  %v5536_v27 = vadd.f32 %v5535_v57, %v16179_v12  ;;  %7732 = vmatpush1.bf16.msra.mxu1 %v13886_v34  ;;  %v13904_v29 = vld [vmem:[%s15367_s23 + $0x17d8] ss:$24 sps:$4 sm:$0xff]   ;;  %v13723_v62 = vld [vmem:[%s15367_s23 + $0x1234] ss:$24 sps:$4 sm:$0xff]  }
 0xa80   : > { %5656 = vmatprep.mubr.f32.mxu0 %v5572_v19  ;;  %v5574_v30 = vsel %vm2868_vm0, %v5534_v3, %v5498_v1  ;;  %v5507_v31 = vrot.slane %v5506_v2, 2  ;;  %v5542_v32 = vadd.f32 %v5541_v14, %v16181_v55  ;;  %v5501_v33 = vrot.slane %v5500_v21, 2  ;;  %7733 = vmatprep.subr.bf16.mxu1 %v13894_v25  ;;  %v13721_v52 = vld [vmem:[%s15367_s23 + $0x1230] ss:$24 sps:$4 sm:$0xff]   ;;  %v13729_v1 = vld [vmem:[%s15367_s23 + $0x1264] ss:$24 sps:$4 sm:$0xff]  }
 0xa81   : > { %5657 = vmatmul.mubr.f32.vlgmr.msra.gmra.mrb[10].mxu0 %v5571_v0  ;;  %v5537_v49 = vrot.slane %v5536_v27, 2  ;;  %v5492_v40 = vadd.f32 %v5491_v22, %v5490_v45  ;;  %v5528_v42 = vadd.f32 %v5527_v24, %v5526_v61  ;;  %v13906_v61 = vld [vmem:[%s15367_s23 + $0x17dc] ss:$24 sps:$4 sm:$0xff]   ;;  %v13910_v63 = vld [vmem:[%s15367_s23 + $0x1808] ss:$24 sps:$4 sm:$0xff]  }
 0xa82   : > { %5663 = vmatpush1.xpose.msra.mxu0 %v16125_v28  ;;  %5726 = vmatprep.mubr.f32.mxu0 %v5574_v30  ;;  %v5508_v12 = vadd.f32 %v5507_v31, %v5506_v2  ;;  %v5543_v57 = vrot.slane %v5542_v32, 2  ;;  %v5502_v35 = vadd.f32 %v5501_v33, %v5500_v21  ;;  %v13892_v28 = vld [vmem:[%s15367_s23 + $0x1778] ss:$24 sps:$4 sm:$0xff]   ;;  %v13912_v0 = vld [vmem:[%s15367_s23 + $0x180c] ss:$24 sps:$4 sm:$0xff]  }
 0xa83   : > { %5732 = vmatprep.subr.mxu0 %v5588_v5  ;;  %v5538_v56 = vadd.f32 %v5537_v49, %v5536_v27  ;;  %v5573_v17 = vsel %vm2868_vm0, %v5528_v42, %v5492_v40  ;;  %7734 = vmatpush1.bf16.msra.mxu1 %v13892_v28  ;;  %v13727_v3 = vld [vmem:[%s15367_s23 + $0x1260] ss:$24 sps:$4 sm:$0xff]   ;;  %v13733_v19 = vld [vmem:[%s15367_s23 + $0x1290] ss:$24 sps:$4 sm:$0xff]   ;;  %v13924_v14 = vld [vmem:[%s15367_s23 + $0x186c] ss:$24 sps:$4 sm:$0xff]  }
 0xa84   : > { %v5509_v55 = vrot.slane %v5508_v12, 1  ;;  %v5544_v8 = vadd.f32 %v5543_v57, %v5542_v32  ;;  %v5503_v44 = vrot.slane %v5502_v35, 1  ;;  %7735 = vmatprep.subr.bf16.mxu1 %v13900_v51  ;;  %v13916_v5 = vld [vmem:[%s15367_s23 + $0x1838] ss:$24 sps:$4 sm:$0xff]   ;;  %v13922_v2 = vld [vmem:[%s15367_s23 + $0x1868] ss:$24 sps:$4 sm:$0xff]  }
 0xa85   : > { %v5539_v58 = vrot.slane %v5538_v56, 1  ;;  %v13741_v21 = vld [vmem:[%s15367_s23 + $0x12c4] ss:$24 sps:$4 sm:$0xff]   ;;  %v13739_v22 = vld [vmem:[%s15367_s23 + $0x12c0] ss:$24 sps:$4 sm:$0xff]  }
 0xa86   : > { %v5510_v41 = vadd.f32 %v5509_v55, %v5508_v12  ;;  %v5545_v38 = vrot.slane %v5544_v8, 1  ;;  %v5504_v45 = vadd.f32 %v5503_v44, %v5502_v35  ;;  %v13928_v24 = vld [vmem:[%s15367_s23 + $0x1898] ss:$24 sps:$4 sm:$0xff]   ;;  %v13930_v27 = vld [vmem:[%s15367_s23 + $0x189c] ss:$24 sps:$4 sm:$0xff]  }
 0xa87   : > { %v5540_v60 = vadd.f32 %v5539_v58, %v5538_v56  ;;  %7736 = vmatpush1.bf16.msra.mxu1 %v13898_v48  ;;  %v13747_v30 = vld [vmem:[%s15367_s23 + $0x12f4] ss:$24 sps:$4 sm:$0xff]   ;;  %v13745_v31 = vld [vmem:[%s15367_s23 + $0x12f0] ss:$24 sps:$4 sm:$0xff]   ;;  %v13753_v49 = vld [vmem:[%s15367_s23 + $0x1324] ss:$24 sps:$4 sm:$0xff]  }
 0xa88   : > { %v5546_v46 = vadd.f32 %v5545_v38, %v5544_v8  ;;  %7737 = vmatprep.subr.bf16.mxu1 %v13906_v61  ;;  %v13934_v32 = vld [vmem:[%s15367_s23 + $0x18c8] ss:$24 sps:$4 sm:$0xff]   ;;  %v13936_v33 = vld [vmem:[%s15367_s23 + $0x18cc] ss:$24 sps:$4 sm:$0xff]   ;;  %v13940_v36 = vld [vmem:[%s15367_s23 + $0x18f8] ss:$24 sps:$4 sm:$0xff]  }
 0xa89   : > { %5727 = vmatmul.mubr.f32.vlgmr.msra.gmra.mrb[10].mxu0 %v5573_v17  ;;  %v13751_v34 = vld [vmem:[%s15367_s23 + $0x1320] ss:$24 sps:$4 sm:$0xff]   ;;  %v13942_v12 = vld [vmem:[%s15367_s23 + $0x18fc] ss:$24 sps:$4 sm:$0xff]   ;;  %v13757_v40 = vld [vmem:[%s15367_s23 + $0x1350] ss:$24 sps:$4 sm:$0xff]  }
 0xa8a   : > { %5733 = vmatpush1.xpose.msra.mxu0 %v11729_v59  ;;  %v5576_v39 = vsel %vm2868_vm0, %v5546_v46, %v5510_v41  ;;  %v5575_v59 = vsel %vm2868_vm0, %v5540_v60, %v5504_v45  ;;  %v13759_v57 = vld [vmem:[%s15367_s23 + $0x1354] ss:$24 sps:$4 sm:$0xff]   ;;  %v13946_v42 = vld [vmem:[%s15367_s23 + $0x1928] ss:$24 sps:$4 sm:$0xff]   ;;  %v13765_v56 = vld [vmem:[%s15367_s23 + $0x1384] ss:$24 sps:$4 sm:$0xff]  }
 0xa8b   : > { %7535 = vmatprep.subr.bf16.mxu0 %v13717_v43  ;;  %5796 = vmatprep.mubr.f32.mxu0 %v5576_v39  ;;  %v13948_v35 = vld [vmem:[%s15367_s23 + $0x192c] ss:$24 sps:$4 sm:$0xff]   ;;  %v13763_v55 = vld [vmem:[%s15367_s23 + $0x1380] ss:$24 sps:$4 sm:$0xff]   ;;  %v13954_v28 = vld [vmem:[%s15367_s23 + $0x195c] ss:$24 sps:$4 sm:$0xff]  }
 0xa8c   : > { %7738 = vmatpush1.bf16.msra.mxu1 %v13904_v29  ;;  %v13952_v8 = vld [vmem:[%s15367_s23 + $0x1958] ss:$24 sps:$4 sm:$0xff]   ;;  %v13771_v25 = vld [vmem:[%s15367_s23 + $0x13b4] ss:$24 sps:$4 sm:$0xff]   ;;  %v13958_v38 = vld [vmem:[%s15367_s23 + $0x1988] ss:$24 sps:$4 sm:$0xff]  }
 0xa8d   : > { %7750 = vmatprep.subr.bf16.mxu1 %v13912_v0  ;;  %v13769_v41 = vld [vmem:[%s15367_s23 + $0x13b0] ss:$24 sps:$4 sm:$0xff]   ;;  %v13960_v43 = vld [vmem:[%s15367_s23 + $0x198c] ss:$24 sps:$4 sm:$0xff]   ;;  %v13775_v44 = vld [vmem:[%s15367_s23 + $0x13e0] ss:$24 sps:$4 sm:$0xff]  }
 0xa8e   : > { %v13777_v17 = vld [vmem:[%s15367_s23 + $0x13e4] ss:$24 sps:$4 sm:$0xff]   ;;  %v13964_v58 = vld [vmem:[%s15367_s23 + $0x19b8] ss:$24 sps:$4 sm:$0xff]   ;;  %v13783_v48 = vld [vmem:[%s15367_s23 + $0x1414] ss:$24 sps:$4 sm:$0xff]  }
 0xa8f   : > { %7740 = vmatmul.mubr.bf16.vlgmr.msra.gmra.mrb[16].mxu1 %v15526_v15  ;;  %v13966_v46 = vld [vmem:[%s15367_s23 + $0x19bc] ss:$24 sps:$4 sm:$0xff]   ;;  %v13781_v51 = vld [vmem:[%s15367_s23 + $0x1410] ss:$24 sps:$4 sm:$0xff]   ;;  %v13972_v45 = vld [vmem:[%s15367_s23 + $0x19ec] ss:$24 sps:$4 sm:$0xff]  }
 0xa90   : > { %7751 = vmatpush1.bf16.msra.mxu1 %v13910_v63  ;;  %7782 = vmatprep.mubr.bf16.mxu1 %v15534_v23  ;;  %v13970_v39 = vld [vmem:[%s15367_s23 + $0x19e8] ss:$24 sps:$4 sm:$0xff]   ;;  %v13789_v60 = vld [vmem:[%s15367_s23 + $0x1444] ss:$24 sps:$4 sm:$0xff]   ;;  %v13976_v29 = vld [vmem:[%s15367_s23 + $0x1a18] ss:$24 sps:$4 sm:$0xff]  }
 0xa91   : > { %5797 = vmatmul.mubr.f32.vlgmr.msra.gmra.mrb[10].mxu0 %v5575_v59  ;;  %7752 = vmatprep.subr.bf16.mxu1 %v13918_v6  ;;  %v13978_v61 = vld [vmem:[%s15367_s23 + $0x1a1c] ss:$24 sps:$4 sm:$0xff]   ;;  %v13793_v59 = vld [vmem:[%s15367_s23 + $0x1470] ss:$24 sps:$4 sm:$0xff]   ;;  %v13984_v63 = vld [vmem:[%s15367_s23 + $0x1a4c] ss:$24 sps:$4 sm:$0xff]  }
 0xa92   : > { %7536 = vmatpush1.bf16.msra.mxu0 %v13715_v47  ;;  %7567 = vmatprep.mubr.bf16.mxu0 %v15432_v50  ;;  %v13787_v47 = vld [vmem:[%s15367_s23 + $0x1440] ss:$24 sps:$4 sm:$0xff]   ;;  %v13801_v0 = vld [vmem:[%s15367_s23 + $0x14a4] ss:$24 sps:$4 sm:$0xff]   ;;  %v13807_v6 = vld [vmem:[%s15367_s23 + $0x14d4] ss:$24 sps:$4 sm:$0xff]  }
 0xa93   : > { %7537 = vmatprep.subr.bf16.mxu0 %v13723_v62  ;;  %v13795_v62 = vld [vmem:[%s15367_s23 + $0x1474] ss:$24 sps:$4 sm:$0xff]  }
 0xa94   : > { %7753 = vmatpush1.bf16.msra.mxu1 %v13916_v5  ;;  %v13990_v5 = vld [vmem:[%s15367_s23 + $0x1a7c] ss:$24 sps:$4 sm:$0xff]  }
 0xa95   : > { %7754 = vmatprep.subr.bf16.mxu1 %v13924_v14  ;;  %v13813_v14 = vld [vmem:[%s15367_s23 + $0x1504] ss:$24 sps:$4 sm:$0xff]  }
 0xa96   : > { %7538 = vmatpush1.bf16.msra.mxu0 %v13721_v52  ;;  %v13982_v52 = vld [vmem:[%s15367_s23 + $0x1a48] ss:$24 sps:$4 sm:$0xff]  }
 0xa97   : > { %7539 = vmatprep.subr.bf16.mxu0 %v13729_v1  ;;  %v13799_v1 = vld [vmem:[%s15367_s23 + $0x14a0] ss:$24 sps:$4 sm:$0xff]  }
 0xa98   : > { %7755 = vmatpush1.bf16.msra.mxu1 %v13922_v2  ;;  %v13996_v2 = vld [vmem:[%s15367_s23 + $0x1aac] ss:$24 sps:$4 sm:$0xff]  }
 0xa99   : > { %7756 = vmatprep.subr.bf16.mxu1 %v13930_v27  ;;  %v13819_v27 = vld [vmem:[%s15367_s23 + $0x1534] ss:$24 sps:$4 sm:$0xff]  }
 0xa9a   : > { %7540 = vmatpush1.bf16.msra.mxu0 %v13727_v3  ;;  %v13988_v3 = vld [vmem:[%s15367_s23 + $0x1a78] ss:$24 sps:$4 sm:$0xff]  }
 0xa9b   : > { %7541 = vmatprep.subr.bf16.mxu0 %v13735_v9  ;;  %v13805_v9 = vld [vmem:[%s15367_s23 + $0x14d0] ss:$24 sps:$4 sm:$0xff]  }
 0xa9c   : > { %7757 = vmatpush1.bf16.msra.mxu1 %v13928_v24  ;;  %v14002_v24 = vld [vmem:[%s15367_s23 + $0x1adc] ss:$24 sps:$4 sm:$0xff]  }
 0xa9d   : > { %7758 = vmatprep.subr.bf16.mxu1 %v13936_v33  ;;  %v13831_v33 = vld [vmem:[%s15367_s23 + $0x1594] ss:$24 sps:$4 sm:$0xff]  }
 0xa9e   : > { %7542 = vmatpush1.bf16.msra.mxu0 %v13733_v19  ;;  %v13994_v19 = vld [vmem:[%s15367_s23 + $0x1aa8] ss:$24 sps:$4 sm:$0xff]  }
 0xa9f   : > { %7543 = vmatprep.subr.bf16.mxu0 %v13741_v21  ;;  %v13811_v21 = vld [vmem:[%s15367_s23 + $0x1500] ss:$24 sps:$4 sm:$0xff]  }
 0xaa0   : > { %7759 = vmatpush1.bf16.msra.mxu1 %v13934_v32  ;;  %v13823_v32 = vld [vmem:[%s15367_s23 + $0x1560] ss:$24 sps:$4 sm:$0xff]  }
 0xaa1   : > { %7760 = vmatprep.subr.bf16.mxu1 %v13942_v12  ;;  %v13843_v12 = vld [vmem:[%s15367_s23 + $0x15f4] ss:$24 sps:$4 sm:$0xff]  }
 0xaa2   : > { %7544 = vmatpush1.bf16.msra.mxu0 %v13739_v22  ;;  %v14000_v22 = vld [vmem:[%s15367_s23 + $0x1ad8] ss:$24 sps:$4 sm:$0xff]  }
 0xaa3   : > { %7545 = vmatprep.subr.bf16.mxu0 %v13747_v30  ;;  %v13817_v30 = vld [vmem:[%s15367_s23 + $0x1530] ss:$24 sps:$4 sm:$0xff]  }
 0xaa4   : > { %7761 = vmatpush1.bf16.msra.mxu1 %v13940_v36  ;;  %v13835_v36 = vld [vmem:[%s15367_s23 + $0x15c0] ss:$24 sps:$4 sm:$0xff]  }
 0xaa5   : > { %7762 = vmatprep.subr.bf16.mxu1 %v13948_v35  ;;  %v13855_v35 = vld [vmem:[%s15367_s23 + $0x1654] ss:$24 sps:$4 sm:$0xff]  }
 0xaa6   : > { %7546 = vmatpush1.bf16.msra.mxu0 %v13745_v31  ;;  %v13825_v31 = vld [vmem:[%s15367_s23 + $0x1564] ss:$24 sps:$4 sm:$0xff]  }
 0xaa7   : > { %7547 = vmatprep.subr.bf16.mxu0 %v13753_v49  ;;  %v13829_v49 = vld [vmem:[%s15367_s23 + $0x1590] ss:$24 sps:$4 sm:$0xff]  }
 0xaa8   : > { %7763 = vmatpush1.bf16.msra.mxu1 %v13946_v42  ;;  %v13847_v42 = vld [vmem:[%s15367_s23 + $0x1620] ss:$24 sps:$4 sm:$0xff]  }
 0xaa9   : > { %7764 = vmatprep.subr.bf16.mxu1 %v13954_v28  ;;  %v13867_v28 = vld [vmem:[%s15367_s23 + $0x16b4] ss:$24 sps:$4 sm:$0xff]  }
 0xaaa   : > { %7548 = vmatpush1.bf16.msra.mxu0 %v13751_v34  ;;  %v13837_v34 = vld [vmem:[%s15367_s23 + $0x15c4] ss:$24 sps:$4 sm:$0xff]  }
 0xaab   : > { %7549 = vmatprep.subr.bf16.mxu0 %v13759_v57  ;;  %v13841_v57 = vld [vmem:[%s15367_s23 + $0x15f0] ss:$24 sps:$4 sm:$0xff]  }
 0xaac   : > { %7765 = vmatpush1.bf16.msra.mxu1 %v13952_v8  ;;  %v13859_v8 = vld [vmem:[%s15367_s23 + $0x1680] ss:$24 sps:$4 sm:$0xff]  }
 0xaad   : > { %7766 = vmatprep.subr.bf16.mxu1 %v13960_v43  ;;  %v13879_v43 = vld [vmem:[%s15367_s23 + $0x1714] ss:$24 sps:$4 sm:$0xff]  }
 0xaae   : > { %7550 = vmatpush1.bf16.msra.mxu0 %v13757_v40  ;;  %v13849_v40 = vld [vmem:[%s15367_s23 + $0x1624] ss:$24 sps:$4 sm:$0xff]  }
 0xaaf   : > { %7551 = vmatprep.subr.bf16.mxu0 %v13765_v56  ;;  %v13853_v56 = vld [vmem:[%s15367_s23 + $0x1650] ss:$24 sps:$4 sm:$0xff]  }
 0xab0   : > { %7767 = vmatpush1.bf16.msra.mxu1 %v13958_v38  ;;  %v13871_v38 = vld [vmem:[%s15367_s23 + $0x16e0] ss:$24 sps:$4 sm:$0xff]  }
 0xab1   : > { %7768 = vmatprep.subr.bf16.mxu1 %v13966_v46  ;;  %v13891_v46 = vld [vmem:[%s15367_s23 + $0x1774] ss:$24 sps:$4 sm:$0xff]  }
 0xab2   : > { %7552 = vmatpush1.bf16.msra.mxu0 %v13763_v55  ;;  %v13861_v55 = vld [vmem:[%s15367_s23 + $0x1684] ss:$24 sps:$4 sm:$0xff]  }
 0xab3   : > { %7553 = vmatprep.subr.bf16.mxu0 %v13771_v25  ;;  %v13865_v25 = vld [vmem:[%s15367_s23 + $0x16b0] ss:$24 sps:$4 sm:$0xff]  }
 0xab4   : > { %7769 = vmatpush1.bf16.msra.mxu1 %v13964_v58  ;;  %v13883_v58 = vld [vmem:[%s15367_s23 + $0x1740] ss:$24 sps:$4 sm:$0xff]  }
 0xab5   : > { %7770 = vmatprep.subr.bf16.mxu1 %v13972_v45  ;;  %v13903_v45 = vld [vmem:[%s15367_s23 + $0x17d4] ss:$24 sps:$4 sm:$0xff]  }
 0xab6   : > { %7554 = vmatpush1.bf16.msra.mxu0 %v13769_v41  ;;  %v13873_v41 = vld [vmem:[%s15367_s23 + $0x16e4] ss:$24 sps:$4 sm:$0xff]  }
 0xab7   : > { %7555 = vmatprep.subr.bf16.mxu0 %v13777_v17  ;;  %v13877_v17 = vld [vmem:[%s15367_s23 + $0x1710] ss:$24 sps:$4 sm:$0xff]  }
 0xab8   : > { %7771 = vmatpush1.bf16.msra.mxu1 %v13970_v39  ;;  %v13895_v39 = vld [vmem:[%s15367_s23 + $0x17a0] ss:$24 sps:$4 sm:$0xff]  }
 0xab9   : > { %7772 = vmatprep.subr.bf16.mxu1 %v13978_v61  ;;  %v13915_v61 = vld [vmem:[%s15367_s23 + $0x1834] ss:$24 sps:$4 sm:$0xff]  }
 0xaba   : > { %7556 = vmatpush1.bf16.msra.mxu0 %v13775_v44  ;;  %v13885_v44 = vld [vmem:[%s15367_s23 + $0x1744] ss:$24 sps:$4 sm:$0xff]  }
 0xabb   : > { %7557 = vmatprep.subr.bf16.mxu0 %v13783_v48  ;;  %v13889_v48 = vld [vmem:[%s15367_s23 + $0x1770] ss:$24 sps:$4 sm:$0xff]  }
 0xabc   : > { %7773 = vmatpush1.bf16.msra.mxu1 %v13976_v29  ;;  %v13907_v29 = vld [vmem:[%s15367_s23 + $0x1800] ss:$24 sps:$4 sm:$0xff]  }
 0xabd   : > { %7774 = vmatprep.subr.bf16.mxu1 %v13984_v63  ;;  %v13927_v63 = vld [vmem:[%s15367_s23 + $0x1894] ss:$24 sps:$4 sm:$0xff]  }
 0xabe   : > { %7558 = vmatpush1.bf16.msra.mxu0 %v13781_v51  ;;  %v13897_v51 = vld [vmem:[%s15367_s23 + $0x17a4] ss:$24 sps:$4 sm:$0xff]  }
 0xabf   : > { %7559 = vmatprep.subr.bf16.mxu0 %v13789_v60  ;;  %v13901_v60 = vld [vmem:[%s15367_s23 + $0x17d0] ss:$24 sps:$4 sm:$0xff]  }
 0xac0   : > { %7775 = vmatpush1.bf16.msra.mxu1 %v13982_v52  ;;  %v13919_v52 = vld [vmem:[%s15367_s23 + $0x1860] ss:$24 sps:$4 sm:$0xff]  }
 0xac1   : > { %7776 = vmatprep.subr.bf16.mxu1 %v13990_v5  ;;  %v13939_v5 = vld [vmem:[%s15367_s23 + $0x18f4] ss:$24 sps:$4 sm:$0xff]  }
 0xac2   : > { %7560 = vmatpush1.bf16.msra.mxu0 %v13787_v47  ;;  %v13909_v47 = vld [vmem:[%s15367_s23 + $0x1804] ss:$24 sps:$4 sm:$0xff]  }
 0xac3   : > { %7561 = vmatprep.subr.bf16.mxu0 %v13795_v62  ;;  %v13913_v62 = vld [vmem:[%s15367_s23 + $0x1830] ss:$24 sps:$4 sm:$0xff]  }
 0xac4   : > { %7777 = vmatpush1.bf16.msra.mxu1 %v13988_v3  ;;  %v13931_v3 = vld [vmem:[%s15367_s23 + $0x18c0] ss:$24 sps:$4 sm:$0xff]  }
 0xac5   : > { %7778 = vmatprep.subr.bf16.mxu1 %v13996_v2  ;;  %v13951_v2 = vld [vmem:[%s15367_s23 + $0x1954] ss:$24 sps:$4 sm:$0xff]  }
 0xac6   : > { %7562 = vmatpush1.bf16.msra.mxu0 %v13793_v59  ;;  %v13921_v59 = vld [vmem:[%s15367_s23 + $0x1864] ss:$24 sps:$4 sm:$0xff]  }
 0xac7   : > { %7563 = vmatprep.subr.bf16.mxu0 %v13801_v0  ;;  %v13925_v0 = vld [vmem:[%s15367_s23 + $0x1890] ss:$24 sps:$4 sm:$0xff]  }
 0xac8   : > { %7779 = vmatpush1.bf16.msra.mxu1 %v13994_v19  ;;  %v13943_v19 = vld [vmem:[%s15367_s23 + $0x1920] ss:$24 sps:$4 sm:$0xff]  }
 0xac9   : > { %7780 = vmatprep.subr.bf16.mxu1 %v14002_v24  ;;  %v13963_v24 = vld [vmem:[%s15367_s23 + $0x19b4] ss:$24 sps:$4 sm:$0xff]  }
 0xaca   : > { %7564 = vmatpush1.bf16.msra.mxu0 %v13799_v1  ;;  %v13933_v1 = vld [vmem:[%s15367_s23 + $0x18c4] ss:$24 sps:$4 sm:$0xff]  }
 0xacb   : > { %7565 = vmatprep.subr.bf16.mxu0 %v13807_v6  ;;  %v13937_v6 = vld [vmem:[%s15367_s23 + $0x18f0] ss:$24 sps:$4 sm:$0xff]  }
 0xacc   : > { %7781 = vmatpush1.bf16.msra.mxu1 %v14000_v22  ;;  %v13955_v22 = vld [vmem:[%s15367_s23 + $0x1980] ss:$24 sps:$4 sm:$0xff]  }
 0xace   : > { %7566 = vmatpush1.bf16.msra.mxu0 %v13805_v9  ;;  %v13945_v9 = vld [vmem:[%s15367_s23 + $0x1924] ss:$24 sps:$4 sm:$0xff]  }
 0xacf   : > { %7578 = vmatprep.subr.bf16.mxu0 %v13813_v14  ;;  %7783 = vmatmul.mubr.bf16.vlgmr.msra.gmra.mrb[16].mxu1 %v15598_v26  ;;  %v13949_v14 = vld [vmem:[%s15367_s23 + $0x1950] ss:$24 sps:$4 sm:$0xff]  }
 0xad1   : > { %7568 = vmatmul.mubr.bf16.vlgmr.msra.gmra.mrb[16].mxu0 %v15454_v7 }
 0xad2   : > { %7579 = vmatpush1.bf16.msra.mxu0 %v13811_v21  ;;  %7610 = vmatprep.mubr.bf16.mxu0 %v15485_v37  ;;  %v13957_v21 = vld [vmem:[%s15367_s23 + $0x1984] ss:$24 sps:$4 sm:$0xff]  }
 0xad3   : > { %7580 = vmatprep.subr.bf16.mxu0 %v13819_v27  ;;  %v13961_v27 = vld [vmem:[%s15367_s23 + $0x19b0] ss:$24 sps:$4 sm:$0xff]  }
 0xad6   : > { %7581 = vmatpush1.bf16.msra.mxu0 %v13817_v30  ;;  %v13969_v30 = vld [vmem:[%s15367_s23 + $0x19e4] ss:$24 sps:$4 sm:$0xff]  }
 0xad7   : > { %7582 = vmatprep.subr.bf16.mxu0 %v13825_v31  ;;  %v13967_v31 = vld [vmem:[%s15367_s23 + $0x19e0] ss:$24 sps:$4 sm:$0xff]  }
 0xada   : > { %7583 = vmatpush1.bf16.msra.mxu0 %v13823_v32  ;;  %v13975_v32 = vld [vmem:[%s15367_s23 + $0x1a14] ss:$24 sps:$4 sm:$0xff]  }
 0xadb   : > { %7584 = vmatprep.subr.bf16.mxu0 %v13831_v33  ;;  %v13973_v33 = vld [vmem:[%s15367_s23 + $0x1a10] ss:$24 sps:$4 sm:$0xff]  }
 0xade   : > { %7585 = vmatpush1.bf16.msra.mxu0 %v13829_v49  ;;  %v13981_v49 = vld [vmem:[%s15367_s23 + $0x1a44] ss:$24 sps:$4 sm:$0xff]  }
 0xadf   : > { %7586 = vmatprep.subr.bf16.mxu0 %v13837_v34  ;;  %v13979_v34 = vld [vmem:[%s15367_s23 + $0x1a40] ss:$24 sps:$4 sm:$0xff]  }
 0xae2   : > { %7587 = vmatpush1.bf16.msra.mxu0 %v13835_v36  ;;  %v13987_v36 = vld [vmem:[%s15367_s23 + $0x1a74] ss:$24 sps:$4 sm:$0xff]  }
 0xae3   : > { %7588 = vmatprep.subr.bf16.mxu0 %v13843_v12  ;;  %v13985_v12 = vld [vmem:[%s15367_s23 + $0x1a70] ss:$24 sps:$4 sm:$0xff]  }
 0xae6   : > { %7589 = vmatpush1.bf16.msra.mxu0 %v13841_v57  ;;  %v13993_v57 = vld [vmem:[%s15367_s23 + $0x1aa4] ss:$24 sps:$4 sm:$0xff]  }
 0xae7   : > { %7590 = vmatprep.subr.bf16.mxu0 %v13849_v40  ;;  %v13991_v40 = vld [vmem:[%s15367_s23 + $0x1aa0] ss:$24 sps:$4 sm:$0xff]  }
 0xaea   : > { %7591 = vmatpush1.bf16.msra.mxu0 %v13847_v42  ;;  %v13999_v42 = vld [vmem:[%s15367_s23 + $0x1ad4] ss:$24 sps:$4 sm:$0xff]  }
 0xaeb   : > { %7592 = vmatprep.subr.bf16.mxu0 %v13855_v35  ;;  %v13997_v35 = vld [vmem:[%s15367_s23 + $0x1ad0] ss:$24 sps:$4 sm:$0xff]  }
 0xaee   : > { %7593 = vmatpush1.bf16.msra.mxu0 %v13853_v56  ;;  %v14005_v56 = vld [vmem:[%s15367_s23 + $0x1214] ss:$24 sps:$4 sm:$0xff]  }
 0xaef   : > { %7594 = vmatprep.subr.bf16.mxu0 %v13861_v55  ;;  %v14003_v55 = vld [vmem:[%s15367_s23 + $0x1210] ss:$24 sps:$4 sm:$0xff]  }
 0xaf2   : > { %7595 = vmatpush1.bf16.msra.mxu0 %v13859_v8  ;;  %v14008_v8 = vld [vmem:[%s15367_s23 + $0x1244] ss:$24 sps:$4 sm:$0xff]  }
 0xaf3   : > { %7596 = vmatprep.subr.bf16.mxu0 %v13867_v28  ;;  %v14006_v28 = vld [vmem:[%s15367_s23 + $0x1240] ss:$24 sps:$4 sm:$0xff]  }
 0xaf6   : > { %7597 = vmatpush1.bf16.msra.mxu0 %v13865_v25  ;;  %v14011_v25 = vld [vmem:[%s15367_s23 + $0x1274] ss:$24 sps:$4 sm:$0xff]  }
 0xaf7   : > { %7598 = vmatprep.subr.bf16.mxu0 %v13873_v41  ;;  %v14009_v41 = vld [vmem:[%s15367_s23 + $0x1270] ss:$24 sps:$4 sm:$0xff]  }
 0xafa   : > { %7599 = vmatpush1.bf16.msra.mxu0 %v13871_v38  ;;  %v14014_v38 = vld [vmem:[%s15367_s23 + $0x12a4] ss:$24 sps:$4 sm:$0xff]  }
 0xafb   : > { %7600 = vmatprep.subr.bf16.mxu0 %v13879_v43  ;;  %v14012_v43 = vld [vmem:[%s15367_s23 + $0x12a0] ss:$24 sps:$4 sm:$0xff]  }
 0xafe   : > { %7601 = vmatpush1.bf16.msra.mxu0 %v13877_v17  ;;  %v14017_v17 = vld [vmem:[%s15367_s23 + $0x12d4] ss:$24 sps:$4 sm:$0xff]  }
 0xaff   : > { %7602 = vmatprep.subr.bf16.mxu0 %v13885_v44  ;;  %v14015_v44 = vld [vmem:[%s15367_s23 + $0x12d0] ss:$24 sps:$4 sm:$0xff]  }
 0xb02   : > { %7603 = vmatpush1.bf16.msra.mxu0 %v13883_v58  ;;  %v11731_v58 = vld [vmem:[%s16000_s29 + $0x1] ss:$0 sm:$0xff] }
 0xb03   : > { %7604 = vmatprep.subr.bf16.mxu0 %v13891_v46  ;;  %v14018_v46 = vld [vmem:[%s15367_s23 + $0x1300] ss:$24 sps:$4 sm:$0xff]  }
 0xb06   : > { %7605 = vmatpush1.bf16.msra.mxu0 %v13889_v48  ;;  %v14023_v48 = vld [vmem:[%s15367_s23 + $0x1334] ss:$24 sps:$4 sm:$0xff]  }
 0xb07   : > { %7606 = vmatprep.subr.bf16.mxu0 %v13897_v51 }
 0xb0a   : > { %7607 = vmatpush1.bf16.msra.mxu0 %v13895_v39 }
 0xb0b   : > { %7608 = vmatprep.subr.bf16.mxu0 %v13903_v45 }
 0xb0e   : > { %7609 = vmatpush1.bf16.msra.mxu0 %v13901_v60  ;;  %v14021_v60 = vld [vmem:[%s15367_s23 + $0x1330] ss:$24 sps:$4 sm:$0xff]  }
 0xb0f   : > { %7621 = vmatprep.subr.bf16.mxu0 %v13909_v47  ;;  %v14026_v47 = vld [vmem:[%s15367_s23 + $0x1364] ss:$24 sps:$4 sm:$0xff]  }
 0xb11   : > { %7611 = vmatmul.mubr.bf16.vlgmr.msra.gmra.mrb[16].mxu0 %v15526_v15 }
 0xb12   : > { %7622 = vmatpush1.bf16.msra.mxu0 %v13907_v29  ;;  %7653 = vmatprep.mubr.bf16.mxu0 %v15534_v23  ;;  %v14024_v29 = vld [vmem:[%s15367_s23 + $0x1360] ss:$24 sps:$4 sm:$0xff]  }
 0xb13   : > { %7623 = vmatprep.subr.bf16.mxu0 %v13915_v61  ;;  %v14029_v61 = vld [vmem:[%s15367_s23 + $0x1394] ss:$24 sps:$4 sm:$0xff]  }
 0xb16   : > { %7624 = vmatpush1.bf16.msra.mxu0 %v13913_v62  ;;  %v14027_v62 = vld [vmem:[%s15367_s23 + $0x1390] ss:$24 sps:$4 sm:$0xff]  }
 0xb17   : > { %7625 = vmatprep.subr.bf16.mxu0 %v13921_v59  ;;  %v14032_v59 = vld [vmem:[%s15367_s23 + $0x13c4] ss:$24 sps:$4 sm:$0xff]  }
 0xb1a   : > { %7626 = vmatpush1.bf16.msra.mxu0 %v13919_v52  ;;  %v14030_v52 = vld [vmem:[%s15367_s23 + $0x13c0] ss:$24 sps:$4 sm:$0xff]  }
 0xb1b   : > { %7627 = vmatprep.subr.bf16.mxu0 %v13927_v63  ;;  %v14035_v63 = vld [vmem:[%s15367_s23 + $0x13f4] ss:$24 sps:$4 sm:$0xff]  }
 0xb1e   : > { %7628 = vmatpush1.bf16.msra.mxu0 %v13925_v0  ;;  %v14033_v0 = vld [vmem:[%s15367_s23 + $0x13f0] ss:$24 sps:$4 sm:$0xff]  }
 0xb1f   : > { %7629 = vmatprep.subr.bf16.mxu0 %v13933_v1  ;;  %v14038_v1 = vld [vmem:[%s15367_s23 + $0x1424] ss:$24 sps:$4 sm:$0xff]  }
 0xb22   : > { %7630 = vmatpush1.bf16.msra.mxu0 %v13931_v3  ;;  %v14036_v3 = vld [vmem:[%s15367_s23 + $0x1420] ss:$24 sps:$4 sm:$0xff]  }
 0xb23   : > { %7631 = vmatprep.subr.bf16.mxu0 %v13939_v5  ;;  %v14041_v5 = vld [vmem:[%s15367_s23 + $0x1454] ss:$24 sps:$4 sm:$0xff]  }
 0xb26   : > { %7632 = vmatpush1.bf16.msra.mxu0 %v13937_v6  ;;  %v14039_v6 = vld [vmem:[%s15367_s23 + $0x1450] ss:$24 sps:$4 sm:$0xff]  }
 0xb27   : > { %7633 = vmatprep.subr.bf16.mxu0 %v13945_v9  ;;  %v14044_v9 = vld [vmem:[%s15367_s23 + $0x1484] ss:$24 sps:$4 sm:$0xff]  }
 0xb2a   : > { %7634 = vmatpush1.bf16.msra.mxu0 %v13943_v19  ;;  %v14042_v19 = vld [vmem:[%s15367_s23 + $0x1480] ss:$24 sps:$4 sm:$0xff]  }
 0xb2b   : > { %7635 = vmatprep.subr.bf16.mxu0 %v13951_v2  ;;  %v14047_v2 = vld [vmem:[%s15367_s23 + $0x14b4] ss:$24 sps:$4 sm:$0xff]  }
 0xb2e   : > { %7636 = vmatpush1.bf16.msra.mxu0 %v13949_v14  ;;  %v14045_v14 = vld [vmem:[%s15367_s23 + $0x14b0] ss:$24 sps:$4 sm:$0xff]  }
 0xb2f   : > { %7637 = vmatprep.subr.bf16.mxu0 %v13957_v21  ;;  %v14050_v21 = vld [vmem:[%s15367_s23 + $0x14e4] ss:$24 sps:$4 sm:$0xff]  }
 0xb32   : > { %7638 = vmatpush1.bf16.msra.mxu0 %v13955_v22  ;;  %v14048_v22 = vld [vmem:[%s15367_s23 + $0x14e0] ss:$24 sps:$4 sm:$0xff]  }
 0xb33   : > { %7639 = vmatprep.subr.bf16.mxu0 %v13963_v24  ;;  %v14053_v24 = vld [vmem:[%s15367_s23 + $0x1514] ss:$24 sps:$4 sm:$0xff]  }
 0xb36   : > { %7640 = vmatpush1.bf16.msra.mxu0 %v13961_v27  ;;  %v14051_v27 = vld [vmem:[%s15367_s23 + $0x1510] ss:$24 sps:$4 sm:$0xff]  }
 0xb37   : > { %7641 = vmatprep.subr.bf16.mxu0 %v13969_v30  ;;  %v14056_v30 = vld [vmem:[%s15367_s23 + $0x1544] ss:$24 sps:$4 sm:$0xff]  }
 0xb3a   : > { %7642 = vmatpush1.bf16.msra.mxu0 %v13967_v31  ;;  %v14054_v31 = vld [vmem:[%s15367_s23 + $0x1540] ss:$24 sps:$4 sm:$0xff]  }
 0xb3b   : > { %7643 = vmatprep.subr.bf16.mxu0 %v13975_v32  ;;  %v14059_v32 = vld [vmem:[%s15367_s23 + $0x1574] ss:$24 sps:$4 sm:$0xff]  }
 0xb3e   : > { %7644 = vmatpush1.bf16.msra.mxu0 %v13973_v33  ;;  %v14057_v33 = vld [vmem:[%s15367_s23 + $0x1570] ss:$24 sps:$4 sm:$0xff]  }
 0xb3f   : > { %7645 = vmatprep.subr.bf16.mxu0 %v13981_v49  ;;  %v14062_v49 = vld [vmem:[%s15367_s23 + $0x15a4] ss:$24 sps:$4 sm:$0xff]  }
 0xb42   : > { %7646 = vmatpush1.bf16.msra.mxu0 %v13979_v34  ;;  %v14060_v34 = vld [vmem:[%s15367_s23 + $0x15a0] ss:$24 sps:$4 sm:$0xff]  }
 0xb43   : > { %7647 = vmatprep.subr.bf16.mxu0 %v13987_v36  ;;  %v14065_v36 = vld [vmem:[%s15367_s23 + $0x15d4] ss:$24 sps:$4 sm:$0xff]  }
 0xb46   : > { %7648 = vmatpush1.bf16.msra.mxu0 %v13985_v12  ;;  %v14066_v12 = vld [vmem:[%s15367_s23 + $0x1600] ss:$24 sps:$4 sm:$0xff]  }
 0xb47   : > { %7649 = vmatprep.subr.bf16.mxu0 %v13993_v57  ;;  %v14071_v57 = vld [vmem:[%s15367_s23 + $0x1634] ss:$24 sps:$4 sm:$0xff]  }
 0xb4a   : > { %7650 = vmatpush1.bf16.msra.mxu0 %v13991_v40  ;;  %v14069_v40 = vld [vmem:[%s15367_s23 + $0x1630] ss:$24 sps:$4 sm:$0xff]  }
 0xb4b   : > { %7651 = vmatprep.subr.bf16.mxu0 %v13999_v42  ;;  %v14074_v42 = vld [vmem:[%s15367_s23 + $0x1664] ss:$24 sps:$4 sm:$0xff]  }
 0xb4e   : > { %7652 = vmatpush1.bf16.msra.mxu0 %v13997_v35 }
 0xb4f   : > { %7793 = vmatprep.subr.bf16.mxu0 %v14005_v56 }
 0xb51   : > { %7654 = vmatmul.mubr.bf16.vlgmr.msra.gmra.mrb[16].mxu0 %v15598_v26 }
 0xb52   : > { %7794 = vmatpush1.bf16.msra.mxu0 %v14003_v55  ;;  %7825 = vmatprep.mubr.bf16.mxu0 %v15432_v50  ;;  %v14020_v50 = vld [vmem:[%s15367_s23 + $0x1304] ss:$24 sps:$4 sm:$0xff]   ;;  %v14072_v55 = vld [vmem:[%s15367_s23 + $0x1660] ss:$24 sps:$4 sm:$0xff]  }
 0xb53   : > { %7795 = vmatprep.subr.bf16.mxu0 %v14008_v8 }
 0xb56   : > { %7796 = vmatpush1.bf16.msra.mxu0 %v14006_v28  ;;  %v14077_v28 = vld [vmem:[%s15367_s23 + $0x1694] ss:$24 sps:$4 sm:$0xff]  }
 0xb57   : > { %7797 = vmatprep.subr.bf16.mxu0 %v14011_v25 }
 0xb5a   : > { %7798 = vmatpush1.bf16.msra.mxu0 %v14009_v41  ;;  %v14075_v41 = vld [vmem:[%s15367_s23 + $0x1690] ss:$24 sps:$4 sm:$0xff]  }
 0xb5b   : > { %7799 = vmatprep.subr.bf16.mxu0 %v14014_v38  ;;  %v14080_v38 = vld [vmem:[%s15367_s23 + $0x16c4] ss:$24 sps:$4 sm:$0xff]  }
 0xb5e   : > { %7800 = vmatpush1.bf16.msra.mxu0 %v14012_v43  ;;  %v14078_v43 = vld [vmem:[%s15367_s23 + $0x16c0] ss:$24 sps:$4 sm:$0xff]  }
 0xb5f   : > { %7801 = vmatprep.subr.bf16.mxu0 %v14017_v17  ;;  %v14083_v17 = vld [vmem:[%s15367_s23 + $0x16f4] ss:$24 sps:$4 sm:$0xff]  }
 0xb62   : > { %7802 = vmatpush1.bf16.msra.mxu0 %v14015_v44  ;;  %v14081_v44 = vld [vmem:[%s15367_s23 + $0x16f0] ss:$24 sps:$4 sm:$0xff]  }
 0xb63   : > { %7803 = vmatprep.subr.bf16.mxu0 %v14020_v50  ;;  %v14086_v50 = vld [vmem:[%s15367_s23 + $0x1724] ss:$24 sps:$4 sm:$0xff]  }
 0xb64   : > { %v5798_v51 = vpop.f32.mrb[10].mxu0 }
 0xb65   : > { %v12612_v39 = vadd.f32 %v11731_v58, %v5798_v51  ;;  %v5800_v45 = vpop.f32.mrb[11].mxu0  ;;  %v14084_v58 = vld [vmem:[%s15367_s23 + $0x1720] ss:$24 sps:$4 sm:$0xff]   ;;  %v14092_v51 = vld [vmem:[%s15367_s23 + $0x1784] ss:$24 sps:$4 sm:$0xff]  }
 0xb66   : > { %7804 = vmatpush1.bf16.msra.mxu0 %v14018_v46  ;;  %v14089_v46 = vld [vmem:[%s15367_s23 + $0x1754] ss:$24 sps:$4 sm:$0xff]  }
 0xb67   : > { %11732 = vst.msk [vmem:[%s16012_s0 + $0x2] sm:$0x3] %vm3235_vm3, %v12612_v39  ;;  %7805 = vmatprep.subr.bf16.mxu0 %v14023_v48  ;;  %v14087_v48 = vld [vmem:[%s15367_s23 + $0x1750] ss:$24 sps:$4 sm:$0xff]   ;;  %v14090_v39 = vld [vmem:[%s15367_s23 + $0x1780] ss:$24 sps:$4 sm:$0xff]  }
 0xb68   : > { %v14095_v45 = vld [vmem:[%s15367_s23 + $0x17b4] ss:$24 sps:$4 sm:$0xff]  }
 0xb6a   : > { %7806 = vmatpush1.bf16.msra.mxu0 %v14021_v60  ;;  %v14093_v60 = vld [vmem:[%s15367_s23 + $0x17b0] ss:$24 sps:$4 sm:$0xff]  }
 0xb6b   : > { %7807 = vmatprep.subr.bf16.mxu0 %v14026_v47  ;;  %v14098_v47 = vld [vmem:[%s15367_s23 + $0x17e4] ss:$24 sps:$4 sm:$0xff]  }
 0xb6e   : > { %7808 = vmatpush1.bf16.msra.mxu0 %v14024_v29  ;;  %v14096_v29 = vld [vmem:[%s15367_s23 + $0x17e0] ss:$24 sps:$4 sm:$0xff]  }
 0xb6f   : > { %7809 = vmatprep.subr.bf16.mxu0 %v14029_v61  ;;  %v14101_v61 = vld [vmem:[%s15367_s23 + $0x1814] ss:$24 sps:$4 sm:$0xff]  }
 0xb72   : > { %7810 = vmatpush1.bf16.msra.mxu0 %v14027_v62  ;;  %v14099_v62 = vld [vmem:[%s15367_s23 + $0x1810] ss:$24 sps:$4 sm:$0xff]  }
 0xb73   : > { %7811 = vmatprep.subr.bf16.mxu0 %v14032_v59  ;;  %v14104_v59 = vld [vmem:[%s15367_s23 + $0x1844] ss:$24 sps:$4 sm:$0xff]  }
 0xb76   : > { %7812 = vmatpush1.bf16.msra.mxu0 %v14030_v52  ;;  %v14102_v52 = vld [vmem:[%s15367_s23 + $0x1840] ss:$24 sps:$4 sm:$0xff]  }
 0xb77   : > { %7813 = vmatprep.subr.bf16.mxu0 %v14035_v63  ;;  %v14107_v63 = vld [vmem:[%s15367_s23 + $0x1874] ss:$24 sps:$4 sm:$0xff]  }
 0xb7a   : > { %7814 = vmatpush1.bf16.msra.mxu0 %v14033_v0  ;;  %v14105_v0 = vld [vmem:[%s15367_s23 + $0x1870] ss:$24 sps:$4 sm:$0xff]  }
 0xb7b   : > { %7815 = vmatprep.subr.bf16.mxu0 %v14038_v1  ;;  %v14110_v1 = vld [vmem:[%s15367_s23 + $0x18a4] ss:$24 sps:$4 sm:$0xff]  }
 0xb7e   : > { %7816 = vmatpush1.bf16.msra.mxu0 %v14036_v3  ;;  %v14108_v3 = vld [vmem:[%s15367_s23 + $0x18a0] ss:$24 sps:$4 sm:$0xff]  }
 0xb7f   : > { %7817 = vmatprep.subr.bf16.mxu0 %v14041_v5  ;;  %v14111_v5 = vld [vmem:[%s15367_s23 + $0x18d0] ss:$24 sps:$4 sm:$0xff]  }
 0xb82   : > { %7818 = vmatpush1.bf16.msra.mxu0 %v14039_v6  ;;  %v14114_v6 = vld [vmem:[%s15367_s23 + $0x1900] ss:$24 sps:$4 sm:$0xff]  }
 0xb83   : > { %7819 = vmatprep.subr.bf16.mxu0 %v14044_v9  ;;  %v14119_v9 = vld [vmem:[%s15367_s23 + $0x1934] ss:$24 sps:$4 sm:$0xff]  }
 0xb86   : > { %7820 = vmatpush1.bf16.msra.mxu0 %v14042_v19  ;;  %v14117_v19 = vld [vmem:[%s15367_s23 + $0x1930] ss:$24 sps:$4 sm:$0xff]  }
 0xb87   : > { %7821 = vmatprep.subr.bf16.mxu0 %v14047_v2  ;;  %v14122_v2 = vld [vmem:[%s15367_s23 + $0x1964] ss:$24 sps:$4 sm:$0xff]  }
 0xb8a   : > { %7822 = vmatpush1.bf16.msra.mxu0 %v14045_v14  ;;  %v14120_v14 = vld [vmem:[%s15367_s23 + $0x1960] ss:$24 sps:$4 sm:$0xff]  }
 0xb8b   : > { %7823 = vmatprep.subr.bf16.mxu0 %v14050_v21  ;;  %v14125_v21 = vld [vmem:[%s15367_s23 + $0x1994] ss:$24 sps:$4 sm:$0xff]  }
 0xb8e   : > { %7824 = vmatpush1.bf16.msra.mxu0 %v14048_v22  ;;  %v14123_v22 = vld [vmem:[%s15367_s23 + $0x1990] ss:$24 sps:$4 sm:$0xff]  }
 0xb8f   : > { %7836 = vmatprep.subr.bf16.mxu0 %v14053_v24  ;;  %v14128_v24 = vld [vmem:[%s15367_s23 + $0x19c4] ss:$24 sps:$4 sm:$0xff]  }
 0xb91   : > { %7826 = vmatmul.mubr.bf16.vlgmr.msra.gmra.mrb[20].mxu0 %v15454_v7  ;;  %v14063_v7 = vld [vmem:[%s15367_s23 + $0x15d0] ss:$24 sps:$4 sm:$0xff]  }
 0xb92   : > { %7837 = vmatpush1.bf16.msra.mxu0 %v14051_v27  ;;  %7868 = vmatprep.mubr.bf16.mxu0 %v15485_v37  ;;  %v14068_v37 = vld [vmem:[%s15367_s23 + $0x1604] ss:$24 sps:$4 sm:$0xff]   ;;  %v14126_v27 = vld [vmem:[%s15367_s23 + $0x19c0] ss:$24 sps:$4 sm:$0xff]  }
 0xb93   : > { %7838 = vmatprep.subr.bf16.mxu0 %v14056_v30  ;;  %v14131_v30 = vld [vmem:[%s15367_s23 + $0x19f4] ss:$24 sps:$4 sm:$0xff]  }
 0xb96   : > { %7839 = vmatpush1.bf16.msra.mxu0 %v14054_v31  ;;  %v14129_v31 = vld [vmem:[%s15367_s23 + $0x19f0] ss:$24 sps:$4 sm:$0xff]  }
 0xb97   : > { %7840 = vmatprep.subr.bf16.mxu0 %v14059_v32  ;;  %v14134_v32 = vld [vmem:[%s15367_s23 + $0x1a24] ss:$24 sps:$4 sm:$0xff]  }
 0xb9a   : > { %7841 = vmatpush1.bf16.msra.mxu0 %v14057_v33  ;;  %v14132_v33 = vld [vmem:[%s15367_s23 + $0x1a20] ss:$24 sps:$4 sm:$0xff]  }
 0xb9b   : > { %7842 = vmatprep.subr.bf16.mxu0 %v14062_v49  ;;  %v14137_v49 = vld [vmem:[%s15367_s23 + $0x1a54] ss:$24 sps:$4 sm:$0xff]  }
 0xb9e   : > { %7843 = vmatpush1.bf16.msra.mxu0 %v14060_v34  ;;  %v14135_v34 = vld [vmem:[%s15367_s23 + $0x1a50] ss:$24 sps:$4 sm:$0xff]  }
 0xb9f   : > { %7844 = vmatprep.subr.bf16.mxu0 %v14065_v36  ;;  %v14140_v36 = vld [vmem:[%s15367_s23 + $0x1a84] ss:$24 sps:$4 sm:$0xff]  }
 0xba2   : > { %7845 = vmatpush1.bf16.msra.mxu0 %v14063_v7  ;;  %v16403_v35 = vpop.f32.mrb[16].mxu1  ;;  %v14138_v7 = vld [vmem:[%s15367_s23 + $0x1a80] ss:$24 sps:$4 sm:$0xff]  }
 0xba3   : > { %7846 = vmatprep.subr.bf16.mxu0 %v14068_v37  ;;  %v16405_v56 = vpop.f32.mrb[17].mxu1  ;;  %v14143_v37 = vld [vmem:[%s15367_s23 + $0x1ab4] ss:$24 sps:$4 sm:$0xff]   ;;  %14639 = vtanh.f32 %v16403_v35 }
 0xba4   : > { %v16408_v8 = vpop.f32.mrb[18].mxu1  ;;  %14641 = vtanh.f32 %v16405_v56 }
 0xba5   : > { %v16411_v25 = vpop.f32.mrb[19].mxu1  ;;  %14643 = vtanh.f32 %v16408_v8 }
 0xba6   : > { %7847 = vmatpush1.bf16.msra.mxu0 %v14066_v12  ;;  %v14141_v12 = vld [vmem:[%s15367_s23 + $0x1ab0] ss:$24 sps:$4 sm:$0xff]   ;;  %14645 = vtanh.f32 %v16411_v25 }
 0xba7   : > { %7848 = vmatprep.subr.bf16.mxu0 %v14071_v57  ;;  %v14146_v57 = vld [vmem:[%s15367_s23 + $0x1ae4] ss:$24 sps:$4 sm:$0xff]  }
 0xbaa   : > { %7849 = vmatpush1.bf16.msra.mxu0 %v14069_v40  ;;  %v14144_v40 = vld [vmem:[%s15367_s23 + $0x1ae0] ss:$24 sps:$4 sm:$0xff]  }
 0xbab   : > { %7850 = vmatprep.subr.bf16.mxu0 %v14074_v42 }
 0xbae   : > { %7851 = vmatpush1.bf16.msra.mxu0 %v14072_v55 }
 0xbaf   : > { %7852 = vmatprep.subr.bf16.mxu0 %v14077_v28 }
 0xbb2   : > { %7853 = vmatpush1.bf16.msra.mxu0 %v14075_v41 }
 0xbb3   : > { %7854 = vmatprep.subr.bf16.mxu0 %v14080_v38  ;;  %v12310_v38 = vld [vmem:[%s15373_s13 + $0xc] sm:$0x3f] }
 0xbb4   : > { %v7944_v56 = vrot.slane %v12310_v38, %v15711_v16  ;;  %v7948_v8 = vrot.slane %v12310_v38, %v15715_v18  ;;  %v7952_v25 = vrot.slane %v12310_v38, %v15719_v20 }
 0xbb6   : > { %7855 = vmatpush1.bf16.msra.mxu0 %v14078_v43  ;;  %v14640_v43 = vpop.eup %14639 }
 0xbb7   : > { %7856 = vmatprep.subr.bf16.mxu0 %v14083_v17  ;;  %v14642_v17 = vpop.eup %14641 }
 0xbb8   : > { %v14644_v35 = vpop.eup %14643 }
 0xbba   : > { %7857 = vmatpush1.bf16.msra.mxu0 %v14081_v44  ;;  %v14646_v44 = vpop.eup %14645 }
 0xbbb   : > { %7858 = vmatprep.subr.bf16.mxu0 %v14086_v50 }
 0xbbe   : > { %7859 = vmatpush1.bf16.msra.mxu0 %v14084_v58 }
 0xbbf   : > { %7860 = vmatprep.subr.bf16.mxu0 %v14089_v46 }
 0xbc2   : > { %7861 = vmatpush1.bf16.msra.mxu0 %v14087_v48 }
 0xbc3   : > { %7862 = vmatprep.subr.bf16.mxu0 %v14092_v51 }
 0xbc6   : > { %7863 = vmatpush1.bf16.msra.mxu0 %v14090_v39  ;;  %v7969_v39 = vmul.f32 %v14640_v43, %v7948_v8 }
 0xbc7   : > { %7864 = vmatprep.subr.bf16.mxu0 %v14095_v45 }
 0xbca   : > { %7865 = vmatpush1.bf16.msra.mxu0 %v14093_v60 }
 0xbcb   : > { %7866 = vmatprep.subr.bf16.mxu0 %v14098_v47  ;;  %v7970_v47 = vmul.f32 %v14642_v17, %v7952_v25 }
 0xbce   : > { %7867 = vmatpush1.bf16.msra.mxu0 %v14096_v29 }
 0xbcf   : > { %7879 = vmatprep.subr.bf16.mxu0 %v14101_v61 }
 0xbd1   : > { %7869 = vmatmul.mubr.bf16.vlgmr.msra.gmra.mrb[20].mxu0 %v15526_v15  ;;  %v14113_v15 = vld [vmem:[%s15367_s23 + $0x18d4] ss:$24 sps:$4 sm:$0xff]  }
 0xbd2   : > { %7880 = vmatpush1.bf16.msra.mxu0 %v14099_v62  ;;  %7911 = vmatprep.mubr.bf16.mxu0 %v15534_v23  ;;  %v14116_v23 = vld [vmem:[%s15367_s23 + $0x1904] ss:$24 sps:$4 sm:$0xff]   ;;  %v7975_v62 = vmul.f32 %v14644_v35, %v7948_v8 }
 0xbd3   : > { %7881 = vmatprep.subr.bf16.mxu0 %v14104_v59 }
 0xbd6   : > { %7882 = vmatpush1.bf16.msra.mxu0 %v14102_v52  ;;  %v7976_v52 = vmul.f32 %v14646_v44, %v7952_v25  ;;  %v16487_v44 = vld [vmem:[%s15375_s21 + $0x38] sm:$0xff] }
 0xbd7   : > { %7883 = vmatprep.subr.bf16.mxu0 %v14107_v63  ;;  %v14153_v25 = vld [vmem:[#allocation10 + $0x8] ss:$24 sps:$4 sm:$0xff]  }
 0xbda   : > { %7884 = vmatpush1.bf16.msra.mxu0 %v14105_v0 }
 0xbdb   : > { %7885 = vmatprep.subr.bf16.mxu0 %v14110_v1 }
 0xbde   : > { %7886 = vmatpush1.bf16.msra.mxu0 %v14108_v3 }
 0xbdf   : > { %7887 = vmatprep.subr.bf16.mxu0 %v14113_v15 }
 0xbe2   : > { %7888 = vmatpush1.bf16.msra.mxu0 %v14111_v5 }
 0xbe3   : > { %7889 = vmatprep.subr.bf16.mxu0 %v14116_v23 }
 0xbe6   : > { %7890 = vmatpush1.bf16.msra.mxu0 %v14114_v6 }
 0xbe7   : > { %7891 = vmatprep.subr.bf16.mxu0 %v14119_v9  ;;  %v7956_v9 = vrot.slane %v12310_v38, %v15724_v53 }
 0xbea   : > { %7892 = vmatpush1.bf16.msra.mxu0 %v14117_v19  ;;  %v7960_v19 = vrot.slane %v12310_v38, %v15727_v54 }
 0xbeb   : > { %7893 = vmatprep.subr.bf16.mxu0 %v14122_v2 }
 0xbee   : > { %7894 = vmatpush1.bf16.msra.mxu0 %v14120_v14 }
 0xbef   : > { %7895 = vmatprep.subr.bf16.mxu0 %v14125_v21 }
 0xbf2   : > { %7896 = vmatpush1.bf16.msra.mxu0 %v14123_v22 }
 0xbf3   : > { %7897 = vmatprep.subr.bf16.mxu0 %v14128_v24 }
 0xbf6   : > { %7898 = vmatpush1.bf16.msra.mxu0 %v14126_v27 }
 0xbf7   : > { %7899 = vmatprep.subr.bf16.mxu0 %v14131_v30 }
 0xbfa   : > { %7900 = vmatpush1.bf16.msra.mxu0 %v14129_v31 }
 0xbfb   : > { %7901 = vmatprep.subr.bf16.mxu0 %v14134_v32 }
 0xbfe   : > { %7902 = vmatpush1.bf16.msra.mxu0 %v14132_v33 }
 0xbff   : > { %7903 = vmatprep.subr.bf16.mxu0 %v14137_v49 }
 0xc02   : > { %7904 = vmatpush1.bf16.msra.mxu0 %v14135_v34 }
 0xc03   : > { %7905 = vmatprep.subr.bf16.mxu0 %v14140_v36 }
 0xc06   : > { %7906 = vmatpush1.bf16.msra.mxu0 %v14138_v7 }
 0xc07   : > { %7907 = vmatprep.subr.bf16.mxu0 %v14143_v37 }
 0xc0a   : > { %7908 = vmatpush1.bf16.msra.mxu0 %v14141_v12 }
 0xc0b   : > { %7909 = vmatprep.subr.bf16.mxu0 %v14146_v57 }
 0xc0e   : > { %7910 = vmatpush1.bf16.msra.mxu0 %v14144_v40 }
 0xc11   : > { %7912 = vmatmul.mubr.bf16.vlgmr.msra.gmra.mrb[20].mxu0 %v15598_v26  ;;  %v7940_v26 = vrot.slane %v12310_v38, %v15708_v13 }
 0xc24   : > { %v7655_v42 = vpop.f32.mrb[16].mxu0 }
 0xc25   : > { %14647 = vtanh.f32 %v7655_v42  ;;  %v7657_v55 = vpop.f32.mrb[17].mxu0 }
 0xc26   : > { %14649 = vtanh.f32 %v7657_v55  ;;  %v7659_v28 = vpop.f32.mrb[18].mxu0 }
 0xc27   : > { %14651 = vtanh.f32 %v7659_v28  ;;  %v7661_v41 = vpop.f32.mrb[19].mxu0 }
 0xc28   : > { %14653 = vtanh.f32 %v7661_v41 }
 0xc2f   : > { %v14648_v50 = vpop.eup %14647 }
 0xc30   : > { %v14650_v58 = vpop.eup %14649  ;;  %v7967_v46 = vmul.f32 %v14648_v50, %v7940_v26  ;;  %v8155_v50 = vcombine.high %v16487_v44, %v16487_v44 }
 0xc31   : > { %v14652_v48 = vpop.eup %14651  ;;  %v7968_v51 = vmul.f32 %v14650_v58, %v7944_v56  ;;  %v14155_v58 = vld [vmem:[#allocation10 + $0xc] ss:$24 sps:$4 sm:$0xff]  }
 0xc32   : > { %v14654_v45 = vpop.eup %14653  ;;  %v7973_v60 = vmul.f32 %v14652_v48, %v7940_v26  ;;  %10298 = vmatprep.subr.bf16.mxu0 %v14155_v58  ;;  %v14161_v48 = vld [vmem:[#allocation10 + $0x3c] ss:$24 sps:$4 sm:$0xff]  }
 0xc33   : > { %v7979_v29 = vadd.f32 %v7968_v51, %v7967_v46  ;;  %v7974_v61 = vmul.f32 %v14654_v45, %v7944_v56  ;;  %10299 = vmatpush1.bf16.msra.mxu0 %v14153_v25  ;;  %v14159_v46 = vld [vmem:[#allocation10 + $0x38] ss:$24 sps:$4 sm:$0xff]   ;;  %v14165_v51 = vld [vmem:[#allocation10 + $0x68] ss:$24 sps:$4 sm:$0xff]  }
 0xc34   : > { %10300 = vmatprep.subr.bf16.mxu0 %v14161_v48  ;;  %v14171_v45 = vld [vmem:[#allocation10 + $0x98] ss:$24 sps:$4 sm:$0xff]   ;;  %v14704_v25 = vld [vmem:[#allocation3 + $0x38] sm:$0xff] }
 0xc35   : > { %v7980_v59 = vadd.f32 %v7979_v29, %v7969_v39  ;;  %v7986_v63 = vadd.f32 %v7974_v61, %v7973_v60  ;;  %v14167_v39 = vld [vmem:[#allocation10 + $0x6c] ss:$24 sps:$4 sm:$0xff]   ;;  %v14173_v60 = vld [vmem:[#allocation10 + $0x9c] ss:$24 sps:$4 sm:$0xff]   ;;  %v14183_v61 = vld [vmem:[#allocation10 + $0xf8] ss:$24 sps:$4 sm:$0xff]  }
 0xc36   : > { %v14179_v29 = vld [vmem:[#allocation10 + $0xcc] ss:$24 sps:$4 sm:$0xff]  }
 0xc37   : > { %v7981_v0 = vadd.f32 %v7980_v59, %v7970_v47  ;;  %v7987_v1 = vadd.f32 %v7986_v63, %v7975_v62  ;;  %10301 = vmatpush1.bf16.msra.mxu0 %v14159_v46  ;;  %v14177_v47 = vld [vmem:[#allocation10 + $0xc8] ss:$24 sps:$4 sm:$0xff]   ;;  %v14185_v62 = vld [vmem:[#allocation10 + $0xfc] ss:$24 sps:$4 sm:$0xff]   ;;  %v14195_v63 = vld [vmem:[#allocation10 + $0x158] ss:$24 sps:$4 sm:$0xff]  }
 0xc38   : > { %10302 = vmatprep.subr.bf16.mxu0 %v14167_v39  ;;  %v14189_v59 = vld [vmem:[#allocation10 + $0x128] ss:$24 sps:$4 sm:$0xff]   ;;  %v14706_v39 = vld [vmem:[#allocation3 + $0x48] sm:$0xff] }
 0xc39   : > { %v7988_v3 = vadd.f32 %v7987_v1, %v7976_v52  ;;  %v14191_v52 = vld [vmem:[#allocation10 + $0x12c] ss:$24 sps:$4 sm:$0xff]   ;;  %v14201_v1 = vld [vmem:[#allocation10 + $0x188] ss:$24 sps:$4 sm:$0xff]  }
 0xc3a   : > { %v14705_v46 = vld [vmem:[#allocation3 + $0x40] sm:$0xff] }
 0xc3b   : > { %10303 = vmatpush1.bf16.msra.mxu0 %v14165_v51  ;;  %v14287_v51 = vld [vmem:[#allocation10 + $0x42c] ss:$24 sps:$4 sm:$0xff]  }
 0xc3c   : > { %10304 = vmatprep.subr.bf16.mxu0 %v14173_v60  ;;  %v14707_v60 = vld [vmem:[#allocation3 + $0x50] sm:$0xff] }
 0xc3f   : > { %10305 = vmatpush1.bf16.msra.mxu0 %v14171_v45 }
 0xc40   : > { %10306 = vmatprep.subr.bf16.mxu0 %v14179_v29  ;;  %v14708_v29 = vld [vmem:[#allocation3] sm:$0xff] }
 0xc43   : > { %10307 = vmatpush1.bf16.msra.mxu0 %v14177_v47 }
 0xc44   : > { %10308 = vmatprep.subr.bf16.mxu0 %v14185_v62  ;;  %v14709_v62 = vld [vmem:[#allocation3 + $0x8] sm:$0xff] }
 0xc47   : > { %10309 = vmatpush1.bf16.msra.mxu0 %v14183_v61 }
 0xc48   : > { %10310 = vmatprep.subr.bf16.mxu0 %v14191_v52  ;;  %v14710_v52 = vld [vmem:[#allocation3 + $0x58] sm:$0xff] }
 0xc4b   : > { %10311 = vmatpush1.bf16.msra.mxu0 %v14189_v59 }
 0xce4   : > { %v7913_v15 = vpop.f32.mrb[20].mxu0 }
 0xce5   : > { %14655 = vtanh.f32 %v7913_v15  ;;  %v7915_v5 = vpop.f32.mrb[21].mxu0  ;;  %v14207_v15 = vld [vmem:[#allocation10 + $0x1b8] ss:$24 sps:$4 sm:$0xff]  }
 0xce6   : > { %14657 = vtanh.f32 %v7915_v5  ;;  %v7917_v23 = vpop.f32.mrb[22].mxu0  ;;  %v14209_v5 = vld [vmem:[#allocation10 + $0x1bc] ss:$24 sps:$4 sm:$0xff]  }
 0xce7   : > { %14659 = vtanh.f32 %v7917_v23  ;;  %v7919_v6 = vpop.f32.mrb[23].mxu0  ;;  %v14213_v23 = vld [vmem:[#allocation10 + $0x1e8] ss:$24 sps:$4 sm:$0xff]  }
 0xce8   : > { %14661 = vtanh.f32 %v7919_v6  ;;  %v14215_v6 = vld [vmem:[#allocation10 + $0x1ec] ss:$24 sps:$4 sm:$0xff]  }
 0xcef   : > { %v14656_v2 = vpop.eup %14655 }
 0xcf0   : > { %v14658_v14 = vpop.eup %14657  ;;  %v7971_v21 = vmul.f32 %v14656_v2, %v7956_v9  ;;  %v14225_v2 = vld [vmem:[#allocation10 + $0x248] ss:$24 sps:$4 sm:$0xff]  }
 0xcf1   : > { %v14660_v22 = vpop.eup %14659  ;;  %v7972_v24 = vmul.f32 %v14658_v14, %v7960_v19  ;;  %v14227_v14 = vld [vmem:[#allocation10 + $0x24c] ss:$24 sps:$4 sm:$0xff]  }
 0xcf2   : > { %v14662_v27 = vpop.eup %14661  ;;  %v7982_v30 = vadd.f32 %v7981_v0, %v7971_v21  ;;  %v7977_v31 = vmul.f32 %v14660_v22, %v7956_v9  ;;  %v14197_v0 = vld [vmem:[#allocation10 + $0x15c] ss:$24 sps:$4 sm:$0xff]   ;;  %v14219_v9 = vld [vmem:[#allocation10 + $0x218] ss:$24 sps:$4 sm:$0xff]  }
 0xcf3   : > { %v7978_v32 = vmul.f32 %v14662_v27, %v7960_v19  ;;  %10312 = vmatprep.subr.bf16.mxu0 %v14197_v0  ;;  %v14221_v19 = vld [vmem:[#allocation10 + $0x21c] ss:$24 sps:$4 sm:$0xff]   ;;  %v14231_v21 = vld [vmem:[#allocation10 + $0x278] ss:$24 sps:$4 sm:$0xff]   ;;  %v14239_v27 = vld [vmem:[#allocation10 + $0x2ac] ss:$24 sps:$4 sm:$0xff]  }
 0xcf4   : > { %v7983_v33 = vadd.f32 %v7982_v30, %v7972_v24  ;;  %v7989_v49 = vadd.f32 %v7988_v3, %v7977_v31  ;;  %10313 = vmatpush1.bf16.msra.mxu0 %v14195_v63  ;;  %v14203_v3 = vld [vmem:[#allocation10 + $0x18c] ss:$24 sps:$4 sm:$0xff]   ;;  %v14233_v22 = vld [vmem:[#allocation10 + $0x27c] ss:$24 sps:$4 sm:$0xff]   ;;  %v14237_v24 = vld [vmem:[#allocation10 + $0x2a8] ss:$24 sps:$4 sm:$0xff]  }
 0xcf5   : > { %10314 = vmatprep.subr.bf16.mxu0 %v14203_v3  ;;  %v14243_v30 = vld [vmem:[#allocation10 + $0x2d8] ss:$24 sps:$4 sm:$0xff]   ;;  %v14245_v31 = vld [vmem:[#allocation10 + $0x2dc] ss:$24 sps:$4 sm:$0xff]  }
 0xcf6   : > { %7984 = vadd.xlane.f32.xlu1 %v7983_v33  ;;  %v7990_v34 = vadd.f32 %v7989_v49, %v7978_v32  ;;  %v15011_v32 = vmov 1983009808  }
 0xcf7   : > { %v8380_v33 = vunpack.c.l.s4 %v15011_v32 }
 0xcf8   : > { %7991 = vadd.xlane.f32.xlu0 %v7990_v34  ;;  %10315 = vmatpush1.bf16.msra.mxu0 %v14201_v1  ;;  %v14251_v34 = vld [vmem:[#allocation10 + $0x30c] ss:$24 sps:$4 sm:$0xff]   ;;  %v14711_v1 = vld [vmem:[#allocation3 + $0x10] sm:$0xff] }
 0xcf9   : > { %10316 = vmatprep.subr.bf16.mxu0 %v14209_v5  ;;  %v8381_v49 = vunpack.c.0.s8 %v8380_v33 }
 0xcfc   : > { %10317 = vmatpush1.bf16.msra.mxu0 %v14207_v15  ;;  %v14712_v15 = vld [vmem:[#allocation3 + $0x18] sm:$0xff] }
 0xcfd   : > { %10318 = vmatprep.subr.bf16.mxu0 %v14215_v6  ;;  %v14713_v6 = vld [vmem:[#allocation3 + $0x20] sm:$0xff] }
 0xd00   : > { %10319 = vmatpush1.bf16.msra.mxu0 %v14213_v23 }
 0xd01   : > { %10320 = vmatprep.subr.bf16.mxu0 %v14221_v19  ;;  %v14714_v19 = vld [vmem:[#allocation3 + $0x28] sm:$0xff] }
 0xd04   : > { %10321 = vmatpush1.bf16.msra.mxu0 %v14219_v9 }
 0xd05   : > { %10322 = vmatprep.subr.bf16.mxu0 %v14227_v14 }
 0xd08   : > { %10323 = vmatpush1.bf16.msra.mxu0 %v14225_v2 }
 0xd09   : > { %10324 = vmatprep.subr.bf16.mxu0 %v14233_v22 }
 0xd0c   : > { %10325 = vmatpush1.bf16.msra.mxu0 %v14231_v21  ;;  %v14285_v21 = vld [vmem:[#allocation10 + $0x428] ss:$24 sps:$4 sm:$0xff]  }
 0xd0d   : > { %10326 = vmatprep.subr.bf16.mxu0 %v14239_v27 }
 0xd10   : > { %10327 = vmatpush1.bf16.msra.mxu0 %v14237_v24 }
 0xd11   : > { %10328 = vmatprep.subr.bf16.mxu0 %v14245_v31  ;;  %v14293_v31 = vld [vmem:[#allocation10 + $0x45c] ss:$24 sps:$4 sm:$0xff]  }
 0xd14   : > { %10329 = vmatpush1.bf16.msra.mxu0 %v14243_v30 }
 0xd15   : > { %10339 = vmatprep.subr.bf16.mxu0 %v14251_v34 }
 0xd83   : > { %v7985_v36 = vpop.xlane.xlu1 %7984 }
 0xd84   : > { %v7998_v37 = vrot.slane %v7985_v36, %v15733_v10  ;;  %v16494_v36 = vld [vmem:[%s16682_s22] sm:$0xff] }
 0xd85   : > { %v7992_v7 = vpop.xlane.xlu0 %7991 }
 0xd86   : > { %v8002_v12 = vrot.slane %v7992_v7, %v15733_v10  ;;  %v12311_v10 = vld [vmem:[%s15375_s21 + $0x30] sm:$0xff]  ;;  %v16497_v7 = vsub.s32 %v8381_v49, %v15704_v4 }
 0xd87   : > { %v8154_v35 = vcombine.high %v12311_v10, %v12311_v10  ;;  %v14263_v4 = vld [vmem:[#allocation10 + $0x36c] ss:$24 sps:$4 sm:$0xff]  }
 0xd88   : > { %v8003_v57 = vsel %vm2868_vm0, %v8002_v12, %v7998_v37  ;;  %v8385_v37 = vrot.slane %v16494_v36, %v16497_v7 }
 0xd89   : > { %v8005_v40 = vsel %vm670_vm1, -inf, %v8003_v57  ;;  %8160 = vmatprep.subr.mxu1 %v8154_v35 }
 0xd8a   : > { %v8006_v42 = vsel %vm2872_vm2, %v8005_v40, -inf  ;;  %8161 = vmatpush1.xpose.msra.mxu1 %v12311_v10  ;;  %v8393_v12 = vcombine.high %v8385_v37, %v8385_v37  ;;  %v14273_v10 = vld [vmem:[#allocation10 + $0x3c8] ss:$24 sps:$4 sm:$0xff]  }
 0xd8b   : > { %8007 = vmax.xlane.f32.xlu0 %v8006_v42  ;;  %8230 = vmatprep.subr.mxu1 %v8155_v50  ;;  %v16503_v42 = vpack.c.bf16 %v8385_v37, %v8385_v37 }
 0xd8c   : > { %v16501_v57 = vpack.c.bf16 %v8393_v12, %v8393_v12 }
 0xd8e   : > { %10330 = vmatprep.mubr.bf16.mxu0 %v16501_v57 }
 0xd8f   : > { %10331 = vmatmul.mubr.bf16.vlgmr.msra.gmra.mrb[24].mxu0 %v16503_v42 }
 0xe18   : > { %v8008_v55 = vpop.xlane.xlu0 %8007 }
 0xe19   : > { %v8009_v28 = vsub.f32 %v8005_v40, %v8008_v55  ;;  %v14249_v40 = vld [vmem:[#allocation10 + $0x308] ss:$24 sps:$4 sm:$0xff]   ;;  %v14257_v55 = vld [vmem:[#allocation10 + $0x33c] ss:$24 sps:$4 sm:$0xff]  }
 0xe1a   : > { %10340 = vmatpush1.bf16.msra.mxu0 %v14249_v40 }
 0xe1b   : > { %v8010_v41 = vmul.f32 1.442695, %v8009_v28  ;;  %v14255_v28 = vld [vmem:[#allocation10 + $0x338] ss:$24 sps:$4 sm:$0xff]   ;;  %10341 = vmatprep.subr.bf16.mxu0 %v14257_v55 }
 0xe1d   : > { %14663 = vpow2.f32 %v8010_v41  ;;  %v14261_v41 = vld [vmem:[#allocation10 + $0x368] ss:$24 sps:$4 sm:$0xff]  }
 0xe1e   : > { %10342 = vmatpush1.bf16.msra.mxu0 %v14255_v28 }
 0xe1f   : > { %10343 = vmatprep.subr.bf16.mxu0 %v14263_v4 }
 0xe22   : > { %10344 = vmatpush1.bf16.msra.mxu0 %v14261_v41 }
 0xe27   : > { %v14664_v38 = vpop.eup %14663 }
 0xe28   : > { %v8012_v43 = vsel %vm2872_vm2, %v14664_v38, 0.0 }
 0xe29   : > { %8013 = vadd.xlane.f32.xlu1 %v8012_v43  ;;  %v14267_v43 = vld [vmem:[#allocation10 + $0x398] ss:$24 sps:$4 sm:$0xff]  }
 0xeb6   : > { %v8014_v17 = vpop.xlane.xlu1 %8013 }
 0xeb7   : > { %14665 = vrcp.f32 %v8014_v17  ;;  %v14275_v17 = vld [vmem:[#allocation10 + $0x3cc] ss:$24 sps:$4 sm:$0xff]  }
 0xec1   : > { %v14666_v26 = vpop.eup %14665 }
 0xec2   : > { %v8016_v11 = vmul.f32 %v14666_v26, %v14664_v38  ;;  %v14269_v38 = vld [vmem:[#allocation10 + $0x39c] ss:$24 sps:$4 sm:$0xff]  }
 0xec3   : > { %10345 = vmatprep.subr.bf16.mxu0 %v14269_v38  ;;  %v14281_v26 = vld [vmem:[#allocation10 + $0x3fc] ss:$24 sps:$4 sm:$0xff]  }
 0xec4   : > { %v8027_v56 = vrot.slane %v8016_v11, %v15711_v16  ;;  %12317 = vst.msk [vmem:[%s15756_s30 + $0x4] sm:$0x3] %vm2872_vm2, %v8016_v11  ;;  %v8020_v8 = vrot.slane %v8016_v11, %v15708_v13  ;;  %10346 = vmatpush1.bf16.msra.mxu0 %v14267_v43  ;;  %v14291_v43 = vld [vmem:[#allocation10 + $0x458] ss:$24 sps:$4 sm:$0xff]  }
 0xec5   : > { %10347 = vmatprep.subr.bf16.mxu0 %v14275_v17 }
 0xec6   : > { %8029 = vbcast.lane.b32.xlu1 %v8027_v56, 256  ;;  %8022 = vbcast.lane.b32.xlu0 %v8020_v8, 256  ;;  %v14279_v56 = vld [vmem:[#allocation10 + $0x3f8] ss:$24 sps:$4 sm:$0xff]  }
 0xec7   : > { %v14703_v8 = vld [vmem:[#allocation3 + $0x30] sm:$0xff] }
 0xec8   : > { %10348 = vmatpush1.bf16.msra.mxu0 %v14273_v10 }
 0xec9   : > { %10349 = vmatprep.subr.bf16.mxu0 %v14281_v26 }
 0xecc   : > { %10350 = vmatpush1.bf16.msra.mxu0 %v14279_v56 }
 0xecd   : > { %10351 = vmatprep.subr.bf16.mxu0 %v14287_v51 }
 0xed0   : > { %10352 = vmatpush1.bf16.msra.mxu0 %v14285_v21 }
 0xed1   : > { %10353 = vmatprep.subr.bf16.mxu0 %v14293_v31 }
 0xed4   : > { %10354 = vmatpush1.bf16.msra.mxu0 %v14291_v43  ;;  %v14309_v43 = vld [vmem:[#allocation10 + $0x4e8] ss:$24 sps:$4 sm:$0xff]  }
 0xf38   : > { %v8030_v35 = vpop.permute.xlu1 %8029  ;;  %v8023_v11 = vpop.permute.xlu0 %8022 }
 0xf39   : > { %v8037_v50 = vmul.f32 %v14703_v8, %v8030_v35  ;;  %v8038_v58 = vmul.f32 %v14704_v25, %v8030_v35  ;;  %v8039_v48 = vmul.f32 %v14705_v46, %v8030_v35  ;;  %v8040_v45 = vmul.f32 %v14706_v39, %v8030_v35 }
 0xf3a   : > { %v16507_v47 = vmul.f32 %v14707_v60, %v8030_v35  ;;  %v8031_v61 = vmul.f32 %v14708_v29, %v8023_v11  ;;  %v8032_v59 = vmul.f32 %v14709_v62, %v8023_v11  ;;  %v16509_v63 = vmul.f32 %v14710_v52, %v8030_v35  ;;  %v16513_v60 = vld [vmem:[%s15375_s21 + $0x40] sm:$0xff]  ;;  %v14297_v52 = vld [vmem:[#allocation10 + $0x488] ss:$24 sps:$4 sm:$0xff]   ;;  %s16683_s21 = sld [smem:[#allocation29_spill]] }
 0xf3b   : > { %v8079_v0 = vrot.slane %v8037_v50, 4  ;;  %v8033_v3 = vmul.f32 %v14711_v1, %v8023_v11  ;;  %v8034_v5 = vmul.f32 %v14712_v15, %v8023_v11  ;;  %v8091_v23 = vrot.slane %v8039_v48, 4 }
 0xf3c   : > { %v8035_v9 = vmul.f32 %v14713_v6, %v8023_v11  ;;  %v8036_v2 = vmul.f32 %v14714_v19, %v8023_v11  ;;  %v8043_v14 = vrot.slane %v8031_v61, 4  ;;  %v8049_v22 = vrot.slane %v8032_v59, 4  ;;  %v14299_v11 = vld [vmem:[#allocation10 + $0x48c] ss:$24 sps:$4 sm:$0xff]  }
 0xf3d   : > { %v8055_v24 = vrot.slane %v8033_v3, 4  ;;  %v8061_v27 = vrot.slane %v8034_v5, 4  ;;  %v8085_v30 = vrot.slane %v8038_v58, 4  ;;  %v8103_v32 = vrot.slane %v16507_v47, 4  ;;  %10355 = vmatprep.subr.bf16.mxu0 %v14299_v11 }
 0xf3e   : > { %v8044_v33 = vadd.f32 %v8043_v14, %v8031_v61  ;;  %v8067_v49 = vrot.slane %v8035_v9, 4  ;;  %v8080_v34 = vadd.f32 %v8079_v0, %v8037_v50  ;;  %v8050_v12 = vadd.f32 %v8049_v22, %v8032_v59  ;;  %10356 = vmatpush1.bf16.msra.mxu0 %v14297_v52 }
 0xf3f   : > { %v8056_v37 = vadd.f32 %v8055_v24, %v8033_v3  ;;  %v8086_v40 = vadd.f32 %v8085_v30, %v8038_v58  ;;  %v8062_v55 = vadd.f32 %v8061_v27, %v8034_v5  ;;  %v8073_v28 = vrot.slane %v8036_v2, 4  ;;  %v14305_v5 = vld [vmem:[#allocation10 + $0x4bc] ss:$24 sps:$4 sm:$0xff]   ;;  %v14303_v30 = vld [vmem:[#allocation10 + $0x4b8] ss:$24 sps:$4 sm:$0xff]  }
 0xf40   : > { %v8045_v4 = vrot.slane %v8044_v33, 2  ;;  %v8081_v41 = vrot.slane %v8080_v34, 2  ;;  %v8097_v38 = vrot.slane %v8040_v45, 4  ;;  %v8051_v17 = vrot.slane %v8050_v12, 2  ;;  %10357 = vmatprep.subr.bf16.mxu0 %v14305_v5  ;;  %v14335_v5 = vld [vmem:[#allocation10 + $0x5ac] ss:$24 sps:$4 sm:$0xff]   ;;  %s650_s12 = scalar_lea.vmem %s16683_s21, %s10860_s14 }
 0xf41   : > { %v8087_v10 = vrot.slane %v8086_v40, 2  ;;  %v8063_v26 = vrot.slane %v8062_v55, 2  ;;  %v8057_v35 = vrot.slane %v8056_v37, 2  ;;  %v8092_v25 = vadd.f32 %v8091_v23, %v8039_v48 }
 0xf42   : > { %v8046_v56 = vadd.f32 %v8045_v4, %v8044_v33  ;;  %v8082_v8 = vadd.f32 %v8081_v41, %v8080_v34  ;;  %v8098_v50 = vadd.f32 %v8097_v38, %v8040_v45  ;;  %v8068_v46 = vadd.f32 %v8067_v49, %v8035_v9  ;;  %v14311_v4 = vld [vmem:[#allocation10 + $0x4ec] ss:$24 sps:$4 sm:$0xff]   ;;  %10358 = vmatpush1.bf16.msra.mxu0 %v14303_v30  ;;  %v14346_v30 = vld [vmem:[#allocation10 + $0x608] ss:$24 sps:$4 sm:$0xff]  }
 0xf43   : > { %v8052_v58 = vadd.f32 %v8051_v17, %v8050_v12  ;;  %v8088_v51 = vadd.f32 %v8087_v10, %v8086_v40  ;;  %v8064_v39 = vadd.f32 %v8063_v26, %v8062_v55  ;;  %v8093_v59 = vrot.slane %v8092_v25, 2  ;;  %v14317_v17 = vld [vmem:[#allocation10 + $0x51c] ss:$24 sps:$4 sm:$0xff]   ;;  %10359 = vmatprep.subr.bf16.mxu0 %v14311_v4  ;;  %v14358_v4 = vld [vmem:[#allocation10 + $0x668] ss:$24 sps:$4 sm:$0xff]  }
 0xf44   : > { %v8047_v29 = vrot.slane %v8046_v56, 1  ;;  %v8083_v61 = vrot.slane %v8082_v8, 1  ;;  %v8099_v62 = vrot.slane %v8098_v50, 2  ;;  %v8058_v15 = vadd.f32 %v8057_v35, %v8056_v37 }
 0xf45   : > { %v8053_v0 = vrot.slane %v8052_v58, 1  ;;  %v8089_v1 = vrot.slane %v8088_v51, 1  ;;  %v8065_v3 = vrot.slane %v8064_v39, 1  ;;  %v8094_v6 = vadd.f32 %v8093_v59, %v8092_v25  ;;  %v14323_v25 = vld [vmem:[#allocation10 + $0x54c] ss:$24 sps:$4 sm:$0xff]  }
 0xf46   : > { %v8048_v45 = vadd.f32 %v8047_v29, %v8046_v56  ;;  %v8084_v48 = vadd.f32 %v8083_v61, %v8082_v8  ;;  %v8100_v23 = vadd.f32 %v8099_v62, %v8098_v50  ;;  %v8156_v14 = vcombine.high %v16513_v60, %v16513_v60  ;;  %10360 = vmatpush1.bf16.msra.mxu0 %v14309_v43  ;;  %v14152_v50 = vld [vmem:[#allocation10 + $0x4] ss:$24 sps:$4 sm:$0xff]  }
 0xf47   : > { %v8054_v9 = vadd.f32 %v8053_v0, %v8052_v58  ;;  %v8090_v19 = vadd.f32 %v8089_v1, %v8088_v51  ;;  %v8066_v22 = vadd.f32 %v8065_v3, %v8064_v39  ;;  %v8074_v27 = vadd.f32 %v8073_v28, %v8036_v2  ;;  %10361 = vmatprep.subr.bf16.mxu0 %v14317_v17  ;;  %v14329_v62 = vld [vmem:[#allocation10 + $0x57c] ss:$24 sps:$4 sm:$0xff]   ;;  %v14150_v0 = vld [vmem:[#allocation10] ss:$24 sps:$4 sm:$0xff]   ;;  %v14372_v43 = vld [vmem:[#allocation10 + $0x6cc] ss:$24 sps:$4 sm:$0xff]  }
 0xf48   : > { %v8139_v21 = vsel %vm2868_vm0, %v8084_v48, %v8048_v45  ;;  %v8101_v24 = vrot.slane %v8100_v23, 1  ;;  %v8059_v33 = vrot.slane %v8058_v15, 1  ;;  %v8109_v49 = vrot.slane %v16509_v63, 4  ;;  %v14158_v3 = vld [vmem:[#allocation10 + $0x34] ss:$24 sps:$4 sm:$0xff]  }
 0xf49   : > { %v8140_v31 = vsel %vm2868_vm0, %v8090_v19, %v8054_v9  ;;  %v8104_v34 = vadd.f32 %v8103_v32, %v16507_v47  ;;  %v8095_v12 = vrot.slane %v8094_v6, 1  ;;  %v8075_v40 = vrot.slane %v8074_v27, 2  ;;  %v14156_v48 = vld [vmem:[#allocation10 + $0x30] ss:$24 sps:$4 sm:$0xff]  }
 0xf4a   : > { %8224 = vmatprep.mubr.f32.mxu1 %v8140_v31  ;;  %v8102_v37 = vadd.f32 %v8101_v24, %v8100_v23  ;;  %v8069_v55 = vrot.slane %v8068_v46, 2  ;;  %v8110_v41 = vadd.f32 %v8109_v49, %v16509_v63  ;;  %v8060_v47 = vadd.f32 %v8059_v33, %v8058_v15  ;;  %v14315_v63 = vld [vmem:[#allocation10 + $0x518] ss:$24 sps:$4 sm:$0xff]   ;;  %v14333_v9 = vld [vmem:[#allocation10 + $0x5a8] ss:$24 sps:$4 sm:$0xff]  }
 0xf4b   : > { %8225 = vmatmul.mubr.f32.vlgmr.msra.gmra.mrb[6].mxu1 %v8139_v21  ;;  %v8105_v2 = vrot.slane %v8104_v34, 2  ;;  %v8076_v38 = vadd.f32 %v8075_v40, %v8074_v27  ;;  %v8096_v10 = vadd.f32 %v8095_v12, %v8094_v6  ;;  %10362 = vmatpush1.bf16.msra.mxu0 %v14315_v63  ;;  %v8378_v1 = vcombine.high %v16494_v36, %v16494_v36  ;;  %v14327_v15 = vld [vmem:[#allocation10 + $0x578] ss:$24 sps:$4 sm:$0xff]   ;;  %v14164_v6 = vld [vmem:[#allocation10 + $0x64] ss:$24 sps:$4 sm:$0xff]  }
 0xf4c   : > { %8231 = vmatpush1.xpose.msra.mxu1 %v16487_v44  ;;  %v8142_v28 = vsel %vm2868_vm0, %v8102_v37, %v8066_v22  ;;  %v8111_v32 = vrot.slane %v8110_v41, 2  ;;  %v8070_v35 = vadd.f32 %v8069_v55, %v8068_v46  ;;  %v14321_v46 = vld [vmem:[#allocation10 + $0x548] ss:$24 sps:$4 sm:$0xff]   ;;  %10363 = vmatprep.subr.bf16.mxu0 %v14323_v25  ;;  %v14341_v36 = vld [vmem:[#allocation10 + $0x5dc] ss:$24 sps:$4 sm:$0xff]  }
 0xf4d   : > { %8294 = vmatprep.mubr.f32.mxu1 %v8142_v28  ;;  %8300 = vmatprep.subr.mxu1 %v8156_v14  ;;  %v8077_v26 = vrot.slane %v8076_v38, 1  ;;  %v8106_v11 = vadd.f32 %v8105_v2, %v8104_v34  ;;  %v8141_v58 = vsel %vm2868_vm0, %v8096_v10, %v8060_v47  ;;  %v8392_v45 = vrot.slane %v8378_v1, %v16497_v7  ;;  %v14162_v14 = vld [vmem:[#allocation10 + $0x60] ss:$24 sps:$4 sm:$0xff]   ;;  %v14170_v7 = vld [vmem:[#allocation10 + $0x94] ss:$24 sps:$4 sm:$0xff]  }
 0xf4e   : > { %v8112_v56 = vadd.f32 %v8111_v32, %v8110_v41  ;;  %v8071_v51 = vrot.slane %v8070_v35, 1  ;;  %v14339_v21 = vld [vmem:[#allocation10 + $0x5d8] ss:$24 sps:$4 sm:$0xff]   ;;  %v14348_v22 = vld [vmem:[#allocation10 + $0x60c] ss:$24 sps:$4 sm:$0xff]  }
 0xf4f   : > { %v8078_v8 = vadd.f32 %v8077_v26, %v8076_v38  ;;  %v8107_v39 = vrot.slane %v8106_v11, 1  ;;  %10364 = vmatpush1.bf16.msra.mxu0 %v14321_v46  ;;  %v8394_v23 = vcombine.high %v8392_v45, %v8392_v45  ;;  %v14168_v24 = vld [vmem:[#allocation10 + $0x90] ss:$24 sps:$4 sm:$0xff]   ;;  %v14176_v27 = vld [vmem:[#allocation10 + $0xc4] ss:$24 sps:$4 sm:$0xff]   ;;  %v16535_v31 = vpack.c.bf16 %v8392_v45, %v8392_v45 }
 0xf50   : > { %v8113_v44 = vrot.slane %v8112_v56, 1  ;;  %v8072_v59 = vadd.f32 %v8071_v51, %v8070_v35  ;;  %10365 = vmatprep.subr.bf16.mxu0 %v14329_v62  ;;  %v14354_v33 = vld [vmem:[#allocation10 + $0x63c] ss:$24 sps:$4 sm:$0xff]   ;;  %v14174_v49 = vld [vmem:[#allocation10 + $0xc0] ss:$24 sps:$4 sm:$0xff]  }
 0xf51   : > { %v8108_v52 = vadd.f32 %v8107_v39, %v8106_v11  ;;  %v16532_v19 = vpack.c.bf16 %v8394_v23, %v8394_v23  ;;  %v14182_v34 = vld [vmem:[#allocation10 + $0xf4] ss:$24 sps:$4 sm:$0xff]   ;;  %v14352_v37 = vld [vmem:[#allocation10 + $0x638] ss:$24 sps:$4 sm:$0xff]   ;;  %v14188_v55 = vld [vmem:[#allocation10 + $0x124] ss:$24 sps:$4 sm:$0xff]  }
 0xf52   : > { %v8114_v29 = vadd.f32 %v8113_v44, %v8112_v56  ;;  %v14360_v12 = vld [vmem:[#allocation10 + $0x66c] ss:$24 sps:$4 sm:$0xff]   ;;  %v14180_v40 = vld [vmem:[#allocation10 + $0xf0] ss:$24 sps:$4 sm:$0xff]   ;;  %v14366_v41 = vld [vmem:[#allocation10 + $0x69c] ss:$24 sps:$4 sm:$0xff]  }
 0xf53   : > { %8295 = vmatmul.mubr.f32.vlgmr.msra.gmra.mrb[6].mxu1 %v8141_v58  ;;  %10366 = vmatpush1.bf16.msra.mxu0 %v14327_v15  ;;  %v14186_v2 = vld [vmem:[#allocation10 + $0x120] ss:$24 sps:$4 sm:$0xff]   ;;  %v14194_v28 = vld [vmem:[#allocation10 + $0x154] ss:$24 sps:$4 sm:$0xff]   ;;  %v14192_v47 = vld [vmem:[#allocation10 + $0x150] ss:$24 sps:$4 sm:$0xff]  }
 0xf54   : > { %8301 = vmatpush1.xpose.msra.mxu1 %v16513_v60  ;;  %v8144_v61 = vsel %vm2868_vm0, %v8114_v29, %v8078_v8  ;;  %v8143_v60 = vsel %vm2868_vm0, %v8108_v52, %v8072_v59  ;;  %10367 = vmatprep.subr.bf16.mxu0 %v14335_v5  ;;  %v14364_v38 = vld [vmem:[#allocation10 + $0x698] ss:$24 sps:$4 sm:$0xff]   ;;  %v14200_v32 = vld [vmem:[#allocation10 + $0x184] ss:$24 sps:$4 sm:$0xff]   ;;  %v14370_v17 = vld [vmem:[#allocation10 + $0x6c8] ss:$24 sps:$4 sm:$0xff]  }
 0xf55   : > { %10175 = vmatprep.subr.bf16.mxu1 %v14152_v50  ;;  %8364 = vmatprep.mubr.f32.mxu1 %v8144_v61  ;;  %v14378_v10 = vld [vmem:[#allocation10 + $0x6fc] ss:$24 sps:$4 sm:$0xff]   ;;  %v14198_v26 = vld [vmem:[#allocation10 + $0x180] ss:$24 sps:$4 sm:$0xff]   ;;  %v14384_v56 = vld [vmem:[#allocation10 + $0x72c] ss:$24 sps:$4 sm:$0xff]  }
 0xf56   : > { %10371 = vmatprep.mubr.bf16.mxu0 %v16532_v19  ;;  %v14206_v35 = vld [vmem:[#allocation10 + $0x1b4] ss:$24 sps:$4 sm:$0xff]   ;;  %v14376_v11 = vld [vmem:[#allocation10 + $0x6f8] ss:$24 sps:$4 sm:$0xff]   ;;  %v14212_v8 = vld [vmem:[#allocation10 + $0x1e4] ss:$24 sps:$4 sm:$0xff]  }
 0xf57   : > { %10368 = vmatpush1.bf16.msra.mxu0 %v14333_v9  ;;  %v14204_v63 = vld [vmem:[#allocation10 + $0x1b0] ss:$24 sps:$4 sm:$0xff]   ;;  %v14390_v50 = vld [vmem:[#allocation10 + $0x75c] ss:$24 sps:$4 sm:$0xff]   ;;  %v14210_v25 = vld [vmem:[#allocation10 + $0x1e0] ss:$24 sps:$4 sm:$0xff]  }
 0xf58   : > { %10369 = vmatprep.subr.bf16.mxu0 %v14341_v36  ;;  %v14382_v44 = vld [vmem:[#allocation10 + $0x728] ss:$24 sps:$4 sm:$0xff]   ;;  %v14218_v58 = vld [vmem:[#allocation10 + $0x214] ss:$24 sps:$4 sm:$0xff]   ;;  %v14388_v51 = vld [vmem:[#allocation10 + $0x758] ss:$24 sps:$4 sm:$0xff]  }
 0xf59   : > { %v14396_v39 = vld [vmem:[#allocation10 + $0x78c] ss:$24 sps:$4 sm:$0xff]   ;;  %v14216_v29 = vld [vmem:[#allocation10 + $0x210] ss:$24 sps:$4 sm:$0xff]   ;;  %v14402_v62 = vld [vmem:[#allocation10 + $0x7bc] ss:$24 sps:$4 sm:$0xff]  }
 0xf5a   : > { %v14224_v46 = vld [vmem:[#allocation10 + $0x244] ss:$24 sps:$4 sm:$0xff]   ;;  %v14394_v61 = vld [vmem:[#allocation10 + $0x788] ss:$24 sps:$4 sm:$0xff]   ;;  %v14230_v52 = vld [vmem:[#allocation10 + $0x274] ss:$24 sps:$4 sm:$0xff]  }
 0xf5b   : > { %8365 = vmatmul.mubr.f32.vlgmr.msra.gmra.mrb[6].mxu1 %v8143_v60  ;;  %10370 = vmatpush1.bf16.msra.mxu0 %v14339_v21  ;;  %v14222_v59 = vld [vmem:[#allocation10 + $0x240] ss:$24 sps:$4 sm:$0xff]   ;;  %v14408_v1 = vld [vmem:[#allocation10 + $0x7ec] ss:$24 sps:$4 sm:$0xff]   ;;  %v14414_v5 = vld [vmem:[#allocation10 + $0x81c] ss:$24 sps:$4 sm:$0xff]  }
 0xf5c   : > { %10176 = vmatpush1.bf16.msra.mxu1 %v14150_v0  ;;  %10207 = vmatprep.mubr.bf16.mxu1 %v16501_v57  ;;  %v14400_v0 = vld [vmem:[#allocation10 + $0x7b8] ss:$24 sps:$4 sm:$0xff]   ;;  %v14236_v15 = vld [vmem:[#allocation10 + $0x2a4] ss:$24 sps:$4 sm:$0xff]   ;;  %v14406_v60 = vld [vmem:[#allocation10 + $0x7e8] ss:$24 sps:$4 sm:$0xff]  }
 0xf5d   : > { %10177 = vmatprep.subr.bf16.mxu1 %v14158_v3  ;;  %10380 = vmatprep.subr.bf16.mxu0 %v14348_v22  ;;  %v14228_v3 = vld [vmem:[#allocation10 + $0x270] ss:$24 sps:$4 sm:$0xff]   ;;  %v14234_v45 = vld [vmem:[#allocation10 + $0x2a0] ss:$24 sps:$4 sm:$0xff]   ;;  %v14248_v36 = vld [vmem:[#allocation10 + $0x304] ss:$24 sps:$4 sm:$0xff]  }
 0xf5e   : > { %10372 = vmatmul.mubr.bf16.vlgmr.msra.gmra.mrb[24].mxu0 %v16535_v31  ;;  %v14412_v23 = vld [vmem:[#allocation10 + $0x818] ss:$24 sps:$4 sm:$0xff]  }
 0xf5f   : > { %10381 = vmatpush1.bf16.msra.mxu0 %v14346_v30  ;;  %v14240_v9 = vld [vmem:[#allocation10 + $0x2d0] ss:$24 sps:$4 sm:$0xff]   ;;  %v14246_v21 = vld [vmem:[#allocation10 + $0x300] ss:$24 sps:$4 sm:$0xff]  }
 0xf60   : > { %10178 = vmatpush1.bf16.msra.mxu1 %v14156_v48  ;;  %10382 = vmatprep.subr.bf16.mxu0 %v14354_v33  ;;  %v14242_v48 = vld [vmem:[#allocation10 + $0x2d4] ss:$24 sps:$4 sm:$0xff]  }
 0xf61   : > { %10179 = vmatprep.subr.bf16.mxu1 %v14164_v6  ;;  %v14420_v6 = vld [vmem:[#allocation10 + $0x84c] ss:$24 sps:$4 sm:$0xff]   ;;  %v12318_v22 = vld.sshfl [vmem:[%s16682_s22 + $0x8] sm:$0x33 pattern:$0x76325410] }
 0xf62   : > { %v8402_v30 = vcombine.high %v12318_v22, %v12318_v22  ;;  %v14432_v33 = vld [vmem:[#allocation10 + $0x8ac] ss:$24 sps:$4 sm:$0xff]  }
 0xf63   : > { %10383 = vmatpush1.bf16.msra.mxu0 %v14352_v37  ;;  %v14260_v37 = vld [vmem:[#allocation10 + $0x364] ss:$24 sps:$4 sm:$0xff]  }
 0xf64   : > { %10180 = vmatpush1.bf16.msra.mxu1 %v14162_v14  ;;  %10384 = vmatprep.subr.bf16.mxu0 %v14360_v12  ;;  %v14418_v14 = vld [vmem:[#allocation10 + $0x848] ss:$24 sps:$4 sm:$0xff]  }
 0xf65   : > { %10181 = vmatprep.subr.bf16.mxu1 %v14170_v7  ;;  %v14426_v7 = vld [vmem:[#allocation10 + $0x87c] ss:$24 sps:$4 sm:$0xff]   ;;  %v14430_v12 = vld [vmem:[#allocation10 + $0x8a8] ss:$24 sps:$4 sm:$0xff]  }
 0xf67   : > { %10385 = vmatpush1.bf16.msra.mxu0 %v14358_v4  ;;  %v14266_v4 = vld [vmem:[#allocation10 + $0x394] ss:$24 sps:$4 sm:$0xff]  }
 0xf68   : > { %10182 = vmatpush1.bf16.msra.mxu1 %v14168_v24  ;;  %10386 = vmatprep.subr.bf16.mxu0 %v14366_v41  ;;  %v14254_v24 = vld [vmem:[#allocation10 + $0x334] ss:$24 sps:$4 sm:$0xff]   ;;  %v14436_v41 = vld [vmem:[#allocation10 + $0x8d8] ss:$24 sps:$4 sm:$0xff]  }
 0xf69   : > { %10183 = vmatprep.subr.bf16.mxu1 %v14176_v27  ;;  %v14424_v27 = vld [vmem:[#allocation10 + $0x878] ss:$24 sps:$4 sm:$0xff]  }
 0xf6b   : > { %10387 = vmatpush1.bf16.msra.mxu0 %v14364_v38  ;;  %v16546_v38 = vpack.c.bf16 %v12318_v22, %v12318_v22  ;;  %v14385_v22 = vld [vmem:[#allocation10 + $0x750] ss:$24 sps:$4 sm:$0xff]  }
 0xf6c   : > { %10184 = vmatpush1.bf16.msra.mxu1 %v14174_v49  ;;  %10388 = vmatprep.subr.bf16.mxu0 %v14372_v43  ;;  %v14252_v49 = vld [vmem:[#allocation10 + $0x330] ss:$24 sps:$4 sm:$0xff]   ;;  %v14270_v43 = vld [vmem:[#allocation10 + $0x3c0] ss:$24 sps:$4 sm:$0xff]  }
 0xf6d   : > { %10185 = vmatprep.subr.bf16.mxu1 %v14182_v34  ;;  %v16543_v34 = vpack.c.bf16 %v8402_v30, %v8402_v30  ;;  %v14399_v30 = vld [vmem:[#allocation10 + $0x7b4] ss:$24 sps:$4 sm:$0xff]  }
 0xf6f   : > { %10389 = vmatpush1.bf16.msra.mxu0 %v14370_v17  ;;  %10412 = vmatprep.mubr.bf16.mxu0 %v16543_v34  ;;  %v14284_v17 = vld [vmem:[#allocation10 + $0x424] ss:$24 sps:$4 sm:$0xff]  }
 0xf70   : > { %10186 = vmatpush1.bf16.msra.mxu1 %v14180_v40  ;;  %10390 = vmatprep.subr.bf16.mxu0 %v14378_v10  ;;  %v14438_v40 = vld [vmem:[#allocation10 + $0x8dc] ss:$24 sps:$4 sm:$0xff]   ;;  %v14282_v10 = vld [vmem:[#allocation10 + $0x420] ss:$24 sps:$4 sm:$0xff]  }
 0xf71   : > { %10187 = vmatprep.subr.bf16.mxu1 %v14188_v55  ;;  %v14258_v55 = vld [vmem:[#allocation10 + $0x360] ss:$24 sps:$4 sm:$0xff]  }
 0xf73   : > { %10391 = vmatpush1.bf16.msra.mxu0 %v14376_v11  ;;  %v14296_v11 = vld [vmem:[#allocation10 + $0x484] ss:$24 sps:$4 sm:$0xff]  }
 0xf74   : > { %10188 = vmatpush1.bf16.msra.mxu1 %v14186_v2  ;;  %10392 = vmatprep.subr.bf16.mxu0 %v14384_v56  ;;  %v14264_v2 = vld [vmem:[#allocation10 + $0x390] ss:$24 sps:$4 sm:$0xff]   ;;  %v14294_v56 = vld [vmem:[#allocation10 + $0x480] ss:$24 sps:$4 sm:$0xff]  }
 0xf75   : > { %10189 = vmatprep.subr.bf16.mxu1 %v14194_v28  ;;  %v14272_v28 = vld [vmem:[#allocation10 + $0x3c4] ss:$24 sps:$4 sm:$0xff]  }
 0xf77   : > { %10393 = vmatpush1.bf16.msra.mxu0 %v14382_v44  ;;  %v14308_v44 = vld [vmem:[#allocation10 + $0x4e4] ss:$24 sps:$4 sm:$0xff]  }
 0xf78   : > { %10190 = vmatpush1.bf16.msra.mxu1 %v14192_v47  ;;  %10394 = vmatprep.subr.bf16.mxu0 %v14390_v50  ;;  %v14278_v47 = vld [vmem:[#allocation10 + $0x3f4] ss:$24 sps:$4 sm:$0xff]   ;;  %v14306_v50 = vld [vmem:[#allocation10 + $0x4e0] ss:$24 sps:$4 sm:$0xff]  }
 0xf79   : > { %10191 = vmatprep.subr.bf16.mxu1 %v14200_v32  ;;  %v14276_v32 = vld [vmem:[#allocation10 + $0x3f0] ss:$24 sps:$4 sm:$0xff]  }
 0xf7b   : > { %10395 = vmatpush1.bf16.msra.mxu0 %v14388_v51  ;;  %v14320_v51 = vld [vmem:[#allocation10 + $0x544] ss:$24 sps:$4 sm:$0xff]  }
 0xf7c   : > { %10192 = vmatpush1.bf16.msra.mxu1 %v14198_v26  ;;  %10396 = vmatprep.subr.bf16.mxu0 %v14396_v39  ;;  %v14290_v26 = vld [vmem:[#allocation10 + $0x454] ss:$24 sps:$4 sm:$0xff]   ;;  %v14318_v39 = vld [vmem:[#allocation10 + $0x540] ss:$24 sps:$4 sm:$0xff]  }
 0xf7d   : > { %10193 = vmatprep.subr.bf16.mxu1 %v14206_v35  ;;  %v14288_v35 = vld [vmem:[#allocation10 + $0x450] ss:$24 sps:$4 sm:$0xff]  }
 0xf7f   : > { %10397 = vmatpush1.bf16.msra.mxu0 %v14394_v61  ;;  %v14332_v61 = vld [vmem:[#allocation10 + $0x5a4] ss:$24 sps:$4 sm:$0xff]  }
 0xf80   : > { %10194 = vmatpush1.bf16.msra.mxu1 %v14204_v63  ;;  %10398 = vmatprep.subr.bf16.mxu0 %v14402_v62  ;;  %v14302_v63 = vld [vmem:[#allocation10 + $0x4b4] ss:$24 sps:$4 sm:$0xff]   ;;  %v14330_v62 = vld [vmem:[#allocation10 + $0x5a0] ss:$24 sps:$4 sm:$0xff]  }
 0xf81   : > { %10195 = vmatprep.subr.bf16.mxu1 %v14212_v8  ;;  %v14300_v8 = vld [vmem:[#allocation10 + $0x4b0] ss:$24 sps:$4 sm:$0xff]  }
 0xf83   : > { %10399 = vmatpush1.bf16.msra.mxu0 %v14400_v0  ;;  %v14345_v0 = vld [vmem:[#allocation10 + $0x604] ss:$24 sps:$4 sm:$0xff]  }
 0xf84   : > { %10196 = vmatpush1.bf16.msra.mxu1 %v14210_v25  ;;  %10400 = vmatprep.subr.bf16.mxu0 %v14408_v1  ;;  %v14314_v25 = vld [vmem:[#allocation10 + $0x514] ss:$24 sps:$4 sm:$0xff]   ;;  %v14343_v1 = vld [vmem:[#allocation10 + $0x600] ss:$24 sps:$4 sm:$0xff]  }
 0xf85   : > { %10197 = vmatprep.subr.bf16.mxu1 %v14218_v58  ;;  %v14312_v58 = vld [vmem:[#allocation10 + $0x510] ss:$24 sps:$4 sm:$0xff]  }
 0xf87   : > { %10401 = vmatpush1.bf16.msra.mxu0 %v14406_v60  ;;  %v14357_v60 = vld [vmem:[#allocation10 + $0x664] ss:$24 sps:$4 sm:$0xff]  }
 0xf88   : > { %10198 = vmatpush1.bf16.msra.mxu1 %v14216_v29  ;;  %10402 = vmatprep.subr.bf16.mxu0 %v14414_v5  ;;  %v14326_v29 = vld [vmem:[#allocation10 + $0x574] ss:$24 sps:$4 sm:$0xff]   ;;  %v14355_v5 = vld [vmem:[#allocation10 + $0x660] ss:$24 sps:$4 sm:$0xff]  }
 0xf89   : > { %10199 = vmatprep.subr.bf16.mxu1 %v14224_v46  ;;  %v14324_v46 = vld [vmem:[#allocation10 + $0x570] ss:$24 sps:$4 sm:$0xff]  }
 0xf8b   : > { %10403 = vmatpush1.bf16.msra.mxu0 %v14412_v23  ;;  %v14369_v23 = vld [vmem:[#allocation10 + $0x6c4] ss:$24 sps:$4 sm:$0xff]  }
 0xf8c   : > { %10200 = vmatpush1.bf16.msra.mxu1 %v14222_v59  ;;  %10404 = vmatprep.subr.bf16.mxu0 %v14420_v6  ;;  %v14338_v59 = vld [vmem:[#allocation10 + $0x5d4] ss:$24 sps:$4 sm:$0xff]   ;;  %v14367_v6 = vld [vmem:[#allocation10 + $0x6c0] ss:$24 sps:$4 sm:$0xff]  }
 0xf8d   : > { %10201 = vmatprep.subr.bf16.mxu1 %v14230_v52  ;;  %v14336_v52 = vld [vmem:[#allocation10 + $0x5d0] ss:$24 sps:$4 sm:$0xff]  }
 0xf8f   : > { %10405 = vmatpush1.bf16.msra.mxu0 %v14418_v14  ;;  %v14381_v14 = vld [vmem:[#allocation10 + $0x724] ss:$24 sps:$4 sm:$0xff]  }
 0xf90   : > { %10202 = vmatpush1.bf16.msra.mxu1 %v14228_v3  ;;  %10406 = vmatprep.subr.bf16.mxu0 %v14426_v7  ;;  %v14351_v3 = vld [vmem:[#allocation10 + $0x634] ss:$24 sps:$4 sm:$0xff]   ;;  %v14379_v7 = vld [vmem:[#allocation10 + $0x720] ss:$24 sps:$4 sm:$0xff]  }
 0xf91   : > { %10203 = vmatprep.subr.bf16.mxu1 %v14236_v15  ;;  %v14349_v15 = vld [vmem:[#allocation10 + $0x630] ss:$24 sps:$4 sm:$0xff]  }
 0xf93   : > { %10407 = vmatpush1.bf16.msra.mxu0 %v14424_v27  ;;  %v14391_v27 = vld [vmem:[#allocation10 + $0x780] ss:$24 sps:$4 sm:$0xff]  }
 0xf94   : > { %10204 = vmatpush1.bf16.msra.mxu1 %v14234_v45  ;;  %10408 = vmatprep.subr.bf16.mxu0 %v14432_v33  ;;  %v14363_v45 = vld [vmem:[#allocation10 + $0x694] ss:$24 sps:$4 sm:$0xff]   ;;  %v14397_v33 = vld [vmem:[#allocation10 + $0x7b0] ss:$24 sps:$4 sm:$0xff]  }
 0xf95   : > { %10205 = vmatprep.subr.bf16.mxu1 %v14242_v48  ;;  %v14361_v48 = vld [vmem:[#allocation10 + $0x690] ss:$24 sps:$4 sm:$0xff]  }
 0xf97   : > { %10409 = vmatpush1.bf16.msra.mxu0 %v14430_v12  ;;  %v14411_v12 = vld [vmem:[#allocation10 + $0x814] ss:$24 sps:$4 sm:$0xff]  }
 0xf98   : > { %10206 = vmatpush1.bf16.msra.mxu1 %v14240_v9  ;;  %10410 = vmatprep.subr.bf16.mxu0 %v14438_v40  ;;  %v14375_v9 = vld [vmem:[#allocation10 + $0x6f4] ss:$24 sps:$4 sm:$0xff]   ;;  %v14409_v40 = vld [vmem:[#allocation10 + $0x810] ss:$24 sps:$4 sm:$0xff]  }
 0xf99   : > { %10216 = vmatprep.subr.bf16.mxu1 %v14248_v36  ;;  %v14373_v36 = vld [vmem:[#allocation10 + $0x6f0] ss:$24 sps:$4 sm:$0xff]  }
 0xf9b   : > { %10208 = vmatmul.mubr.bf16.vlgmr.msra.gmra.mrb[20].mxu1 %v16503_v42  ;;  %10411 = vmatpush1.bf16.msra.mxu0 %v14436_v41  ;;  %v14423_v41 = vld [vmem:[#allocation10 + $0x874] ss:$24 sps:$4 sm:$0xff]  }
 0xf9c   : > { %10217 = vmatpush1.bf16.msra.mxu1 %v14246_v21  ;;  %10248 = vmatprep.mubr.bf16.mxu1 %v16532_v19  ;;  %v14387_v21 = vld [vmem:[#allocation10 + $0x754] ss:$24 sps:$4 sm:$0xff]  }
 0xf9d   : > { %10218 = vmatprep.subr.bf16.mxu1 %v14254_v24  ;;  %v14393_v24 = vld [vmem:[#allocation10 + $0x784] ss:$24 sps:$4 sm:$0xff]  }
 0xf9e   : > { %10413 = vmatmul.mubr.bf16.vlgmr.msra.gmra.mrb[24].mxu0 %v16546_v38 }
 0xfa0   : > { %10219 = vmatpush1.bf16.msra.mxu1 %v14252_v49  ;;  %v14405_v49 = vld [vmem:[#allocation10 + $0x7e4] ss:$24 sps:$4 sm:$0xff]  }
 0xfa1   : > { %10220 = vmatprep.subr.bf16.mxu1 %v14260_v37  ;;  %v14403_v37 = vld [vmem:[#allocation10 + $0x7e0] ss:$24 sps:$4 sm:$0xff]  }
 0xfa4   : > { %10221 = vmatpush1.bf16.msra.mxu1 %v14258_v55  ;;  %v14417_v55 = vld [vmem:[#allocation10 + $0x844] ss:$24 sps:$4 sm:$0xff]  }
 0xfa5   : > { %10222 = vmatprep.subr.bf16.mxu1 %v14266_v4  ;;  %v14415_v4 = vld [vmem:[#allocation10 + $0x840] ss:$24 sps:$4 sm:$0xff]  }
 0xfa8   : > { %10223 = vmatpush1.bf16.msra.mxu1 %v14264_v2  ;;  %v14421_v2 = vld [vmem:[#allocation10 + $0x870] ss:$24 sps:$4 sm:$0xff]  }
 0xfa9   : > { %10224 = vmatprep.subr.bf16.mxu1 %v14272_v28  ;;  %v14429_v28 = vld [vmem:[#allocation10 + $0x8a4] ss:$24 sps:$4 sm:$0xff]  }
 0xfac   : > { %10225 = vmatpush1.bf16.msra.mxu1 %v14270_v43  ;;  %v14427_v43 = vld [vmem:[#allocation10 + $0x8a0] ss:$24 sps:$4 sm:$0xff]  }
 0xfad   : > { %10226 = vmatprep.subr.bf16.mxu1 %v14278_v47  ;;  %v14435_v47 = vld [vmem:[#allocation10 + $0x8d4] ss:$24 sps:$4 sm:$0xff]  }
 0xfb0   : > { %10227 = vmatpush1.bf16.msra.mxu1 %v14276_v32  ;;  %v14433_v32 = vld [vmem:[#allocation10 + $0x8d0] ss:$24 sps:$4 sm:$0xff]  }
 0xfb1   : > { %10228 = vmatprep.subr.bf16.mxu1 %v14284_v17  ;;  %v14441_v17 = vld [vmem:[#allocation10 + $0x14] ss:$24 sps:$4 sm:$0xff]  }
 0xfb4   : > { %10229 = vmatpush1.bf16.msra.mxu1 %v14282_v10  ;;  %v14439_v10 = vld [vmem:[#allocation10 + $0x10] ss:$24 sps:$4 sm:$0xff]  }
 0xfb5   : > { %10230 = vmatprep.subr.bf16.mxu1 %v14290_v26  ;;  %v14444_v26 = vld [vmem:[#allocation10 + $0x44] ss:$24 sps:$4 sm:$0xff]  }
 0xfb8   : > { %10231 = vmatpush1.bf16.msra.mxu1 %v14288_v35  ;;  %v14442_v35 = vld [vmem:[#allocation10 + $0x40] ss:$24 sps:$4 sm:$0xff]  }
 0xfb9   : > { %10232 = vmatprep.subr.bf16.mxu1 %v14296_v11  ;;  %v14447_v11 = vld [vmem:[#allocation10 + $0x74] ss:$24 sps:$4 sm:$0xff]  }
 0xfbc   : > { %10233 = vmatpush1.bf16.msra.mxu1 %v14294_v56  ;;  %v14445_v56 = vld [vmem:[#allocation10 + $0x70] ss:$24 sps:$4 sm:$0xff]  }
 0xfbd   : > { %10234 = vmatprep.subr.bf16.mxu1 %v14302_v63  ;;  %v14450_v63 = vld [vmem:[#allocation10 + $0xa4] ss:$24 sps:$4 sm:$0xff]  }
 0xfc0   : > { %10235 = vmatpush1.bf16.msra.mxu1 %v14300_v8  ;;  %v14448_v8 = vld [vmem:[#allocation10 + $0xa0] ss:$24 sps:$4 sm:$0xff]  }
 0xfc1   : > { %10236 = vmatprep.subr.bf16.mxu1 %v14308_v44  ;;  %v14453_v44 = vld [vmem:[#allocation10 + $0xd4] ss:$24 sps:$4 sm:$0xff]  }
 0xfc4   : > { %10237 = vmatpush1.bf16.msra.mxu1 %v14306_v50  ;;  %v14451_v50 = vld [vmem:[#allocation10 + $0xd0] ss:$24 sps:$4 sm:$0xff]  }
 0xfc5   : > { %10238 = vmatprep.subr.bf16.mxu1 %v14314_v25  ;;  %v14456_v25 = vld [vmem:[#allocation10 + $0x104] ss:$24 sps:$4 sm:$0xff]  }
 0xfc8   : > { %10239 = vmatpush1.bf16.msra.mxu1 %v14312_v58  ;;  %v12315_v58 = vld [vmem:[%s16000_s29 + $0x2] ss:$0 sm:$0xff] }
 0xfc9   : > { %10240 = vmatprep.subr.bf16.mxu1 %v14320_v51  ;;  %v14454_v51 = vld [vmem:[#allocation10 + $0x100] ss:$24 sps:$4 sm:$0xff]  }
 0xfcc   : > { %10241 = vmatpush1.bf16.msra.mxu1 %v14318_v39 }
 0xfcd   : > { %10242 = vmatprep.subr.bf16.mxu1 %v14326_v29 }
 0xfd0   : > { %10243 = vmatpush1.bf16.msra.mxu1 %v14324_v46 }
 0xfd1   : > { %10244 = vmatprep.subr.bf16.mxu1 %v14332_v61  ;;  %v14457_v61 = vld [vmem:[#allocation10 + $0x130] ss:$24 sps:$4 sm:$0xff]  }
 0xfd4   : > { %10245 = vmatpush1.bf16.msra.mxu1 %v14330_v62  ;;  %v14462_v62 = vld [vmem:[#allocation10 + $0x164] ss:$24 sps:$4 sm:$0xff]  }
 0xfd5   : > { %10246 = vmatprep.subr.bf16.mxu1 %v14338_v59  ;;  %v14460_v59 = vld [vmem:[#allocation10 + $0x160] ss:$24 sps:$4 sm:$0xff]  }
 0xfd8   : > { %10247 = vmatpush1.bf16.msra.mxu1 %v14336_v52  ;;  %v14465_v52 = vld [vmem:[#allocation10 + $0x194] ss:$24 sps:$4 sm:$0xff]  }
 0xfd9   : > { %10257 = vmatprep.subr.bf16.mxu1 %v14345_v0  ;;  %v14463_v0 = vld [vmem:[#allocation10 + $0x190] ss:$24 sps:$4 sm:$0xff]  }
 0xfdb   : > { %10249 = vmatmul.mubr.bf16.vlgmr.msra.gmra.mrb[20].mxu1 %v16535_v31 }
 0xfdc   : > { %10258 = vmatpush1.bf16.msra.mxu1 %v14343_v1  ;;  %10289 = vmatprep.mubr.bf16.mxu1 %v16543_v34  ;;  %v14468_v1 = vld [vmem:[#allocation10 + $0x1c4] ss:$24 sps:$4 sm:$0xff]  }
 0xfdd   : > { %10259 = vmatprep.subr.bf16.mxu1 %v14351_v3  ;;  %v14466_v3 = vld [vmem:[#allocation10 + $0x1c0] ss:$24 sps:$4 sm:$0xff]  }
 0xfe0   : > { %10260 = vmatpush1.bf16.msra.mxu1 %v14349_v15  ;;  %v14471_v15 = vld [vmem:[#allocation10 + $0x1f4] ss:$24 sps:$4 sm:$0xff]  }
 0xfe1   : > { %10261 = vmatprep.subr.bf16.mxu1 %v14357_v60  ;;  %v14469_v60 = vld [vmem:[#allocation10 + $0x1f0] ss:$24 sps:$4 sm:$0xff]  }
 0xfe4   : > { %10262 = vmatpush1.bf16.msra.mxu1 %v14355_v5  ;;  %v14474_v5 = vld [vmem:[#allocation10 + $0x224] ss:$24 sps:$4 sm:$0xff]  }
 0xfe5   : > { %10263 = vmatprep.subr.bf16.mxu1 %v14363_v45  ;;  %v14472_v45 = vld [vmem:[#allocation10 + $0x220] ss:$24 sps:$4 sm:$0xff]  }
 0xfe8   : > { %10264 = vmatpush1.bf16.msra.mxu1 %v14361_v48  ;;  %v14477_v48 = vld [vmem:[#allocation10 + $0x254] ss:$24 sps:$4 sm:$0xff]  }
 0xfe9   : > { %10265 = vmatprep.subr.bf16.mxu1 %v14369_v23  ;;  %v14475_v23 = vld [vmem:[#allocation10 + $0x250] ss:$24 sps:$4 sm:$0xff]  }
 0xfec   : > { %10266 = vmatpush1.bf16.msra.mxu1 %v14367_v6  ;;  %v14480_v6 = vld [vmem:[#allocation10 + $0x284] ss:$24 sps:$4 sm:$0xff]  }
 0xfed   : > { %10267 = vmatprep.subr.bf16.mxu1 %v14375_v9  ;;  %v14478_v9 = vld [vmem:[#allocation10 + $0x280] ss:$24 sps:$4 sm:$0xff]  }
 0xff0   : > { %10268 = vmatpush1.bf16.msra.mxu1 %v14373_v36  ;;  %v14483_v36 = vld [vmem:[#allocation10 + $0x2b4] ss:$24 sps:$4 sm:$0xff]  }
 0xff1   : > { %10269 = vmatprep.subr.bf16.mxu1 %v14381_v14  ;;  %v14481_v14 = vld [vmem:[#allocation10 + $0x2b0] ss:$24 sps:$4 sm:$0xff]  }
 0xff4   : > { %10270 = vmatpush1.bf16.msra.mxu1 %v14379_v7  ;;  %v14486_v7 = vld [vmem:[#allocation10 + $0x2e4] ss:$24 sps:$4 sm:$0xff]  }
 0xff5   : > { %10271 = vmatprep.subr.bf16.mxu1 %v14387_v21  ;;  %v14484_v21 = vld [vmem:[#allocation10 + $0x2e0] ss:$24 sps:$4 sm:$0xff]  }
 0xff8   : > { %10272 = vmatpush1.bf16.msra.mxu1 %v14385_v22  ;;  %v14489_v22 = vld [vmem:[#allocation10 + $0x314] ss:$24 sps:$4 sm:$0xff]  }
 0xff9   : > { %10273 = vmatprep.subr.bf16.mxu1 %v14393_v24  ;;  %v14487_v24 = vld [vmem:[#allocation10 + $0x310] ss:$24 sps:$4 sm:$0xff]  }
 0xffc   : > { %10274 = vmatpush1.bf16.msra.mxu1 %v14391_v27  ;;  %v14492_v27 = vld [vmem:[#allocation10 + $0x344] ss:$24 sps:$4 sm:$0xff]  }
 0xffd   : > { %10275 = vmatprep.subr.bf16.mxu1 %v14399_v30  ;;  %v14490_v30 = vld [vmem:[#allocation10 + $0x340] ss:$24 sps:$4 sm:$0xff]  }
0x1000   : > { %10276 = vmatpush1.bf16.msra.mxu1 %v14397_v33  ;;  %v14495_v33 = vld [vmem:[#allocation10 + $0x374] ss:$24 sps:$4 sm:$0xff]  }
0x1001   : > { %10277 = vmatprep.subr.bf16.mxu1 %v14405_v49  ;;  %v14493_v49 = vld [vmem:[#allocation10 + $0x370] ss:$24 sps:$4 sm:$0xff]  }
0x1004   : > { %10278 = vmatpush1.bf16.msra.mxu1 %v14403_v37  ;;  %v14498_v37 = vld [vmem:[#allocation10 + $0x3a4] ss:$24 sps:$4 sm:$0xff]  }
0x1005   : > { %10279 = vmatprep.subr.bf16.mxu1 %v14411_v12  ;;  %v14496_v12 = vld [vmem:[#allocation10 + $0x3a0] ss:$24 sps:$4 sm:$0xff]  }
0x1008   : > { %10280 = vmatpush1.bf16.msra.mxu1 %v14409_v40  ;;  %v14501_v40 = vld [vmem:[#allocation10 + $0x3d4] ss:$24 sps:$4 sm:$0xff]  }
0x1009   : > { %10281 = vmatprep.subr.bf16.mxu1 %v14417_v55  ;;  %v14499_v55 = vld [vmem:[#allocation10 + $0x3d0] ss:$24 sps:$4 sm:$0xff]  }
0x100c   : > { %10282 = vmatpush1.bf16.msra.mxu1 %v14415_v4  ;;  %v14504_v4 = vld [vmem:[#allocation10 + $0x404] ss:$24 sps:$4 sm:$0xff]  }
0x100d   : > { %10283 = vmatprep.subr.bf16.mxu1 %v14423_v41  ;;  %v14507_v41 = vld [vmem:[#allocation10 + $0x434] ss:$24 sps:$4 sm:$0xff]  }
0x1010   : > { %10284 = vmatpush1.bf16.msra.mxu1 %v14421_v2  ;;  %v14510_v2 = vld [vmem:[#allocation10 + $0x464] ss:$24 sps:$4 sm:$0xff]  }
0x1011   : > { %10285 = vmatprep.subr.bf16.mxu1 %v14429_v28  ;;  %v14508_v28 = vld [vmem:[#allocation10 + $0x460] ss:$24 sps:$4 sm:$0xff]  }
0x1014   : > { %10286 = vmatpush1.bf16.msra.mxu1 %v14427_v43  ;;  %v14513_v43 = vld [vmem:[#allocation10 + $0x494] ss:$24 sps:$4 sm:$0xff]  }
0x1015   : > { %10287 = vmatprep.subr.bf16.mxu1 %v14435_v47  ;;  %v14511_v47 = vld [vmem:[#allocation10 + $0x490] ss:$24 sps:$4 sm:$0xff]  }
0x1018   : > { %10288 = vmatpush1.bf16.msra.mxu1 %v14433_v32  ;;  %v14516_v32 = vld [vmem:[#allocation10 + $0x4c4] ss:$24 sps:$4 sm:$0xff]  }
0x1019   : > { %10421 = vmatprep.subr.bf16.mxu1 %v14441_v17  ;;  %v14514_v17 = vld [vmem:[#allocation10 + $0x4c0] ss:$24 sps:$4 sm:$0xff]  }
0x101b   : > { %10290 = vmatmul.mubr.bf16.vlgmr.msra.gmra.mrb[20].mxu1 %v16546_v38 }
0x101c   : > { %10422 = vmatpush1.bf16.msra.mxu1 %v14439_v10  ;;  %10453 = vmatprep.mubr.bf16.mxu1 %v16501_v57  ;;  %v14459_v57 = vld [vmem:[#allocation10 + $0x134] ss:$24 sps:$4 sm:$0xff]  }
0x101d   : > { %10423 = vmatprep.subr.bf16.mxu1 %v14444_v26  ;;  %v14519_v26 = vld [vmem:[#allocation10 + $0x4f4] ss:$24 sps:$4 sm:$0xff]  }
0x1020   : > { %10424 = vmatpush1.bf16.msra.mxu1 %v14442_v35 }
0x1021   : > { %10425 = vmatprep.subr.bf16.mxu1 %v14447_v11 }
0x1024   : > { %10426 = vmatpush1.bf16.msra.mxu1 %v14445_v56 }
0x1025   : > { %10427 = vmatprep.subr.bf16.mxu1 %v14450_v63  ;;  %v14517_v63 = vld [vmem:[#allocation10 + $0x4f0] ss:$24 sps:$4 sm:$0xff]  }
0x1028   : > { %10428 = vmatpush1.bf16.msra.mxu1 %v14448_v8  ;;  %v14522_v8 = vld [vmem:[#allocation10 + $0x524] ss:$24 sps:$4 sm:$0xff]  }
0x1029   : > { %10429 = vmatprep.subr.bf16.mxu1 %v14453_v44  ;;  %v14520_v44 = vld [vmem:[#allocation10 + $0x520] ss:$24 sps:$4 sm:$0xff]  }
0x102c   : > { %10430 = vmatpush1.bf16.msra.mxu1 %v14451_v50  ;;  %v14525_v50 = vld [vmem:[#allocation10 + $0x554] ss:$24 sps:$4 sm:$0xff]  }
0x102d   : > { %10431 = vmatprep.subr.bf16.mxu1 %v14456_v25  ;;  %v14523_v25 = vld [vmem:[#allocation10 + $0x550] ss:$24 sps:$4 sm:$0xff]  }
0x102e   : > { %v8366_v39 = vpop.f32.mrb[6].mxu1 }
0x102f   : > { %v12613_v29 = vadd.f32 %v12315_v58, %v8366_v39  ;;  %v8368_v46 = vpop.f32.mrb[7].mxu1  ;;  %v14528_v58 = vld [vmem:[#allocation10 + $0x584] ss:$24 sps:$4 sm:$0xff]   ;;  %v14529_v39 = vld [vmem:[#allocation10 + $0x5b0] ss:$24 sps:$4 sm:$0xff]  }
0x1030   : > { %10432 = vmatpush1.bf16.msra.mxu1 %v14454_v51  ;;  %v14526_v51 = vld [vmem:[#allocation10 + $0x580] ss:$24 sps:$4 sm:$0xff]  }
0x1031   : > { %12316 = vst.msk [vmem:[%s16012_s0 + $0x4] sm:$0x3] %vm3235_vm3, %v12613_v29  ;;  %10433 = vmatprep.subr.bf16.mxu1 %v14459_v57  ;;  %v14531_v57 = vld [vmem:[#allocation10 + $0x5b4] ss:$24 sps:$4 sm:$0xff]   ;;  %v14534_v29 = vld [vmem:[#allocation10 + $0x5e4] ss:$24 sps:$4 sm:$0xff]  }
0x1032   : > { %v14532_v46 = vld [vmem:[#allocation10 + $0x5e0] ss:$24 sps:$4 sm:$0xff]  }
0x1034   : > { %10434 = vmatpush1.bf16.msra.mxu1 %v14457_v61  ;;  %v14537_v61 = vld [vmem:[#allocation10 + $0x614] ss:$24 sps:$4 sm:$0xff]  }
0x1035   : > { %10435 = vmatprep.subr.bf16.mxu1 %v14462_v62  ;;  %v14535_v62 = vld [vmem:[#allocation10 + $0x610] ss:$24 sps:$4 sm:$0xff]  }
0x1038   : > { %10436 = vmatpush1.bf16.msra.mxu1 %v14460_v59  ;;  %v14540_v59 = vld [vmem:[#allocation10 + $0x644] ss:$24 sps:$4 sm:$0xff]  }
0x1039   : > { %10437 = vmatprep.subr.bf16.mxu1 %v14465_v52  ;;  %v14538_v52 = vld [vmem:[#allocation10 + $0x640] ss:$24 sps:$4 sm:$0xff]  }
0x103c   : > { %10438 = vmatpush1.bf16.msra.mxu1 %v14463_v0  ;;  %v14543_v0 = vld [vmem:[#allocation10 + $0x674] ss:$24 sps:$4 sm:$0xff]  }
0x103d   : > { %10439 = vmatprep.subr.bf16.mxu1 %v14468_v1  ;;  %v14541_v1 = vld [vmem:[#allocation10 + $0x670] ss:$24 sps:$4 sm:$0xff]  }
0x1040   : > { %10440 = vmatpush1.bf16.msra.mxu1 %v14466_v3  ;;  %v14546_v3 = vld [vmem:[#allocation10 + $0x6a4] ss:$24 sps:$4 sm:$0xff]  }
0x1041   : > { %10441 = vmatprep.subr.bf16.mxu1 %v14471_v15  ;;  %v14544_v15 = vld [vmem:[#allocation10 + $0x6a0] ss:$24 sps:$4 sm:$0xff]  }
0x1044   : > { %10442 = vmatpush1.bf16.msra.mxu1 %v14469_v60  ;;  %v14549_v60 = vld [vmem:[#allocation10 + $0x6d4] ss:$24 sps:$4 sm:$0xff]  }
0x1045   : > { %10443 = vmatprep.subr.bf16.mxu1 %v14474_v5  ;;  %v14547_v5 = vld [vmem:[#allocation10 + $0x6d0] ss:$24 sps:$4 sm:$0xff]  }
0x1048   : > { %10444 = vmatpush1.bf16.msra.mxu1 %v14472_v45  ;;  %v14552_v45 = vld [vmem:[#allocation10 + $0x704] ss:$24 sps:$4 sm:$0xff]  }
0x1049   : > { %10445 = vmatprep.subr.bf16.mxu1 %v14477_v48  ;;  %v14555_v48 = vld [vmem:[#allocation10 + $0x734] ss:$24 sps:$4 sm:$0xff]  }
0x104c   : > { %10446 = vmatpush1.bf16.msra.mxu1 %v14475_v23  ;;  %v14558_v23 = vld [vmem:[#allocation10 + $0x764] ss:$24 sps:$4 sm:$0xff]  }
0x104d   : > { %10447 = vmatprep.subr.bf16.mxu1 %v14480_v6  ;;  %v14556_v6 = vld [vmem:[#allocation10 + $0x760] ss:$24 sps:$4 sm:$0xff]  }
0x1050   : > { %10448 = vmatpush1.bf16.msra.mxu1 %v14478_v9  ;;  %v14561_v9 = vld [vmem:[#allocation10 + $0x794] ss:$24 sps:$4 sm:$0xff]  }
0x1051   : > { %10449 = vmatprep.subr.bf16.mxu1 %v14483_v36  ;;  %v14559_v36 = vld [vmem:[#allocation10 + $0x790] ss:$24 sps:$4 sm:$0xff]  }
0x1054   : > { %10450 = vmatpush1.bf16.msra.mxu1 %v14481_v14  ;;  %v14564_v14 = vld [vmem:[#allocation10 + $0x7c4] ss:$24 sps:$4 sm:$0xff]  }
0x1055   : > { %10451 = vmatprep.subr.bf16.mxu1 %v14486_v7  ;;  %v14562_v7 = vld [vmem:[#allocation10 + $0x7c0] ss:$24 sps:$4 sm:$0xff]  }
0x1058   : > { %10452 = vmatpush1.bf16.msra.mxu1 %v14484_v21  ;;  %v14567_v21 = vld [vmem:[#allocation10 + $0x7f4] ss:$24 sps:$4 sm:$0xff]  }
0x1059   : > { %10462 = vmatprep.subr.bf16.mxu1 %v14489_v22  ;;  %v14565_v22 = vld [vmem:[#allocation10 + $0x7f0] ss:$24 sps:$4 sm:$0xff]  }
0x105b   : > { %10454 = vmatmul.mubr.bf16.vlgmr.msra.gmra.mrb[24].mxu1 %v16503_v42  ;;  %v14502_v42 = vld [vmem:[#allocation10 + $0x400] ss:$24 sps:$4 sm:$0xff]  }
0x105c   : > { %10463 = vmatpush1.bf16.msra.mxu1 %v14487_v24  ;;  %10494 = vmatprep.mubr.bf16.mxu1 %v16532_v19  ;;  %v14505_v19 = vld [vmem:[#allocation10 + $0x430] ss:$24 sps:$4 sm:$0xff]   ;;  %v14570_v24 = vld [vmem:[#allocation10 + $0x824] ss:$24 sps:$4 sm:$0xff]  }
0x105d   : > { %10464 = vmatprep.subr.bf16.mxu1 %v14492_v27  ;;  %v14568_v27 = vld [vmem:[#allocation10 + $0x820] ss:$24 sps:$4 sm:$0xff]  }
0x1060   : > { %10465 = vmatpush1.bf16.msra.mxu1 %v14490_v30  ;;  %v14573_v30 = vld [vmem:[#allocation10 + $0x854] ss:$24 sps:$4 sm:$0xff]  }
0x1061   : > { %10466 = vmatprep.subr.bf16.mxu1 %v14495_v33  ;;  %v14571_v33 = vld [vmem:[#allocation10 + $0x850] ss:$24 sps:$4 sm:$0xff]  }
0x1064   : > { %10467 = vmatpush1.bf16.msra.mxu1 %v14493_v49  ;;  %v14576_v49 = vld [vmem:[#allocation10 + $0x884] ss:$24 sps:$4 sm:$0xff]  }
0x1065   : > { %10468 = vmatprep.subr.bf16.mxu1 %v14498_v37  ;;  %v14574_v37 = vld [vmem:[#allocation10 + $0x880] ss:$24 sps:$4 sm:$0xff]  }
0x1068   : > { %10469 = vmatpush1.bf16.msra.mxu1 %v14496_v12  ;;  %v14579_v12 = vld [vmem:[#allocation10 + $0x8b4] ss:$24 sps:$4 sm:$0xff]  }
0x1069   : > { %10470 = vmatprep.subr.bf16.mxu1 %v14501_v40  ;;  %v14577_v40 = vld [vmem:[#allocation10 + $0x8b0] ss:$24 sps:$4 sm:$0xff]  }
0x106c   : > { %10471 = vmatpush1.bf16.msra.mxu1 %v14499_v55  ;;  %v14582_v55 = vld [vmem:[#allocation10 + $0x8e4] ss:$24 sps:$4 sm:$0xff]  }
0x106d   : > { %10472 = vmatprep.subr.bf16.mxu1 %v14504_v4  ;;  %v14580_v4 = vld [vmem:[#allocation10 + $0x8e0] ss:$24 sps:$4 sm:$0xff]  }
0x1070   : > { %10473 = vmatpush1.bf16.msra.mxu1 %v14502_v42  ;;  %v8703_v42 = vld [vmem:[#allocation11] sm:$0x3f] }
0x1071   : > { %10474 = vmatprep.subr.bf16.mxu1 %v14507_v41  ;;  %v16558_v10 = vpop.f32.mrb[24].mxu0  ;;  %v8716_v41 = vrot.slane %v8703_v42, %v15715_v18 }
0x1072   : > { %v16560_v35 = vpop.f32.mrb[25].mxu0 }
0x1073   : > { %v10418_v11 = vpop.f32.mrb[26].mxu0 }
0x1074   : > { %10475 = vmatpush1.bf16.msra.mxu1 %v14505_v19  ;;  %v10419_v56 = vpop.f32.mrb[27].mxu0  ;;  %v8720_v19 = vrot.slane %v8703_v42, %v15719_v20 }
0x1075   : > { %10476 = vmatprep.subr.bf16.mxu1 %v14510_v2  ;;  %v12616_v2 = vadd.f32 %v16558_v10, %v8716_v41 }
0x1077   : > { %14667 = vtanh.f32 %v12616_v2 }
0x1078   : > { %10477 = vmatpush1.bf16.msra.mxu1 %v14508_v28  ;;  %v8708_v28 = vrot.slane %v8703_v42, %v15708_v13 }
0x1079   : > { %10478 = vmatprep.subr.bf16.mxu1 %v14513_v43  ;;  %v8712_v43 = vrot.slane %v8703_v42, %v15711_v16 }
0x107c   : > { %10479 = vmatpush1.bf16.msra.mxu1 %v14511_v47  ;;  %v12617_v47 = vadd.f32 %v16560_v35, %v8720_v19 }
0x107d   : > { %10480 = vmatprep.subr.bf16.mxu1 %v14516_v32 }
0x107e   : > { %14669 = vtanh.f32 %v12617_v47 }
0x1080   : > { %10481 = vmatpush1.bf16.msra.mxu1 %v14514_v17 }
0x1081   : > { %10482 = vmatprep.subr.bf16.mxu1 %v14519_v26  ;;  %v14668_v10 = vpop.eup %14667 }
0x1084   : > { %10483 = vmatpush1.bf16.msra.mxu1 %v14517_v63  ;;  %v10550_v63 = vld [vmem:[#allocation13] sm:$0x3f] }
0x1085   : > { %10484 = vmatprep.subr.bf16.mxu1 %v14522_v8  ;;  %v10563_v8 = vrot.slane %v10550_v63, %v15715_v18  ;;  %v10567_v35 = vrot.slane %v10550_v63, %v15719_v20  ;;  %v8724_v20 = vrot.slane %v8703_v42, %v15724_v53 }
0x1088   : > { %10485 = vmatpush1.bf16.msra.mxu1 %v14520_v44  ;;  %v10555_v44 = vrot.slane %v10550_v63, %v15708_v13 }
0x1089   : > { %10486 = vmatprep.subr.bf16.mxu1 %v14525_v50  ;;  %v10559_v50 = vrot.slane %v10550_v63, %v15711_v16 }
0x108c   : > { %10487 = vmatpush1.bf16.msra.mxu1 %v14523_v25  ;;  %v14670_v25 = vpop.eup %14669 }
0x108d   : > { %10488 = vmatprep.subr.bf16.mxu1 %v14528_v58 }
0x1090   : > { %10489 = vmatpush1.bf16.msra.mxu1 %v14526_v51  ;;  %v10584_v51 = vmul.f32 %v14668_v10, %v10563_v8 }
0x1091   : > { %10490 = vmatprep.subr.bf16.mxu1 %v14531_v57 }
0x1092   : > { %v10592_v18 = vsel %vm10588_vm4, %v10584_v51, 0.0 }
0x1094   : > { %10491 = vmatpush1.bf16.msra.mxu1 %v14529_v39 }
0x1095   : > { %10492 = vmatprep.subr.bf16.mxu1 %v14534_v29 }
0x1098   : > { %10493 = vmatpush1.bf16.msra.mxu1 %v14532_v46  ;;  %v10585_v46 = vmul.f32 %v14670_v25, %v10567_v35 }
0x1099   : > { %10503 = vmatprep.subr.bf16.mxu1 %v14537_v61 }
0x109a   : > { %v10594_v13 = vsel %vm10588_vm4, %v10585_v46, 0.0 }
0x109b   : > { %10495 = vmatmul.mubr.bf16.vlgmr.msra.gmra.mrb[24].mxu1 %v16535_v31  ;;  %v14550_v31 = vld [vmem:[#allocation10 + $0x700] ss:$24 sps:$4 sm:$0xff]  }
0x109c   : > { %10504 = vmatpush1.bf16.msra.mxu1 %v14535_v62  ;;  %10535 = vmatprep.mubr.bf16.mxu1 %v16543_v34  ;;  %v14553_v34 = vld [vmem:[#allocation10 + $0x730] ss:$24 sps:$4 sm:$0xff]  }
0x109d   : > { %10505 = vmatprep.subr.bf16.mxu1 %v14540_v59 }
0x10a0   : > { %10506 = vmatpush1.bf16.msra.mxu1 %v14538_v52 }
0x10a1   : > { %10507 = vmatprep.subr.bf16.mxu1 %v14543_v0  ;;  %v8728_v0 = vrot.slane %v8703_v42, %v15727_v54 }
0x10a4   : > { %10508 = vmatpush1.bf16.msra.mxu1 %v14541_v1 }
0x10a5   : > { %10509 = vmatprep.subr.bf16.mxu1 %v14546_v3 }
0x10a8   : > { %10510 = vmatpush1.bf16.msra.mxu1 %v14544_v15 }
0x10a9   : > { %10511 = vmatprep.subr.bf16.mxu1 %v14549_v60 }
0x10ac   : > { %10512 = vmatpush1.bf16.msra.mxu1 %v14547_v5 }
0x10ad   : > { %10513 = vmatprep.subr.bf16.mxu1 %v14552_v45 }
0x10b0   : > { %10514 = vmatpush1.bf16.msra.mxu1 %v14550_v31  ;;  %v10571_v31 = vrot.slane %v10550_v63, %v15724_v53 }
0x10b1   : > { %10515 = vmatprep.subr.bf16.mxu1 %v14555_v48  ;;  %v10575_v48 = vrot.slane %v10550_v63, %v15727_v54 }
0x10b4   : > { %10516 = vmatpush1.bf16.msra.mxu1 %v14553_v34 }
0x10b5   : > { %10517 = vmatprep.subr.bf16.mxu1 %v14558_v23 }
0x10b8   : > { %10518 = vmatpush1.bf16.msra.mxu1 %v14556_v6 }
0x10b9   : > { %10519 = vmatprep.subr.bf16.mxu1 %v14561_v9 }
0x10bc   : > { %10520 = vmatpush1.bf16.msra.mxu1 %v14559_v36 }
0x10bd   : > { %10521 = vmatprep.subr.bf16.mxu1 %v14564_v14 }
0x10c0   : > { %10522 = vmatpush1.bf16.msra.mxu1 %v14562_v7 }
0x10c1   : > { %10523 = vmatprep.subr.bf16.mxu1 %v14567_v21 }
0x10c4   : > { %10524 = vmatpush1.bf16.msra.mxu1 %v14565_v22  ;;  %v12607_v22 = vld [vmem:[#allocation2] ss:$0 sm:$0xff] }
0x10c5   : > { %10525 = vmatprep.subr.bf16.mxu1 %v14570_v24 }
0x10c8   : > { %10526 = vmatpush1.bf16.msra.mxu1 %v14568_v27 }
0x10c9   : > { %10527 = vmatprep.subr.bf16.mxu1 %v14573_v30 }
0x10cc   : > { %10528 = vmatpush1.bf16.msra.mxu1 %v14571_v33 }
0x10cd   : > { %10529 = vmatprep.subr.bf16.mxu1 %v14576_v49 }
0x10d0   : > { %10530 = vmatpush1.bf16.msra.mxu1 %v14574_v37 }
0x10d1   : > { %10531 = vmatprep.subr.bf16.mxu1 %v14579_v12 }
0x10d4   : > { %10532 = vmatpush1.bf16.msra.mxu1 %v14577_v40 }
0x10d5   : > { %10533 = vmatprep.subr.bf16.mxu1 %v14582_v55 }
0x10d8   : > { %10534 = vmatpush1.bf16.msra.mxu1 %v14580_v4 }
0x10db   : > { %10536 = vmatmul.mubr.bf16.vlgmr.msra.gmra.mrb[24].mxu1 %v16546_v38 }
0x10ee   : > { %v10291_v32 = vpop.f32.mrb[20].mxu1 }
0x10ef   : > { %v12614_v17 = vadd.f32 %v10291_v32, %v8708_v28  ;;  %v10293_v26 = vpop.f32.mrb[21].mxu1 }
0x10f0   : > { %v12615_v11 = vadd.f32 %v10293_v26, %v8712_v43  ;;  %v10295_v56 = vpop.f32.mrb[22].mxu1 }
0x10f1   : > { %14671 = vtanh.f32 %v12614_v17  ;;  %v10296_v38 = vpop.f32.mrb[23].mxu1 }
0x10f2   : > { %14673 = vtanh.f32 %v12615_v11 }
0x10fb   : > { %v14672_v58 = vpop.eup %14671 }
0x10fc   : > { %v14674_v57 = vpop.eup %14673  ;;  %v10582_v39 = vmul.f32 %v14672_v58, %v10555_v44 }
0x10fd   : > { %v10583_v29 = vmul.f32 %v14674_v57, %v10559_v50 }
0x10fe   : > { %v10589_v61 = vsel %vm10588_vm4, %v10582_v39, 0.0 }
0x10ff   : > { %v10590_v62 = vsel %vm10588_vm4, %v10583_v29, 0.0 }
0x1100   : > { %v10591_v59 = vadd.f32 %v10590_v62, %v10589_v61 }
0x1102   : > { %v10593_v16 = vadd.f32 %v10592_v18, %v10591_v59 }
0x1104   : > { %v10595_v52 = vadd.f32 %v10594_v13, %v10593_v16 }
0x11ae   : > { %v10537_v1 = vpop.f32.mrb[24].mxu1 }
0x11af   : > { %v12618_v3 = vadd.f32 %v10537_v1, %v8724_v20  ;;  %v10539_v15 = vpop.f32.mrb[25].mxu1 }
0x11b0   : > { %v12619_v60 = vadd.f32 %v10539_v15, %v8728_v0  ;;  %v10541_v5 = vpop.f32.mrb[26].mxu1 }
0x11b1   : > { %14675 = vtanh.f32 %v12618_v3  ;;  %v10542_v45 = vpop.f32.mrb[27].mxu1 }
0x11b2   : > { %14677 = vtanh.f32 %v12619_v60 }
0x11bb   : > { %v14676_v34 = vpop.eup %14675 }
0x11bc   : > { %v14678_v23 = vpop.eup %14677  ;;  %v10586_v6 = vmul.f32 %v14676_v34, %v10571_v31 }
0x11bd   : > { %v10587_v9 = vmul.f32 %v14678_v23, %v10575_v48 }
0x11be   : > { %v10596_v36 = vsel %vm10588_vm4, %v10586_v6, 0.0 }
0x11bf   : > { %v10597_v14 = vadd.f32 %v10596_v36, %v10595_v52  ;;  %v10598_v7 = vsel %vm10588_vm4, %v10587_v9, 0.0 }
0x11c1   : > { %v10599_v21 = vadd.f32 %v10598_v7, %v10597_v14 }
0x11c3   : > { %10600 = vadd.xlane.f32.xlu1 %v10599_v21 }
0x1250   : > { %v10601_v53 = vpop.xlane.xlu1 %10600 }
0x1251   : > { %v10609_v54 = vadd.f32 %v12607_v22, %v10601_v53 }
0x1253   : > { %10611 = vst.msk [vmem:[%s650_s12] sm:$0x3] %vm10610_vm5, %v10609_v54 }
0x1254 PF: > { %s16684_s30 = sld [smem:[#allocation21_spill]]  ;;  %s16685_s26 = sld [smem:[#allocation19_spill]] }
0x1255   : > { %s16686_s29 = sld [smem:[#allocation22_spill]]  ;;  %s16687_s27 = smov %s14987_s28 }
0x125a   : > { %p26_p7 = scmp.ge.s32.totalorder %s16684_s30, 8   ;;  %s16688_s28 = smov %s16685_s26 }
0x125c   :  { %28 = sbr.rel (!%p26_p7) target bundleno = 12 (0xc), region = 184 }
0x1263   :  { %10665 = vsyncpa [#allocation4], 1 }
0x1264   :  { %10667 = vsyncpa [#allocation4 + $0x1], 1 }
0x1265   :  { %10668 = vsyncpa [#allocation6], 1 }
0x1266   :  { %10669 = vsyncpa [#allocation12], 1 }

</bundles_post_ra>
